<compile_context>
chip_gen: v7x
topology: tpu7x:2x2x1
jax: 0.10.0
libtpu: 0.0.40
codegen_flags: <defaults>
</compile_context>

<pallas_src>
import jax
import jax.numpy as jnp
from jax.experimental import pallas as pl
from jax.experimental.pallas import tpu as pltpu


# ----------------------------------------------------------------------------
# Pallas kernels
# ----------------------------------------------------------------------------
def _conv_mm_relu_kernel(x_ref, w_ref, o_ref):
    # o = relu(x @ w); conv bias is absent (bias=False in the module).
    o_ref[...] = jnp.maximum(
        jnp.dot(x_ref[...], w_ref[...], preferred_element_type=jnp.float32), 0.0
    )


def conv_matmul_relu(x, w, *, tm_max=512):
    """relu(x @ w) with an M-axis grid; weights stay VMEM-resident across tiles."""
    M, K = x.shape
    K2, N = w.shape
    assert K == K2, (K, K2)
    tm = M if M <= tm_max else tm_max          # tm_max is a multiple of 8
    grid = (pl.cdiv(M, tm),)
    return pl.pallas_call(
        _conv_mm_relu_kernel,
        out_shape=jax.ShapeDtypeStruct((M, N), jnp.float32),
        grid=grid,
        in_specs=[
            pl.BlockSpec((tm, K), lambda i: (i, 0)),   # row tile marches over M
            pl.BlockSpec((K, N), lambda i: (0, 0)),    # weight resident
        ],
        out_specs=pl.BlockSpec((tm, N), lambda i: (i, 0)),
        compiler_params=pltpu.CompilerParams(dimension_semantics=("parallel",)),
    )(x, w)


def _dueling_head_kernel(feat_ref, w1_ref, b1_ref, w2_ref, b2_ref, o_ref):
    # hidden = relu(feat @ [wv1|wa1] + [bv1|ba1])            (B, 1024)
    # out    = hidden @ blockdiag(wv2, wa2) + [bv2|ba2]       (B, 1+A)
    # q      = out[:, :1] + out[:, 1:] - mean(out[:, 1:])
    feat = feat_ref[...].astype(jnp.bfloat16)          # bf16 MXU inputs, f32 acc
    h = jnp.dot(feat, w1_ref[...], preferred_element_type=jnp.float32) + b1_ref[...]
    h = jnp.maximum(h, 0.0)
    out = jnp.dot(h, w2_ref[...], preferred_element_type=jnp.float32) + b2_ref[...]
    v = out[:, 0:1]
    a = out[:, 1:]
    o_ref[...] = v + a - jnp.mean(a, axis=1, keepdims=True)


def dueling_head(feat, w1, b1, w2, b2):
    B, K = feat.shape
    H2 = w1.shape[1]        # 1024
    NA = w2.shape[1]        # 1 + action_dim
    A = NA - 1
    return pl.pallas_call(
        _dueling_head_kernel,
        out_shape=jax.ShapeDtypeStruct((B, A), jnp.float32),
        in_specs=[
            pl.BlockSpec((B, K), lambda *_: (0, 0)),
            pl.BlockSpec((K, H2), lambda *_: (0, 0)),
            pl.BlockSpec((1, H2), lambda *_: (0, 0)),
            pl.BlockSpec((H2, NA), lambda *_: (0, 0)),
            pl.BlockSpec((1, NA), lambda *_: (0, 0)),
        ],
        out_specs=pl.BlockSpec((B, A), lambda *_: (0, 0)),
        compiler_params=pltpu.CompilerParams(vmem_limit_bytes=32 * 1024 * 1024),
    )(feat, w1, b1.reshape(1, H2), w2, b2.reshape(1, NA))


# ----------------------------------------------------------------------------
# Glue: im2col patch extraction (pure gather / reshape in XLA)
# ----------------------------------------------------------------------------
def im2col(x, kh, kw, stride):
    """x: (B, H, W, C) NHWC -> (B*Ho*Wo, kh*kw*C) patches in (kh, kw, C) order."""
    B, H, W, C = x.shape
    Ho = (H - kh) // stride + 1
    Wo = (W - kw) // stride + 1
    cols = []
    for i in range(kh):
        for j in range(kw):
            cols.append(x[:, i:i + stride * Ho:stride, j:j + stride * Wo:stride, :])
    patches = jnp.concatenate(cols, axis=-1)  # (B, Ho, Wo, kh*kw*C)
    return patches.reshape(B * Ho * Wo, kh * kw * C), Ho, Wo


# ----------------------------------------------------------------------------
# Parameters (kaiming-normal-like, zero bias, converted from PyTorch layouts)
# ----------------------------------------------------------------------------
def init_params(key, action_dim):
    ks = jax.random.split(key, 8)

    def kaiming(k, shape, fan_in):
        return jax.random.normal(k, shape, jnp.float32) * jnp.sqrt(2.0 / fan_in)

    # PyTorch layouts first.
    w1 = kaiming(ks[0], (32, 4, 8, 8), 4 * 8 * 8)      # conv1 (Cout,Cin,KH,KW), no bias
    w2 = kaiming(ks[1], (64, 32, 4, 4), 32 * 4 * 4)    # conv2
    w3 = kaiming(ks[2], (64, 64, 3, 3), 64 * 3 * 3)    # conv3
    wv1 = kaiming(ks[3], (512, 64 * 7 * 7), 64 * 7 * 7)
    wv2 = kaiming(ks[4], (1, 512), 512)
    wa1 = kaiming(ks[5], (512, 64 * 7 * 7), 64 * 7 * 7)
    wa2 = kaiming(ks[6], (action_dim, 512), 512)

    def conv_w(w):  # (Cout,Cin,KH,KW) -> (KH*KW*Cin, Cout), matching im2col order
        co, ci, kh, kw = w.shape
        return jnp.transpose(w, (2, 3, 1, 0)).reshape(kh * kw * ci, co)

    def head_w(w_pt):
        # (512, 3136) with columns in PyTorch's (C=64,H=7,W=7) flatten order
        # -> (3136, 512) with rows permuted to the NHWC (H,W,C) flatten order,
        # so no runtime activation transpose is needed before the head.
        wt = w_pt.T.reshape(64, 7, 7, w_pt.shape[0])
        return jnp.transpose(wt, (1, 2, 0, 3)).reshape(64 * 7 * 7, w_pt.shape[0])

    # Fused first head layer: [value | advantage] hidden units.
    W1 = jnp.concatenate([head_w(wv1), head_w(wa1)], axis=1).astype(jnp.bfloat16)
    b1 = jnp.zeros((1024,), jnp.float32)               # [bv1 | ba1], both zero

    # Fused second head layer as a block-diagonal (1024, 1+A) weight:
    #   column 0      <- value2 acting on the first 512 hidden units
    #   columns 1..A  <- advantage2 acting on the last 512 hidden units
    W2 = jnp.zeros((1024, 1 + action_dim), jnp.float32)
    W2 = W2.at[:512, 0:1].set(wv2.T)
    W2 = W2.at[512:, 1:].set(wa2.T)
    b2 = jnp.zeros((1 + action_dim,), jnp.float32)     # [bv2 | ba2], both zero

    return {
        "w1": conv_w(w1) / 255.0,   # /255 input scaling folded into conv1 weight
        "w2": conv_w(w2),
        "w3": conv_w(w3),
        "W1": W1, "b1": b1,
        "W2": W2, "b2": b2,
    }


# ----------------------------------------------------------------------------
# Forward pass (mirrors DQN.forward)
# ----------------------------------------------------------------------------
def dqn_forward(x_nchw, params):
    B = x_nchw.shape[0]
    x = jnp.transpose(x_nchw, (0, 2, 3, 1)).astype(jnp.float32)  # NCHW -> NHWC

    # conv1 (8x8 s4, /255 folded into weight), ReLU fused.
    p, Ho, Wo = im2col(x, 8, 8, 4)
    x = conv_matmul_relu(p, params["w1"]).reshape(B, Ho, Wo, 32)

    # conv2 (4x4 s2), ReLU fused.
    p, Ho, Wo = im2col(x, 4, 4, 2)
    x = conv_matmul_relu(p, params["w2"]).reshape(B, Ho, Wo, 64)

    # conv3 (3x3 s1), ReLU fused.
    p, Ho, Wo = im2col(x, 3, 3, 1)
    x = conv_matmul_relu(p, params["w3"])              # (B*Ho*Wo, 64)

    # Flatten directly in (H, W, C) order — head weights were row-permuted at
    # init so this matches PyTorch's NCHW x.view(B, -1) exactly.
    feat = x.reshape(B, Ho * Wo * 64)                  # (B, 3136)

    # Entire dueling head (both branches, both layers, mean, combine) in one kernel.
    return dueling_head(feat, params["W1"], params["b1"], params["W2"], params["b2"])


if __name__ == "__main__":
    key = jax.random.PRNGKey(0)
    action_dim = 6
    params = init_params(key, action_dim)

    # Atari-style frames: the 64*7*7 flatten in the module mandates 84x84 input.
    x = jax.random.uniform(
        jax.random.fold_in(key, 123), (2, 4, 84, 84), jnp.float32, 0.0, 255.0
    )

    q = jax.jit(dqn_forward)(x, params)
    q = jax.block_until_ready(q)
    assert q.shape == (2, action_dim), q.shape
    assert bool(jnp.all(jnp.isfinite(q)))
    print("KERNEL_OK")
</pallas_src>

<mosaic_0001>
module attributes {stable_mosaic.version = 11 : i64} {
  func.func @_conv_mm_relu_kernel(%arg0: i32, %arg1: memref<512x256xf32, #tpu.memory_space<vmem>>, %arg2: memref<256x32xf32, #tpu.memory_space<vmem>>, %arg3: memref<512x32xf32, #tpu.memory_space<vmem>>) attributes {dimension_semantics = [#tpu.dimension_semantics<parallel>], iteration_bounds = array<i64: 2>, scalar_prefetch = 0 : i64, scratch_operands = 0 : i64, tpu.core_type = #tpu.core_type<tc>, window_params = [{transform_indices = @transform_0, window_bounds = array<i64: 512, 256>}, {pipeline_mode = #tpu.pipeline_mode<synchronous>, transform_indices = @transform_1, window_bounds = array<i64: 256, 32>}, {transform_indices = @transform_2, window_bounds = array<i64: 512, 32>}]} {
    %c0 = arith.constant 0 : index
    %c0_0 = arith.constant 0 : index
    %0 = vector.load %arg1[%c0, %c0_0] : memref<512x256xf32, #tpu.memory_space<vmem>>, vector<512x256xf32>
    %c0_1 = arith.constant 0 : index
    %c0_2 = arith.constant 0 : index
    %1 = vector.load %arg2[%c0_1, %c0_2] : memref<256x32xf32, #tpu.memory_space<vmem>>, vector<256x32xf32>
    %cst = arith.constant dense<0.000000e+00> : vector<512x32xf32>
    %2 = tpu.matmul %0, %1, %cst {dimension_numbers = #tpu.dot_dimension_numbers<[1], [0], [0], [1], [0, 0, 1, 1], [], []>} : vector<512x256xf32>, vector<256x32xf32>, vector<512x32xf32> -> vector<512x32xf32>
    %cst_3 = arith.constant 0.000000e+00 : f32
    %3 = vector.broadcast %cst_3 : f32 to vector<512x32xf32>
    %4 = arith.maximumf %2, %3 : vector<512x32xf32>
    %c0_4 = arith.constant 0 : index
    %c0_5 = arith.constant 0 : index
    %5 = vector.load %arg3[%c0_4, %c0_5] : memref<512x32xf32, #tpu.memory_space<vmem>>, vector<512x32xf32>
    tpu.vector_store %arg3[%c0_4, %c0_5], %4 {strides = array<i32>} : memref<512x32xf32, #tpu.memory_space<vmem>>, vector<512x32xf32>,
    return
  }
  func.func @transform_0(%arg0: i32) -> (i32, i32) {
    %c0_i32 = arith.constant 0 : i32
    %c0_i32_0 = arith.constant 0 : i32
    return %arg0, %c0_i32 : i32, i32
  }
  func.func @transform_1(%arg0: i32) -> (i32, i32) {
    %c0_i32 = arith.constant 0 : i32
    %c0_i32_0 = arith.constant 0 : i32
    %c0_i32_1 = arith.constant 0 : i32
    return %c0_i32, %c0_i32_0 : i32, i32
  }
  func.func @transform_2(%arg0: i32) -> (i32, i32) {
    %c0_i32 = arith.constant 0 : i32
    %c0_i32_0 = arith.constant 0 : i32
    return %arg0, %c0_i32 : i32, i32
  }
}

module attributes {stable_mosaic.version = 11 : i64} {
  func.func @_conv_mm_relu_kernel(%arg0: i32, %arg1: memref<162x512xf32, #tpu.memory_space<vmem>>, %arg2: memref<512x64xf32, #tpu.memory_space<vmem>>, %arg3: memref<162x64xf32, #tpu.memory_space<vmem>>) attributes {dimension_semantics = [#tpu.dimension_semantics<parallel>], iteration_bounds = array<i64: 1>, scalar_prefetch = 0 : i64, scratch_operands = 0 : i64, tpu.core_type = #tpu.core_type<tc>, window_params = [{transform_indices = @transform_0, window_bounds = array<i64: 162, 512>}, {pipeline_mode = #tpu.pipeline_mode<synchronous>, transform_indices = @transform_1, window_bounds = array<i64: 512, 64>}, {transform_indices = @transform_2, window_bounds = array<i64: 162, 64>}]} {
    %c0 = arith.constant 0 : index
    %c0_0 = arith.constant 0 : index
    %0 = vector.load %arg1[%c0, %c0_0] : memref<162x512xf32, #tpu.memory_space<vmem>>, vector<162x512xf32>
    %c0_1 = arith.constant 0 : index
    %c0_2 = arith.constant 0 : index
    %1 = vector.load %arg2[%c0_1, %c0_2] : memref<512x64xf32, #tpu.memory_space<vmem>>, vector<512x64xf32>
    %cst = arith.constant dense<0.000000e+00> : vector<162x64xf32>
    %2 = tpu.matmul %0, %1, %cst {dimension_numbers = #tpu.dot_dimension_numbers<[1], [0], [0], [1], [0, 0, 1, 1], [], []>} : vector<162x512xf32>, vector<512x64xf32>, vector<162x64xf32> -> vector<162x64xf32>
    %cst_3 = arith.constant 0.000000e+00 : f32
    %3 = vector.broadcast %cst_3 : f32 to vector<162x64xf32>
    %4 = arith.maximumf %2, %3 : vector<162x64xf32>
    %c0_4 = arith.constant 0 : index
    %c0_5 = arith.constant 0 : index
    %5 = vector.load %arg3[%c0_4, %c0_5] : memref<162x64xf32, #tpu.memory_space<vmem>>, vector<162x64xf32>
    tpu.vector_store %arg3[%c0_4, %c0_5], %4 {strides = array<i32>} : memref<162x64xf32, #tpu.memory_space<vmem>>, vector<162x64xf32>,
    return
  }
  func.func @transform_0(%arg0: i32) -> (i32, i32) {
    %c0_i32 = arith.constant 0 : i32
    %c0_i32_0 = arith.constant 0 : i32
    return %arg0, %c0_i32 : i32, i32
  }
  func.func @transform_1(%arg0: i32) -> (i32, i32) {
    %c0_i32 = arith.constant 0 : i32
    %c0_i32_0 = arith.constant 0 : i32
    %c0_i32_1 = arith.constant 0 : i32
    return %c0_i32, %c0_i32_0 : i32, i32
  }
  func.func @transform_2(%arg0: i32) -> (i32, i32) {
    %c0_i32 = arith.constant 0 : i32
    %c0_i32_0 = arith.constant 0 : i32
    return %arg0, %c0_i32 : i32, i32
  }
}

module attributes {stable_mosaic.version = 11 : i64} {
  func.func @_conv_mm_relu_kernel(%arg0: i32, %arg1: memref<98x576xf32, #tpu.memory_space<vmem>>, %arg2: memref<576x64xf32, #tpu.memory_space<vmem>>, %arg3: memref<98x64xf32, #tpu.memory_space<vmem>>) attributes {dimension_semantics = [#tpu.dimension_semantics<parallel>], iteration_bounds = array<i64: 1>, scalar_prefetch = 0 : i64, scratch_operands = 0 : i64, tpu.core_type = #tpu.core_type<tc>, window_params = [{transform_indices = @transform_0, window_bounds = array<i64: 98, 576>}, {pipeline_mode = #tpu.pipeline_mode<synchronous>, transform_indices = @transform_1, window_bounds = array<i64: 576, 64>}, {transform_indices = @transform_2, window_bounds = array<i64: 98, 64>}]} {
    %c0 = arith.constant 0 : index
    %c0_0 = arith.constant 0 : index
    %0 = vector.load %arg1[%c0, %c0_0] : memref<98x576xf32, #tpu.memory_space<vmem>>, vector<98x576xf32>
    %c0_1 = arith.constant 0 : index
    %c0_2 = arith.constant 0 : index
    %1 = vector.load %arg2[%c0_1, %c0_2] : memref<576x64xf32, #tpu.memory_space<vmem>>, vector<576x64xf32>
    %cst = arith.constant dense<0.000000e+00> : vector<98x64xf32>
    %2 = tpu.matmul %0, %1, %cst {dimension_numbers = #tpu.dot_dimension_numbers<[1], [0], [0], [1], [0, 0, 1, 1], [], []>} : vector<98x576xf32>, vector<576x64xf32>, vector<98x64xf32> -> vector<98x64xf32>
    %cst_3 = arith.constant 0.000000e+00 : f32
    %3 = vector.broadcast %cst_3 : f32 to vector<98x64xf32>
    %4 = arith.maximumf %2, %3 : vector<98x64xf32>
    %c0_4 = arith.constant 0 : index
    %c0_5 = arith.constant 0 : index
    %5 = vector.load %arg3[%c0_4, %c0_5] : memref<98x64xf32, #tpu.memory_space<vmem>>, vector<98x64xf32>
    tpu.vector_store %arg3[%c0_4, %c0_5], %4 {strides = array<i32>} : memref<98x64xf32, #tpu.memory_space<vmem>>, vector<98x64xf32>,
    return
  }
  func.func @transform_0(%arg0: i32) -> (i32, i32) {
    %c0_i32 = arith.constant 0 : i32
    %c0_i32_0 = arith.constant 0 : i32
    return %arg0, %c0_i32 : i32, i32
  }
  func.func @transform_1(%arg0: i32) -> (i32, i32) {
    %c0_i32 = arith.constant 0 : i32
    %c0_i32_0 = arith.constant 0 : i32
    %c0_i32_1 = arith.constant 0 : i32
    return %c0_i32, %c0_i32_0 : i32, i32
  }
  func.func @transform_2(%arg0: i32) -> (i32, i32) {
    %c0_i32 = arith.constant 0 : i32
    %c0_i32_0 = arith.constant 0 : i32
    return %arg0, %c0_i32 : i32, i32
  }
}

module attributes {stable_mosaic.version = 11 : i64} {
  func.func @_dueling_head_kernel(%arg0: memref<2x3136xf32, #tpu.memory_space<vmem>>, %arg1: memref<3136x1024xbf16, #tpu.memory_space<vmem>>, %arg2: memref<1x1024xf32, #tpu.memory_space<vmem>>, %arg3: memref<1024x7xf32, #tpu.memory_space<vmem>>, %arg4: memref<1x7xf32, #tpu.memory_space<vmem>>, %arg5: memref<2x6xf32, #tpu.memory_space<vmem>>) attributes {dimension_semantics = [], scalar_prefetch = 0 : i64, scratch_operands = 0 : i64, tpu.core_type = #tpu.core_type<tc>} {
    %c0 = arith.constant 0 : index
    %c0_0 = arith.constant 0 : index
    %0 = vector.load %arg0[%c0, %c0_0] : memref<2x3136xf32, #tpu.memory_space<vmem>>, vector<2x3136xf32>
    %1 = arith.truncf %0 : vector<2x3136xf32> to vector<2x3136xbf16>
    %c0_1 = arith.constant 0 : index
    %c0_2 = arith.constant 0 : index
    %2 = vector.load %arg1[%c0_1, %c0_2] : memref<3136x1024xbf16, #tpu.memory_space<vmem>>, vector<3136x1024xbf16>
    %cst = arith.constant dense<0.000000e+00> : vector<2x1024xf32>
    %3 = tpu.matmul %1, %2, %cst {dimension_numbers = #tpu.dot_dimension_numbers<[1], [0], [0], [1], [0, 0, 1, 1], [], []>} : vector<2x3136xbf16>, vector<3136x1024xbf16>, vector<2x1024xf32> -> vector<2x1024xf32>
    %c0_3 = arith.constant 0 : index
    %c0_4 = arith.constant 0 : index
    %4 = vector.load %arg2[%c0_3, %c0_4] : memref<1x1024xf32, #tpu.memory_space<vmem>>, vector<1x1024xf32>
    %5 = vector.broadcast %4 : vector<1x1024xf32> to vector<2x1024xf32>
    %6 = arith.addf %3, %5 : vector<2x1024xf32>
    %cst_5 = arith.constant 0.000000e+00 : f32
    %7 = vector.broadcast %cst_5 : f32 to vector<2x1024xf32>
    %8 = arith.maximumf %6, %7 : vector<2x1024xf32>
    %c0_6 = arith.constant 0 : index
    %c0_7 = arith.constant 0 : index
    %9 = vector.load %arg3[%c0_6, %c0_7] : memref<1024x7xf32, #tpu.memory_space<vmem>>, vector<1024x7xf32>
    %cst_8 = arith.constant dense<0.000000e+00> : vector<2x7xf32>
    %10 = tpu.matmul %8, %9, %cst_8 {dimension_numbers = #tpu.dot_dimension_numbers<[1], [0], [0], [1], [0, 0, 1, 1], [], []>} : vector<2x1024xf32>, vector<1024x7xf32>, vector<2x7xf32> -> vector<2x7xf32>
    %c0_9 = arith.constant 0 : index
    %c0_10 = arith.constant 0 : index
    %11 = vector.load %arg4[%c0_9, %c0_10] : memref<1x7xf32, #tpu.memory_space<vmem>>, vector<1x7xf32>
    %12 = vector.broadcast %11 : vector<1x7xf32> to vector<2x7xf32>
    %13 = arith.addf %10, %12 : vector<2x7xf32>
    %14 = vector.extract_strided_slice %13 {offsets = [0, 0], sizes = [2, 1], strides = [1, 1]} : vector<2x7xf32> to vector<2x1xf32>
    %15 = vector.extract_strided_slice %13 {offsets = [0, 1], sizes = [2, 6], strides = [1, 1]} : vector<2x7xf32> to vector<2x6xf32>
    %16 = vector.broadcast %14 : vector<2x1xf32> to vector<2x6xf32>
    %17 = arith.addf %16, %15 : vector<2x6xf32>
    %cst_11 = arith.constant dense<0.000000e+00> : vector<2xf32>
    %18 = vector.multi_reduction <add>, %15, %cst_11 [1] : vector<2x6xf32> to vector<2xf32>
    %19 = vector.shape_cast %18 : vector<2xf32> to vector<2x1xf32>
    %cst_12 = arith.constant 6.000000e+00 : f32
    %20 = vector.broadcast %cst_12 : f32 to vector<2x1xf32>
    %21 = arith.divf %19, %20 : vector<2x1xf32>
    %22 = vector.broadcast %21 : vector<2x1xf32> to vector<2x6xf32>
    %23 = arith.subf %17, %22 : vector<2x6xf32>
    %c0_13 = arith.constant 0 : index
    %c0_14 = arith.constant 0 : index
    %24 = vector.load %arg5[%c0_13, %c0_14] : memref<2x6xf32, #tpu.memory_space<vmem>>, vector<2x6xf32>
    tpu.vector_store %arg5[%c0_13, %c0_14], %23 {strides = array<i32>} : memref<2x6xf32, #tpu.memory_space<vmem>>, vector<2x6xf32>,
    return
  }
}

</mosaic_0001>

<bundles_post_ra>
// kernel: dqn_forward.4
= control target key start
LH: loop header
LB: loop body
LE: loop exit
PB: predicated region body
PF: predicated region fallthrough
CT: control target
= control target key end

     0   :  { %s1616_s9 = smov 0   ;;  %s1618_s10 = smov 0   ;;  %s2248_s0 = inlined_call_operand.vmem [shape: f32[800,256], index: 0, kind: input, shape index: {}]   ;;  %s2249_s1 = inlined_call_operand.vmem [shape: f32[256,32], index: 1, kind: input, shape index: {}]   ;;  %s2250_s2 = inlined_call_operand.vmem [shape: f32[800,32], index: 2, kind: output, shape index: {}]  }
   0x1   :  { %s1620_s11 = smov 0  }
   0x2 LB: > { %s1629_s12 = sadd.s32 4294967295, %s1566_s11   ;;  %s1631_s13 = sadd.s32 1, %s1566_s11   ;;  %s1566_s11 = sphi %s1620_s11, %s2259_s11   ;;  %s1562_s10 = sphi %s1618_s10, %s2258_s10   ;;  %s1558_s9 = sphi %s1616_s9, %s2257_s9  }
   0x3   : > { %s63_s14 = ssub.s32 %s1566_s11, %s1631_s13  ;;  %s66_s15 = sadd.s32 1, %s1562_s10 }
   0x4   : > { %p64_p0 = scmp.eq.s32.totalorder %s63_s14, 0  ;;  %p76_p1 = scmp.ne.s32.totalorder %s1562_s10, %s1558_s9 }
   0x5   : > { %p77_p2 = scmp.eq.s32.totalorder %s1629_s12, 1  ;;  %p1317_p3 = scmp.ge.s32.totalorder %s1566_s11, 1 }
   0x6   : > { %s1639_s16 = scalar_select %p64_p0, %s1562_s10, %s66_s15  }
   0x7   : > { %p1641_p4 = por %p77_p2, %p76_p1  ;;  %p124_p5 = scmp.lt.s32.totalorder %s1566_s11, 3 }
   0x9   : > { %p125_p6 = pnand %p1317_p3, %p124_p5 }
   0xa   : > { %v301_v0 = vld [vmem:[%s2249_s1] sm:$0xff] (!%p125_p6)  ;;  %v302_v1 = vld [vmem:[%s2249_s1 + $0x8] sm:$0xff] (!%p125_p6)  ;;  %v303_v2 = vld [vmem:[%s2249_s1 + $0x10] sm:$0xff] (!%p125_p6)  ;;  %s1655_s24 = sshll.u32 (!%p125_p6), %s1629_s12, 6  ;;  %v1600_v3 = vmov (!%p125_p6), 0.0|0.0   ;;  %vm782_vm0 = vcmask (!%p125_p6), 261120  }
   0xb   : > { %128 = sbr.rel (%p125_p6) target bundleno = 487 (0x1e7), region = 28  ;;  %1343 = vmatprep.subr.bf16.mxu0 (!%p125_p6), %v1600_v3  ;;  %1391 = vmatprep.subr.bf16.mxu1 (!%p125_p6), %v1600_v3  ;;  %v1344_v4 = vpack.c.bf16 (!%p125_p6), %v302_v1, %v301_v0  ;;  %v304_v5 = vld [vmem:[%s2249_s1 + $0x18] sm:$0xff] (!%p125_p6)  ;;  %p157_p7 = scmp.lt.s32.totalorder (!%p125_p6), %s1655_s24, 99  ;;  %v305_v7 = vld [vmem:[%s2249_s1 + $0x20] sm:$0xff] (!%p125_p6)  ;;  %v306_v8 = vld [vmem:[%s2249_s1 + $0x28] sm:$0xff] (!%p125_p6) }
   0xc   : > { %v1347_v6 = vpack.c.bf16 (!%p125_p6), %v304_v5, %v303_v2  ;;  %v1350_v9 = vpack.c.bf16 (!%p125_p6), %v306_v8, %v305_v7  ;;  %v307_v10 = vld [vmem:[%s2249_s1 + $0x30] sm:$0xff] (!%p125_p6)  ;;  %v308_v11 = vld [vmem:[%s2249_s1 + $0x38] sm:$0xff] (!%p125_p6)  ;;  %v309_v15 = vld [vmem:[%s2249_s1 + $0x40] sm:$0xff] (!%p125_p6) }
   0xd   : > { %1345 = vmatpush1.bf16.msra.mxu0 (!%p125_p6), %v1344_v4  ;;  %1407 = vmatpush1.bf16.msra.mxu1 (!%p125_p6), %v1344_v4  ;;  %v1353_v13 = vpack.c.bf16 (!%p125_p6), %v308_v11, %v307_v10  ;;  %v310_v16 = vld [vmem:[%s2249_s1 + $0x48] sm:$0xff] (!%p125_p6)  ;;  %v311_v18 = vld [vmem:[%s2249_s1 + $0x50] sm:$0xff] (!%p125_p6)  ;;  %v312_v19 = vld [vmem:[%s2249_s1 + $0x58] sm:$0xff] (!%p125_p6) }
   0xe   : > { %1346 = vmatprep.subr.bf16.mxu0 (!%p125_p6), %v1600_v3  ;;  %1392 = vmatprep.subr.bf16.mxu1 (!%p125_p6), %v1600_v3  ;;  %v1356_v17 = vpack.c.bf16 (!%p125_p6), %v310_v16, %v309_v15  ;;  %v1359_v20 = vpack.c.bf16 (!%p125_p6), %v312_v19, %v311_v18  ;;  %v313_v21 = vld [vmem:[%s2249_s1 + $0x60] sm:$0xff] (!%p125_p6)  ;;  %v314_v22 = vld [vmem:[%s2249_s1 + $0x68] sm:$0xff] (!%p125_p6)  ;;  %v315_v24 = vld [vmem:[%s2249_s1 + $0x70] sm:$0xff] (!%p125_p6) }
   0xf   : > { %v1362_v23 = vpack.c.bf16 (!%p125_p6), %v314_v22, %v313_v21  ;;  %v316_v25 = vld [vmem:[%s2249_s1 + $0x78] sm:$0xff] (!%p125_p6)  ;;  %v317_v27 = vld [vmem:[%s2249_s1 + $0x80] sm:$0xff] (!%p125_p6)  ;;  %v318_v28 = vld [vmem:[%s2249_s1 + $0x88] sm:$0xff] (!%p125_p6) }
  0x10   : > { %v1365_v26 = vpack.c.bf16 (!%p125_p6), %v316_v25, %v315_v24  ;;  %v1368_v29 = vpack.c.bf16 (!%p125_p6), %v318_v28, %v317_v27  ;;  %v319_v30 = vld [vmem:[%s2249_s1 + $0x90] sm:$0xff] (!%p125_p6)  ;;  %v320_v31 = vld [vmem:[%s2249_s1 + $0x98] sm:$0xff] (!%p125_p6)  ;;  %v321_v33 = vld [vmem:[%s2249_s1 + $0xa0] sm:$0xff] (!%p125_p6) }
  0x11   : > { %1348 = vmatpush1.bf16.msra.mxu0 (!%p125_p6), %v1347_v6  ;;  %1408 = vmatpush1.bf16.msra.mxu1 (!%p125_p6), %v1347_v6  ;;  %v1371_v32 = vpack.c.bf16 (!%p125_p6), %v320_v31, %v319_v30  ;;  %v322_v34 = vld [vmem:[%s2249_s1 + $0xa8] sm:$0xff] (!%p125_p6)  ;;  %v323_v36 = vld [vmem:[%s2249_s1 + $0xb0] sm:$0xff] (!%p125_p6)  ;;  %v324_v37 = vld [vmem:[%s2249_s1 + $0xb8] sm:$0xff] (!%p125_p6) }
  0x12   : > { %s158_s27 = scalar_select %p157_p7, %s1655_s24, 99  ;;  %1349 = vmatprep.subr.bf16.mxu0 %v1600_v3  ;;  %1393 = vmatprep.subr.bf16.mxu1 %v1600_v3  ;;  %v1374_v35 = vpack.c.bf16 %v322_v34, %v321_v33  ;;  %v1377_v38 = vpack.c.bf16 %v324_v37, %v323_v36  ;;  %v325_v39 = vld [vmem:[%s2249_s1 + $0xc0] sm:$0xff]  ;;  %v326_v40 = vld [vmem:[%s2249_s1 + $0xc8] sm:$0xff]  ;;  %v327_v42 = vld [vmem:[%s2249_s1 + $0xd0] sm:$0xff] }
  0x13   : > { %v1380_v41 = vpack.c.bf16 %v326_v40, %v325_v39  ;;  %v328_v43 = vld [vmem:[%s2249_s1 + $0xd8] sm:$0xff]  ;;  %v329_v45 = vld [vmem:[%s2249_s1 + $0xe0] sm:$0xff]  ;;  %v330_v46 = vld [vmem:[%s2249_s1 + $0xe8] sm:$0xff] }
  0x14   : > { %s1339_s4 = sshll.u32 %s158_s27, 4  ;;  %v1383_v44 = vpack.c.bf16 %v328_v43, %v327_v42  ;;  %v1386_v47 = vpack.c.bf16 %v330_v46, %v329_v45  ;;  %v331_v48 = vld [vmem:[%s2249_s1 + $0xf0] sm:$0xff]  ;;  %v332_v49 = vld [vmem:[%s2249_s1 + $0xf8] sm:$0xff]  ;;  %s148_s27 = sand.u32 1, %s1558_s9  }
  0x15   : > { %s1675_s7 = scalar_lea.vmem %s2248_s0, %s1339_s4  ;;  %1351 = vmatpush1.bf16.msra.mxu0 %v1350_v9  ;;  %1409 = vmatpush1.bf16.msra.mxu1 %v1350_v9  ;;  %v1389_v50 = vpack.c.bf16 %v332_v49, %v331_v48  ;;  %s1318_s28 = sshll.u32 %s148_s27, 9 }
  0x16   : > { %v174_v12 = vld [vmem:[%s1675_s7 + $0x8] sm:$0xff]  ;;  %1352 = vmatprep.subr.bf16.mxu0 %v1600_v3  ;;  %1394 = vmatprep.subr.bf16.mxu1 %v1600_v3  ;;  %v173_v51 = vld [vmem:[%s1675_s7] sm:$0xff]  ;;  %v176_v53 = vld [vmem:[%s1675_s7 + $0x18] sm:$0xff]  ;;  %s1912_s29 = scalar_lea.vmem [#allocation2], %s1318_s28   ;;  %s855_s9 = ssub.s32 (%p1641_p4), 100, %s1655_s24 }
  0x17   : > { %v238_v14 = vld [vmem:[%s1675_s7 + $0x208] sm:$0xff]  ;;  %397 = vmatprep.mubr.f32.mxu0 %v174_v12  ;;  %v237_v52 = vld [vmem:[%s1675_s7 + $0x200] sm:$0xff]  ;;  %v240_v54 = vld [vmem:[%s1675_s7 + $0x218] sm:$0xff]  ;;  %p856_p8 = scmp.lt.s32.totalorder (%p1641_p4), %s855_s9, 64 }
  0x18   : > { %557 = vmatprep.mubr.f32.mxu1 %v238_v14  ;;  %v175_v55 = vld [vmem:[%s1675_s7 + $0x10] sm:$0xff]  ;;  %v178_v57 = vld [vmem:[%s1675_s7 + $0x28] sm:$0xff]  ;;  %v177_v59 = vld [vmem:[%s1675_s7 + $0x20] sm:$0xff] }
  0x19   : > { %1354 = vmatpush1.bf16.msra.mxu0 %v1353_v13  ;;  %1410 = vmatpush1.bf16.msra.mxu1 %v1353_v13  ;;  %v239_v56 = vld [vmem:[%s1675_s7 + $0x210] sm:$0xff]  ;;  %v242_v58 = vld [vmem:[%s1675_s7 + $0x228] sm:$0xff]  ;;  %v241_v60 = vld [vmem:[%s1675_s7 + $0x220] sm:$0xff] }
  0x1a   : > { %1355 = vmatprep.subr.bf16.mxu0 %v1600_v3  ;;  %1395 = vmatprep.subr.bf16.mxu1 %v1600_v3  ;;  %v180_v61 = vld [vmem:[%s1675_s7 + $0x38] sm:$0xff]  ;;  %v179_v63 = vld [vmem:[%s1675_s7 + $0x30] sm:$0xff]  ;;  %v182_v1 = vld [vmem:[%s1675_s7 + $0x48] sm:$0xff] }
  0x1b   : > { %v244_v62 = vld [vmem:[%s1675_s7 + $0x238] sm:$0xff]  ;;  %v243_v0 = vld [vmem:[%s1675_s7 + $0x230] sm:$0xff]  ;;  %v246_v2 = vld [vmem:[%s1675_s7 + $0x248] sm:$0xff] }
  0x1c   : > { %v245_v4 = vld [vmem:[%s1675_s7 + $0x240] sm:$0xff]  ;;  %v184_v5 = vld [vmem:[%s1675_s7 + $0x58] sm:$0xff]  ;;  %v183_v7 = vld [vmem:[%s1675_s7 + $0x50] sm:$0xff] }
  0x1d   : > { %1357 = vmatpush1.bf16.msra.mxu0 %v1356_v17  ;;  %1411 = vmatpush1.bf16.msra.mxu1 %v1356_v17  ;;  %v248_v6 = vld [vmem:[%s1675_s7 + $0x258] sm:$0xff]  ;;  %v247_v8 = vld [vmem:[%s1675_s7 + $0x250] sm:$0xff]  ;;  %v186_v9 = vld [vmem:[%s1675_s7 + $0x68] sm:$0xff] }
  0x1e   : > { %1358 = vmatprep.subr.bf16.mxu0 %v1600_v3  ;;  %1396 = vmatprep.subr.bf16.mxu1 %v1600_v3  ;;  %v250_v10 = vld [vmem:[%s1675_s7 + $0x268] sm:$0xff]  ;;  %v185_v11 = vld [vmem:[%s1675_s7 + $0x60] sm:$0xff]  ;;  %v188_v13 = vld [vmem:[%s1675_s7 + $0x78] sm:$0xff] }
  0x1f   : > { %v249_v12 = vld [vmem:[%s1675_s7 + $0x260] sm:$0xff]  ;;  %v252_v14 = vld [vmem:[%s1675_s7 + $0x278] sm:$0xff]  ;;  %v187_v15 = vld [vmem:[%s1675_s7 + $0x70] sm:$0xff] }
  0x20   : > { %v251_v16 = vld [vmem:[%s1675_s7 + $0x270] sm:$0xff]  ;;  %v190_v17 = vld [vmem:[%s1675_s7 + $0x88] sm:$0xff]  ;;  %v189_v19 = vld [vmem:[%s1675_s7 + $0x80] sm:$0xff] }
  0x21   : > { %1360 = vmatpush1.bf16.msra.mxu0 %v1359_v20  ;;  %1412 = vmatpush1.bf16.msra.mxu1 %v1359_v20  ;;  %v254_v18 = vld [vmem:[%s1675_s7 + $0x288] sm:$0xff]  ;;  %v253_v20 = vld [vmem:[%s1675_s7 + $0x280] sm:$0xff]  ;;  %v192_v21 = vld [vmem:[%s1675_s7 + $0x98] sm:$0xff] }
  0x22   : > { %1361 = vmatprep.subr.bf16.mxu0 %v1600_v3  ;;  %1397 = vmatprep.subr.bf16.mxu1 %v1600_v3  ;;  %v256_v22 = vld [vmem:[%s1675_s7 + $0x298] sm:$0xff]  ;;  %v255_v24 = vld [vmem:[%s1675_s7 + $0x290] sm:$0xff]  ;;  %v194_v25 = vld [vmem:[%s1675_s7 + $0xa8] sm:$0xff] }
  0x23   : > { %v193_v27 = vld [vmem:[%s1675_s7 + $0xa0] sm:$0xff]  ;;  %v260_v30 = vld [vmem:[%s1675_s7 + $0x2b8] sm:$0xff]  ;;  %v195_v31 = vld [vmem:[%s1675_s7 + $0xb0] sm:$0xff] }
  0x24   : > { %v257_v28 = vld [vmem:[%s1675_s7 + $0x2a0] sm:$0xff]  ;;  %v198_v33 = vld [vmem:[%s1675_s7 + $0xc8] sm:$0xff]  ;;  %v200_v37 = vld [vmem:[%s1675_s7 + $0xd8] sm:$0xff] }
  0x25   : > { %1363 = vmatpush1.bf16.msra.mxu0 %v1362_v23  ;;  %1413 = vmatpush1.bf16.msra.mxu1 %v1362_v23  ;;  %v191_v23 = vld [vmem:[%s1675_s7 + $0x90] sm:$0xff]  ;;  %v262_v34 = vld [vmem:[%s1675_s7 + $0x2c8] sm:$0xff]  ;;  %v261_v36 = vld [vmem:[%s1675_s7 + $0x2c0] sm:$0xff] }
  0x26   : > { %1364 = vmatprep.subr.bf16.mxu0 %v1600_v3  ;;  %1398 = vmatprep.subr.bf16.mxu1 %v1600_v3  ;;  %v199_v39 = vld [vmem:[%s1675_s7 + $0xd0] sm:$0xff]  ;;  %v266_v42 = vld [vmem:[%s1675_s7 + $0x2e8] sm:$0xff]  ;;  %v201_v43 = vld [vmem:[%s1675_s7 + $0xe0] sm:$0xff] }
  0x27   : > { %v263_v40 = vld [vmem:[%s1675_s7 + $0x2d0] sm:$0xff]  ;;  %v204_v45 = vld [vmem:[%s1675_s7 + $0xf8] sm:$0xff]  ;;  %v206_v49 = vld [vmem:[%s1675_s7 + $0x108] sm:$0xff] }
  0x28   : > { %v268_v46 = vld [vmem:[%s1675_s7 + $0x2f8] sm:$0xff]  ;;  %v267_v48 = vld [vmem:[%s1675_s7 + $0x2f0] sm:$0xff] }
  0x29   : > { %1366 = vmatpush1.bf16.msra.mxu0 %v1365_v26  ;;  %1414 = vmatpush1.bf16.msra.mxu1 %v1365_v26  ;;  %v258_v26 = vld [vmem:[%s1675_s7 + $0x2a8] sm:$0xff] }
  0x2a   : > { %1367 = vmatprep.subr.bf16.mxu0 %v1600_v3  ;;  %1399 = vmatprep.subr.bf16.mxu1 %v1600_v3 }
  0x2d   : > { %1369 = vmatpush1.bf16.msra.mxu0 %v1368_v29  ;;  %1415 = vmatpush1.bf16.msra.mxu1 %v1368_v29  ;;  %v196_v29 = vld [vmem:[%s1675_s7 + $0xb8] sm:$0xff] }
  0x2e   : > { %1370 = vmatprep.subr.bf16.mxu0 %v1600_v3  ;;  %1400 = vmatprep.subr.bf16.mxu1 %v1600_v3 }
  0x31   : > { %1372 = vmatpush1.bf16.msra.mxu0 %v1371_v32  ;;  %1416 = vmatpush1.bf16.msra.mxu1 %v1371_v32  ;;  %v259_v32 = vld [vmem:[%s1675_s7 + $0x2b0] sm:$0xff] }
  0x32   : > { %1373 = vmatprep.subr.bf16.mxu0 %v1600_v3  ;;  %1401 = vmatprep.subr.bf16.mxu1 %v1600_v3 }
  0x35   : > { %1375 = vmatpush1.bf16.msra.mxu0 %v1374_v35  ;;  %1417 = vmatpush1.bf16.msra.mxu1 %v1374_v35  ;;  %v197_v35 = vld [vmem:[%s1675_s7 + $0xc0] sm:$0xff] }
  0x36   : > { %1376 = vmatprep.subr.bf16.mxu0 %v1600_v3  ;;  %1402 = vmatprep.subr.bf16.mxu1 %v1600_v3 }
  0x39   : > { %1378 = vmatpush1.bf16.msra.mxu0 %v1377_v38  ;;  %1418 = vmatpush1.bf16.msra.mxu1 %v1377_v38  ;;  %v264_v38 = vld [vmem:[%s1675_s7 + $0x2d8] sm:$0xff] }
  0x3a   : > { %1379 = vmatprep.subr.bf16.mxu0 %v1600_v3  ;;  %1403 = vmatprep.subr.bf16.mxu1 %v1600_v3 }
  0x3d   : > { %1381 = vmatpush1.bf16.msra.mxu0 %v1380_v41  ;;  %1419 = vmatpush1.bf16.msra.mxu1 %v1380_v41  ;;  %v202_v41 = vld [vmem:[%s1675_s7 + $0xe8] sm:$0xff] }
  0x3e   : > { %1382 = vmatprep.subr.bf16.mxu0 %v1600_v3  ;;  %1404 = vmatprep.subr.bf16.mxu1 %v1600_v3 }
  0x41   : > { %1384 = vmatpush1.bf16.msra.mxu0 %v1383_v44  ;;  %1420 = vmatpush1.bf16.msra.mxu1 %v1383_v44  ;;  %v265_v44 = vld [vmem:[%s1675_s7 + $0x2e0] sm:$0xff] }
  0x42   : > { %1385 = vmatprep.subr.bf16.mxu0 %v1600_v3  ;;  %1405 = vmatprep.subr.bf16.mxu1 %v1600_v3 }
  0x45   : > { %1387 = vmatpush1.bf16.msra.mxu0 %v1386_v47  ;;  %1421 = vmatpush1.bf16.msra.mxu1 %v1386_v47  ;;  %v203_v47 = vld [vmem:[%s1675_s7 + $0xf0] sm:$0xff] }
  0x46   : > { %1388 = vmatprep.subr.bf16.mxu0 %v1600_v3  ;;  %1406 = vmatprep.subr.bf16.mxu1 %v1600_v3  ;;  %v181_v3 = vld [vmem:[%s1675_s7 + $0x40] sm:$0xff] }
  0x49   : > { %1390 = vmatpush1.bf16.msra.mxu0 %v1389_v50  ;;  %1422 = vmatpush1.bf16.msra.mxu1 %v1389_v50  ;;  %v270_v50 = vld [vmem:[%s1675_s7 + $0x308] sm:$0xff] }
  0x4c   : > { %398 = vmatmul.mubr.f32.vlgmr.msra.gmra.mrb[0].mxu0 %v173_v51  ;;  %558 = vmatmul.mubr.f32.vlgmr.msra.gmra.mrb[0].mxu1 %v237_v52  ;;  %v205_v51 = vld [vmem:[%s1675_s7 + $0x100] sm:$0xff] }
  0x4d   : > { %402 = vmatprep.mubr.f32.mxu0 %v176_v53  ;;  %562 = vmatprep.mubr.f32.mxu1 %v240_v54  ;;  %v269_v52 = vld [vmem:[%s1675_s7 + $0x300] sm:$0xff]  ;;  %v208_v53 = vld [vmem:[%s1675_s7 + $0x118] sm:$0xff] }
  0x4e   : > { %v272_v54 = vld [vmem:[%s1675_s7 + $0x318] sm:$0xff] }
  0x50   : > { %403 = vmatmul.mubr.f32.gmra.mrb[2].mxu0 %v175_v55  ;;  %563 = vmatmul.mubr.f32.gmra.mrb[2].mxu1 %v239_v56  ;;  %v207_v55 = vld [vmem:[%s1675_s7 + $0x110] sm:$0xff] }
  0x51   : > { %407 = vmatprep.mubr.f32.mxu0 %v178_v57  ;;  %567 = vmatprep.mubr.f32.mxu1 %v242_v58  ;;  %v271_v56 = vld [vmem:[%s1675_s7 + $0x310] sm:$0xff]  ;;  %v210_v57 = vld [vmem:[%s1675_s7 + $0x128] sm:$0xff] }
  0x52   : > { %v274_v58 = vld [vmem:[%s1675_s7 + $0x328] sm:$0xff] }
  0x54   : > { %408 = vmatmul.mubr.f32.gmra.mrb[4].mxu0 %v177_v59  ;;  %568 = vmatmul.mubr.f32.gmra.mrb[4].mxu1 %v241_v60  ;;  %v209_v59 = vld [vmem:[%s1675_s7 + $0x120] sm:$0xff] }
  0x55   : > { %412 = vmatprep.mubr.f32.mxu0 %v180_v61  ;;  %572 = vmatprep.mubr.f32.mxu1 %v244_v62  ;;  %v273_v60 = vld [vmem:[%s1675_s7 + $0x320] sm:$0xff]  ;;  %v212_v61 = vld [vmem:[%s1675_s7 + $0x138] sm:$0xff] }
  0x56   : > { %v276_v62 = vld [vmem:[%s1675_s7 + $0x338] sm:$0xff] }
  0x58   : > { %413 = vmatmul.mubr.f32.gmra.mrb[6].mxu0 %v179_v63  ;;  %573 = vmatmul.mubr.f32.gmra.mrb[6].mxu1 %v243_v0  ;;  %v211_v63 = vld [vmem:[%s1675_s7 + $0x130] sm:$0xff] }
  0x59   : > { %417 = vmatprep.mubr.f32.mxu0 %v182_v1  ;;  %577 = vmatprep.mubr.f32.mxu1 %v246_v2  ;;  %v275_v0 = vld [vmem:[%s1675_s7 + $0x330] sm:$0xff]  ;;  %v214_v1 = vld [vmem:[%s1675_s7 + $0x148] sm:$0xff] }
  0x5a   : > { %v278_v2 = vld [vmem:[%s1675_s7 + $0x348] sm:$0xff] }
  0x5c   : > { %418 = vmatmul.mubr.f32.gmra.mrb[8].mxu0 %v181_v3  ;;  %578 = vmatmul.mubr.f32.gmra.mrb[8].mxu1 %v245_v4  ;;  %v213_v3 = vld [vmem:[%s1675_s7 + $0x140] sm:$0xff] }
  0x5d   : > { %422 = vmatprep.mubr.f32.mxu0 %v184_v5  ;;  %582 = vmatprep.mubr.f32.mxu1 %v248_v6  ;;  %v277_v4 = vld [vmem:[%s1675_s7 + $0x340] sm:$0xff]  ;;  %v216_v5 = vld [vmem:[%s1675_s7 + $0x158] sm:$0xff] }
  0x5e   : > { %v280_v6 = vld [vmem:[%s1675_s7 + $0x358] sm:$0xff] }
  0x60   : > { %423 = vmatmul.mubr.f32.gmra.mrb[10].mxu0 %v183_v7  ;;  %583 = vmatmul.mubr.f32.gmra.mrb[10].mxu1 %v247_v8  ;;  %v215_v7 = vld [vmem:[%s1675_s7 + $0x150] sm:$0xff] }
  0x61   : > { %427 = vmatprep.mubr.f32.mxu0 %v186_v9  ;;  %587 = vmatprep.mubr.f32.mxu1 %v250_v10  ;;  %v279_v8 = vld [vmem:[%s1675_s7 + $0x350] sm:$0xff]  ;;  %v218_v9 = vld [vmem:[%s1675_s7 + $0x168] sm:$0xff] }
  0x62   : > { %v282_v10 = vld [vmem:[%s1675_s7 + $0x368] sm:$0xff] }
  0x64   : > { %428 = vmatmul.mubr.f32.gmra.mrb[12].mxu0 %v185_v11  ;;  %588 = vmatmul.mubr.f32.gmra.mrb[12].mxu1 %v249_v12  ;;  %v217_v11 = vld [vmem:[%s1675_s7 + $0x160] sm:$0xff] }
  0x65   : > { %432 = vmatprep.mubr.f32.mxu0 %v188_v13  ;;  %592 = vmatprep.mubr.f32.mxu1 %v252_v14  ;;  %v281_v12 = vld [vmem:[%s1675_s7 + $0x360] sm:$0xff]  ;;  %v220_v13 = vld [vmem:[%s1675_s7 + $0x178] sm:$0xff] }
  0x66   : > { %v284_v14 = vld [vmem:[%s1675_s7 + $0x378] sm:$0xff] }
  0x68   : > { %433 = vmatmul.mubr.f32.gmra.mrb[14].mxu0 %v187_v15  ;;  %593 = vmatmul.mubr.f32.gmra.mrb[14].mxu1 %v251_v16  ;;  %v219_v15 = vld [vmem:[%s1675_s7 + $0x170] sm:$0xff] }
  0x69   : > { %437 = vmatprep.mubr.f32.mxu0 %v190_v17  ;;  %597 = vmatprep.mubr.f32.mxu1 %v254_v18  ;;  %v283_v16 = vld [vmem:[%s1675_s7 + $0x370] sm:$0xff]  ;;  %v222_v17 = vld [vmem:[%s1675_s7 + $0x188] sm:$0xff] }
  0x6a   : > { %v286_v18 = vld [vmem:[%s1675_s7 + $0x388] sm:$0xff] }
  0x6c   : > { %438 = vmatmul.mubr.f32.gmra.mrb[16].mxu0 %v189_v19  ;;  %598 = vmatmul.mubr.f32.gmra.mrb[16].mxu1 %v253_v20  ;;  %v221_v19 = vld [vmem:[%s1675_s7 + $0x180] sm:$0xff] }
  0x6d   : > { %442 = vmatprep.mubr.f32.mxu0 %v192_v21  ;;  %602 = vmatprep.mubr.f32.mxu1 %v256_v22  ;;  %v285_v20 = vld [vmem:[%s1675_s7 + $0x380] sm:$0xff]  ;;  %v224_v21 = vld [vmem:[%s1675_s7 + $0x198] sm:$0xff] }
  0x6e   : > { %v288_v22 = vld [vmem:[%s1675_s7 + $0x398] sm:$0xff] }
  0x70   : > { %443 = vmatmul.mubr.f32.gmra.mrb[18].mxu0 %v191_v23  ;;  %603 = vmatmul.mubr.f32.gmra.mrb[18].mxu1 %v255_v24  ;;  %v223_v23 = vld [vmem:[%s1675_s7 + $0x190] sm:$0xff] }
  0x71   : > { %447 = vmatprep.mubr.f32.mxu0 %v194_v25  ;;  %607 = vmatprep.mubr.f32.mxu1 %v258_v26  ;;  %v287_v24 = vld [vmem:[%s1675_s7 + $0x390] sm:$0xff]  ;;  %v226_v25 = vld [vmem:[%s1675_s7 + $0x1a8] sm:$0xff] }
  0x72   : > { %v290_v26 = vld [vmem:[%s1675_s7 + $0x3a8] sm:$0xff] }
  0x74   : > { %448 = vmatmul.mubr.f32.gmra.mrb[20].mxu0 %v193_v27  ;;  %608 = vmatmul.mubr.f32.gmra.mrb[20].mxu1 %v257_v28  ;;  %v225_v27 = vld [vmem:[%s1675_s7 + $0x1a0] sm:$0xff] }
  0x75   : > { %452 = vmatprep.mubr.f32.mxu0 %v196_v29  ;;  %612 = vmatprep.mubr.f32.mxu1 %v260_v30  ;;  %v289_v28 = vld [vmem:[%s1675_s7 + $0x3a0] sm:$0xff]  ;;  %v228_v29 = vld [vmem:[%s1675_s7 + $0x1b8] sm:$0xff] }
  0x76   : > { %v292_v30 = vld [vmem:[%s1675_s7 + $0x3b8] sm:$0xff] }
  0x78   : > { %453 = vmatmul.mubr.f32.gmra.mrb[22].mxu0 %v195_v31  ;;  %613 = vmatmul.mubr.f32.gmra.mrb[22].mxu1 %v259_v32  ;;  %v227_v31 = vld [vmem:[%s1675_s7 + $0x1b0] sm:$0xff] }
  0x79   : > { %457 = vmatprep.mubr.f32.mxu0 %v198_v33  ;;  %617 = vmatprep.mubr.f32.mxu1 %v262_v34  ;;  %v291_v32 = vld [vmem:[%s1675_s7 + $0x3b0] sm:$0xff]  ;;  %v230_v33 = vld [vmem:[%s1675_s7 + $0x1c8] sm:$0xff] }
  0x7a   : > { %v294_v34 = vld [vmem:[%s1675_s7 + $0x3c8] sm:$0xff] }
  0x7c   : > { %458 = vmatmul.mubr.f32.gmra.mrb[24].mxu0 %v197_v35  ;;  %618 = vmatmul.mubr.f32.gmra.mrb[24].mxu1 %v261_v36  ;;  %v229_v35 = vld [vmem:[%s1675_s7 + $0x1c0] sm:$0xff] }
  0x7d   : > { %462 = vmatprep.mubr.f32.mxu0 %v200_v37  ;;  %622 = vmatprep.mubr.f32.mxu1 %v264_v38  ;;  %v293_v36 = vld [vmem:[%s1675_s7 + $0x3c0] sm:$0xff]  ;;  %v232_v37 = vld [vmem:[%s1675_s7 + $0x1d8] sm:$0xff] }
  0x7e   : > { %v296_v38 = vld [vmem:[%s1675_s7 + $0x3d8] sm:$0xff] }
  0x80   : > { %463 = vmatmul.mubr.f32.gmra.mrb[26].mxu0 %v199_v39  ;;  %623 = vmatmul.mubr.f32.gmra.mrb[26].mxu1 %v263_v40  ;;  %v231_v39 = vld [vmem:[%s1675_s7 + $0x1d0] sm:$0xff] }
  0x81   : > { %467 = vmatprep.mubr.f32.mxu0 %v202_v41  ;;  %627 = vmatprep.mubr.f32.mxu1 %v266_v42  ;;  %v295_v40 = vld [vmem:[%s1675_s7 + $0x3d0] sm:$0xff]  ;;  %v234_v41 = vld [vmem:[%s1675_s7 + $0x1e8] sm:$0xff] }
  0x82   : > { %v298_v42 = vld [vmem:[%s1675_s7 + $0x3e8] sm:$0xff] }
  0x84   : > { %468 = vmatmul.mubr.f32.gmra.mrb[28].mxu0 %v201_v43  ;;  %628 = vmatmul.mubr.f32.gmra.mrb[28].mxu1 %v265_v44  ;;  %v233_v43 = vld [vmem:[%s1675_s7 + $0x1e0] sm:$0xff] }
  0x85   : > { %472 = vmatprep.mubr.f32.mxu0 %v204_v45  ;;  %632 = vmatprep.mubr.f32.mxu1 %v268_v46  ;;  %v297_v44 = vld [vmem:[%s1675_s7 + $0x3e0] sm:$0xff]  ;;  %v236_v45 = vld [vmem:[%s1675_s7 + $0x1f8] sm:$0xff] }
  0x86   : > { %v300_v46 = vld [vmem:[%s1675_s7 + $0x3f8] sm:$0xff] }
  0x88   : > { %473 = vmatmul.mubr.f32.gmra.mrb[30].mxu0 %v203_v47  ;;  %633 = vmatmul.mubr.f32.gmra.mrb[30].mxu1 %v267_v48  ;;  %v235_v47 = vld [vmem:[%s1675_s7 + $0x1f0] sm:$0xff] }
  0x89   : > { %477 = vmatprep.mubr.f32.mxu0 %v206_v49  ;;  %637 = vmatprep.mubr.f32.mxu1 %v270_v50  ;;  %v299_v48 = vld [vmem:[%s1675_s7 + $0x3f0] sm:$0xff]  ;;  %s1340_s7 = sshll.u32 (%p1641_p4), %s1629_s12, 9 }
  0x8a   : > { %s2049_s4 = scalar_lea.vmem (%p1641_p4), %s2250_s2, %s1340_s7  }
  0x8c   : > { %478 = vmatmul.mubr.f32.gmra.mrb[32].mxu0 %v205_v51  ;;  %638 = vmatmul.mubr.f32.gmra.mrb[32].mxu1 %v269_v52 }
  0x8d   : > { %482 = vmatprep.mubr.f32.mxu0 %v208_v53  ;;  %642 = vmatprep.mubr.f32.mxu1 %v272_v54 }
  0x90   : > { %483 = vmatmul.mubr.f32.gmra.mrb[34].mxu0 %v207_v55  ;;  %643 = vmatmul.mubr.f32.gmra.mrb[34].mxu1 %v271_v56 }
  0x91   : > { %487 = vmatprep.mubr.f32.mxu0 %v210_v57  ;;  %647 = vmatprep.mubr.f32.mxu1 %v274_v58 }
  0x94   : > { %488 = vmatmul.mubr.f32.gmra.mrb[36].mxu0 %v209_v59  ;;  %648 = vmatmul.mubr.f32.gmra.mrb[36].mxu1 %v273_v60 }
  0x95   : > { %492 = vmatprep.mubr.f32.mxu0 %v212_v61  ;;  %652 = vmatprep.mubr.f32.mxu1 %v276_v62 }
  0x98   : > { %493 = vmatmul.mubr.f32.gmra.mrb[38].mxu0 %v211_v63  ;;  %653 = vmatmul.mubr.f32.gmra.mrb[38].mxu1 %v275_v0 }
  0x99   : > { %497 = vmatprep.mubr.f32.mxu0 %v214_v1  ;;  %657 = vmatprep.mubr.f32.mxu1 %v278_v2 }
  0x9c   : > { %498 = vmatmul.mubr.f32.gmra.mrb[40].mxu0 %v213_v3  ;;  %658 = vmatmul.mubr.f32.gmra.mrb[40].mxu1 %v277_v4 }
  0x9d   : > { %502 = vmatprep.mubr.f32.mxu0 %v216_v5  ;;  %662 = vmatprep.mubr.f32.mxu1 %v280_v6 }
  0xa0   : > { %503 = vmatmul.mubr.f32.gmra.mrb[42].mxu0 %v215_v7  ;;  %663 = vmatmul.mubr.f32.gmra.mrb[42].mxu1 %v279_v8 }
  0xa1   : > { %507 = vmatprep.mubr.f32.mxu0 %v218_v9  ;;  %667 = vmatprep.mubr.f32.mxu1 %v282_v10 }
  0xa4   : > { %508 = vmatmul.mubr.f32.gmra.mrb[44].mxu0 %v217_v11  ;;  %668 = vmatmul.mubr.f32.gmra.mrb[44].mxu1 %v281_v12 }
  0xa5   : > { %512 = vmatprep.mubr.f32.mxu0 %v220_v13  ;;  %672 = vmatprep.mubr.f32.mxu1 %v284_v14 }
  0xa8   : > { %513 = vmatmul.mubr.f32.gmra.mrb[46].mxu0 %v219_v15  ;;  %673 = vmatmul.mubr.f32.gmra.mrb[46].mxu1 %v283_v16 }
  0xa9   : > { %517 = vmatprep.mubr.f32.mxu0 %v222_v17  ;;  %677 = vmatprep.mubr.f32.mxu1 %v286_v18 }
  0xac   : > { %518 = vmatmul.mubr.f32.gmra.mrb[48].mxu0 %v221_v19  ;;  %678 = vmatmul.mubr.f32.gmra.mrb[48].mxu1 %v285_v20 }
  0xad   : > { %522 = vmatprep.mubr.f32.mxu0 %v224_v21  ;;  %682 = vmatprep.mubr.f32.mxu1 %v288_v22 }
  0xb0   : > { %523 = vmatmul.mubr.f32.gmra.mrb[50].mxu0 %v223_v23  ;;  %683 = vmatmul.mubr.f32.gmra.mrb[50].mxu1 %v287_v24 }
  0xb1   : > { %527 = vmatprep.mubr.f32.mxu0 %v226_v25  ;;  %687 = vmatprep.mubr.f32.mxu1 %v290_v26 }
  0xb4   : > { %528 = vmatmul.mubr.f32.gmra.mrb[52].mxu0 %v225_v27  ;;  %688 = vmatmul.mubr.f32.gmra.mrb[52].mxu1 %v289_v28 }
  0xb5   : > { %532 = vmatprep.mubr.f32.mxu0 %v228_v29  ;;  %692 = vmatprep.mubr.f32.mxu1 %v292_v30 }
  0xb8   : > { %533 = vmatmul.mubr.f32.gmra.mrb[54].mxu0 %v227_v31  ;;  %693 = vmatmul.mubr.f32.gmra.mrb[54].mxu1 %v291_v32 }
  0xb9   : > { %537 = vmatprep.mubr.f32.mxu0 %v230_v33  ;;  %697 = vmatprep.mubr.f32.mxu1 %v294_v34 }
  0xbc   : > { %538 = vmatmul.mubr.f32.gmra.mrb[56].mxu0 %v229_v35  ;;  %698 = vmatmul.mubr.f32.gmra.mrb[56].mxu1 %v293_v36 }
  0xbd   : > { %542 = vmatprep.mubr.f32.mxu0 %v232_v37  ;;  %702 = vmatprep.mubr.f32.mxu1 %v296_v38 }
  0xc0   : > { %543 = vmatmul.mubr.f32.gmra.mrb[58].mxu0 %v231_v39  ;;  %703 = vmatmul.mubr.f32.gmra.mrb[58].mxu1 %v295_v40 }
  0xc1   : > { %547 = vmatprep.mubr.f32.mxu0 %v234_v41  ;;  %707 = vmatprep.mubr.f32.mxu1 %v298_v42 }
  0xc4   : > { %548 = vmatmul.mubr.f32.gmra.mrb[60].mxu0 %v233_v43  ;;  %708 = vmatmul.mubr.f32.gmra.mrb[60].mxu1 %v297_v44 }
  0xc5   : > { %552 = vmatprep.mubr.f32.mxu0 %v236_v45  ;;  %712 = vmatprep.mubr.f32.mxu1 %v300_v46 }
  0xc8   : > { %553 = vmatmul.mubr.f32.gmra.mrb[62].mxu0 %v235_v47  ;;  %713 = vmatmul.mubr.f32.gmra.mrb[62].mxu1 %v299_v48 }
 0x11f   : > { %v399_v49 = vpop.f32.mrb[0].mxu0  ;;  %v559_v50 = vpop.f32.mrb[0].mxu1 }
 0x120   : > { %v718_v51 = vmax.f32 %v399_v49, 0.0  ;;  %v750_v52 = vmax.f32 %v559_v50, 0.0  ;;  %v401_v53 = vpop.f32.mrb[1].mxu0  ;;  %v561_v54 = vpop.f32.mrb[1].mxu1 }
 0x122   : > { %783 = vst.msk [vmem:[%s1912_s29] sm:$0xff] %vm782_vm0, %v718_v51  ;;  %815 = vst.msk [vmem:[%s1912_s29 + $0x100] sm:$0xff] %vm782_vm0, %v750_v52 }
 0x123   : > { %v404_v55 = vpop.f32.mrb[2].mxu0  ;;  %v564_v56 = vpop.f32.mrb[2].mxu1 }
 0x124   : > { %v719_v57 = vmax.f32 %v404_v55, 0.0  ;;  %v751_v58 = vmax.f32 %v564_v56, 0.0  ;;  %v406_v59 = vpop.f32.mrb[3].mxu0  ;;  %v566_v60 = vpop.f32.mrb[3].mxu1 }
 0x126   : > { %784 = vst.msk [vmem:[%s1912_s29 + $0x8] sm:$0xff] %vm782_vm0, %v719_v57  ;;  %816 = vst.msk [vmem:[%s1912_s29 + $0x108] sm:$0xff] %vm782_vm0, %v751_v58 }
 0x127   : > { %v409_v61 = vpop.f32.mrb[4].mxu0  ;;  %v569_v62 = vpop.f32.mrb[4].mxu1 }
 0x128   : > { %v720_v63 = vmax.f32 %v409_v61, 0.0  ;;  %v752_v0 = vmax.f32 %v569_v62, 0.0  ;;  %v411_v1 = vpop.f32.mrb[5].mxu0  ;;  %v571_v2 = vpop.f32.mrb[5].mxu1 }
 0x12a   : > { %785 = vst.msk [vmem:[%s1912_s29 + $0x10] sm:$0xff] %vm782_vm0, %v720_v63  ;;  %817 = vst.msk [vmem:[%s1912_s29 + $0x110] sm:$0xff] %vm782_vm0, %v752_v0 }
 0x12b   : > { %v414_v3 = vpop.f32.mrb[6].mxu0  ;;  %v574_v4 = vpop.f32.mrb[6].mxu1 }
 0x12c   : > { %v721_v5 = vmax.f32 %v414_v3, 0.0  ;;  %v753_v6 = vmax.f32 %v574_v4, 0.0  ;;  %v416_v7 = vpop.f32.mrb[7].mxu0  ;;  %v576_v8 = vpop.f32.mrb[7].mxu1 }
 0x12e   : > { %786 = vst.msk [vmem:[%s1912_s29 + $0x18] sm:$0xff] %vm782_vm0, %v721_v5  ;;  %818 = vst.msk [vmem:[%s1912_s29 + $0x118] sm:$0xff] %vm782_vm0, %v753_v6 }
 0x12f   : > { %v419_v9 = vpop.f32.mrb[8].mxu0  ;;  %v579_v10 = vpop.f32.mrb[8].mxu1 }
 0x130   : > { %v722_v11 = vmax.f32 %v419_v9, 0.0  ;;  %v754_v12 = vmax.f32 %v579_v10, 0.0  ;;  %v421_v13 = vpop.f32.mrb[9].mxu0  ;;  %v581_v14 = vpop.f32.mrb[9].mxu1 }
 0x132   : > { %787 = vst.msk [vmem:[%s1912_s29 + $0x20] sm:$0xff] %vm782_vm0, %v722_v11  ;;  %819 = vst.msk [vmem:[%s1912_s29 + $0x120] sm:$0xff] %vm782_vm0, %v754_v12 }
 0x133   : > { %v424_v15 = vpop.f32.mrb[10].mxu0  ;;  %v584_v16 = vpop.f32.mrb[10].mxu1 }
 0x134   : > { %v723_v17 = vmax.f32 %v424_v15, 0.0  ;;  %v755_v18 = vmax.f32 %v584_v16, 0.0  ;;  %v426_v19 = vpop.f32.mrb[11].mxu0  ;;  %v586_v20 = vpop.f32.mrb[11].mxu1 }
 0x136   : > { %788 = vst.msk [vmem:[%s1912_s29 + $0x28] sm:$0xff] %vm782_vm0, %v723_v17  ;;  %820 = vst.msk [vmem:[%s1912_s29 + $0x128] sm:$0xff] %vm782_vm0, %v755_v18 }
 0x137   : > { %v429_v21 = vpop.f32.mrb[12].mxu0  ;;  %v589_v22 = vpop.f32.mrb[12].mxu1 }
 0x138   : > { %v724_v23 = vmax.f32 %v429_v21, 0.0  ;;  %v756_v24 = vmax.f32 %v589_v22, 0.0  ;;  %v431_v25 = vpop.f32.mrb[13].mxu0  ;;  %v591_v26 = vpop.f32.mrb[13].mxu1 }
 0x13a   : > { %789 = vst.msk [vmem:[%s1912_s29 + $0x30] sm:$0xff] %vm782_vm0, %v724_v23  ;;  %821 = vst.msk [vmem:[%s1912_s29 + $0x130] sm:$0xff] %vm782_vm0, %v756_v24 }
 0x13b   : > { %v434_v27 = vpop.f32.mrb[14].mxu0  ;;  %v594_v28 = vpop.f32.mrb[14].mxu1 }
 0x13c   : > { %v725_v29 = vmax.f32 %v434_v27, 0.0  ;;  %v757_v30 = vmax.f32 %v594_v28, 0.0  ;;  %v436_v31 = vpop.f32.mrb[15].mxu0  ;;  %v596_v32 = vpop.f32.mrb[15].mxu1 }
 0x13e   : > { %790 = vst.msk [vmem:[%s1912_s29 + $0x38] sm:$0xff] %vm782_vm0, %v725_v29  ;;  %822 = vst.msk [vmem:[%s1912_s29 + $0x138] sm:$0xff] %vm782_vm0, %v757_v30 }
 0x13f   : > { %v439_v33 = vpop.f32.mrb[16].mxu0  ;;  %v599_v34 = vpop.f32.mrb[16].mxu1 }
 0x140   : > { %v726_v35 = vmax.f32 %v439_v33, 0.0  ;;  %v758_v36 = vmax.f32 %v599_v34, 0.0  ;;  %v441_v37 = vpop.f32.mrb[17].mxu0  ;;  %v601_v38 = vpop.f32.mrb[17].mxu1 }
 0x142   : > { %791 = vst.msk [vmem:[%s1912_s29 + $0x40] sm:$0xff] %vm782_vm0, %v726_v35  ;;  %823 = vst.msk [vmem:[%s1912_s29 + $0x140] sm:$0xff] %vm782_vm0, %v758_v36 }
 0x143   : > { %v444_v39 = vpop.f32.mrb[18].mxu0  ;;  %v604_v40 = vpop.f32.mrb[18].mxu1 }
 0x144   : > { %v727_v41 = vmax.f32 %v444_v39, 0.0  ;;  %v759_v42 = vmax.f32 %v604_v40, 0.0  ;;  %v446_v43 = vpop.f32.mrb[19].mxu0  ;;  %v606_v44 = vpop.f32.mrb[19].mxu1 }
 0x146   : > { %792 = vst.msk [vmem:[%s1912_s29 + $0x48] sm:$0xff] %vm782_vm0, %v727_v41  ;;  %824 = vst.msk [vmem:[%s1912_s29 + $0x148] sm:$0xff] %vm782_vm0, %v759_v42 }
 0x147   : > { %v449_v45 = vpop.f32.mrb[20].mxu0  ;;  %v609_v46 = vpop.f32.mrb[20].mxu1 }
 0x148   : > { %v728_v47 = vmax.f32 %v449_v45, 0.0  ;;  %v760_v48 = vmax.f32 %v609_v46, 0.0  ;;  %v451_v49 = vpop.f32.mrb[21].mxu0  ;;  %v611_v50 = vpop.f32.mrb[21].mxu1 }
 0x14a   : > { %793 = vst.msk [vmem:[%s1912_s29 + $0x50] sm:$0xff] %vm782_vm0, %v728_v47  ;;  %825 = vst.msk [vmem:[%s1912_s29 + $0x150] sm:$0xff] %vm782_vm0, %v760_v48 }
 0x14b   : > { %v454_v51 = vpop.f32.mrb[22].mxu0  ;;  %v614_v52 = vpop.f32.mrb[22].mxu1 }
 0x14c   : > { %v729_v53 = vmax.f32 %v454_v51, 0.0  ;;  %v761_v54 = vmax.f32 %v614_v52, 0.0  ;;  %v456_v55 = vpop.f32.mrb[23].mxu0  ;;  %v616_v56 = vpop.f32.mrb[23].mxu1 }
 0x14e   : > { %794 = vst.msk [vmem:[%s1912_s29 + $0x58] sm:$0xff] %vm782_vm0, %v729_v53  ;;  %826 = vst.msk [vmem:[%s1912_s29 + $0x158] sm:$0xff] %vm782_vm0, %v761_v54 }
 0x14f   : > { %v459_v57 = vpop.f32.mrb[24].mxu0  ;;  %v619_v58 = vpop.f32.mrb[24].mxu1 }
 0x150   : > { %v730_v59 = vmax.f32 %v459_v57, 0.0  ;;  %v762_v60 = vmax.f32 %v619_v58, 0.0  ;;  %v461_v61 = vpop.f32.mrb[25].mxu0  ;;  %v621_v62 = vpop.f32.mrb[25].mxu1 }
 0x152   : > { %795 = vst.msk [vmem:[%s1912_s29 + $0x60] sm:$0xff] %vm782_vm0, %v730_v59  ;;  %827 = vst.msk [vmem:[%s1912_s29 + $0x160] sm:$0xff] %vm782_vm0, %v762_v60 }
 0x153   : > { %v464_v63 = vpop.f32.mrb[26].mxu0  ;;  %v624_v0 = vpop.f32.mrb[26].mxu1 }
 0x154   : > { %v731_v1 = vmax.f32 %v464_v63, 0.0  ;;  %v763_v2 = vmax.f32 %v624_v0, 0.0  ;;  %v466_v3 = vpop.f32.mrb[27].mxu0  ;;  %v626_v4 = vpop.f32.mrb[27].mxu1 }
 0x156   : > { %796 = vst.msk [vmem:[%s1912_s29 + $0x68] sm:$0xff] %vm782_vm0, %v731_v1  ;;  %828 = vst.msk [vmem:[%s1912_s29 + $0x168] sm:$0xff] %vm782_vm0, %v763_v2 }
 0x157   : > { %v469_v5 = vpop.f32.mrb[28].mxu0  ;;  %v629_v6 = vpop.f32.mrb[28].mxu1 }
 0x158   : > { %v732_v7 = vmax.f32 %v469_v5, 0.0  ;;  %v764_v8 = vmax.f32 %v629_v6, 0.0  ;;  %v471_v9 = vpop.f32.mrb[29].mxu0  ;;  %v631_v10 = vpop.f32.mrb[29].mxu1 }
 0x15a   : > { %797 = vst.msk [vmem:[%s1912_s29 + $0x70] sm:$0xff] %vm782_vm0, %v732_v7  ;;  %829 = vst.msk [vmem:[%s1912_s29 + $0x170] sm:$0xff] %vm782_vm0, %v764_v8 }
 0x15b   : > { %v474_v11 = vpop.f32.mrb[30].mxu0  ;;  %v634_v12 = vpop.f32.mrb[30].mxu1 }
 0x15c   : > { %v733_v13 = vmax.f32 %v474_v11, 0.0  ;;  %v765_v14 = vmax.f32 %v634_v12, 0.0  ;;  %v476_v15 = vpop.f32.mrb[31].mxu0  ;;  %v636_v16 = vpop.f32.mrb[31].mxu1 }
 0x15e   : > { %798 = vst.msk [vmem:[%s1912_s29 + $0x78] sm:$0xff] %vm782_vm0, %v733_v13  ;;  %830 = vst.msk [vmem:[%s1912_s29 + $0x178] sm:$0xff] %vm782_vm0, %v765_v14 }
 0x15f   : > { %v479_v17 = vpop.f32.mrb[32].mxu0  ;;  %v639_v18 = vpop.f32.mrb[32].mxu1 }
 0x160   : > { %v734_v19 = vmax.f32 %v479_v17, 0.0  ;;  %v766_v20 = vmax.f32 %v639_v18, 0.0  ;;  %v481_v21 = vpop.f32.mrb[33].mxu0  ;;  %v641_v22 = vpop.f32.mrb[33].mxu1 }
 0x162   : > { %799 = vst.msk [vmem:[%s1912_s29 + $0x80] sm:$0xff] %vm782_vm0, %v734_v19  ;;  %831 = vst.msk [vmem:[%s1912_s29 + $0x180] sm:$0xff] %vm782_vm0, %v766_v20 }
 0x163   : > { %v484_v23 = vpop.f32.mrb[34].mxu0  ;;  %v644_v24 = vpop.f32.mrb[34].mxu1 }
 0x164   : > { %v735_v25 = vmax.f32 %v484_v23, 0.0  ;;  %v767_v26 = vmax.f32 %v644_v24, 0.0  ;;  %v486_v27 = vpop.f32.mrb[35].mxu0  ;;  %v646_v28 = vpop.f32.mrb[35].mxu1 }
 0x166   : > { %800 = vst.msk [vmem:[%s1912_s29 + $0x88] sm:$0xff] %vm782_vm0, %v735_v25  ;;  %832 = vst.msk [vmem:[%s1912_s29 + $0x188] sm:$0xff] %vm782_vm0, %v767_v26 }
 0x167   : > { %v489_v29 = vpop.f32.mrb[36].mxu0  ;;  %v649_v30 = vpop.f32.mrb[36].mxu1 }
 0x168   : > { %v736_v31 = vmax.f32 %v489_v29, 0.0  ;;  %v768_v32 = vmax.f32 %v649_v30, 0.0  ;;  %v491_v33 = vpop.f32.mrb[37].mxu0  ;;  %v651_v34 = vpop.f32.mrb[37].mxu1 }
 0x16a   : > { %801 = vst.msk [vmem:[%s1912_s29 + $0x90] sm:$0xff] %vm782_vm0, %v736_v31  ;;  %833 = vst.msk [vmem:[%s1912_s29 + $0x190] sm:$0xff] %vm782_vm0, %v768_v32 }
 0x16b   : > { %v494_v35 = vpop.f32.mrb[38].mxu0  ;;  %v654_v36 = vpop.f32.mrb[38].mxu1 }
 0x16c   : > { %v737_v37 = vmax.f32 %v494_v35, 0.0  ;;  %v769_v38 = vmax.f32 %v654_v36, 0.0  ;;  %v496_v39 = vpop.f32.mrb[39].mxu0  ;;  %v656_v40 = vpop.f32.mrb[39].mxu1 }
 0x16e   : > { %802 = vst.msk [vmem:[%s1912_s29 + $0x98] sm:$0xff] %vm782_vm0, %v737_v37  ;;  %834 = vst.msk [vmem:[%s1912_s29 + $0x198] sm:$0xff] %vm782_vm0, %v769_v38 }
 0x16f   : > { %v499_v41 = vpop.f32.mrb[40].mxu0  ;;  %v659_v42 = vpop.f32.mrb[40].mxu1 }
 0x170   : > { %v738_v43 = vmax.f32 %v499_v41, 0.0  ;;  %v770_v44 = vmax.f32 %v659_v42, 0.0  ;;  %v501_v45 = vpop.f32.mrb[41].mxu0  ;;  %v661_v46 = vpop.f32.mrb[41].mxu1 }
 0x172   : > { %803 = vst.msk [vmem:[%s1912_s29 + $0xa0] sm:$0xff] %vm782_vm0, %v738_v43  ;;  %835 = vst.msk [vmem:[%s1912_s29 + $0x1a0] sm:$0xff] %vm782_vm0, %v770_v44 }
 0x173   : > { %v504_v47 = vpop.f32.mrb[42].mxu0  ;;  %v664_v48 = vpop.f32.mrb[42].mxu1 }
 0x174   : > { %v739_v49 = vmax.f32 %v504_v47, 0.0  ;;  %v771_v50 = vmax.f32 %v664_v48, 0.0  ;;  %v506_v51 = vpop.f32.mrb[43].mxu0  ;;  %v666_v52 = vpop.f32.mrb[43].mxu1 }
 0x176   : > { %804 = vst.msk [vmem:[%s1912_s29 + $0xa8] sm:$0xff] %vm782_vm0, %v739_v49  ;;  %836 = vst.msk [vmem:[%s1912_s29 + $0x1a8] sm:$0xff] %vm782_vm0, %v771_v50 }
 0x177   : > { %v509_v53 = vpop.f32.mrb[44].mxu0  ;;  %v669_v54 = vpop.f32.mrb[44].mxu1 }
 0x178   : > { %v740_v55 = vmax.f32 %v509_v53, 0.0  ;;  %v772_v56 = vmax.f32 %v669_v54, 0.0  ;;  %v511_v57 = vpop.f32.mrb[45].mxu0  ;;  %v671_v58 = vpop.f32.mrb[45].mxu1 }
 0x17a   : > { %805 = vst.msk [vmem:[%s1912_s29 + $0xb0] sm:$0xff] %vm782_vm0, %v740_v55  ;;  %837 = vst.msk [vmem:[%s1912_s29 + $0x1b0] sm:$0xff] %vm782_vm0, %v772_v56 }
 0x17b   : > { %v514_v59 = vpop.f32.mrb[46].mxu0  ;;  %v674_v60 = vpop.f32.mrb[46].mxu1 }
 0x17c   : > { %v741_v61 = vmax.f32 %v514_v59, 0.0  ;;  %v773_v62 = vmax.f32 %v674_v60, 0.0  ;;  %v516_v63 = vpop.f32.mrb[47].mxu0  ;;  %v676_v0 = vpop.f32.mrb[47].mxu1 }
 0x17e   : > { %806 = vst.msk [vmem:[%s1912_s29 + $0xb8] sm:$0xff] %vm782_vm0, %v741_v61  ;;  %838 = vst.msk [vmem:[%s1912_s29 + $0x1b8] sm:$0xff] %vm782_vm0, %v773_v62 }
 0x17f   : > { %v519_v1 = vpop.f32.mrb[48].mxu0  ;;  %v679_v2 = vpop.f32.mrb[48].mxu1 }
 0x180   : > { %v742_v3 = vmax.f32 %v519_v1, 0.0  ;;  %v774_v4 = vmax.f32 %v679_v2, 0.0  ;;  %v521_v5 = vpop.f32.mrb[49].mxu0  ;;  %v681_v6 = vpop.f32.mrb[49].mxu1 }
 0x182   : > { %807 = vst.msk [vmem:[%s1912_s29 + $0xc0] sm:$0xff] %vm782_vm0, %v742_v3  ;;  %839 = vst.msk [vmem:[%s1912_s29 + $0x1c0] sm:$0xff] %vm782_vm0, %v774_v4 }
 0x183   : > { %v524_v7 = vpop.f32.mrb[50].mxu0  ;;  %v684_v8 = vpop.f32.mrb[50].mxu1 }
 0x184   : > { %v743_v9 = vmax.f32 %v524_v7, 0.0  ;;  %v775_v10 = vmax.f32 %v684_v8, 0.0  ;;  %v526_v11 = vpop.f32.mrb[51].mxu0  ;;  %v686_v12 = vpop.f32.mrb[51].mxu1 }
 0x186   : > { %808 = vst.msk [vmem:[%s1912_s29 + $0xc8] sm:$0xff] %vm782_vm0, %v743_v9  ;;  %840 = vst.msk [vmem:[%s1912_s29 + $0x1c8] sm:$0xff] %vm782_vm0, %v775_v10 }
 0x187   : > { %v529_v13 = vpop.f32.mrb[52].mxu0  ;;  %v689_v14 = vpop.f32.mrb[52].mxu1 }
 0x188   : > { %v744_v15 = vmax.f32 %v529_v13, 0.0  ;;  %v776_v16 = vmax.f32 %v689_v14, 0.0  ;;  %v531_v17 = vpop.f32.mrb[53].mxu0  ;;  %v691_v18 = vpop.f32.mrb[53].mxu1 }
 0x18a   : > { %809 = vst.msk [vmem:[%s1912_s29 + $0xd0] sm:$0xff] %vm782_vm0, %v744_v15  ;;  %841 = vst.msk [vmem:[%s1912_s29 + $0x1d0] sm:$0xff] %vm782_vm0, %v776_v16 }
 0x18b   : > { %v534_v19 = vpop.f32.mrb[54].mxu0  ;;  %v694_v20 = vpop.f32.mrb[54].mxu1 }
 0x18c   : > { %v745_v21 = vmax.f32 %v534_v19, 0.0  ;;  %v777_v22 = vmax.f32 %v694_v20, 0.0  ;;  %v536_v23 = vpop.f32.mrb[55].mxu0  ;;  %v696_v24 = vpop.f32.mrb[55].mxu1 }
 0x18e   : > { %810 = vst.msk [vmem:[%s1912_s29 + $0xd8] sm:$0xff] %vm782_vm0, %v745_v21  ;;  %842 = vst.msk [vmem:[%s1912_s29 + $0x1d8] sm:$0xff] %vm782_vm0, %v777_v22 }
 0x18f   : > { %v539_v25 = vpop.f32.mrb[56].mxu0  ;;  %v699_v26 = vpop.f32.mrb[56].mxu1 }
 0x190   : > { %v746_v27 = vmax.f32 %v539_v25, 0.0  ;;  %v778_v28 = vmax.f32 %v699_v26, 0.0  ;;  %v541_v29 = vpop.f32.mrb[57].mxu0  ;;  %v701_v30 = vpop.f32.mrb[57].mxu1 }
 0x192   : > { %811 = vst.msk [vmem:[%s1912_s29 + $0xe0] sm:$0xff] %vm782_vm0, %v746_v27  ;;  %843 = vst.msk [vmem:[%s1912_s29 + $0x1e0] sm:$0xff] %vm782_vm0, %v778_v28 }
 0x193   : > { %v544_v31 = vpop.f32.mrb[58].mxu0  ;;  %v704_v32 = vpop.f32.mrb[58].mxu1 }
 0x194   : > { %v747_v33 = vmax.f32 %v544_v31, 0.0  ;;  %v779_v34 = vmax.f32 %v704_v32, 0.0  ;;  %v546_v35 = vpop.f32.mrb[59].mxu0  ;;  %v706_v36 = vpop.f32.mrb[59].mxu1 }
 0x196   : > { %812 = vst.msk [vmem:[%s1912_s29 + $0xe8] sm:$0xff] %vm782_vm0, %v747_v33  ;;  %844 = vst.msk [vmem:[%s1912_s29 + $0x1e8] sm:$0xff] %vm782_vm0, %v779_v34 }
 0x197   : > { %v549_v37 = vpop.f32.mrb[60].mxu0  ;;  %v709_v38 = vpop.f32.mrb[60].mxu1 }
 0x198   : > { %v748_v39 = vmax.f32 %v549_v37, 0.0  ;;  %v780_v40 = vmax.f32 %v709_v38, 0.0  ;;  %v551_v41 = vpop.f32.mrb[61].mxu0  ;;  %v711_v42 = vpop.f32.mrb[61].mxu1  ;;  %853 = sbr.rel (!%p1641_p4) target bundleno = 487 (0x1e7), region = 32 }
 0x19a   : > { %813 = vst.msk [vmem:[%s1912_s29 + $0xf0] sm:$0xff] %vm782_vm0, %v748_v39  ;;  %845 = vst.msk [vmem:[%s1912_s29 + $0x1f0] sm:$0xff] %vm782_vm0, %v780_v40 }
 0x19b   : > { %v554_v43 = vpop.f32.mrb[62].mxu0  ;;  %v714_v44 = vpop.f32.mrb[62].mxu1 }
 0x19c   : > { %v749_v45 = vmax.f32 %v554_v43, 0.0  ;;  %v781_v46 = vmax.f32 %v714_v44, 0.0  ;;  %v556_v47 = vpop.f32.mrb[63].mxu0  ;;  %v716_v48 = vpop.f32.mrb[63].mxu1 }
 0x19e   : > { %814 = vst.msk [vmem:[%s1912_s29 + $0xf8] sm:$0xff] %vm782_vm0, %v749_v45  ;;  %846 = vst.msk [vmem:[%s1912_s29 + $0x1f8] sm:$0xff] %vm782_vm0, %v781_v46 }
 0x19f   : > { %s2261_s9 = smov (!%p856_p8, %s855_s9), 64 }
 0x1a0   : > { %s1324_s5 = sshll.u32 %s2261_s9, 7 }
 0x1a1   : > { %p1327_p9 = scmp.eq.s32.totalorder %s1324_s5, 0 }
 0x1a2   : > { %s2055_s6 = sshrl.u32 (!%p1327_p9), %s2261_s9, 6 }
 0x1a3   : > { %864 = sbr.rel (%p1327_p9) target bundleno = 487 (0x1e7), region = 36  ;;  %p1328_p10 = scmp.le.s32.totalorder (!%p1327_p9), %s2055_s6, 0 }
 0x1aa   : > { %1270 = sbr.rel (%p1328_p10) target bundleno = 466 (0x1d2), region = 112  ;;  %s2252_s12 = smov (!%p1328_p10), %s2049_s4 }
 0x1ab   : > { %s2253_s17 = smov (!%p1328_p10), %s1912_s29  ;;  %s2064_s24 = smov (!%p1328_p10), 0  }
 0x1ac   : > { %s2066_s8 = smov (!%p1328_p10), 0  }
 0x1b1 LB: >> { %v1052_v49 = vld [vmem:[%s1574_s17] sm:$0xff]  ;;  %v1054_v50 = vld [vmem:[%s1574_s17 + $0x8] sm:$0xff]  ;;  %v1056_v51 = vld [vmem:[%s1574_s17 + $0x10] sm:$0xff]  ;;  %s1180_s11 = sadd.s32 1, %s1578_s24  ;;  %s1046_s8 = sadd.s32 1, %s1582_s8   ;;  %s1582_s8 = sphi %s2066_s8, %s1046_s8   ;;  %s1578_s24 = sphi %s2064_s24, %s2256_s24   ;;  %s1574_s17 = sphi %s2253_s17, %s2255_s17   ;;  %s1570_s12 = sphi %s2252_s12, %s2254_s12  }
 0x1b2   : >> { %1053 = vst [vmem:[%s1570_s12] sm:$0xff] %v1052_v49  ;;  %1055 = vst [vmem:[%s1570_s12 + $0x8] sm:$0xff] %v1054_v50  ;;  %v1058_v52 = vld [vmem:[%s1574_s17 + $0x18] sm:$0xff]  ;;  %v1060_v53 = vld [vmem:[%s1574_s17 + $0x20] sm:$0xff]  ;;  %p1181_p11 = scmp.ge.s32.totalorder %s1180_s11, %s2055_s6  ;;  %p1045_p12 = scmp.ge.s32.totalorder %s1046_s8, %s2055_s6 }
 0x1b3   : >> { %1057 = vst [vmem:[%s1570_s12 + $0x10] sm:$0xff] %v1056_v51  ;;  %v1062_v54 = vld [vmem:[%s1574_s17 + $0x28] sm:$0xff]  ;;  %1059 = vst [vmem:[%s1570_s12 + $0x18] sm:$0xff] %v1058_v52  ;;  %v1064_v55 = vld [vmem:[%s1574_s17 + $0x30] sm:$0xff] }
 0x1b4   : >> { %1061 = vst [vmem:[%s1570_s12 + $0x20] sm:$0xff] %v1060_v53  ;;  %1063 = vst [vmem:[%s1570_s12 + $0x28] sm:$0xff] %v1062_v54  ;;  %v1066_v56 = vld [vmem:[%s1574_s17 + $0x38] sm:$0xff]  ;;  %v1068_v57 = vld [vmem:[%s1574_s17 + $0x40] sm:$0xff]  ;;  %s2263_s11 = smov (%p1181_p11, %s1180_s11), 0 }
 0x1b5   : >> { %1065 = vst [vmem:[%s1570_s12 + $0x30] sm:$0xff] %v1064_v55  ;;  %1067 = vst [vmem:[%s1570_s12 + $0x38] sm:$0xff] %v1066_v56  ;;  %v1070_v58 = vld [vmem:[%s1574_s17 + $0x48] sm:$0xff]  ;;  %v1072_v59 = vld [vmem:[%s1574_s17 + $0x50] sm:$0xff]  ;;  %s1329_s14 = sshll.u32 %s2263_s11, 9  ;;  %s2256_s24 = smov %s2263_s11 }
 0x1b6   : >> { %1069 = vst [vmem:[%s1570_s12 + $0x40] sm:$0xff] %v1068_v57  ;;  %v1074_v60 = vld [vmem:[%s1574_s17 + $0x58] sm:$0xff]  ;;  %1071 = vst [vmem:[%s1570_s12 + $0x48] sm:$0xff] %v1070_v58  ;;  %v1076_v61 = vld [vmem:[%s1574_s17 + $0x60] sm:$0xff]  ;;  %s2122_s15 = scalar_lea.vmem %s1912_s29, %s1329_s14 [#allocation2]   ;;  %s2125_s18 = scalar_lea.vmem %s2049_s4, %s1329_s14  }
 0x1b7   : >> { %1073 = vst [vmem:[%s1570_s12 + $0x50] sm:$0xff] %v1072_v59  ;;  %1075 = vst [vmem:[%s1570_s12 + $0x58] sm:$0xff] %v1074_v60  ;;  %v1078_v62 = vld [vmem:[%s1574_s17 + $0x68] sm:$0xff]  ;;  %v1080_v63 = vld [vmem:[%s1574_s17 + $0x70] sm:$0xff] }
 0x1b8   : >> { %1077 = vst [vmem:[%s1570_s12 + $0x60] sm:$0xff] %v1076_v61  ;;  %1079 = vst [vmem:[%s1570_s12 + $0x68] sm:$0xff] %v1078_v62  ;;  %v1082_v0 = vld [vmem:[%s1574_s17 + $0x78] sm:$0xff]  ;;  %v1084_v1 = vld [vmem:[%s1574_s17 + $0x80] sm:$0xff] }
 0x1b9   : >> { %1081 = vst [vmem:[%s1570_s12 + $0x70] sm:$0xff] %v1080_v63  ;;  %v1086_v2 = vld [vmem:[%s1574_s17 + $0x88] sm:$0xff]  ;;  %1083 = vst [vmem:[%s1570_s12 + $0x78] sm:$0xff] %v1082_v0  ;;  %v1088_v3 = vld [vmem:[%s1574_s17 + $0x90] sm:$0xff] }
 0x1ba   : >> { %1085 = vst [vmem:[%s1570_s12 + $0x80] sm:$0xff] %v1084_v1  ;;  %1087 = vst [vmem:[%s1570_s12 + $0x88] sm:$0xff] %v1086_v2  ;;  %v1090_v4 = vld [vmem:[%s1574_s17 + $0x98] sm:$0xff]  ;;  %v1092_v5 = vld [vmem:[%s1574_s17 + $0xa0] sm:$0xff] }
 0x1bb   : >> { %1089 = vst [vmem:[%s1570_s12 + $0x90] sm:$0xff] %v1088_v3  ;;  %1091 = vst [vmem:[%s1570_s12 + $0x98] sm:$0xff] %v1090_v4  ;;  %v1094_v6 = vld [vmem:[%s1574_s17 + $0xa8] sm:$0xff]  ;;  %v1096_v7 = vld [vmem:[%s1574_s17 + $0xb0] sm:$0xff] }
 0x1bc   : >> { %1093 = vst [vmem:[%s1570_s12 + $0xa0] sm:$0xff] %v1092_v5  ;;  %v1098_v8 = vld [vmem:[%s1574_s17 + $0xb8] sm:$0xff]  ;;  %1095 = vst [vmem:[%s1570_s12 + $0xa8] sm:$0xff] %v1094_v6  ;;  %v1100_v9 = vld [vmem:[%s1574_s17 + $0xc0] sm:$0xff] }
 0x1bd   : >> { %1097 = vst [vmem:[%s1570_s12 + $0xb0] sm:$0xff] %v1096_v7  ;;  %1099 = vst [vmem:[%s1570_s12 + $0xb8] sm:$0xff] %v1098_v8  ;;  %v1102_v10 = vld [vmem:[%s1574_s17 + $0xc8] sm:$0xff]  ;;  %v1104_v11 = vld [vmem:[%s1574_s17 + $0xd0] sm:$0xff] }
 0x1be   : >> { %1101 = vst [vmem:[%s1570_s12 + $0xc0] sm:$0xff] %v1100_v9  ;;  %1103 = vst [vmem:[%s1570_s12 + $0xc8] sm:$0xff] %v1102_v10  ;;  %v1106_v12 = vld [vmem:[%s1574_s17 + $0xd8] sm:$0xff]  ;;  %v1108_v13 = vld [vmem:[%s1574_s17 + $0xe0] sm:$0xff] }
 0x1bf   : >> { %1105 = vst [vmem:[%s1570_s12 + $0xd0] sm:$0xff] %v1104_v11  ;;  %v1110_v14 = vld [vmem:[%s1574_s17 + $0xe8] sm:$0xff]  ;;  %1107 = vst [vmem:[%s1570_s12 + $0xd8] sm:$0xff] %v1106_v12  ;;  %v1112_v15 = vld [vmem:[%s1574_s17 + $0xf0] sm:$0xff] }
 0x1c0   : >> { %1109 = vst [vmem:[%s1570_s12 + $0xe0] sm:$0xff] %v1108_v13  ;;  %1111 = vst [vmem:[%s1570_s12 + $0xe8] sm:$0xff] %v1110_v14  ;;  %v1114_v16 = vld [vmem:[%s1574_s17 + $0xf8] sm:$0xff]  ;;  %v1116_v17 = vld [vmem:[%s1574_s17 + $0x100] sm:$0xff] }
 0x1c1   : >> { %1113 = vst [vmem:[%s1570_s12 + $0xf0] sm:$0xff] %v1112_v15  ;;  %1115 = vst [vmem:[%s1570_s12 + $0xf8] sm:$0xff] %v1114_v16  ;;  %v1118_v18 = vld [vmem:[%s1574_s17 + $0x108] sm:$0xff]  ;;  %v1120_v19 = vld [vmem:[%s1574_s17 + $0x110] sm:$0xff] }
 0x1c2   : >> { %1117 = vst [vmem:[%s1570_s12 + $0x100] sm:$0xff] %v1116_v17  ;;  %v1122_v20 = vld [vmem:[%s1574_s17 + $0x118] sm:$0xff]  ;;  %1119 = vst [vmem:[%s1570_s12 + $0x108] sm:$0xff] %v1118_v18  ;;  %v1124_v21 = vld [vmem:[%s1574_s17 + $0x120] sm:$0xff] }
 0x1c3   : >> { %1121 = vst [vmem:[%s1570_s12 + $0x110] sm:$0xff] %v1120_v19  ;;  %1123 = vst [vmem:[%s1570_s12 + $0x118] sm:$0xff] %v1122_v20  ;;  %v1126_v22 = vld [vmem:[%s1574_s17 + $0x128] sm:$0xff]  ;;  %v1128_v23 = vld [vmem:[%s1574_s17 + $0x130] sm:$0xff] }
 0x1c4   : >> { %1125 = vst [vmem:[%s1570_s12 + $0x120] sm:$0xff] %v1124_v21  ;;  %1127 = vst [vmem:[%s1570_s12 + $0x128] sm:$0xff] %v1126_v22  ;;  %v1130_v24 = vld [vmem:[%s1574_s17 + $0x138] sm:$0xff]  ;;  %v1132_v25 = vld [vmem:[%s1574_s17 + $0x140] sm:$0xff] }
 0x1c5   : >> { %1129 = vst [vmem:[%s1570_s12 + $0x130] sm:$0xff] %v1128_v23  ;;  %v1134_v26 = vld [vmem:[%s1574_s17 + $0x148] sm:$0xff]  ;;  %1131 = vst [vmem:[%s1570_s12 + $0x138] sm:$0xff] %v1130_v24  ;;  %v1136_v27 = vld [vmem:[%s1574_s17 + $0x150] sm:$0xff] }
 0x1c6   : >> { %1133 = vst [vmem:[%s1570_s12 + $0x140] sm:$0xff] %v1132_v25  ;;  %1135 = vst [vmem:[%s1570_s12 + $0x148] sm:$0xff] %v1134_v26  ;;  %v1138_v28 = vld [vmem:[%s1574_s17 + $0x158] sm:$0xff]  ;;  %v1140_v29 = vld [vmem:[%s1574_s17 + $0x160] sm:$0xff] }
 0x1c7   : >> { %1137 = vst [vmem:[%s1570_s12 + $0x150] sm:$0xff] %v1136_v27  ;;  %1139 = vst [vmem:[%s1570_s12 + $0x158] sm:$0xff] %v1138_v28  ;;  %v1142_v30 = vld [vmem:[%s1574_s17 + $0x168] sm:$0xff]  ;;  %v1144_v31 = vld [vmem:[%s1574_s17 + $0x170] sm:$0xff] }
 0x1c8   : >> { %1141 = vst [vmem:[%s1570_s12 + $0x160] sm:$0xff] %v1140_v29  ;;  %v1146_v32 = vld [vmem:[%s1574_s17 + $0x178] sm:$0xff]  ;;  %1143 = vst [vmem:[%s1570_s12 + $0x168] sm:$0xff] %v1142_v30  ;;  %v1148_v33 = vld [vmem:[%s1574_s17 + $0x180] sm:$0xff] }
 0x1c9   : >> { %1145 = vst [vmem:[%s1570_s12 + $0x170] sm:$0xff] %v1144_v31  ;;  %1147 = vst [vmem:[%s1570_s12 + $0x178] sm:$0xff] %v1146_v32  ;;  %v1150_v34 = vld [vmem:[%s1574_s17 + $0x188] sm:$0xff]  ;;  %v1152_v35 = vld [vmem:[%s1574_s17 + $0x190] sm:$0xff] }
 0x1ca   : >> { %1149 = vst [vmem:[%s1570_s12 + $0x180] sm:$0xff] %v1148_v33  ;;  %1151 = vst [vmem:[%s1570_s12 + $0x188] sm:$0xff] %v1150_v34  ;;  %v1154_v36 = vld [vmem:[%s1574_s17 + $0x198] sm:$0xff]  ;;  %v1156_v37 = vld [vmem:[%s1574_s17 + $0x1a0] sm:$0xff] }
 0x1cb   : >> { %1153 = vst [vmem:[%s1570_s12 + $0x190] sm:$0xff] %v1152_v35  ;;  %v1158_v38 = vld [vmem:[%s1574_s17 + $0x1a8] sm:$0xff]  ;;  %1155 = vst [vmem:[%s1570_s12 + $0x198] sm:$0xff] %v1154_v36  ;;  %v1160_v39 = vld [vmem:[%s1574_s17 + $0x1b0] sm:$0xff]  ;;  %1048 = sbr.rel (!%p1045_p12) target bundleno = 433 (0x1b1), region = 118 }
 0x1cc   : >> { %1157 = vst [vmem:[%s1570_s12 + $0x1a0] sm:$0xff] %v1156_v37  ;;  %1159 = vst [vmem:[%s1570_s12 + $0x1a8] sm:$0xff] %v1158_v38  ;;  %v1162_v40 = vld [vmem:[%s1574_s17 + $0x1b8] sm:$0xff]  ;;  %v1164_v41 = vld [vmem:[%s1574_s17 + $0x1c0] sm:$0xff] }
 0x1cd   : >> { %1161 = vst [vmem:[%s1570_s12 + $0x1b0] sm:$0xff] %v1160_v39  ;;  %1163 = vst [vmem:[%s1570_s12 + $0x1b8] sm:$0xff] %v1162_v40  ;;  %v1166_v42 = vld [vmem:[%s1574_s17 + $0x1c8] sm:$0xff]  ;;  %v1168_v43 = vld [vmem:[%s1574_s17 + $0x1d0] sm:$0xff] }
 0x1ce   : >> { %1165 = vst [vmem:[%s1570_s12 + $0x1c0] sm:$0xff] %v1164_v41  ;;  %v1170_v44 = vld [vmem:[%s1574_s17 + $0x1d8] sm:$0xff]  ;;  %1167 = vst [vmem:[%s1570_s12 + $0x1c8] sm:$0xff] %v1166_v42  ;;  %v1172_v45 = vld [vmem:[%s1574_s17 + $0x1e0] sm:$0xff] }
 0x1cf   : >> { %1169 = vst [vmem:[%s1570_s12 + $0x1d0] sm:$0xff] %v1168_v43  ;;  %1171 = vst [vmem:[%s1570_s12 + $0x1d8] sm:$0xff] %v1170_v44  ;;  %v1174_v46 = vld [vmem:[%s1574_s17 + $0x1e8] sm:$0xff]  ;;  %v1176_v47 = vld [vmem:[%s1574_s17 + $0x1f0] sm:$0xff] }
 0x1d0   : >> { %1173 = vst [vmem:[%s1570_s12 + $0x1e0] sm:$0xff] %v1172_v45  ;;  %1175 = vst [vmem:[%s1570_s12 + $0x1e8] sm:$0xff] %v1174_v46  ;;  %v1178_v48 = vld [vmem:[%s1574_s17 + $0x1f8] sm:$0xff]  ;;  %s2255_s17 = smov %s2122_s15 }
 0x1d1   : >> { %1177 = vst [vmem:[%s1570_s12 + $0x1f0] sm:$0xff] %v1176_v47  ;;  %1179 = vst [vmem:[%s1570_s12 + $0x1f8] sm:$0xff] %v1178_v48  ;;  %s2254_s12 = smov %s2125_s18 }
 0x1d2 PF: > { %s2230_s19 = sand.u32 63, %s2261_s9   ;;  %s1341_s20 = sshll.u32 %s2055_s6, 9 }
 0x1d3   : > { %s1191_s21 = scalar_lea.vmem %s1912_s29, %s1341_s20 [#allocation2]   ;;  %s1193_s22 = scalar_lea.vmem %s2049_s4, %s1341_s20  }
 0x1d4   : > { %p1334_p13 = scmp.le.s32.totalorder %s2230_s19, 0 }
 0x1d5   : > { %s1584_s23 = smov (!%p1334_p13), %s1193_s22   ;;  %s1588_s25 = smov (!%p1334_p13), %s1191_s21  }
 0x1d6   : > { %1284 = sbr.rel (%p1334_p13) target bundleno = 487 (0x1e7), region = 123  ;;  %s1592_s26 = smov (!%p1334_p13), 0  }
 0x1d7   : > { %s1596_s27 = smov (!%p1334_p13), 0  }
 0x1dd LB: >> { %v1203_v49 = vld [vmem:[%s1590_s25] sm:$0xff]  ;;  %s1205_s28 = sadd.s32 1, %s1594_s26  ;;  %s1197_s27 = sadd.s32 1, %s1598_s27   ;;  %s1598_s27 = sphi %s1596_s27, %s1197_s27   ;;  %s1594_s26 = sphi %s1592_s26, %s1593_s26   ;;  %s1590_s25 = sphi %s1588_s25, %s1210_s25   ;;  %s1586_s23 = sphi %s1584_s23, %s1211_s23  }
 0x1de   : >> { %1204 = vst [vmem:[%s1586_s23] sm:$0xff] %v1203_v49  ;;  %p1206_p0 = scmp.ge.s32.totalorder %s1205_s28, %s2230_s19  ;;  %p1196_p1 = scmp.ge.s32.totalorder %s1197_s27, %s2230_s19 }
 0x1e0   : >> { %s2265_s28 = smov (%p1206_p0, %s1205_s28), 0  ;;  %1199 = sbr.rel (!%p1196_p1) target bundleno = 477 (0x1dd), region = 129 }
 0x1e1   : >> { %s1335_s29 = sshll.u32 %s2265_s28, 3  ;;  %s1593_s26 = smov %s2265_s28  }
 0x1e2   : >> { %s1210_s25 = scalar_lea.vmem %s1191_s21, %s1335_s29 [#allocation2]   ;;  %s1211_s23 = scalar_lea.vmem %s1193_s22, %s1335_s29  }
 0x1e7 PF: > { %p9_p2 = scmp.ge.s32.totalorder %s1631_s13, 4   ;;  %s2257_s9 = smov %s1562_s10 }
 0x1e8   : > { %s2258_s10 = smov %s1639_s16  ;;  %s2259_s11 = smov %s1631_s13 }
 0x1e9   :  { %11 = sbr.rel (!%p9_p2) target bundleno = 2 (0x2), region = 140 }

// kernel: dqn_forward.5
= control target key start
LH: loop header
LB: loop body
LE: loop exit
PB: predicated region body
PF: predicated region fallthrough
CT: control target
= control target key end

     0   :  { %v665_v0 = vmov 0.0|0.0   ;;  %vm520_vm0 = vcmask 523264   ;;  %vm541_vm1 = vcmask 517120   ;;  %s1240_s1 = inlined_call_operand.vmem [shape: f32[512,64], index: 1, kind: input, shape index: {}]   ;;  %s1241_s0 = inlined_call_operand.vmem [shape: f32[162,512], index: 0, kind: input, shape index: {}]   ;;  %s1242_s2 = inlined_call_operand.vmem [shape: f32[162,64], index: 2, kind: output, shape index: {}]  }
   0x1   :  { %547 = vmatprep.subr.bf16.mxu1 %v665_v0  ;;  %595 = vmatprep.subr.bf16.mxu0 %v665_v0  ;;  %v95_v1 = vld [vmem:[%s1240_s1] sm:$0xff]  ;;  %v96_v2 = vld [vmem:[%s1240_s1 + $0x8] sm:$0xff]  ;;  %v97_v6 = vld [vmem:[%s1240_s1 + $0x10] sm:$0xff] }
   0x2   :  { %v127_v3 = vld [vmem:[%s1240_s1 + $0x100] sm:$0xff]  ;;  %v548_v4 = vpack.c.bf16 %v96_v2, %v95_v1  ;;  %v128_v5 = vld [vmem:[%s1240_s1 + $0x108] sm:$0xff]  ;;  %v98_v7 = vld [vmem:[%s1240_s1 + $0x18] sm:$0xff] }
   0x3   :  { %v596_v8 = vpack.c.bf16 %v128_v5, %v127_v3  ;;  %v129_v9 = vld [vmem:[%s1240_s1 + $0x110] sm:$0xff]  ;;  %v130_v10 = vld [vmem:[%s1240_s1 + $0x118] sm:$0xff]  ;;  %v551_v11 = vpack.c.bf16 %v98_v7, %v97_v6  ;;  %v99_v13 = vld [vmem:[%s1240_s1 + $0x20] sm:$0xff] }
   0x4   :  { %549 = vmatpush1.bf16.msra.mxu1 %v548_v4  ;;  %v599_v12 = vpack.c.bf16 %v130_v10, %v129_v9  ;;  %v100_v14 = vld [vmem:[%s1240_s1 + $0x28] sm:$0xff]  ;;  %v131_v15 = vld [vmem:[%s1240_s1 + $0x120] sm:$0xff]  ;;  %v101_v19 = vld [vmem:[%s1240_s1 + $0x30] sm:$0xff] }
   0x5   :  { %597 = vmatpush1.bf16.msra.mxu0 %v596_v8  ;;  %550 = vmatprep.subr.bf16.mxu1 %v665_v0  ;;  %v132_v16 = vld [vmem:[%s1240_s1 + $0x128] sm:$0xff]  ;;  %v554_v17 = vpack.c.bf16 %v100_v14, %v99_v13  ;;  %v102_v20 = vld [vmem:[%s1240_s1 + $0x38] sm:$0xff]  ;;  %v133_v21 = vld [vmem:[%s1240_s1 + $0x130] sm:$0xff] }
   0x6   :  { %598 = vmatprep.subr.bf16.mxu0 %v665_v0  ;;  %v602_v18 = vpack.c.bf16 %v132_v16, %v131_v15  ;;  %v134_v22 = vld [vmem:[%s1240_s1 + $0x138] sm:$0xff]  ;;  %v557_v23 = vpack.c.bf16 %v102_v20, %v101_v19  ;;  %v103_v25 = vld [vmem:[%s1240_s1 + $0x40] sm:$0xff]  ;;  %v104_v26 = vld [vmem:[%s1240_s1 + $0x48] sm:$0xff] }
   0x7   :  { %v605_v24 = vpack.c.bf16 %v134_v22, %v133_v21  ;;  %v135_v27 = vld [vmem:[%s1240_s1 + $0x140] sm:$0xff]  ;;  %v136_v28 = vld [vmem:[%s1240_s1 + $0x148] sm:$0xff]  ;;  %v560_v29 = vpack.c.bf16 %v104_v26, %v103_v25  ;;  %v105_v31 = vld [vmem:[%s1240_s1 + $0x50] sm:$0xff] }
   0x8   :  { %552 = vmatpush1.bf16.msra.mxu1 %v551_v11  ;;  %v608_v30 = vpack.c.bf16 %v136_v28, %v135_v27  ;;  %v106_v32 = vld [vmem:[%s1240_s1 + $0x58] sm:$0xff]  ;;  %v137_v33 = vld [vmem:[%s1240_s1 + $0x150] sm:$0xff]  ;;  %v107_v37 = vld [vmem:[%s1240_s1 + $0x60] sm:$0xff] }
   0x9   :  { %600 = vmatpush1.bf16.msra.mxu0 %v599_v12  ;;  %553 = vmatprep.subr.bf16.mxu1 %v665_v0  ;;  %v138_v34 = vld [vmem:[%s1240_s1 + $0x158] sm:$0xff]  ;;  %v563_v35 = vpack.c.bf16 %v106_v32, %v105_v31  ;;  %v108_v38 = vld [vmem:[%s1240_s1 + $0x68] sm:$0xff]  ;;  %v139_v39 = vld [vmem:[%s1240_s1 + $0x160] sm:$0xff] }
   0xa   :  { %601 = vmatprep.subr.bf16.mxu0 %v665_v0  ;;  %v611_v36 = vpack.c.bf16 %v138_v34, %v137_v33  ;;  %v140_v40 = vld [vmem:[%s1240_s1 + $0x168] sm:$0xff]  ;;  %v14_v42 = vld [vmem:[%s1241_s0 + $0x18] sm:$0xff]  ;;  %v566_v43 = vpack.c.bf16 %v108_v38, %v107_v37  ;;  %v109_v45 = vld [vmem:[%s1240_s1 + $0x70] sm:$0xff] }
   0xb   :  { %v12_v41 = vld [vmem:[%s1241_s0 + $0x8] sm:$0xff]  ;;  %393 = vmatprep.mubr.f32.mxu0 %v14_v42  ;;  %v614_v44 = vpack.c.bf16 %v140_v40, %v139_v39  ;;  %v110_v46 = vld [vmem:[%s1240_s1 + $0x78] sm:$0xff]  ;;  %v141_v47 = vld [vmem:[%s1240_s1 + $0x170] sm:$0xff] }
   0xc   :  { %555 = vmatpush1.bf16.msra.mxu1 %v554_v17  ;;  %223 = vmatprep.mubr.f32.mxu1 %v12_v41  ;;  %v142_v48 = vld [vmem:[%s1240_s1 + $0x178] sm:$0xff]  ;;  %v569_v49 = vpack.c.bf16 %v110_v46, %v109_v45  ;;  %v111_v51 = vld [vmem:[%s1240_s1 + $0x80] sm:$0xff]  ;;  %v112_v52 = vld [vmem:[%s1240_s1 + $0x88] sm:$0xff] }
   0xd   :  { %603 = vmatpush1.bf16.msra.mxu0 %v602_v18  ;;  %556 = vmatprep.subr.bf16.mxu1 %v665_v0  ;;  %v617_v50 = vpack.c.bf16 %v142_v48, %v141_v47  ;;  %v143_v53 = vld [vmem:[%s1240_s1 + $0x180] sm:$0xff]  ;;  %v144_v54 = vld [vmem:[%s1240_s1 + $0x188] sm:$0xff]  ;;  %v572_v55 = vpack.c.bf16 %v112_v52, %v111_v51  ;;  %v113_v57 = vld [vmem:[%s1240_s1 + $0x90] sm:$0xff] }
   0xe   :  { %604 = vmatprep.subr.bf16.mxu0 %v665_v0  ;;  %v620_v56 = vpack.c.bf16 %v144_v54, %v143_v53  ;;  %v114_v58 = vld [vmem:[%s1240_s1 + $0x98] sm:$0xff]  ;;  %v145_v59 = vld [vmem:[%s1240_s1 + $0x190] sm:$0xff]  ;;  %v115_v63 = vld [vmem:[%s1240_s1 + $0xa0] sm:$0xff] }
   0xf   :  { %v146_v60 = vld [vmem:[%s1240_s1 + $0x198] sm:$0xff]  ;;  %v575_v61 = vpack.c.bf16 %v114_v58, %v113_v57  ;;  %v116_v1 = vld [vmem:[%s1240_s1 + $0xa8] sm:$0xff]  ;;  %v147_v2 = vld [vmem:[%s1240_s1 + $0x1a0] sm:$0xff] }
  0x10   :  { %558 = vmatpush1.bf16.msra.mxu1 %v557_v23  ;;  %v623_v62 = vpack.c.bf16 %v146_v60, %v145_v59  ;;  %v148_v3 = vld [vmem:[%s1240_s1 + $0x1a8] sm:$0xff]  ;;  %v578_v4 = vpack.c.bf16 %v116_v1, %v115_v63  ;;  %v117_v6 = vld [vmem:[%s1240_s1 + $0xb0] sm:$0xff]  ;;  %v118_v7 = vld [vmem:[%s1240_s1 + $0xb8] sm:$0xff] }
  0x11   :  { %606 = vmatpush1.bf16.msra.mxu0 %v605_v24  ;;  %559 = vmatprep.subr.bf16.mxu1 %v665_v0  ;;  %v626_v5 = vpack.c.bf16 %v148_v3, %v147_v2  ;;  %v149_v8 = vld [vmem:[%s1240_s1 + $0x1b0] sm:$0xff]  ;;  %v150_v9 = vld [vmem:[%s1240_s1 + $0x1b8] sm:$0xff]  ;;  %v581_v10 = vpack.c.bf16 %v118_v7, %v117_v6  ;;  %v119_v12 = vld [vmem:[%s1240_s1 + $0xc0] sm:$0xff] }
  0x12   :  { %607 = vmatprep.subr.bf16.mxu0 %v665_v0  ;;  %v629_v11 = vpack.c.bf16 %v150_v9, %v149_v8  ;;  %v120_v13 = vld [vmem:[%s1240_s1 + $0xc8] sm:$0xff]  ;;  %v151_v14 = vld [vmem:[%s1240_s1 + $0x1c0] sm:$0xff]  ;;  %v121_v18 = vld [vmem:[%s1240_s1 + $0xd0] sm:$0xff] }
  0x13   :  { %v152_v15 = vld [vmem:[%s1240_s1 + $0x1c8] sm:$0xff]  ;;  %v584_v16 = vpack.c.bf16 %v120_v13, %v119_v12  ;;  %v122_v19 = vld [vmem:[%s1240_s1 + $0xd8] sm:$0xff]  ;;  %v153_v20 = vld [vmem:[%s1240_s1 + $0x1d0] sm:$0xff] }
  0x14   :  { %561 = vmatpush1.bf16.msra.mxu1 %v560_v29  ;;  %v632_v17 = vpack.c.bf16 %v152_v15, %v151_v14  ;;  %v154_v21 = vld [vmem:[%s1240_s1 + $0x1d8] sm:$0xff]  ;;  %v587_v22 = vpack.c.bf16 %v122_v19, %v121_v18  ;;  %v123_v24 = vld [vmem:[%s1240_s1 + $0xe0] sm:$0xff]  ;;  %v124_v25 = vld [vmem:[%s1240_s1 + $0xe8] sm:$0xff] }
  0x15   :  { %609 = vmatpush1.bf16.msra.mxu0 %v608_v30  ;;  %562 = vmatprep.subr.bf16.mxu1 %v665_v0  ;;  %v635_v23 = vpack.c.bf16 %v154_v21, %v153_v20  ;;  %v155_v26 = vld [vmem:[%s1240_s1 + $0x1e0] sm:$0xff]  ;;  %v156_v27 = vld [vmem:[%s1240_s1 + $0x1e8] sm:$0xff]  ;;  %v590_v28 = vpack.c.bf16 %v124_v25, %v123_v24  ;;  %v125_v30 = vld [vmem:[%s1240_s1 + $0xf0] sm:$0xff] }
  0x16   :  { %610 = vmatprep.subr.bf16.mxu0 %v665_v0  ;;  %v638_v29 = vpack.c.bf16 %v156_v27, %v155_v26  ;;  %v126_v31 = vld [vmem:[%s1240_s1 + $0xf8] sm:$0xff]  ;;  %v157_v32 = vld [vmem:[%s1240_s1 + $0x1f0] sm:$0xff]  ;;  %v16_v38 = vld [vmem:[%s1241_s0 + $0x28] sm:$0xff] }
  0x17   :  { %v158_v33 = vld [vmem:[%s1240_s1 + $0x1f8] sm:$0xff]  ;;  %v593_v34 = vpack.c.bf16 %v126_v31, %v125_v30  ;;  %v13_v37 = vld [vmem:[%s1241_s0 + $0x10] sm:$0xff]  ;;  %v20_v41 = vld [vmem:[%s1241_s0 + $0x48] sm:$0xff] }
  0x18   :  { %564 = vmatpush1.bf16.msra.mxu1 %v563_v35  ;;  %v641_v35 = vpack.c.bf16 %v158_v33, %v157_v32  ;;  %v18_v39 = vld [vmem:[%s1241_s0 + $0x38] sm:$0xff]  ;;  %v17_v40 = vld [vmem:[%s1241_s0 + $0x30] sm:$0xff]  ;;  %v24_v45 = vld [vmem:[%s1241_s0 + $0x68] sm:$0xff] }
  0x19   :  { %612 = vmatpush1.bf16.msra.mxu0 %v611_v36  ;;  %565 = vmatprep.subr.bf16.mxu1 %v665_v0  ;;  %v11_v36 = vld [vmem:[%s1241_s0] sm:$0xff]  ;;  %v22_v42 = vld [vmem:[%s1241_s0 + $0x58] sm:$0xff]  ;;  %v25_v48 = vld [vmem:[%s1241_s0 + $0x70] sm:$0xff] }
  0x1a   :  { %613 = vmatprep.subr.bf16.mxu0 %v665_v0  ;;  %v26_v46 = vld [vmem:[%s1241_s0 + $0x78] sm:$0xff]  ;;  %v23_v47 = vld [vmem:[%s1241_s0 + $0x60] sm:$0xff]  ;;  %v29_v52 = vld [vmem:[%s1241_s0 + $0x90] sm:$0xff] }
  0x1b   :  { %v27_v51 = vld [vmem:[%s1241_s0 + $0x80] sm:$0xff]  ;;  %v32_v53 = vld [vmem:[%s1241_s0 + $0xa8] sm:$0xff]  ;;  %v34_v54 = vld [vmem:[%s1241_s0 + $0xb8] sm:$0xff] }
  0x1c   :  { %567 = vmatpush1.bf16.msra.mxu1 %v566_v43  ;;  %v19_v43 = vld [vmem:[%s1241_s0 + $0x40] sm:$0xff]  ;;  %v36_v57 = vld [vmem:[%s1241_s0 + $0xc8] sm:$0xff]  ;;  %v38_v58 = vld [vmem:[%s1241_s0 + $0xd8] sm:$0xff] }
  0x1d   :  { %615 = vmatpush1.bf16.msra.mxu0 %v614_v44  ;;  %568 = vmatprep.subr.bf16.mxu1 %v665_v0  ;;  %v21_v44 = vld [vmem:[%s1241_s0 + $0x50] sm:$0xff]  ;;  %v35_v59 = vld [vmem:[%s1241_s0 + $0xc0] sm:$0xff]  ;;  %v44_v2 = vld [vmem:[%s1241_s0 + $0x108] sm:$0xff] }
  0x1e   :  { %616 = vmatprep.subr.bf16.mxu0 %v665_v0  ;;  %v37_v60 = vld [vmem:[%s1241_s0 + $0xd0] sm:$0xff]  ;;  %v39_v63 = vld [vmem:[%s1241_s0 + $0xe0] sm:$0xff]  ;;  %v46_v3 = vld [vmem:[%s1241_s0 + $0x118] sm:$0xff] }
  0x1f   :  { %v41_v1 = vld [vmem:[%s1241_s0 + $0xf0] sm:$0xff]  ;;  %v48_v6 = vld [vmem:[%s1241_s0 + $0x128] sm:$0xff]  ;;  %v50_v7 = vld [vmem:[%s1241_s0 + $0x138] sm:$0xff] }
  0x20   :  { %570 = vmatpush1.bf16.msra.mxu1 %v569_v49  ;;  %v28_v49 = vld [vmem:[%s1241_s0 + $0x88] sm:$0xff]  ;;  %v47_v8 = vld [vmem:[%s1241_s0 + $0x120] sm:$0xff]  ;;  %v49_v9 = vld [vmem:[%s1241_s0 + $0x130] sm:$0xff] }
  0x21   :  { %618 = vmatpush1.bf16.msra.mxu0 %v617_v50  ;;  %571 = vmatprep.subr.bf16.mxu1 %v665_v0  ;;  %v30_v50 = vld [vmem:[%s1241_s0 + $0x98] sm:$0xff]  ;;  %v51_v12 = vld [vmem:[%s1241_s0 + $0x140] sm:$0xff]  ;;  %v53_v13 = vld [vmem:[%s1241_s0 + $0x150] sm:$0xff] }
  0x22   :  { %619 = vmatprep.subr.bf16.mxu0 %v665_v0  ;;  %v56_v14 = vld [vmem:[%s1241_s0 + $0x168] sm:$0xff]  ;;  %v58_v15 = vld [vmem:[%s1241_s0 + $0x178] sm:$0xff]  ;;  %v59_v20 = vld [vmem:[%s1241_s0 + $0x180] sm:$0xff] }
  0x23   :  { %v60_v18 = vld [vmem:[%s1241_s0 + $0x188] sm:$0xff]  ;;  %v62_v19 = vld [vmem:[%s1241_s0 + $0x198] sm:$0xff]  ;;  %v61_v21 = vld [vmem:[%s1241_s0 + $0x190] sm:$0xff] }
  0x24   :  { %573 = vmatpush1.bf16.msra.mxu1 %v572_v55  ;;  %v31_v55 = vld [vmem:[%s1241_s0 + $0xa0] sm:$0xff]  ;;  %v65_v25 = vld [vmem:[%s1241_s0 + $0x1b0] sm:$0xff]  ;;  %v68_v26 = vld [vmem:[%s1241_s0 + $0x1c8] sm:$0xff] }
  0x25   :  { %621 = vmatpush1.bf16.msra.mxu0 %v620_v56  ;;  %574 = vmatprep.subr.bf16.mxu1 %v665_v0  ;;  %v33_v56 = vld [vmem:[%s1241_s0 + $0xb0] sm:$0xff]  ;;  %v63_v24 = vld [vmem:[%s1241_s0 + $0x1a0] sm:$0xff]  ;;  %v70_v27 = vld [vmem:[%s1241_s0 + $0x1d8] sm:$0xff] }
  0x26   :  { %622 = vmatprep.subr.bf16.mxu0 %v665_v0  ;;  %v72_v30 = vld [vmem:[%s1241_s0 + $0x1e8] sm:$0xff]  ;;  %v74_v31 = vld [vmem:[%s1241_s0 + $0x1f8] sm:$0xff]  ;;  %v71_v32 = vld [vmem:[%s1241_s0 + $0x1e0] sm:$0xff] }
  0x27   :  { %v73_v33 = vld [vmem:[%s1241_s0 + $0x1f0] sm:$0xff] }
  0x28   :  { %576 = vmatpush1.bf16.msra.mxu1 %v575_v61  ;;  %v40_v61 = vld [vmem:[%s1241_s0 + $0xe8] sm:$0xff] }
  0x29   :  { %624 = vmatpush1.bf16.msra.mxu0 %v623_v62  ;;  %577 = vmatprep.subr.bf16.mxu1 %v665_v0  ;;  %v42_v62 = vld [vmem:[%s1241_s0 + $0xf8] sm:$0xff] }
  0x2a   :  { %625 = vmatprep.subr.bf16.mxu0 %v665_v0 }
  0x2c   :  { %579 = vmatpush1.bf16.msra.mxu1 %v578_v4  ;;  %v43_v4 = vld [vmem:[%s1241_s0 + $0x100] sm:$0xff] }
  0x2d   :  { %627 = vmatpush1.bf16.msra.mxu0 %v626_v5  ;;  %580 = vmatprep.subr.bf16.mxu1 %v665_v0  ;;  %v45_v5 = vld [vmem:[%s1241_s0 + $0x110] sm:$0xff] }
  0x2e   :  { %628 = vmatprep.subr.bf16.mxu0 %v665_v0 }
  0x30   :  { %582 = vmatpush1.bf16.msra.mxu1 %v581_v10  ;;  %v52_v10 = vld [vmem:[%s1241_s0 + $0x148] sm:$0xff] }
  0x31   :  { %630 = vmatpush1.bf16.msra.mxu0 %v629_v11  ;;  %583 = vmatprep.subr.bf16.mxu1 %v665_v0  ;;  %v54_v11 = vld [vmem:[%s1241_s0 + $0x158] sm:$0xff] }
  0x32   :  { %631 = vmatprep.subr.bf16.mxu0 %v665_v0 }
  0x34   :  { %585 = vmatpush1.bf16.msra.mxu1 %v584_v16  ;;  %v55_v16 = vld [vmem:[%s1241_s0 + $0x160] sm:$0xff] }
  0x35   :  { %633 = vmatpush1.bf16.msra.mxu0 %v632_v17  ;;  %586 = vmatprep.subr.bf16.mxu1 %v665_v0  ;;  %v57_v17 = vld [vmem:[%s1241_s0 + $0x170] sm:$0xff] }
  0x36   :  { %634 = vmatprep.subr.bf16.mxu0 %v665_v0 }
  0x38   :  { %588 = vmatpush1.bf16.msra.mxu1 %v587_v22  ;;  %v64_v22 = vld [vmem:[%s1241_s0 + $0x1a8] sm:$0xff] }
  0x39   :  { %636 = vmatpush1.bf16.msra.mxu0 %v635_v23  ;;  %589 = vmatprep.subr.bf16.mxu1 %v665_v0  ;;  %v66_v23 = vld [vmem:[%s1241_s0 + $0x1b8] sm:$0xff] }
  0x3a   :  { %637 = vmatprep.subr.bf16.mxu0 %v665_v0 }
  0x3c   :  { %591 = vmatpush1.bf16.msra.mxu1 %v590_v28  ;;  %v67_v28 = vld [vmem:[%s1241_s0 + $0x1c0] sm:$0xff] }
  0x3d   :  { %639 = vmatpush1.bf16.msra.mxu0 %v638_v29  ;;  %592 = vmatprep.subr.bf16.mxu1 %v665_v0  ;;  %v69_v29 = vld [vmem:[%s1241_s0 + $0x1d0] sm:$0xff] }
  0x3e   :  { %640 = vmatprep.subr.bf16.mxu0 %v665_v0  ;;  %v15_v0 = vld [vmem:[%s1241_s0 + $0x20] sm:$0xff] }
  0x40   :  { %594 = vmatpush1.bf16.msra.mxu1 %v593_v34  ;;  %v76_v34 = vld [vmem:[%s1241_s0 + $0x208] sm:$0xff] }
  0x41   :  { %642 = vmatpush1.bf16.msra.mxu0 %v641_v35  ;;  %v78_v35 = vld [vmem:[%s1241_s0 + $0x218] sm:$0xff] }
  0x43   :  { %224 = vmatmul.mubr.f32.vlgmr.msra.gmra.mrb[0].mxu1 %v11_v36  ;;  %v75_v36 = vld [vmem:[%s1241_s0 + $0x200] sm:$0xff] }
  0x44   :  { %394 = vmatmul.mubr.f32.vlgmr.msra.gmra.mrb[0].mxu0 %v13_v37  ;;  %228 = vmatprep.mubr.f32.mxu1 %v16_v38  ;;  %v77_v37 = vld [vmem:[%s1241_s0 + $0x210] sm:$0xff]  ;;  %v80_v38 = vld [vmem:[%s1241_s0 + $0x228] sm:$0xff] }
  0x45   :  { %398 = vmatprep.mubr.f32.mxu0 %v18_v39  ;;  %v82_v39 = vld [vmem:[%s1241_s0 + $0x238] sm:$0xff] }
  0x47   :  { %229 = vmatmul.mubr.f32.gmra.mrb[2].mxu1 %v15_v0  ;;  %v79_v0 = vld [vmem:[%s1241_s0 + $0x220] sm:$0xff] }
  0x48   :  { %399 = vmatmul.mubr.f32.gmra.mrb[2].mxu0 %v17_v40  ;;  %233 = vmatprep.mubr.f32.mxu1 %v20_v41  ;;  %v81_v40 = vld [vmem:[%s1241_s0 + $0x230] sm:$0xff]  ;;  %v84_v41 = vld [vmem:[%s1241_s0 + $0x248] sm:$0xff] }
  0x49   :  { %403 = vmatprep.mubr.f32.mxu0 %v22_v42  ;;  %v86_v42 = vld [vmem:[%s1241_s0 + $0x258] sm:$0xff] }
  0x4b   :  { %234 = vmatmul.mubr.f32.gmra.mrb[4].mxu1 %v19_v43  ;;  %v83_v43 = vld [vmem:[%s1241_s0 + $0x240] sm:$0xff] }
  0x4c   :  { %404 = vmatmul.mubr.f32.gmra.mrb[4].mxu0 %v21_v44  ;;  %238 = vmatprep.mubr.f32.mxu1 %v24_v45  ;;  %v85_v44 = vld [vmem:[%s1241_s0 + $0x250] sm:$0xff]  ;;  %v88_v45 = vld [vmem:[%s1241_s0 + $0x268] sm:$0xff] }
  0x4d   :  { %408 = vmatprep.mubr.f32.mxu0 %v26_v46  ;;  %v90_v46 = vld [vmem:[%s1241_s0 + $0x278] sm:$0xff] }
  0x4f   :  { %239 = vmatmul.mubr.f32.gmra.mrb[6].mxu1 %v23_v47  ;;  %v87_v47 = vld [vmem:[%s1241_s0 + $0x260] sm:$0xff] }
  0x50   :  { %409 = vmatmul.mubr.f32.gmra.mrb[6].mxu0 %v25_v48  ;;  %243 = vmatprep.mubr.f32.mxu1 %v28_v49  ;;  %v89_v48 = vld [vmem:[%s1241_s0 + $0x270] sm:$0xff]  ;;  %v92_v49 = vld [vmem:[%s1241_s0 + $0x288] sm:$0x3] }
  0x51   :  { %413 = vmatprep.mubr.f32.mxu0 %v30_v50  ;;  %v94_v50 = vld [vmem:[%s1241_s0 + $0x298] sm:$0x3] }
  0x53   :  { %244 = vmatmul.mubr.f32.gmra.mrb[8].mxu1 %v27_v51  ;;  %v91_v51 = vld [vmem:[%s1241_s0 + $0x280] sm:$0x3] }
  0x54   :  { %414 = vmatmul.mubr.f32.gmra.mrb[8].mxu0 %v29_v52  ;;  %248 = vmatprep.mubr.f32.mxu1 %v32_v53  ;;  %v93_v52 = vld [vmem:[%s1241_s0 + $0x290] sm:$0x3] }
  0x55   :  { %418 = vmatprep.mubr.f32.mxu0 %v34_v54 }
  0x57   :  { %249 = vmatmul.mubr.f32.gmra.mrb[10].mxu1 %v31_v55 }
  0x58   :  { %419 = vmatmul.mubr.f32.gmra.mrb[10].mxu0 %v33_v56  ;;  %253 = vmatprep.mubr.f32.mxu1 %v36_v57 }
  0x59   :  { %423 = vmatprep.mubr.f32.mxu0 %v38_v58 }
  0x5b   :  { %254 = vmatmul.mubr.f32.gmra.mrb[12].mxu1 %v35_v59 }
  0x5c   :  { %424 = vmatmul.mubr.f32.gmra.mrb[12].mxu0 %v37_v60  ;;  %258 = vmatprep.mubr.f32.mxu1 %v40_v61 }
  0x5d   :  { %428 = vmatprep.mubr.f32.mxu0 %v42_v62 }
  0x5f   :  { %259 = vmatmul.mubr.f32.gmra.mrb[14].mxu1 %v39_v63 }
  0x60   :  { %429 = vmatmul.mubr.f32.gmra.mrb[14].mxu0 %v41_v1  ;;  %263 = vmatprep.mubr.f32.mxu1 %v44_v2 }
  0x61   :  { %433 = vmatprep.mubr.f32.mxu0 %v46_v3 }
  0x63   :  { %264 = vmatmul.mubr.f32.gmra.mrb[16].mxu1 %v43_v4 }
  0x64   :  { %434 = vmatmul.mubr.f32.gmra.mrb[16].mxu0 %v45_v5  ;;  %268 = vmatprep.mubr.f32.mxu1 %v48_v6 }
  0x65   :  { %438 = vmatprep.mubr.f32.mxu0 %v50_v7 }
  0x67   :  { %269 = vmatmul.mubr.f32.gmra.mrb[18].mxu1 %v47_v8 }
  0x68   :  { %439 = vmatmul.mubr.f32.gmra.mrb[18].mxu0 %v49_v9  ;;  %273 = vmatprep.mubr.f32.mxu1 %v52_v10 }
  0x69   :  { %443 = vmatprep.mubr.f32.mxu0 %v54_v11 }
  0x6b   :  { %274 = vmatmul.mubr.f32.gmra.mrb[20].mxu1 %v51_v12 }
  0x6c   :  { %444 = vmatmul.mubr.f32.gmra.mrb[20].mxu0 %v53_v13  ;;  %278 = vmatprep.mubr.f32.mxu1 %v56_v14 }
  0x6d   :  { %448 = vmatprep.mubr.f32.mxu0 %v58_v15 }
  0x6f   :  { %279 = vmatmul.mubr.f32.gmra.mrb[22].mxu1 %v55_v16 }
  0x70   :  { %449 = vmatmul.mubr.f32.gmra.mrb[22].mxu0 %v57_v17  ;;  %283 = vmatprep.mubr.f32.mxu1 %v60_v18 }
  0x71   :  { %453 = vmatprep.mubr.f32.mxu0 %v62_v19 }
  0x73   :  { %284 = vmatmul.mubr.f32.gmra.mrb[24].mxu1 %v59_v20 }
  0x74   :  { %454 = vmatmul.mubr.f32.gmra.mrb[24].mxu0 %v61_v21  ;;  %288 = vmatprep.mubr.f32.mxu1 %v64_v22 }
  0x75   :  { %458 = vmatprep.mubr.f32.mxu0 %v66_v23 }
  0x77   :  { %289 = vmatmul.mubr.f32.gmra.mrb[26].mxu1 %v63_v24 }
  0x78   :  { %459 = vmatmul.mubr.f32.gmra.mrb[26].mxu0 %v65_v25  ;;  %293 = vmatprep.mubr.f32.mxu1 %v68_v26 }
  0x79   :  { %463 = vmatprep.mubr.f32.mxu0 %v70_v27 }
  0x7b   :  { %294 = vmatmul.mubr.f32.gmra.mrb[28].mxu1 %v67_v28 }
  0x7c   :  { %464 = vmatmul.mubr.f32.gmra.mrb[28].mxu0 %v69_v29  ;;  %298 = vmatprep.mubr.f32.mxu1 %v72_v30 }
  0x7d   :  { %468 = vmatprep.mubr.f32.mxu0 %v74_v31 }
  0x7f   :  { %299 = vmatmul.mubr.f32.gmra.mrb[30].mxu1 %v71_v32 }
  0x80   :  { %469 = vmatmul.mubr.f32.gmra.mrb[30].mxu0 %v73_v33  ;;  %303 = vmatprep.mubr.f32.mxu1 %v76_v34 }
  0x81   :  { %473 = vmatprep.mubr.f32.mxu0 %v78_v35 }
  0x83   :  { %304 = vmatmul.mubr.f32.gmra.mrb[32].mxu1 %v75_v36 }
  0x84   :  { %474 = vmatmul.mubr.f32.gmra.mrb[32].mxu0 %v77_v37  ;;  %308 = vmatprep.mubr.f32.mxu1 %v80_v38 }
  0x85   :  { %478 = vmatprep.mubr.f32.mxu0 %v82_v39 }
  0x87   :  { %309 = vmatmul.mubr.f32.gmra.mrb[34].mxu1 %v79_v0 }
  0x88   :  { %479 = vmatmul.mubr.f32.gmra.mrb[34].mxu0 %v81_v40  ;;  %313 = vmatprep.mubr.f32.mxu1 %v84_v41 }
  0x89   :  { %483 = vmatprep.mubr.f32.mxu0 %v86_v42 }
  0x8b   :  { %314 = vmatmul.mubr.f32.gmra.mrb[36].mxu1 %v83_v43 }
  0x8c   :  { %484 = vmatmul.mubr.f32.gmra.mrb[36].mxu0 %v85_v44  ;;  %318 = vmatprep.mubr.f32.mxu1 %v88_v45 }
  0x8d   :  { %488 = vmatprep.mubr.f32.mxu0 %v90_v46 }
  0x8f   :  { %319 = vmatmul.mubr.f32.gmra.mrb[38].mxu1 %v87_v47 }
  0x90   :  { %489 = vmatmul.mubr.f32.gmra.mrb[38].mxu0 %v89_v48  ;;  %323 = vmatprep.mubr.f32.mxu1 %v92_v49 }
  0x91   :  { %493 = vmatprep.mubr.f32.mxu0 %v94_v50 }
  0x93   :  { %324 = vmatmul.mubr.f32.gmra.mrb[40].mxu1 %v91_v51 }
  0x94   :  { %494 = vmatmul.mubr.f32.gmra.mrb[40].mxu0 %v93_v52 }
 0x116   :  { %v225_v53 = vpop.f32.mrb[0].mxu1 }
 0x117   :  { %v395_v54 = vpop.f32.mrb[0].mxu0  ;;  %v227_v55 = vpop.f32.mrb[1].mxu1 }
 0x118   :  { %v396_v56 = vadd.f32 %v395_v54, %v225_v53  ;;  %v397_v57 = vpop.f32.mrb[1].mxu0 }
 0x11a   :  { %v499_v58 = vmax.f32 %v396_v56, 0.0  ;;  %v230_v59 = vpop.f32.mrb[2].mxu1 }
 0x11b   :  { %v400_v60 = vpop.f32.mrb[2].mxu0  ;;  %v232_v61 = vpop.f32.mrb[3].mxu1 }
 0x11c   :  { %521 = vst.msk [vmem:[%s1242_s2] sm:$0xff] %vm520_vm0, %v499_v58  ;;  %v401_v62 = vadd.f32 %v400_v60, %v230_v59  ;;  %v402_v63 = vpop.f32.mrb[3].mxu0 }
 0x11e   :  { %v500_v1 = vmax.f32 %v401_v62, 0.0  ;;  %v235_v2 = vpop.f32.mrb[4].mxu1 }
 0x11f   :  { %v405_v3 = vpop.f32.mrb[4].mxu0  ;;  %v237_v4 = vpop.f32.mrb[5].mxu1 }
 0x120   :  { %522 = vst.msk [vmem:[%s1242_s2 + $0x8] sm:$0xff] %vm520_vm0, %v500_v1  ;;  %v406_v5 = vadd.f32 %v405_v3, %v235_v2  ;;  %v407_v6 = vpop.f32.mrb[5].mxu0 }
 0x122   :  { %v501_v7 = vmax.f32 %v406_v5, 0.0  ;;  %v240_v8 = vpop.f32.mrb[6].mxu1 }
 0x123   :  { %v410_v9 = vpop.f32.mrb[6].mxu0  ;;  %v242_v10 = vpop.f32.mrb[7].mxu1 }
 0x124   :  { %523 = vst.msk [vmem:[%s1242_s2 + $0x10] sm:$0xff] %vm520_vm0, %v501_v7  ;;  %v411_v11 = vadd.f32 %v410_v9, %v240_v8  ;;  %v412_v12 = vpop.f32.mrb[7].mxu0 }
 0x126   :  { %v502_v13 = vmax.f32 %v411_v11, 0.0  ;;  %v245_v14 = vpop.f32.mrb[8].mxu1 }
 0x127   :  { %v415_v15 = vpop.f32.mrb[8].mxu0  ;;  %v247_v16 = vpop.f32.mrb[9].mxu1 }
 0x128   :  { %524 = vst.msk [vmem:[%s1242_s2 + $0x18] sm:$0xff] %vm520_vm0, %v502_v13  ;;  %v416_v17 = vadd.f32 %v415_v15, %v245_v14  ;;  %v417_v18 = vpop.f32.mrb[9].mxu0 }
 0x12a   :  { %v503_v19 = vmax.f32 %v416_v17, 0.0  ;;  %v250_v20 = vpop.f32.mrb[10].mxu1 }
 0x12b   :  { %v420_v21 = vpop.f32.mrb[10].mxu0  ;;  %v252_v22 = vpop.f32.mrb[11].mxu1 }
 0x12c   :  { %525 = vst.msk [vmem:[%s1242_s2 + $0x20] sm:$0xff] %vm520_vm0, %v503_v19  ;;  %v421_v23 = vadd.f32 %v420_v21, %v250_v20  ;;  %v422_v24 = vpop.f32.mrb[11].mxu0 }
 0x12e   :  { %v504_v25 = vmax.f32 %v421_v23, 0.0  ;;  %v255_v26 = vpop.f32.mrb[12].mxu1 }
 0x12f   :  { %v425_v27 = vpop.f32.mrb[12].mxu0  ;;  %v257_v28 = vpop.f32.mrb[13].mxu1 }
 0x130   :  { %526 = vst.msk [vmem:[%s1242_s2 + $0x28] sm:$0xff] %vm520_vm0, %v504_v25  ;;  %v426_v29 = vadd.f32 %v425_v27, %v255_v26  ;;  %v427_v30 = vpop.f32.mrb[13].mxu0 }
 0x132   :  { %v505_v31 = vmax.f32 %v426_v29, 0.0  ;;  %v260_v32 = vpop.f32.mrb[14].mxu1 }
 0x133   :  { %v430_v33 = vpop.f32.mrb[14].mxu0  ;;  %v262_v34 = vpop.f32.mrb[15].mxu1 }
 0x134   :  { %527 = vst.msk [vmem:[%s1242_s2 + $0x30] sm:$0xff] %vm520_vm0, %v505_v31  ;;  %v431_v35 = vadd.f32 %v430_v33, %v260_v32  ;;  %v432_v36 = vpop.f32.mrb[15].mxu0 }
 0x136   :  { %v506_v37 = vmax.f32 %v431_v35, 0.0  ;;  %v265_v38 = vpop.f32.mrb[16].mxu1 }
 0x137   :  { %v435_v39 = vpop.f32.mrb[16].mxu0  ;;  %v267_v0 = vpop.f32.mrb[17].mxu1 }
 0x138   :  { %528 = vst.msk [vmem:[%s1242_s2 + $0x38] sm:$0xff] %vm520_vm0, %v506_v37  ;;  %v436_v40 = vadd.f32 %v435_v39, %v265_v38  ;;  %v437_v41 = vpop.f32.mrb[17].mxu0 }
 0x13a   :  { %v507_v42 = vmax.f32 %v436_v40, 0.0  ;;  %v270_v43 = vpop.f32.mrb[18].mxu1 }
 0x13b   :  { %v440_v44 = vpop.f32.mrb[18].mxu0  ;;  %v272_v45 = vpop.f32.mrb[19].mxu1 }
 0x13c   :  { %529 = vst.msk [vmem:[%s1242_s2 + $0x40] sm:$0xff] %vm520_vm0, %v507_v42  ;;  %v441_v46 = vadd.f32 %v440_v44, %v270_v43  ;;  %v442_v47 = vpop.f32.mrb[19].mxu0 }
 0x13e   :  { %v508_v48 = vmax.f32 %v441_v46, 0.0  ;;  %v275_v49 = vpop.f32.mrb[20].mxu1 }
 0x13f   :  { %v445_v50 = vpop.f32.mrb[20].mxu0  ;;  %v277_v51 = vpop.f32.mrb[21].mxu1 }
 0x140   :  { %530 = vst.msk [vmem:[%s1242_s2 + $0x48] sm:$0xff] %vm520_vm0, %v508_v48  ;;  %v446_v52 = vadd.f32 %v445_v50, %v275_v49  ;;  %v447_v53 = vpop.f32.mrb[21].mxu0 }
 0x142   :  { %v509_v54 = vmax.f32 %v446_v52, 0.0  ;;  %v280_v55 = vpop.f32.mrb[22].mxu1 }
 0x143   :  { %v450_v56 = vpop.f32.mrb[22].mxu0  ;;  %v282_v57 = vpop.f32.mrb[23].mxu1 }
 0x144   :  { %531 = vst.msk [vmem:[%s1242_s2 + $0x50] sm:$0xff] %vm520_vm0, %v509_v54  ;;  %v451_v58 = vadd.f32 %v450_v56, %v280_v55  ;;  %v452_v59 = vpop.f32.mrb[23].mxu0 }
 0x146   :  { %v510_v60 = vmax.f32 %v451_v58, 0.0  ;;  %v285_v61 = vpop.f32.mrb[24].mxu1 }
 0x147   :  { %v455_v62 = vpop.f32.mrb[24].mxu0  ;;  %v287_v63 = vpop.f32.mrb[25].mxu1 }
 0x148   :  { %532 = vst.msk [vmem:[%s1242_s2 + $0x58] sm:$0xff] %vm520_vm0, %v510_v60  ;;  %v456_v1 = vadd.f32 %v455_v62, %v285_v61  ;;  %v457_v2 = vpop.f32.mrb[25].mxu0 }
 0x14a   :  { %v511_v3 = vmax.f32 %v456_v1, 0.0  ;;  %v290_v4 = vpop.f32.mrb[26].mxu1 }
 0x14b   :  { %v460_v5 = vpop.f32.mrb[26].mxu0  ;;  %v292_v6 = vpop.f32.mrb[27].mxu1 }
 0x14c   :  { %533 = vst.msk [vmem:[%s1242_s2 + $0x60] sm:$0xff] %vm520_vm0, %v511_v3  ;;  %v461_v7 = vadd.f32 %v460_v5, %v290_v4  ;;  %v462_v8 = vpop.f32.mrb[27].mxu0 }
 0x14e   :  { %v512_v9 = vmax.f32 %v461_v7, 0.0  ;;  %v295_v10 = vpop.f32.mrb[28].mxu1 }
 0x14f   :  { %v465_v11 = vpop.f32.mrb[28].mxu0  ;;  %v297_v12 = vpop.f32.mrb[29].mxu1 }
 0x150   :  { %534 = vst.msk [vmem:[%s1242_s2 + $0x68] sm:$0xff] %vm520_vm0, %v512_v9  ;;  %v466_v13 = vadd.f32 %v465_v11, %v295_v10  ;;  %v467_v14 = vpop.f32.mrb[29].mxu0 }
 0x152   :  { %v513_v15 = vmax.f32 %v466_v13, 0.0  ;;  %v300_v16 = vpop.f32.mrb[30].mxu1 }
 0x153   :  { %v470_v17 = vpop.f32.mrb[30].mxu0  ;;  %v302_v18 = vpop.f32.mrb[31].mxu1 }
 0x154   :  { %535 = vst.msk [vmem:[%s1242_s2 + $0x70] sm:$0xff] %vm520_vm0, %v513_v15  ;;  %v471_v19 = vadd.f32 %v470_v17, %v300_v16  ;;  %v472_v20 = vpop.f32.mrb[31].mxu0 }
 0x156   :  { %v514_v21 = vmax.f32 %v471_v19, 0.0  ;;  %v305_v22 = vpop.f32.mrb[32].mxu1 }
 0x157   :  { %v475_v23 = vpop.f32.mrb[32].mxu0  ;;  %v307_v24 = vpop.f32.mrb[33].mxu1 }
 0x158   :  { %536 = vst.msk [vmem:[%s1242_s2 + $0x78] sm:$0xff] %vm520_vm0, %v514_v21  ;;  %v476_v25 = vadd.f32 %v475_v23, %v305_v22  ;;  %v477_v26 = vpop.f32.mrb[33].mxu0 }
 0x15a   :  { %v515_v27 = vmax.f32 %v476_v25, 0.0  ;;  %v310_v28 = vpop.f32.mrb[34].mxu1 }
 0x15b   :  { %v480_v29 = vpop.f32.mrb[34].mxu0  ;;  %v312_v30 = vpop.f32.mrb[35].mxu1 }
 0x15c   :  { %537 = vst.msk [vmem:[%s1242_s2 + $0x80] sm:$0xff] %vm520_vm0, %v515_v27  ;;  %v481_v31 = vadd.f32 %v480_v29, %v310_v28  ;;  %v482_v32 = vpop.f32.mrb[35].mxu0 }
 0x15e   :  { %v516_v33 = vmax.f32 %v481_v31, 0.0  ;;  %v315_v34 = vpop.f32.mrb[36].mxu1 }
 0x15f   :  { %v485_v35 = vpop.f32.mrb[36].mxu0  ;;  %v317_v36 = vpop.f32.mrb[37].mxu1 }
 0x160   :  { %538 = vst.msk [vmem:[%s1242_s2 + $0x88] sm:$0xff] %vm520_vm0, %v516_v33  ;;  %v486_v37 = vadd.f32 %v485_v35, %v315_v34  ;;  %v487_v38 = vpop.f32.mrb[37].mxu0 }
 0x162   :  { %v517_v39 = vmax.f32 %v486_v37, 0.0  ;;  %v320_v0 = vpop.f32.mrb[38].mxu1 }
 0x163   :  { %v490_v40 = vpop.f32.mrb[38].mxu0  ;;  %v322_v41 = vpop.f32.mrb[39].mxu1 }
 0x164   :  { %539 = vst.msk [vmem:[%s1242_s2 + $0x90] sm:$0xff] %vm520_vm0, %v517_v39  ;;  %v491_v42 = vadd.f32 %v490_v40, %v320_v0  ;;  %v492_v43 = vpop.f32.mrb[39].mxu0 }
 0x166   :  { %v518_v44 = vmax.f32 %v491_v42, 0.0  ;;  %v325_v45 = vpop.f32.mrb[40].mxu1 }
 0x167   :  { %v495_v46 = vpop.f32.mrb[40].mxu0  ;;  %v327_v47 = vpop.f32.mrb[41].mxu1 }
 0x168   :  { %540 = vst.msk [vmem:[%s1242_s2 + $0x98] sm:$0xff] %vm520_vm0, %v518_v44  ;;  %v496_v48 = vadd.f32 %v495_v46, %v325_v45  ;;  %v497_v49 = vpop.f32.mrb[41].mxu0 }
 0x16a   :  { %v519_v50 = vmax.f32 %v496_v48, 0.0 }
 0x16c   :  { %542 = vst.msk [vmem:[%s1242_s2 + $0xa0] sm:$0x3] %vm541_vm1, %v519_v50 }

// kernel: dqn_forward.6
= control target key start
LH: loop header
LB: loop body
LE: loop exit
PB: predicated region body
PF: predicated region fallthrough
CT: control target
= control target key end

     0   :  { %vm928_vm0 = vmmov 0   ;;  %vm148_vm1 = vcmask 523264   ;;  %vm603_vm2 = vcmask 517120   ;;  %s1454_s1 = inlined_call_operand.vmem [shape: f32[576,64], index: 1, kind: input, shape index: {}]   ;;  %s1455_s0 = inlined_call_operand.vmem [shape: f32[98,576], index: 0, kind: input, shape index: {}]   ;;  %s1456_s2 = inlined_call_operand.vmem [shape: f32[98,64], index: 2, kind: output, shape index: {}]  }
   0x1   :  { %v92_v0 = vld [vmem:[%s1454_s1 + $0x80] sm:$0xff]  ;;  %v93_v1 = vld [vmem:[%s1454_s1 + $0x88] sm:$0xff]  ;;  %v94_v11 = vld [vmem:[%s1454_s1 + $0x90] sm:$0xff] }
   0x2   :  { %v124_v2 = vld [vmem:[%s1454_s1 + $0x180] sm:$0xff]  ;;  %v840_v3 = vpack.c.bf16 %v93_v1, %v92_v0  ;;  %v125_v4 = vld [vmem:[%s1454_s1 + $0x188] sm:$0xff]  ;;  %v95_v13 = vld [vmem:[%s1454_s1 + $0x98] sm:$0xff] }
   0x3   :  { %v76_v5 = vld [vmem:[%s1454_s1] sm:$0xff]  ;;  %v77_v6 = vld [vmem:[%s1454_s1 + $0x8] sm:$0xff]  ;;  %v872_v7 = vpack.c.bf16 %v125_v4, %v124_v2  ;;  %v126_v14 = vld [vmem:[%s1454_s1 + $0x190] sm:$0xff]  ;;  %v844_v16 = vpack.c.bf16 %v95_v13, %v94_v11 }
   0x4   :  { %v842_v8 = vpack.c.bf16 %v77_v6, %v76_v5  ;;  %v108_v9 = vld [vmem:[%s1454_s1 + $0x100] sm:$0xff]  ;;  %v109_v10 = vld [vmem:[%s1454_s1 + $0x108] sm:$0xff]  ;;  %841 = vmatprep.subr.bf16.mxu0 %v840_v3  ;;  %v127_v15 = vld [vmem:[%s1454_s1 + $0x198] sm:$0xff] }
   0x5   :  { %v874_v12 = vpack.c.bf16 %v109_v10, %v108_v9  ;;  %873 = vmatprep.subr.bf16.mxu1 %v872_v7  ;;  %v876_v17 = vpack.c.bf16 %v127_v15, %v126_v14  ;;  %v78_v18 = vld [vmem:[%s1454_s1 + $0x10] sm:$0xff]  ;;  %v79_v19 = vld [vmem:[%s1454_s1 + $0x18] sm:$0xff]  ;;  %v96_v23 = vld [vmem:[%s1454_s1 + $0xa0] sm:$0xff] }
   0x6   :  { %843 = vmatpush3.bf16.msra.mxu0 %v842_v8  ;;  %v110_v20 = vld [vmem:[%s1454_s1 + $0x110] sm:$0xff]  ;;  %v846_v21 = vpack.c.bf16 %v79_v19, %v78_v18  ;;  %v111_v22 = vld [vmem:[%s1454_s1 + $0x118] sm:$0xff]  ;;  %v97_v24 = vld [vmem:[%s1454_s1 + $0xa8] sm:$0xff] }
   0x7   :  { %875 = vmatpush3.bf16.msra.mxu1 %v874_v12  ;;  %845 = vmatprep.subr.bf16.mxu0 %v844_v16  ;;  %v878_v25 = vpack.c.bf16 %v111_v22, %v110_v20  ;;  %v848_v26 = vpack.c.bf16 %v97_v24, %v96_v23  ;;  %v128_v27 = vld [vmem:[%s1454_s1 + $0x1a0] sm:$0xff]  ;;  %v129_v28 = vld [vmem:[%s1454_s1 + $0x1a8] sm:$0xff]  ;;  %v98_v35 = vld [vmem:[%s1454_s1 + $0xb0] sm:$0xff] }
   0x8   :  { %877 = vmatprep.subr.bf16.mxu1 %v876_v17  ;;  %v80_v29 = vld [vmem:[%s1454_s1 + $0x20] sm:$0xff]  ;;  %v880_v30 = vpack.c.bf16 %v129_v28, %v128_v27  ;;  %v81_v31 = vld [vmem:[%s1454_s1 + $0x28] sm:$0xff]  ;;  %v99_v36 = vld [vmem:[%s1454_s1 + $0xb8] sm:$0xff] }
   0x9   :  { %v112_v32 = vld [vmem:[%s1454_s1 + $0x120] sm:$0xff]  ;;  %v113_v33 = vld [vmem:[%s1454_s1 + $0x128] sm:$0xff]  ;;  %v850_v34 = vpack.c.bf16 %v81_v31, %v80_v29  ;;  %v130_v37 = vld [vmem:[%s1454_s1 + $0x1b0] sm:$0xff]  ;;  %v852_v39 = vpack.c.bf16 %v99_v36, %v98_v35 }
   0xa   :  { %847 = vmatpush3.bf16.msra.mxu0 %v846_v21  ;;  %v882_v38 = vpack.c.bf16 %v113_v33, %v112_v32  ;;  %v131_v40 = vld [vmem:[%s1454_s1 + $0x1b8] sm:$0xff]  ;;  %v82_v41 = vld [vmem:[%s1454_s1 + $0x30] sm:$0xff]  ;;  %v100_v46 = vld [vmem:[%s1454_s1 + $0xc0] sm:$0xff] }
   0xb   :  { %879 = vmatpush3.bf16.msra.mxu1 %v878_v25  ;;  %849 = vmatprep.subr.bf16.mxu0 %v848_v26  ;;  %v83_v42 = vld [vmem:[%s1454_s1 + $0x38] sm:$0xff]  ;;  %v884_v43 = vpack.c.bf16 %v131_v40, %v130_v37  ;;  %v114_v44 = vld [vmem:[%s1454_s1 + $0x130] sm:$0xff]  ;;  %v101_v47 = vld [vmem:[%s1454_s1 + $0xc8] sm:$0xff] }
   0xc   :  { %881 = vmatprep.subr.bf16.mxu1 %v880_v30  ;;  %v115_v45 = vld [vmem:[%s1454_s1 + $0x138] sm:$0xff]  ;;  %v132_v48 = vld [vmem:[%s1454_s1 + $0x1c0] sm:$0xff]  ;;  %v133_v49 = vld [vmem:[%s1454_s1 + $0x1c8] sm:$0xff]  ;;  %v854_v50 = vpack.c.bf16 %v83_v42, %v82_v41  ;;  %v856_v52 = vpack.c.bf16 %v101_v47, %v100_v46 }
   0xd   :  { %v886_v51 = vpack.c.bf16 %v115_v45, %v114_v44  ;;  %v84_v53 = vld [vmem:[%s1454_s1 + $0x40] sm:$0xff]  ;;  %v85_v54 = vld [vmem:[%s1454_s1 + $0x48] sm:$0xff]  ;;  %v888_v56 = vpack.c.bf16 %v133_v49, %v132_v48  ;;  %v102_v58 = vld [vmem:[%s1454_s1 + $0xd0] sm:$0xff] }
   0xe   :  { %851 = vmatpush3.bf16.msra.mxu0 %v850_v34  ;;  %v116_v55 = vld [vmem:[%s1454_s1 + $0x140] sm:$0xff]  ;;  %v117_v57 = vld [vmem:[%s1454_s1 + $0x148] sm:$0xff]  ;;  %v103_v59 = vld [vmem:[%s1454_s1 + $0xd8] sm:$0xff]  ;;  %v858_v62 = vpack.c.bf16 %v85_v54, %v84_v53 }
   0xf   :  { %883 = vmatpush3.bf16.msra.mxu1 %v882_v38  ;;  %853 = vmatprep.subr.bf16.mxu0 %v852_v39  ;;  %v134_v60 = vld [vmem:[%s1454_s1 + $0x1d0] sm:$0xff]  ;;  %v135_v61 = vld [vmem:[%s1454_s1 + $0x1d8] sm:$0xff]  ;;  %v890_v63 = vpack.c.bf16 %v117_v57, %v116_v55  ;;  %v860_v0 = vpack.c.bf16 %v103_v59, %v102_v58  ;;  %v104_v6 = vld [vmem:[%s1454_s1 + $0xe0] sm:$0xff]  ;;  %v927_v39 = vmov 0.0|0.0  }
  0x10   :  { %885 = vmatprep.subr.bf16.mxu1 %v884_v43  ;;  %v86_v1 = vld [vmem:[%s1454_s1 + $0x50] sm:$0xff]  ;;  %v87_v2 = vld [vmem:[%s1454_s1 + $0x58] sm:$0xff]  ;;  %v892_v4 = vpack.c.bf16 %v135_v61, %v134_v60  ;;  %v105_v7 = vld [vmem:[%s1454_s1 + $0xe8] sm:$0xff] }
  0x11   :  { %v118_v3 = vld [vmem:[%s1454_s1 + $0x150] sm:$0xff]  ;;  %v119_v5 = vld [vmem:[%s1454_s1 + $0x158] sm:$0xff]  ;;  %v136_v8 = vld [vmem:[%s1454_s1 + $0x1e0] sm:$0xff]  ;;  %v862_v10 = vpack.c.bf16 %v87_v2, %v86_v1  ;;  %v864_v14 = vpack.c.bf16 %v105_v7, %v104_v6 }
  0x12   :  { %855 = vmatpush3.bf16.msra.mxu0 %v854_v50  ;;  %v137_v9 = vld [vmem:[%s1454_s1 + $0x1e8] sm:$0xff]  ;;  %v88_v11 = vld [vmem:[%s1454_s1 + $0x60] sm:$0xff]  ;;  %v894_v13 = vpack.c.bf16 %v119_v5, %v118_v3  ;;  %v14_v17 = vld [vmem:[%s1455_s0 + $0x18] sm:$0xff] }
  0x13   :  { %887 = vmatpush3.bf16.msra.mxu1 %v886_v51  ;;  %857 = vmatprep.subr.bf16.mxu0 %v856_v52  ;;  %v89_v12 = vld [vmem:[%s1454_s1 + $0x68] sm:$0xff]  ;;  %v120_v15 = vld [vmem:[%s1454_s1 + $0x160] sm:$0xff]  ;;  %v896_v18 = vpack.c.bf16 %v137_v9, %v136_v8  ;;  %v106_v20 = vld [vmem:[%s1454_s1 + $0xf0] sm:$0xff] }
  0x14   :  { %889 = vmatprep.subr.bf16.mxu1 %v888_v56  ;;  %v12_v16 = vld [vmem:[%s1455_s0 + $0x8] sm:$0xff]  ;;  %v107_v21 = vld [vmem:[%s1454_s1 + $0xf8] sm:$0xff]  ;;  %v138_v22 = vld [vmem:[%s1454_s1 + $0x1f0] sm:$0xff]  ;;  %382 = vmatprep.mubr.f32.mxu1 %v14_v17  ;;  %v866_v24 = vpack.c.bf16 %v89_v12, %v88_v11 }
  0x15   :  { %v121_v19 = vld [vmem:[%s1454_s1 + $0x168] sm:$0xff]  ;;  %252 = vmatprep.mubr.f32.mxu0 %v12_v16  ;;  %v139_v23 = vld [vmem:[%s1454_s1 + $0x1f8] sm:$0xff]  ;;  %v868_v26 = vpack.c.bf16 %v107_v21, %v106_v20  ;;  %v90_v27 = vld [vmem:[%s1454_s1 + $0x70] sm:$0xff] }
  0x16   :  { %859 = vmatpush3.bf16.msra.mxu0 %v858_v62  ;;  %v898_v25 = vpack.c.bf16 %v121_v19, %v120_v15  ;;  %v91_v28 = vld [vmem:[%s1454_s1 + $0x78] sm:$0xff]  ;;  %v900_v29 = vpack.c.bf16 %v139_v23, %v138_v22  ;;  %v122_v30 = vld [vmem:[%s1454_s1 + $0x170] sm:$0xff]  ;;  %v140_v34 = vld [vmem:[%s1454_s1 + $0x200] sm:$0xff] }
  0x17   :  { %891 = vmatpush3.bf16.msra.mxu1 %v890_v63  ;;  %861 = vmatprep.subr.bf16.mxu0 %v860_v0  ;;  %v123_v31 = vld [vmem:[%s1454_s1 + $0x178] sm:$0xff]  ;;  %v870_v32 = vpack.c.bf16 %v91_v28, %v90_v27  ;;  %v141_v35 = vld [vmem:[%s1454_s1 + $0x208] sm:$0xff]  ;;  %v11_v36 = vld [vmem:[%s1455_s0] sm:$0xff] }
  0x18   :  { %893 = vmatprep.subr.bf16.mxu1 %v892_v4  ;;  %v902_v33 = vpack.c.bf16 %v123_v31, %v122_v30  ;;  %v905_v37 = vpack.c.bf16 %v141_v35, %v140_v34  ;;  %v13_v38 = vld [vmem:[%s1455_s0 + $0x10] sm:$0xff]  ;;  %v19_v41 = vld [vmem:[%s1455_s0 + $0x40] sm:$0xff]  ;;  %v143_v43 = vld [vmem:[%s1454_s1 + $0x218] sm:$0xff] }
  0x19   :  { %v17_v40 = vld [vmem:[%s1455_s0 + $0x30] sm:$0xff]  ;;  %v16_v44 = vld [vmem:[%s1455_s0 + $0x28] sm:$0xff]  ;;  %v18_v45 = vld [vmem:[%s1455_s0 + $0x38] sm:$0xff] }
  0x1a   :  { %863 = vmatpush3.bf16.msra.mxu0 %v862_v10  ;;  %v142_v42 = vld [vmem:[%s1454_s1 + $0x210] sm:$0xff]  ;;  %v22_v46 = vld [vmem:[%s1455_s0 + $0x58] sm:$0xff]  ;;  %v24_v48 = vld [vmem:[%s1455_s0 + $0x68] sm:$0xff] }
  0x1b   :  { %895 = vmatpush3.bf16.msra.mxu1 %v894_v13  ;;  %865 = vmatprep.subr.bf16.mxu0 %v864_v14  ;;  %v908_v47 = vpack.c.bf16 %v143_v43, %v142_v42  ;;  %v144_v49 = vld [vmem:[%s1454_s1 + $0x220] sm:$0xff]  ;;  %v145_v50 = vld [vmem:[%s1454_s1 + $0x228] sm:$0xff]  ;;  %v21_v51 = vld [vmem:[%s1455_s0 + $0x50] sm:$0xff] }
  0x1c   :  { %897 = vmatprep.subr.bf16.mxu1 %v896_v18  ;;  %v23_v52 = vld [vmem:[%s1455_s0 + $0x60] sm:$0xff]  ;;  %v911_v54 = vpack.c.bf16 %v145_v50, %v144_v49  ;;  %v29_v55 = vld [vmem:[%s1455_s0 + $0x90] sm:$0xff]  ;;  %v147_v57 = vld [vmem:[%s1454_s1 + $0x238] sm:$0xff] }
  0x1d   :  { %v27_v53 = vld [vmem:[%s1455_s0 + $0x80] sm:$0xff]  ;;  %v146_v56 = vld [vmem:[%s1454_s1 + $0x230] sm:$0xff]  ;;  %v26_v58 = vld [vmem:[%s1455_s0 + $0x78] sm:$0xff] }
  0x1e   :  { %867 = vmatpush3.bf16.msra.mxu0 %v866_v24  ;;  %v28_v59 = vld [vmem:[%s1455_s0 + $0x88] sm:$0xff]  ;;  %v914_v61 = vpack.c.bf16 %v147_v57, %v146_v56  ;;  %v34_v62 = vld [vmem:[%s1455_s0 + $0xb8] sm:$0xff]  ;;  %v31_v63 = vld [vmem:[%s1455_s0 + $0xa0] sm:$0xff] }
  0x1f   :  { %899 = vmatpush3.bf16.msra.mxu1 %v898_v25  ;;  %869 = vmatprep.subr.bf16.mxu0 %v868_v26  ;;  %v32_v60 = vld [vmem:[%s1455_s0 + $0xa8] sm:$0xff]  ;;  %v33_v0 = vld [vmem:[%s1455_s0 + $0xb0] sm:$0xff]  ;;  %v39_v2 = vld [vmem:[%s1455_s0 + $0xe0] sm:$0xff] }
  0x20   :  { %901 = vmatprep.subr.bf16.mxu1 %v900_v29  ;;  %v37_v1 = vld [vmem:[%s1455_s0 + $0xd0] sm:$0xff]  ;;  %v36_v3 = vld [vmem:[%s1455_s0 + $0xc8] sm:$0xff]  ;;  %v38_v4 = vld [vmem:[%s1455_s0 + $0xd8] sm:$0xff] }
  0x21   :  { %v42_v5 = vld [vmem:[%s1455_s0 + $0xf8] sm:$0xff]  ;;  %v44_v6 = vld [vmem:[%s1455_s0 + $0x108] sm:$0xff]  ;;  %v41_v7 = vld [vmem:[%s1455_s0 + $0xf0] sm:$0xff] }
  0x22   :  { %871 = vmatpush3.bf16.msra.mxu0 %v870_v32  ;;  %v43_v8 = vld [vmem:[%s1455_s0 + $0x100] sm:$0xff]  ;;  %v49_v10 = vld [vmem:[%s1455_s0 + $0x130] sm:$0xff]  ;;  %v46_v11 = vld [vmem:[%s1455_s0 + $0x118] sm:$0xff] }
  0x23   :  { %903 = vmatpush3.bf16.msra.mxu1 %v902_v33  ;;  %904 = vmatprep.subr.bf16.mxu0 %v927_v39  ;;  %v47_v9 = vld [vmem:[%s1455_s0 + $0x120] sm:$0xff]  ;;  %v48_v12 = vld [vmem:[%s1455_s0 + $0x128] sm:$0xff]  ;;  %v54_v14 = vld [vmem:[%s1455_s0 + $0x158] sm:$0xff]  ;;  %v929_v33 = vmov 0.0  }
  0x24   :  { %916 = vmatprep.subr.bf16.mxu1 %v927_v39  ;;  %v52_v13 = vld [vmem:[%s1455_s0 + $0x148] sm:$0xff]  ;;  %v51_v15 = vld [vmem:[%s1455_s0 + $0x140] sm:$0xff]  ;;  %v53_v16 = vld [vmem:[%s1455_s0 + $0x150] sm:$0xff] }
  0x25   :  { %253 = vmatmul.mubr.f32.vlgmr.msra.gmra.mrb[0].mxu0 %v11_v36  ;;  %v57_v17 = vld [vmem:[%s1455_s0 + $0x170] sm:$0xff]  ;;  %v59_v18 = vld [vmem:[%s1455_s0 + $0x180] sm:$0xff]  ;;  %v56_v19 = vld [vmem:[%s1455_s0 + $0x168] sm:$0xff] }
  0x26   :  { %383 = vmatmul.mubr.f32.vlgmr.msra.gmra.mrb[0].mxu1 %v13_v38  ;;  %906 = vmatpush3.bf16.msra.mxu0 %v905_v37  ;;  %v58_v20 = vld [vmem:[%s1455_s0 + $0x178] sm:$0xff]  ;;  %v64_v22 = vld [vmem:[%s1455_s0 + $0x1a8] sm:$0xff]  ;;  %v61_v23 = vld [vmem:[%s1455_s0 + $0x190] sm:$0xff] }
  0x27   :  { %257 = vmatprep.mubr.f32.mxu0 %v17_v40  ;;  %387 = vmatprep.mubr.f32.mxu1 %v19_v41  ;;  %v62_v21 = vld [vmem:[%s1455_s0 + $0x198] sm:$0xff]  ;;  %v63_v24 = vld [vmem:[%s1455_s0 + $0x1a0] sm:$0xff]  ;;  %v69_v26 = vld [vmem:[%s1455_s0 + $0x1d0] sm:$0xff] }
  0x28   :  { %920 = vmatpush3.bf16.msra.mxu1 %v905_v37  ;;  %907 = vmatprep.subr.bf16.mxu0 %v927_v39  ;;  %v67_v25 = vld [vmem:[%s1455_s0 + $0x1c0] sm:$0xff]  ;;  %v66_v27 = vld [vmem:[%s1455_s0 + $0x1b8] sm:$0xff]  ;;  %v68_v28 = vld [vmem:[%s1455_s0 + $0x1c8] sm:$0xff] }
  0x29   :  { %258 = vmatmul.mubr.f32.gmra.mrb[2].mxu0 %v16_v44  ;;  %917 = vmatprep.subr.bf16.mxu1 %v927_v39  ;;  %v72_v29 = vld [vmem:[%s1455_s0 + $0x1e8] sm:$0x3]  ;;  %v74_v30 = vld [vmem:[%s1455_s0 + $0x1f8] sm:$0x3]  ;;  %v71_v31 = vld [vmem:[%s1455_s0 + $0x1e0] sm:$0x3] }
  0x2a   :  { %388 = vmatmul.mubr.f32.gmra.mrb[2].mxu1 %v18_v45  ;;  %262 = vmatprep.mubr.f32.mxu0 %v22_v46  ;;  %v73_v32 = vld [vmem:[%s1455_s0 + $0x1f0] sm:$0x3]  ;;  %v15_v34 = vld [vmem:[%s1455_s0 + $0x20] sm:$0xff]  ;;  %v50_v35 = vld [vmem:[%s1455_s0 + $0x138] sm:$0xff] }
  0x2b   :  { %392 = vmatprep.mubr.f32.mxu1 %v24_v48  ;;  %909 = vmatpush3.bf16.msra.mxu0 %v908_v47  ;;  %v20_v36 = vld [vmem:[%s1455_s0 + $0x48] sm:$0xff]  ;;  %v55_v37 = vld [vmem:[%s1455_s0 + $0x160] sm:$0xff]  ;;  %v25_v38 = vld [vmem:[%s1455_s0 + $0x70] sm:$0xff] }
  0x2c   :  { %921 = vmatpush3.bf16.msra.mxu1 %v908_v47  ;;  %910 = vmatprep.subr.bf16.mxu0 %v927_v39  ;;  %v30_v40 = vld [vmem:[%s1455_s0 + $0x98] sm:$0xff]  ;;  %v65_v41 = vld [vmem:[%s1455_s0 + $0x1b0] sm:$0xff]  ;;  %v35_v42 = vld [vmem:[%s1455_s0 + $0xc0] sm:$0xff] }
  0x2d   :  { %263 = vmatmul.mubr.f32.gmra.mrb[4].mxu0 %v21_v51  ;;  %918 = vmatprep.subr.bf16.mxu1 %v927_v39  ;;  %v70_v43 = vld [vmem:[%s1455_s0 + $0x1d8] sm:$0xff]  ;;  %v40_v44 = vld [vmem:[%s1455_s0 + $0xe8] sm:$0xff]  ;;  %v75_v45 = vld [vmem:[%s1455_s0 + $0x200] sm:$0x3] }
  0x2e   :  { %393 = vmatmul.mubr.f32.gmra.mrb[4].mxu1 %v23_v52  ;;  %267 = vmatprep.mubr.f32.mxu0 %v27_v53  ;;  %v45_v46 = vld [vmem:[%s1455_s0 + $0x110] sm:$0xff] }
  0x2f   :  { %397 = vmatprep.mubr.f32.mxu1 %v29_v55  ;;  %912 = vmatpush3.bf16.msra.mxu0 %v911_v54 }
  0x30   :  { %922 = vmatpush3.bf16.msra.mxu1 %v911_v54  ;;  %913 = vmatprep.subr.bf16.mxu0 %v927_v39 }
  0x31   :  { %268 = vmatmul.mubr.f32.gmra.mrb[6].mxu0 %v26_v58  ;;  %919 = vmatprep.subr.bf16.mxu1 %v927_v39  ;;  %v60_v39 = vld [vmem:[%s1455_s0 + $0x188] sm:$0xff] }
  0x32   :  { %398 = vmatmul.mubr.f32.gmra.mrb[6].mxu1 %v28_v59  ;;  %272 = vmatprep.mubr.f32.mxu0 %v32_v60 }
  0x33   :  { %402 = vmatprep.mubr.f32.mxu1 %v34_v62  ;;  %915 = vmatpush3.bf16.msra.mxu0 %v914_v61 }
  0x34   :  { %923 = vmatpush3.bf16.msra.mxu1 %v914_v61 }
  0x35   :  { %273 = vmatmul.mubr.f32.gmra.mrb[8].mxu0 %v31_v63 }
  0x36   :  { %403 = vmatmul.mubr.f32.gmra.mrb[8].mxu1 %v33_v0  ;;  %277 = vmatprep.mubr.f32.mxu0 %v37_v1 }
  0x37   :  { %407 = vmatprep.mubr.f32.mxu1 %v39_v2 }
  0x39   :  { %278 = vmatmul.mubr.f32.gmra.mrb[10].mxu0 %v36_v3 }
  0x3a   :  { %408 = vmatmul.mubr.f32.gmra.mrb[10].mxu1 %v38_v4  ;;  %282 = vmatprep.mubr.f32.mxu0 %v42_v5 }
  0x3b   :  { %412 = vmatprep.mubr.f32.mxu1 %v44_v6 }
  0x3d   :  { %283 = vmatmul.mubr.f32.gmra.mrb[12].mxu0 %v41_v7 }
  0x3e   :  { %413 = vmatmul.mubr.f32.gmra.mrb[12].mxu1 %v43_v8  ;;  %287 = vmatprep.mubr.f32.mxu0 %v47_v9 }
  0x3f   :  { %417 = vmatprep.mubr.f32.mxu1 %v49_v10 }
  0x41   :  { %288 = vmatmul.mubr.f32.gmra.mrb[14].mxu0 %v46_v11 }
  0x42   :  { %418 = vmatmul.mubr.f32.gmra.mrb[14].mxu1 %v48_v12  ;;  %292 = vmatprep.mubr.f32.mxu0 %v52_v13 }
  0x43   :  { %422 = vmatprep.mubr.f32.mxu1 %v54_v14 }
  0x45   :  { %293 = vmatmul.mubr.f32.gmra.mrb[16].mxu0 %v51_v15 }
  0x46   :  { %423 = vmatmul.mubr.f32.gmra.mrb[16].mxu1 %v53_v16  ;;  %297 = vmatprep.mubr.f32.mxu0 %v57_v17 }
  0x47   :  { %427 = vmatprep.mubr.f32.mxu1 %v59_v18 }
  0x49   :  { %298 = vmatmul.mubr.f32.gmra.mrb[18].mxu0 %v56_v19 }
  0x4a   :  { %428 = vmatmul.mubr.f32.gmra.mrb[18].mxu1 %v58_v20  ;;  %302 = vmatprep.mubr.f32.mxu0 %v62_v21 }
  0x4b   :  { %432 = vmatprep.mubr.f32.mxu1 %v64_v22 }
  0x4d   :  { %303 = vmatmul.mubr.f32.gmra.mrb[20].mxu0 %v61_v23 }
  0x4e   :  { %433 = vmatmul.mubr.f32.gmra.mrb[20].mxu1 %v63_v24  ;;  %307 = vmatprep.mubr.f32.mxu0 %v67_v25 }
  0x4f   :  { %437 = vmatprep.mubr.f32.mxu1 %v69_v26 }
  0x51   :  { %308 = vmatmul.mubr.f32.gmra.mrb[22].mxu0 %v66_v27 }
  0x52   :  { %438 = vmatmul.mubr.f32.gmra.mrb[22].mxu1 %v68_v28  ;;  %312 = vmatprep.mubr.f32.mxu0 %v72_v29 }
  0x53   :  { %442 = vmatprep.mubr.f32.mxu1 %v74_v30 }
  0x55   :  { %313 = vmatmul.mubr.f32.gmra.mrb[24].mxu0 %v71_v31 }
  0x56   :  { %443 = vmatmul.mubr.f32.gmra.mrb[24].mxu1 %v73_v32  ;;  %801 = vmatprep.mubr.msk.f32.mxu0 %vm928_vm0, %v929_v33 }
  0x57   :  { %822 = vmatprep.mubr.msk.f32.mxu1 %vm928_vm0, %v929_v33 }
  0x59   :  { %802 = vmatmul.mubr.msk.f32.vlgmr.msra.gmra.mrb[26].mxu0 %vm148_vm1, %v15_v34 }
  0x5a   :  { %823 = vmatmul.mubr.msk.f32.vlgmr.msra.gmra.mrb[26].mxu1 %vm148_vm1, %v50_v35  ;;  %804 = vmatprep.mubr.msk.f32.mxu0 %vm928_vm0, %v929_v33 }
  0x5b   :  { %825 = vmatprep.mubr.msk.f32.mxu1 %vm928_vm0, %v929_v33 }
  0x5d   :  { %805 = vmatmul.mubr.msk.f32.gmra.mrb[28].mxu0 %vm148_vm1, %v20_v36 }
  0x5e   :  { %826 = vmatmul.mubr.msk.f32.gmra.mrb[28].mxu1 %vm148_vm1, %v55_v37  ;;  %807 = vmatprep.mubr.msk.f32.mxu0 %vm928_vm0, %v929_v33 }
  0x5f   :  { %828 = vmatprep.mubr.msk.f32.mxu1 %vm928_vm0, %v929_v33 }
  0x61   :  { %808 = vmatmul.mubr.msk.f32.gmra.mrb[30].mxu0 %vm148_vm1, %v25_v38 }
  0x62   :  { %829 = vmatmul.mubr.msk.f32.gmra.mrb[30].mxu1 %vm148_vm1, %v60_v39  ;;  %810 = vmatprep.mubr.msk.f32.mxu0 %vm928_vm0, %v929_v33 }
  0x63   :  { %831 = vmatprep.mubr.msk.f32.mxu1 %vm928_vm0, %v929_v33 }
  0x65   :  { %811 = vmatmul.mubr.msk.f32.gmra.mrb[32].mxu0 %vm148_vm1, %v30_v40 }
  0x66   :  { %832 = vmatmul.mubr.msk.f32.gmra.mrb[32].mxu1 %vm148_vm1, %v65_v41  ;;  %813 = vmatprep.mubr.msk.f32.mxu0 %vm928_vm0, %v929_v33 }
  0x67   :  { %834 = vmatprep.mubr.msk.f32.mxu1 %vm928_vm0, %v929_v33 }
  0x69   :  { %814 = vmatmul.mubr.msk.f32.gmra.mrb[34].mxu0 %vm148_vm1, %v35_v42 }
  0x6a   :  { %835 = vmatmul.mubr.msk.f32.gmra.mrb[34].mxu1 %vm148_vm1, %v70_v43  ;;  %816 = vmatprep.mubr.msk.f32.mxu0 %vm928_vm0, %v929_v33 }
  0x6b   :  { %837 = vmatprep.mubr.msk.f32.mxu1 %vm928_vm0, %v929_v33 }
  0x6d   :  { %817 = vmatmul.mubr.msk.f32.gmra.mrb[36].mxu0 %vm148_vm1, %v40_v44 }
  0x6e   :  { %838 = vmatmul.mubr.msk.f32.gmra.mrb[36].mxu1 %vm148_vm1, %v75_v45  ;;  %819 = vmatprep.mubr.msk.f32.mxu0 %vm928_vm0, %v929_v33 }
  0x71   :  { %820 = vmatmul.mubr.msk.f32.gmra.mrb[38].mxu0 %vm148_vm1, %v45_v46 }
  0xf8   :  { %v654_v47 = vpop.f32.mrb[0].mxu0 }
  0xf9   :  { %v725_v48 = vpop.f32.mrb[0].mxu1  ;;  %v655_v49 = vpop.f32.mrb[1].mxu0 }
  0xfa   :  { %v656_v50 = vadd.f32 %v655_v49, %v654_v47  ;;  %v726_v51 = vpop.f32.mrb[1].mxu1 }
  0xfb   :  { %v727_v52 = vadd.f32 %v726_v51, %v725_v48 }
  0xfc   :  { %v657_v53 = vpop.f32.mrb[2].mxu0 }
  0xfd   :  { %v728_v54 = vpop.f32.mrb[2].mxu1  ;;  %v658_v55 = vpop.f32.mrb[3].mxu0  ;;  %v1382_v56 = vadd.f32 %v727_v52, %v656_v50 }
  0xfe   :  { %v659_v57 = vadd.f32 %v658_v55, %v657_v53  ;;  %v729_v58 = vpop.f32.mrb[3].mxu1 }
  0xff   :  { %v730_v59 = vadd.f32 %v729_v58, %v728_v54 }
 0x100   :  { %v660_v60 = vpop.f32.mrb[4].mxu0 }
 0x101   :  { %v731_v61 = vpop.f32.mrb[4].mxu1  ;;  %v661_v62 = vpop.f32.mrb[5].mxu0  ;;  %v1384_v63 = vadd.f32 %v730_v59, %v659_v57 }
 0x102   :  { %v662_v0 = vadd.f32 %v661_v62, %v660_v60  ;;  %v732_v1 = vpop.f32.mrb[5].mxu1 }
 0x103   :  { %v733_v2 = vadd.f32 %v732_v1, %v731_v61 }
 0x104   :  { %v663_v3 = vpop.f32.mrb[6].mxu0 }
 0x105   :  { %v734_v4 = vpop.f32.mrb[6].mxu1  ;;  %v664_v5 = vpop.f32.mrb[7].mxu0  ;;  %v1386_v6 = vadd.f32 %v733_v2, %v662_v0 }
 0x106   :  { %v665_v7 = vadd.f32 %v664_v5, %v663_v3  ;;  %v735_v8 = vpop.f32.mrb[7].mxu1 }
 0x107   :  { %v736_v9 = vadd.f32 %v735_v8, %v734_v4 }
 0x108   :  { %v666_v10 = vpop.f32.mrb[8].mxu0 }
 0x109   :  { %v737_v11 = vpop.f32.mrb[8].mxu1  ;;  %v667_v12 = vpop.f32.mrb[9].mxu0  ;;  %v1388_v13 = vadd.f32 %v736_v9, %v665_v7 }
 0x10a   :  { %v668_v14 = vadd.f32 %v667_v12, %v666_v10  ;;  %v738_v15 = vpop.f32.mrb[9].mxu1 }
 0x10b   :  { %v739_v16 = vadd.f32 %v738_v15, %v737_v11 }
 0x10c   :  { %v669_v17 = vpop.f32.mrb[10].mxu0 }
 0x10d   :  { %v740_v18 = vpop.f32.mrb[10].mxu1  ;;  %v670_v19 = vpop.f32.mrb[11].mxu0  ;;  %v1390_v20 = vadd.f32 %v739_v16, %v668_v14 }
 0x10e   :  { %v671_v21 = vadd.f32 %v670_v19, %v669_v17  ;;  %v741_v22 = vpop.f32.mrb[11].mxu1 }
 0x10f   :  { %v742_v23 = vadd.f32 %v741_v22, %v740_v18 }
 0x110   :  { %v672_v24 = vpop.f32.mrb[12].mxu0 }
 0x111   :  { %v743_v25 = vpop.f32.mrb[12].mxu1  ;;  %v673_v26 = vpop.f32.mrb[13].mxu0  ;;  %v1392_v27 = vadd.f32 %v742_v23, %v671_v21 }
 0x112   :  { %v674_v28 = vadd.f32 %v673_v26, %v672_v24  ;;  %v744_v29 = vpop.f32.mrb[13].mxu1 }
 0x113   :  { %v745_v30 = vadd.f32 %v744_v29, %v743_v25 }
 0x114   :  { %v675_v31 = vpop.f32.mrb[14].mxu0 }
 0x115   :  { %v746_v32 = vpop.f32.mrb[14].mxu1  ;;  %v676_v33 = vpop.f32.mrb[15].mxu0  ;;  %v1394_v34 = vadd.f32 %v745_v30, %v674_v28 }
 0x116   :  { %v677_v35 = vadd.f32 %v676_v33, %v675_v31  ;;  %v747_v36 = vpop.f32.mrb[15].mxu1 }
 0x117   :  { %v748_v37 = vadd.f32 %v747_v36, %v746_v32 }
 0x118   :  { %v678_v38 = vpop.f32.mrb[16].mxu0 }
 0x119   :  { %v749_v39 = vpop.f32.mrb[16].mxu1  ;;  %v679_v40 = vpop.f32.mrb[17].mxu0  ;;  %v420_v41 = vadd.f32 %v748_v37, %v677_v35 }
 0x11a   :  { %v680_v42 = vadd.f32 %v679_v40, %v678_v38  ;;  %v750_v43 = vpop.f32.mrb[17].mxu1 }
 0x11b   :  { %v751_v44 = vadd.f32 %v750_v43, %v749_v39 }
 0x11c   :  { %v681_v45 = vpop.f32.mrb[18].mxu0 }
 0x11d   :  { %v752_v46 = vpop.f32.mrb[18].mxu1  ;;  %v682_v47 = vpop.f32.mrb[19].mxu0  ;;  %v425_v48 = vadd.f32 %v751_v44, %v680_v42 }
 0x11e   :  { %v683_v49 = vadd.f32 %v682_v47, %v681_v45  ;;  %v753_v50 = vpop.f32.mrb[19].mxu1 }
 0x11f   :  { %v754_v51 = vadd.f32 %v753_v50, %v752_v46 }
 0x120   :  { %v684_v52 = vpop.f32.mrb[20].mxu0 }
 0x121   :  { %v755_v53 = vpop.f32.mrb[20].mxu1  ;;  %v685_v54 = vpop.f32.mrb[21].mxu0  ;;  %v430_v55 = vadd.f32 %v754_v51, %v683_v49 }
 0x122   :  { %v686_v57 = vadd.f32 %v685_v54, %v684_v52  ;;  %v756_v58 = vpop.f32.mrb[21].mxu1 }
 0x123   :  { %v757_v59 = vadd.f32 %v756_v58, %v755_v53 }
 0x124   :  { %v687_v60 = vpop.f32.mrb[22].mxu0 }
 0x125   :  { %v758_v61 = vpop.f32.mrb[22].mxu1  ;;  %v688_v62 = vpop.f32.mrb[23].mxu0  ;;  %v435_v0 = vadd.f32 %v757_v59, %v686_v57 }
 0x126   :  { %v689_v1 = vadd.f32 %v688_v62, %v687_v60  ;;  %v759_v2 = vpop.f32.mrb[23].mxu1 }
 0x127   :  { %v760_v3 = vadd.f32 %v759_v2, %v758_v61 }
 0x128   :  { %v690_v4 = vpop.f32.mrb[24].mxu0 }
 0x129   :  { %v761_v5 = vpop.f32.mrb[24].mxu1  ;;  %v691_v7 = vpop.f32.mrb[25].mxu0  ;;  %v440_v8 = vadd.f32 %v760_v3, %v689_v1 }
 0x12a   :  { %v692_v9 = vadd.f32 %v691_v7, %v690_v4  ;;  %v762_v10 = vpop.f32.mrb[25].mxu1 }
 0x12b   :  { %v763_v11 = vadd.f32 %v762_v10, %v761_v5 }
 0x12c   :  { %v514_v12 = vpop.f32.mrb[26].mxu0 }
 0x12d   :  { %v515_v14 = vadd.f32 %v514_v12, %v1382_v56  ;;  %v549_v15 = vpop.f32.mrb[26].mxu1  ;;  %v803_v16 = vpop.f32.mrb[27].mxu0  ;;  %v445_v17 = vadd.f32 %v763_v11, %v692_v9 }
 0x12e   :  { %v550_v18 = vadd.f32 %v549_v15, %v420_v41  ;;  %v824_v19 = vpop.f32.mrb[27].mxu1 }
 0x12f   :  { %v578_v21 = vmax.f32 %v515_v14, 0.0 }
 0x130   :  { %v585_v22 = vmax.f32 %v550_v18, 0.0  ;;  %v519_v23 = vpop.f32.mrb[28].mxu0 }
 0x131   :  { %591 = vst.msk [vmem:[%s1456_s2] sm:$0xff] %vm148_vm1, %v578_v21  ;;  %v520_v24 = vadd.f32 %v519_v23, %v1384_v63  ;;  %v554_v25 = vpop.f32.mrb[28].mxu1  ;;  %v806_v26 = vpop.f32.mrb[29].mxu0 }
 0x132   :  { %598 = vst.msk [vmem:[%s1456_s2 + $0x38] sm:$0xff] %vm148_vm1, %v585_v22  ;;  %v555_v56 = vadd.f32 %v554_v25, %v425_v48  ;;  %v827_v28 = vpop.f32.mrb[29].mxu1 }
 0x133   :  { %v579_v29 = vmax.f32 %v520_v24, 0.0 }
 0x134   :  { %v586_v30 = vmax.f32 %v555_v56, 0.0  ;;  %v524_v31 = vpop.f32.mrb[30].mxu0 }
 0x135   :  { %592 = vst.msk [vmem:[%s1456_s2 + $0x8] sm:$0xff] %vm148_vm1, %v579_v29  ;;  %v525_v32 = vadd.f32 %v524_v31, %v1386_v6  ;;  %v559_v63 = vpop.f32.mrb[30].mxu1  ;;  %v809_v33 = vpop.f32.mrb[31].mxu0 }
 0x136   :  { %599 = vst.msk [vmem:[%s1456_s2 + $0x40] sm:$0xff] %vm148_vm1, %v586_v30  ;;  %v560_v35 = vadd.f32 %v559_v63, %v430_v55  ;;  %v830_v36 = vpop.f32.mrb[31].mxu1 }
 0x137   :  { %v580_v37 = vmax.f32 %v525_v32, 0.0 }
 0x138   :  { %v587_v38 = vmax.f32 %v560_v35, 0.0  ;;  %v529_v39 = vpop.f32.mrb[32].mxu0 }
 0x139   :  { %593 = vst.msk [vmem:[%s1456_s2 + $0x10] sm:$0xff] %vm148_vm1, %v580_v37  ;;  %v530_v40 = vadd.f32 %v529_v39, %v1388_v13  ;;  %v564_v6 = vpop.f32.mrb[32].mxu1  ;;  %v812_v41 = vpop.f32.mrb[33].mxu0 }
 0x13a   :  { %600 = vst.msk [vmem:[%s1456_s2 + $0x48] sm:$0xff] %vm148_vm1, %v587_v38  ;;  %v565_v42 = vadd.f32 %v564_v6, %v435_v0  ;;  %v833_v43 = vpop.f32.mrb[33].mxu1 }
 0x13b   :  { %v581_v44 = vmax.f32 %v530_v40, 0.0 }
 0x13c   :  { %v588_v45 = vmax.f32 %v565_v42, 0.0  ;;  %v534_v46 = vpop.f32.mrb[34].mxu0 }
 0x13d   :  { %594 = vst.msk [vmem:[%s1456_s2 + $0x18] sm:$0xff] %vm148_vm1, %v581_v44  ;;  %v535_v47 = vadd.f32 %v534_v46, %v1390_v20  ;;  %v569_v13 = vpop.f32.mrb[34].mxu1  ;;  %v815_v48 = vpop.f32.mrb[35].mxu0 }
 0x13e   :  { %601 = vst.msk [vmem:[%s1456_s2 + $0x50] sm:$0xff] %vm148_vm1, %v588_v45  ;;  %v570_v49 = vadd.f32 %v569_v13, %v440_v8  ;;  %v836_v50 = vpop.f32.mrb[35].mxu1 }
 0x13f   :  { %v582_v51 = vmax.f32 %v535_v47, 0.0 }
 0x140   :  { %v589_v52 = vmax.f32 %v570_v49, 0.0  ;;  %v539_v53 = vpop.f32.mrb[36].mxu0 }
 0x141   :  { %595 = vst.msk [vmem:[%s1456_s2 + $0x20] sm:$0xff] %vm148_vm1, %v582_v51  ;;  %v540_v54 = vadd.f32 %v539_v53, %v1392_v27  ;;  %v574_v20 = vpop.f32.mrb[36].mxu1  ;;  %v818_v55 = vpop.f32.mrb[37].mxu0 }
 0x142   :  { %602 = vst.msk [vmem:[%s1456_s2 + $0x58] sm:$0xff] %vm148_vm1, %v589_v52  ;;  %v575_v57 = vadd.f32 %v574_v20, %v445_v17  ;;  %v839_v58 = vpop.f32.mrb[37].mxu1 }
 0x143   :  { %v583_v59 = vmax.f32 %v540_v54, 0.0 }
 0x144   :  { %v590_v60 = vmax.f32 %v575_v57, 0.0  ;;  %v544_v61 = vpop.f32.mrb[38].mxu0 }
 0x145   :  { %596 = vst.msk [vmem:[%s1456_s2 + $0x28] sm:$0xff] %vm148_vm1, %v583_v59  ;;  %v545_v27 = vadd.f32 %v544_v61, %v1394_v34  ;;  %v821_v62 = vpop.f32.mrb[39].mxu0 }
 0x146   :  { %604 = vst.msk [vmem:[%s1456_s2 + $0x60] sm:$0x3] %vm603_vm2, %v590_v60 }
 0x147   :  { %v584_v0 = vmax.f32 %v545_v27, 0.0 }
 0x149   :  { %597 = vst.msk [vmem:[%s1456_s2 + $0x30] sm:$0xff] %vm148_vm1, %v584_v0 }

// kernel: dqn_forward.7
= control target key start
LH: loop header
LB: loop body
LE: loop exit
PB: predicated region body
PF: predicated region fallthrough
CT: control target
= control target key end

     0   :  { %v14317_v32 = vmov 1983009808   ;;  %v40_v34 = vlaneseq  ;;  %s19787_s0 = inlined_call_operand.vmem [shape: f32[2,3136], index: 0, kind: input, shape index: {}]   ;;  %s19788_s1 = inlined_call_operand.vmem [shape: bf16[3136,1024], index: 1, kind: input, shape index: {}]   ;;  %s19789_s2 = inlined_call_operand.vmem [shape: f32[1,1024], index: 2, kind: input, shape index: {}]   ;;  %s19790_s3 = inlined_call_operand.vmem [shape: f32[1024,7], index: 3, kind: input, shape index: {}]   ;;  %s19791_s4 = inlined_call_operand.vmem [shape: f32[1,7], index: 4, kind: input, shape index: {}]   ;;  %s19792_s5 = inlined_call_operand.hbm [shape: f32[2,6], index: 5, kind: output, shape index: {}]  }
   0x1   :  { %v195_v0 = vld [vmem:[%s19788_s1] sm:$0xff]  ;;  %v196_v2 = vld [vmem:[%s19788_s1 + $0x8] sm:$0xff]  ;;  %v38_v33 = vunpack.c.l.s4 %v14317_v32 }
   0x2   :  { %v199_v1 = vld [vmem:[%s19788_s1 + $0x20] sm:$0xff]  ;;  %v200_v4 = vld [vmem:[%s19788_s1 + $0x28] sm:$0xff]  ;;  %v14417_v44 = vshrl.u32 %v40_v34, 7 }
   0x3   :  { %v12241_v3 = vcombine.high %v195_v0, %v199_v1  ;;  %v12240_v5 = vcombine.low %v195_v0, %v199_v1  ;;  %v203_v6 = vld [vmem:[%s19788_s1 + $0x40] sm:$0xff]  ;;  %v12243_v8 = vcombine.high %v196_v2, %v200_v4  ;;  %v12242_v9 = vcombine.low %v196_v2, %v200_v4  ;;  %v204_v11 = vld [vmem:[%s19788_s1 + $0x48] sm:$0xff] }
   0x4   :  { %v207_v7 = vld [vmem:[%s19788_s1 + $0x60] sm:$0xff]  ;;  %v208_v12 = vld [vmem:[%s19788_s1 + $0x68] sm:$0xff]  ;;  %v39_v43 = vunpack.c.0.s8 %v38_v33 }
   0x5   :  { %v12249_v10 = vcombine.high %v203_v6, %v207_v7  ;;  %v211_v13 = vld [vmem:[%s19788_s1 + $0x80] sm:$0xff]  ;;  %9649 = vmatprep.subr.bf16.mxu0 %v12241_v3  ;;  %v12251_v14 = vcombine.high %v204_v11, %v208_v12  ;;  %v212_v16 = vld [vmem:[%s19788_s1 + $0x88] sm:$0xff]  ;;  %10182 = vmatprep.subr.bf16.mxu1 %v12243_v8  ;;  %v12248_v18 = vcombine.low %v203_v6, %v207_v7 }
   0x6   :  { %v215_v15 = vld [vmem:[%s19788_s1 + $0xa0] sm:$0xff]  ;;  %v216_v17 = vld [vmem:[%s19788_s1 + $0xa8] sm:$0xff]  ;;  %9650 = vmatpush1.bf16.msra.mxu0 %v12240_v5  ;;  %10183 = vmatpush1.bf16.msra.mxu1 %v12242_v9  ;;  %v12250_v19 = vcombine.low %v204_v11, %v208_v12  ;;  %v14432_v53 = vsub.s32 %v39_v43, %v14417_v44 }
   0x7   :  { %9651 = vmatprep.subr.bf16.mxu0 %v12249_v10  ;;  %v12257_v20 = vcombine.high %v211_v13, %v215_v15  ;;  %10184 = vmatprep.subr.bf16.mxu1 %v12251_v14  ;;  %v12259_v21 = vcombine.high %v212_v16, %v216_v17  ;;  %v219_v22 = vld [vmem:[%s19788_s1 + $0xc0] sm:$0xff]  ;;  %v220_v24 = vld [vmem:[%s19788_s1 + $0xc8] sm:$0xff]  ;;  %v12256_v26 = vcombine.low %v211_v13, %v215_v15 }
   0x8   :  { %v223_v23 = vld [vmem:[%s19788_s1 + $0xe0] sm:$0xff]  ;;  %v224_v25 = vld [vmem:[%s19788_s1 + $0xe8] sm:$0xff]  ;;  %v12258_v27 = vcombine.low %v212_v16, %v216_v17 }
   0x9   :  { %v12265_v28 = vcombine.high %v219_v22, %v223_v23  ;;  %v12267_v29 = vcombine.high %v220_v24, %v224_v25  ;;  %v227_v30 = vld [vmem:[%s19788_s1 + $0x100] sm:$0xff]  ;;  %v228_v35 = vld [vmem:[%s19788_s1 + $0x108] sm:$0xff]  ;;  %v12264_v37 = vcombine.low %v219_v22, %v223_v23  ;;  %v12266_v38 = vcombine.low %v220_v24, %v224_v25 }
   0xa   :  { %9652 = vmatpush1.bf16.msra.mxu0 %v12248_v18  ;;  %10185 = vmatpush1.bf16.msra.mxu1 %v12250_v19  ;;  %v231_v31 = vld [vmem:[%s19788_s1 + $0x120] sm:$0xff]  ;;  %v232_v36 = vld [vmem:[%s19788_s1 + $0x128] sm:$0xff] }
   0xb   :  { %9653 = vmatprep.subr.bf16.mxu0 %v12257_v20  ;;  %10186 = vmatprep.subr.bf16.mxu1 %v12259_v21  ;;  %v12273_v39 = vcombine.high %v227_v30, %v231_v31  ;;  %v12275_v40 = vcombine.high %v228_v35, %v232_v36  ;;  %v235_v41 = vld [vmem:[%s19788_s1 + $0x140] sm:$0xff]  ;;  %v236_v45 = vld [vmem:[%s19788_s1 + $0x148] sm:$0xff]  ;;  %v12272_v47 = vcombine.low %v227_v30, %v231_v31 }
   0xc   :  { %v239_v42 = vld [vmem:[%s19788_s1 + $0x160] sm:$0xff]  ;;  %v240_v46 = vld [vmem:[%s19788_s1 + $0x168] sm:$0xff]  ;;  %v12274_v48 = vcombine.low %v228_v35, %v232_v36 }
   0xd   :  { %v12281_v49 = vcombine.high %v235_v41, %v239_v42  ;;  %v12283_v50 = vcombine.high %v236_v45, %v240_v46  ;;  %v243_v51 = vld [vmem:[%s19788_s1 + $0x180] sm:$0xff]  ;;  %v244_v54 = vld [vmem:[%s19788_s1 + $0x188] sm:$0xff]  ;;  %v12280_v56 = vcombine.low %v235_v41, %v239_v42  ;;  %v12282_v57 = vcombine.low %v236_v45, %v240_v46 }
   0xe   :  { %9654 = vmatpush1.bf16.msra.mxu0 %v12256_v26  ;;  %10187 = vmatpush1.bf16.msra.mxu1 %v12258_v27  ;;  %v247_v52 = vld [vmem:[%s19788_s1 + $0x1a0] sm:$0xff]  ;;  %v248_v55 = vld [vmem:[%s19788_s1 + $0x1a8] sm:$0xff] }
   0xf   :  { %9655 = vmatprep.subr.bf16.mxu0 %v12265_v28  ;;  %10188 = vmatprep.subr.bf16.mxu1 %v12267_v29  ;;  %v12289_v58 = vcombine.high %v243_v51, %v247_v52  ;;  %v14443_v59 = vld [vmem:[%s19787_s0] sm:$0xff]  ;;  %v12291_v60 = vcombine.high %v244_v54, %v248_v55  ;;  %v252_v0 = vld [vmem:[%s19788_s1 + $0x1c8] sm:$0xff]  ;;  %v12288_v2 = vcombine.low %v243_v51, %v247_v52 }
  0x10   :  { %v251_v61 = vld [vmem:[%s19788_s1 + $0x1c0] sm:$0xff]  ;;  %v14453_v63 = vrot.slane %v14443_v59, %v14432_v53  ;;  %v256_v1 = vld [vmem:[%s19788_s1 + $0x1e8] sm:$0xff]  ;;  %v12290_v4 = vcombine.low %v244_v54, %v248_v55 }
  0x11   :  { %v255_v62 = vld [vmem:[%s19788_s1 + $0x1e0] sm:$0xff]  ;;  %v12299_v6 = vcombine.high %v252_v0, %v256_v1  ;;  %v260_v10 = vld [vmem:[%s19788_s1 + $0x208] sm:$0xff]  ;;  %v12298_v13 = vcombine.low %v252_v0, %v256_v1 }
  0x12   :  { %9656 = vmatpush1.bf16.msra.mxu0 %v12264_v37  ;;  %10189 = vmatpush1.bf16.msra.mxu1 %v12266_v38  ;;  %v51_v3 = vcombine.high %v14453_v63, %v14453_v63  ;;  %v12297_v5 = vcombine.high %v251_v61, %v255_v62  ;;  %v259_v7 = vld [vmem:[%s19788_s1 + $0x200] sm:$0xff]  ;;  %v264_v11 = vld [vmem:[%s19788_s1 + $0x228] sm:$0xff]  ;;  %v12296_v12 = vcombine.low %v251_v61, %v255_v62 }
  0x13   :  { %9657 = vmatprep.subr.bf16.mxu0 %v12273_v39  ;;  %10190 = vmatprep.subr.bf16.mxu1 %v12275_v40  ;;  %v263_v8 = vld [vmem:[%s19788_s1 + $0x220] sm:$0xff]  ;;  %v12307_v15 = vcombine.high %v260_v10, %v264_v11  ;;  %v268_v18 = vld [vmem:[%s19788_s1 + $0x248] sm:$0xff]  ;;  %v12306_v21 = vcombine.low %v260_v10, %v264_v11 }
  0x14   :  { %v14469_v9 = vpack.c.bf16 %v51_v3, %v51_v3  ;;  %v12305_v14 = vcombine.high %v259_v7, %v263_v8  ;;  %v267_v16 = vld [vmem:[%s19788_s1 + $0x240] sm:$0xff]  ;;  %v272_v19 = vld [vmem:[%s19788_s1 + $0x268] sm:$0xff]  ;;  %v12304_v20 = vcombine.low %v259_v7, %v263_v8 }
  0x15   :  { %v271_v17 = vld [vmem:[%s19788_s1 + $0x260] sm:$0xff]  ;;  %v12315_v23 = vcombine.high %v268_v18, %v272_v19  ;;  %v276_v26 = vld [vmem:[%s19788_s1 + $0x288] sm:$0xff]  ;;  %v12314_v29 = vcombine.low %v268_v18, %v272_v19 }
  0x16   :  { %9658 = vmatpush1.bf16.msra.mxu0 %v12272_v47  ;;  %10191 = vmatpush1.bf16.msra.mxu1 %v12274_v48  ;;  %v12313_v22 = vcombine.high %v267_v16, %v271_v17  ;;  %v275_v24 = vld [vmem:[%s19788_s1 + $0x280] sm:$0xff]  ;;  %v280_v27 = vld [vmem:[%s19788_s1 + $0x2a8] sm:$0xff]  ;;  %v12312_v28 = vcombine.low %v267_v16, %v271_v17 }
  0x17   :  { %9659 = vmatprep.subr.bf16.mxu0 %v12281_v49  ;;  %10192 = vmatprep.subr.bf16.mxu1 %v12283_v50  ;;  %v279_v25 = vld [vmem:[%s19788_s1 + $0x2a0] sm:$0xff]  ;;  %v12323_v31 = vcombine.high %v276_v26, %v280_v27  ;;  %v284_v34 = vld [vmem:[%s19788_s1 + $0x2c8] sm:$0xff]  ;;  %v12322_v37 = vcombine.low %v276_v26, %v280_v27 }
  0x18   :  { %9681 = vmatprep.mubr.bf16.mxu0 %v14469_v9  ;;  %10214 = vmatprep.mubr.bf16.mxu1 %v14469_v9  ;;  %v12321_v30 = vcombine.high %v275_v24, %v279_v25  ;;  %v283_v32 = vld [vmem:[%s19788_s1 + $0x2c0] sm:$0xff]  ;;  %v288_v35 = vld [vmem:[%s19788_s1 + $0x2e8] sm:$0xff]  ;;  %v12320_v36 = vcombine.low %v275_v24, %v279_v25  ;;  %v14590_v25 = vpack.c.bf16 %v14453_v63, %v14453_v63 }
  0x19   :  { %v287_v33 = vld [vmem:[%s19788_s1 + $0x2e0] sm:$0xff]  ;;  %v12331_v39 = vcombine.high %v284_v34, %v288_v35  ;;  %v292_v42 = vld [vmem:[%s19788_s1 + $0x308] sm:$0xff]  ;;  %v12330_v46 = vcombine.low %v284_v34, %v288_v35 }
  0x1a   :  { %9660 = vmatpush1.bf16.msra.mxu0 %v12280_v56  ;;  %10193 = vmatpush1.bf16.msra.mxu1 %v12282_v57  ;;  %v12329_v38 = vcombine.high %v283_v32, %v287_v33  ;;  %v291_v40 = vld [vmem:[%s19788_s1 + $0x300] sm:$0xff]  ;;  %v296_v43 = vld [vmem:[%s19788_s1 + $0x328] sm:$0xff]  ;;  %v12328_v45 = vcombine.low %v283_v32, %v287_v33 }
  0x1b   :  { %9661 = vmatprep.subr.bf16.mxu0 %v12289_v58  ;;  %10194 = vmatprep.subr.bf16.mxu1 %v12291_v60  ;;  %v295_v41 = vld [vmem:[%s19788_s1 + $0x320] sm:$0xff]  ;;  %v12339_v48 = vcombine.high %v292_v42, %v296_v43  ;;  %v300_v51 = vld [vmem:[%s19788_s1 + $0x348] sm:$0xff]  ;;  %v12338_v55 = vcombine.low %v292_v42, %v296_v43 }
  0x1c   :  { %v12337_v47 = vcombine.high %v291_v40, %v295_v41  ;;  %v299_v49 = vld [vmem:[%s19788_s1 + $0x340] sm:$0xff]  ;;  %v304_v52 = vld [vmem:[%s19788_s1 + $0x368] sm:$0xff]  ;;  %v12336_v54 = vcombine.low %v291_v40, %v295_v41 }
  0x1d   :  { %v303_v50 = vld [vmem:[%s19788_s1 + $0x360] sm:$0xff]  ;;  %v12347_v57 = vcombine.high %v300_v51, %v304_v52  ;;  %v308_v61 = vld [vmem:[%s19788_s1 + $0x388] sm:$0xff]  ;;  %v12346_v1 = vcombine.low %v300_v51, %v304_v52 }
  0x1e   :  { %9662 = vmatpush1.bf16.msra.mxu0 %v12288_v2  ;;  %10195 = vmatpush1.bf16.msra.mxu1 %v12290_v4  ;;  %v12345_v56 = vcombine.high %v299_v49, %v303_v50  ;;  %v307_v58 = vld [vmem:[%s19788_s1 + $0x380] sm:$0xff]  ;;  %v312_v62 = vld [vmem:[%s19788_s1 + $0x3a8] sm:$0xff]  ;;  %v12344_v0 = vcombine.low %v299_v49, %v303_v50 }
  0x1f   :  { %9663 = vmatprep.subr.bf16.mxu0 %v12297_v5  ;;  %10196 = vmatprep.subr.bf16.mxu1 %v12299_v6  ;;  %v311_v60 = vld [vmem:[%s19788_s1 + $0x3a0] sm:$0xff]  ;;  %v12355_v3 = vcombine.high %v308_v61, %v312_v62  ;;  %v36_v6 = vcombine.high %v14443_v59, %v14443_v59  ;;  %v316_v7 = vld [vmem:[%s19788_s1 + $0x3c8] sm:$0xff]  ;;  %v12354_v11 = vcombine.low %v308_v61, %v312_v62 }
  0x20   :  { %v12353_v2 = vcombine.high %v307_v58, %v311_v60  ;;  %v315_v4 = vld [vmem:[%s19788_s1 + $0x3c0] sm:$0xff]  ;;  %v320_v8 = vld [vmem:[%s19788_s1 + $0x3e8] sm:$0xff]  ;;  %v12352_v10 = vcombine.low %v307_v58, %v311_v60 }
  0x21   :  { %v319_v5 = vld [vmem:[%s19788_s1 + $0x3e0] sm:$0xff]  ;;  %v324_v16 = vld [vmem:[%s19788_s1 + $0x408] sm:$0xff]  ;;  %v12362_v19 = vcombine.low %v316_v7, %v320_v8 }
  0x22   :  { %9664 = vmatpush1.bf16.msra.mxu0 %v12296_v12  ;;  %10197 = vmatpush1.bf16.msra.mxu1 %v12298_v13  ;;  %v12361_v12 = vcombine.high %v315_v4, %v319_v5  ;;  %v12363_v13 = vcombine.high %v316_v7, %v320_v8  ;;  %v323_v59 = vld [vmem:[%s19788_s1 + $0x400] sm:$0xff]  ;;  %v328_v17 = vld [vmem:[%s19788_s1 + $0x428] sm:$0xff]  ;;  %v12360_v18 = vcombine.low %v315_v4, %v319_v5 }
  0x23   :  { %9665 = vmatprep.subr.bf16.mxu0 %v12305_v14  ;;  %10198 = vmatprep.subr.bf16.mxu1 %v12307_v15  ;;  %v327_v14 = vld [vmem:[%s19788_s1 + $0x420] sm:$0xff]  ;;  %v14572_v15 = vrot.slane %v36_v6, %v14432_v53  ;;  %v332_v26 = vld [vmem:[%s19788_s1 + $0x448] sm:$0xff] }
  0x24   :  { %v336_v27 = vld [vmem:[%s19788_s1 + $0x468] sm:$0xff] }
  0x25   :  { %v52_v24 = vcombine.high %v14572_v15, %v14572_v15 }
  0x26   :  { %9666 = vmatpush1.bf16.msra.mxu0 %v12304_v20  ;;  %10199 = vmatpush1.bf16.msra.mxu1 %v12306_v21  ;;  %v12369_v20 = vcombine.high %v323_v59, %v327_v14  ;;  %v12371_v21 = vcombine.high %v324_v16, %v328_v17 }
  0x27   :  { %9667 = vmatprep.subr.bf16.mxu0 %v12313_v22  ;;  %10200 = vmatprep.subr.bf16.mxu1 %v12315_v23  ;;  %v331_v22 = vld [vmem:[%s19788_s1 + $0x440] sm:$0xff] }
  0x28   :  { %v335_v23 = vld [vmem:[%s19788_s1 + $0x460] sm:$0xff] }
  0x2a   :  { %9668 = vmatpush1.bf16.msra.mxu0 %v12312_v28  ;;  %10201 = vmatpush1.bf16.msra.mxu1 %v12314_v29  ;;  %v12368_v28 = vcombine.low %v323_v59, %v327_v14 }
  0x2b   :  { %9669 = vmatprep.subr.bf16.mxu0 %v12321_v30  ;;  %10202 = vmatprep.subr.bf16.mxu1 %v12323_v31 }
  0x2e   :  { %9670 = vmatpush1.bf16.msra.mxu0 %v12320_v36  ;;  %10203 = vmatpush1.bf16.msra.mxu1 %v12322_v37 }
  0x2f   :  { %9671 = vmatprep.subr.bf16.mxu0 %v12329_v38  ;;  %10204 = vmatprep.subr.bf16.mxu1 %v12331_v39 }
  0x32   :  { %9672 = vmatpush1.bf16.msra.mxu0 %v12328_v45  ;;  %10205 = vmatpush1.bf16.msra.mxu1 %v12330_v46 }
  0x33   :  { %9673 = vmatprep.subr.bf16.mxu0 %v12337_v47  ;;  %10206 = vmatprep.subr.bf16.mxu1 %v12339_v48 }
  0x36   :  { %9674 = vmatpush1.bf16.msra.mxu0 %v12336_v54  ;;  %10207 = vmatpush1.bf16.msra.mxu1 %v12338_v55 }
  0x37   :  { %9675 = vmatprep.subr.bf16.mxu0 %v12345_v56  ;;  %10208 = vmatprep.subr.bf16.mxu1 %v12347_v57 }
  0x3a   :  { %9676 = vmatpush1.bf16.msra.mxu0 %v12344_v0  ;;  %10209 = vmatpush1.bf16.msra.mxu1 %v12346_v1 }
  0x3b   :  { %9677 = vmatprep.subr.bf16.mxu0 %v12353_v2  ;;  %10210 = vmatprep.subr.bf16.mxu1 %v12355_v3 }
  0x3e   :  { %9678 = vmatpush1.bf16.msra.mxu0 %v12352_v10  ;;  %10211 = vmatpush1.bf16.msra.mxu1 %v12354_v11 }
  0x3f   :  { %9679 = vmatprep.subr.bf16.mxu0 %v12361_v12  ;;  %10212 = vmatprep.subr.bf16.mxu1 %v12363_v13 }
  0x42   :  { %9680 = vmatpush1.bf16.msra.mxu0 %v12360_v18 }
  0x43   :  { %10 = vsyncpa [#allocation3], 0  ;;  %10213 = vmatpush1.bf16.msra.mxu1 %v12362_v19  ;;  %9690 = vmatprep.subr.bf16.mxu0 %v12369_v20  ;;  %v12370_v29 = vcombine.low %v324_v16, %v328_v17  ;;  %v12377_v30 = vcombine.high %v331_v22, %v335_v23  ;;  %v12379_v31 = vcombine.high %v332_v26, %v336_v27  ;;  %v339_v63 = vld [vmem:[%s19788_s1 + $0x480] sm:$0xff]  ;;  %v340_v34 = vld [vmem:[%s19788_s1 + $0x488] sm:$0xff]  ;;  %vm9645_vm0 = vcmask 523264   ;;  %s14319_s13 = smov 127  }
  0x44   :  { %10223 = vmatprep.subr.bf16.mxu1 %v12371_v21  ;;  %v343_v32 = vld [vmem:[%s19788_s1 + $0x4a0] sm:$0xff]  ;;  %v14604_v33 = vpack.c.bf16 %v52_v24, %v52_v24  ;;  %v344_v35 = vld [vmem:[%s19788_s1 + $0x4a8] sm:$0xff]  ;;  %v12376_v36 = vcombine.low %v331_v22, %v335_v23  ;;  %v12378_v37 = vcombine.low %v332_v26, %v336_v27  ;;  %vm12213_vm1 = vcmask 41984  }
  0x45   :  { %9682 = vmatmul.mubr.bf16.vlgmr.msra.gmra.mrb[0].mxu0 %v14590_v25  ;;  %v12385_v38 = vcombine.high %v339_v63, %v343_v32  ;;  %v12387_v39 = vcombine.high %v340_v34, %v344_v35  ;;  %v347_v40 = vld [vmem:[%s19788_s1 + $0x4c0] sm:$0xff]  ;;  %v348_v42 = vld [vmem:[%s19788_s1 + $0x4c8] sm:$0xff]  ;;  %v12384_v45 = vcombine.low %v339_v63, %v343_v32  ;;  %v12386_v46 = vcombine.low %v340_v34, %v344_v35 }
  0x46   :  { %9691 = vmatpush1.bf16.msra.mxu0 %v12368_v28  ;;  %10215 = vmatmul.mubr.bf16.vlgmr.msra.gmra.mrb[0].mxu1 %v14590_v25  ;;  %v351_v41 = vld [vmem:[%s19788_s1 + $0x4e0] sm:$0xff]  ;;  %v352_v43 = vld [vmem:[%s19788_s1 + $0x4e8] sm:$0xff] }
  0x47   :  { %10224 = vmatpush1.bf16.msra.mxu1 %v12370_v29  ;;  %9692 = vmatprep.subr.bf16.mxu0 %v12377_v30  ;;  %v12393_v47 = vcombine.high %v347_v40, %v351_v41  ;;  %v12395_v48 = vcombine.high %v348_v42, %v352_v43  ;;  %v355_v49 = vld [vmem:[%s19788_s1 + $0x500] sm:$0xff]  ;;  %v356_v51 = vld [vmem:[%s19788_s1 + $0x508] sm:$0xff]  ;;  %v12392_v54 = vcombine.low %v347_v40, %v351_v41 }
  0x48   :  { %10225 = vmatprep.subr.bf16.mxu1 %v12379_v31  ;;  %9722 = vmatprep.mubr.bf16.mxu0 %v14604_v33  ;;  %v359_v50 = vld [vmem:[%s19788_s1 + $0x520] sm:$0xff]  ;;  %v360_v52 = vld [vmem:[%s19788_s1 + $0x528] sm:$0xff]  ;;  %v12394_v55 = vcombine.low %v348_v42, %v352_v43 }
  0x49   :  { %10255 = vmatprep.mubr.bf16.mxu1 %v14604_v33  ;;  %v12401_v56 = vcombine.high %v355_v49, %v359_v50  ;;  %v12403_v57 = vcombine.high %v356_v51, %v360_v52  ;;  %v363_v58 = vld [vmem:[%s19788_s1 + $0x540] sm:$0xff]  ;;  %v364_v61 = vld [vmem:[%s19788_s1 + $0x548] sm:$0xff]  ;;  %v12400_v0 = vcombine.low %v355_v49, %v359_v50  ;;  %v12402_v1 = vcombine.low %v356_v51, %v360_v52 }
  0x4a   :  { %9693 = vmatpush1.bf16.msra.mxu0 %v12376_v36  ;;  %v367_v60 = vld [vmem:[%s19788_s1 + $0x560] sm:$0xff]  ;;  %v368_v62 = vld [vmem:[%s19788_s1 + $0x568] sm:$0xff] }
  0x4b   :  { %10226 = vmatpush1.bf16.msra.mxu1 %v12378_v37  ;;  %9694 = vmatprep.subr.bf16.mxu0 %v12385_v38  ;;  %v12409_v2 = vcombine.high %v363_v58, %v367_v60  ;;  %v12411_v3 = vcombine.high %v364_v61, %v368_v62  ;;  %v371_v4 = vld [vmem:[%s19788_s1 + $0x580] sm:$0xff]  ;;  %v372_v6 = vld [vmem:[%s19788_s1 + $0x588] sm:$0xff]  ;;  %v12408_v8 = vcombine.low %v363_v58, %v367_v60 }
  0x4c   :  { %10227 = vmatprep.subr.bf16.mxu1 %v12387_v39  ;;  %v375_v5 = vld [vmem:[%s19788_s1 + $0x5a0] sm:$0xff]  ;;  %v376_v7 = vld [vmem:[%s19788_s1 + $0x5a8] sm:$0xff]  ;;  %v12410_v10 = vcombine.low %v364_v61, %v368_v62 }
  0x4d   :  { %v12417_v11 = vcombine.high %v371_v4, %v375_v5  ;;  %v12419_v12 = vcombine.high %v372_v6, %v376_v7  ;;  %v379_v13 = vld [vmem:[%s19788_s1 + $0x5c0] sm:$0xff]  ;;  %v380_v14 = vld [vmem:[%s19788_s1 + $0x5c8] sm:$0xff]  ;;  %v12416_v17 = vcombine.low %v371_v4, %v375_v5  ;;  %v12418_v18 = vcombine.low %v372_v6, %v376_v7 }
  0x4e   :  { %9695 = vmatpush1.bf16.msra.mxu0 %v12384_v45  ;;  %v383_v59 = vld [vmem:[%s19788_s1 + $0x5e0] sm:$0xff]  ;;  %v384_v16 = vld [vmem:[%s19788_s1 + $0x5e8] sm:$0xff] }
  0x4f   :  { %10228 = vmatpush1.bf16.msra.mxu1 %v12386_v46  ;;  %9696 = vmatprep.subr.bf16.mxu0 %v12393_v47  ;;  %v12425_v19 = vcombine.high %v379_v13, %v383_v59  ;;  %v12427_v20 = vcombine.high %v380_v14, %v384_v16  ;;  %v387_v21 = vld [vmem:[%s19788_s1 + $0x600] sm:$0xff]  ;;  %v388_v23 = vld [vmem:[%s19788_s1 + $0x608] sm:$0xff]  ;;  %v12424_v26 = vcombine.low %v379_v13, %v383_v59 }
  0x50   :  { %10229 = vmatprep.subr.bf16.mxu1 %v12395_v48  ;;  %v391_v22 = vld [vmem:[%s19788_s1 + $0x620] sm:$0xff]  ;;  %v392_v24 = vld [vmem:[%s19788_s1 + $0x628] sm:$0xff]  ;;  %v12426_v27 = vcombine.low %v380_v14, %v384_v16 }
  0x51   :  { %v12433_v28 = vcombine.high %v387_v21, %v391_v22  ;;  %v12435_v29 = vcombine.high %v388_v23, %v392_v24  ;;  %v395_v30 = vld [vmem:[%s19788_s1 + $0x640] sm:$0xff]  ;;  %v396_v63 = vld [vmem:[%s19788_s1 + $0x648] sm:$0xff]  ;;  %v12432_v34 = vcombine.low %v387_v21, %v391_v22  ;;  %v12434_v35 = vcombine.low %v388_v23, %v392_v24 }
  0x52   :  { %9697 = vmatpush1.bf16.msra.mxu0 %v12392_v54  ;;  %v399_v31 = vld [vmem:[%s19788_s1 + $0x660] sm:$0xff]  ;;  %v400_v32 = vld [vmem:[%s19788_s1 + $0x668] sm:$0xff] }
  0x53   :  { %10230 = vmatpush1.bf16.msra.mxu1 %v12394_v55  ;;  %9698 = vmatprep.subr.bf16.mxu0 %v12401_v56  ;;  %v12441_v36 = vcombine.high %v395_v30, %v399_v31  ;;  %v12443_v37 = vcombine.high %v396_v63, %v400_v32  ;;  %v403_v38 = vld [vmem:[%s19788_s1 + $0x680] sm:$0xff]  ;;  %v404_v40 = vld [vmem:[%s19788_s1 + $0x688] sm:$0xff]  ;;  %v12440_v42 = vcombine.low %v395_v30, %v399_v31 }
  0x54   :  { %10231 = vmatprep.subr.bf16.mxu1 %v12403_v57  ;;  %v407_v39 = vld [vmem:[%s19788_s1 + $0x6a0] sm:$0xff]  ;;  %v408_v41 = vld [vmem:[%s19788_s1 + $0x6a8] sm:$0xff]  ;;  %v12442_v43 = vcombine.low %v396_v63, %v400_v32 }
  0x55   :  { %v12449_v45 = vcombine.high %v403_v38, %v407_v39  ;;  %v12451_v46 = vcombine.high %v404_v40, %v408_v41  ;;  %v411_v47 = vld [vmem:[%s19788_s1 + $0x6c0] sm:$0xff]  ;;  %v412_v49 = vld [vmem:[%s19788_s1 + $0x6c8] sm:$0xff]  ;;  %v12448_v51 = vcombine.low %v403_v38, %v407_v39  ;;  %v12450_v52 = vcombine.low %v404_v40, %v408_v41 }
  0x56   :  { %9699 = vmatpush1.bf16.msra.mxu0 %v12400_v0  ;;  %v415_v48 = vld [vmem:[%s19788_s1 + $0x6e0] sm:$0xff]  ;;  %v416_v50 = vld [vmem:[%s19788_s1 + $0x6e8] sm:$0xff]  ;;  %v14803_v41 = vpack.c.bf16 %v14572_v15, %v14572_v15 }
  0x57   :  { %10232 = vmatpush1.bf16.msra.mxu1 %v12402_v1  ;;  %9700 = vmatprep.subr.bf16.mxu0 %v12409_v2  ;;  %v12457_v54 = vcombine.high %v411_v47, %v415_v48  ;;  %v12459_v55 = vcombine.high %v412_v49, %v416_v50  ;;  %v419_v56 = vld [vmem:[%s19788_s1 + $0x700] sm:$0xff]  ;;  %v420_v58 = vld [vmem:[%s19788_s1 + $0x708] sm:$0xff]  ;;  %v12456_v61 = vcombine.low %v411_v47, %v415_v48 }
  0x58   :  { %10233 = vmatprep.subr.bf16.mxu1 %v12411_v3  ;;  %v423_v57 = vld [vmem:[%s19788_s1 + $0x720] sm:$0xff]  ;;  %v424_v60 = vld [vmem:[%s19788_s1 + $0x728] sm:$0xff]  ;;  %v12458_v62 = vcombine.low %v412_v49, %v416_v50 }
  0x59   :  { %v12465_v0 = vcombine.high %v419_v56, %v423_v57  ;;  %v12467_v1 = vcombine.high %v420_v58, %v424_v60  ;;  %v427_v2 = vld [vmem:[%s19788_s1 + $0x740] sm:$0xff]  ;;  %v428_v4 = vld [vmem:[%s19788_s1 + $0x748] sm:$0xff]  ;;  %v12464_v6 = vcombine.low %v419_v56, %v423_v57  ;;  %v12466_v7 = vcombine.low %v420_v58, %v424_v60 }
  0x5a   :  { %9701 = vmatpush1.bf16.msra.mxu0 %v12408_v8  ;;  %v431_v3 = vld [vmem:[%s19788_s1 + $0x760] sm:$0xff]  ;;  %v432_v5 = vld [vmem:[%s19788_s1 + $0x768] sm:$0xff] }
  0x5b   :  { %10234 = vmatpush1.bf16.msra.mxu1 %v12410_v10  ;;  %9702 = vmatprep.subr.bf16.mxu0 %v12417_v11  ;;  %v12473_v8 = vcombine.high %v427_v2, %v431_v3  ;;  %v12475_v10 = vcombine.high %v428_v4, %v432_v5  ;;  %v435_v11 = vld [vmem:[%s19788_s1 + $0x780] sm:$0xff]  ;;  %v436_v13 = vld [vmem:[%s19788_s1 + $0x788] sm:$0xff]  ;;  %v12472_v14 = vcombine.low %v427_v2, %v431_v3 }
  0x5c   :  { %10235 = vmatprep.subr.bf16.mxu1 %v12419_v12  ;;  %v439_v12 = vld [vmem:[%s19788_s1 + $0x7a0] sm:$0xff]  ;;  %v440_v59 = vld [vmem:[%s19788_s1 + $0x7a8] sm:$0xff]  ;;  %v12474_v16 = vcombine.low %v428_v4, %v432_v5 }
  0x5d   :  { %v444_v21 = vld [vmem:[%s19788_s1 + $0x7c8] sm:$0xff]  ;;  %v12480_v24 = vcombine.low %v435_v11, %v439_v12  ;;  %v455_v30 = vld [vmem:[%s19788_s1 + $0x820] sm:$0xff] }
  0x5e   :  { %9703 = vmatpush1.bf16.msra.mxu0 %v12416_v17  ;;  %v12481_v17 = vcombine.high %v435_v11, %v439_v12  ;;  %v448_v22 = vld [vmem:[%s19788_s1 + $0x7e8] sm:$0xff]  ;;  %v459_v38 = vld [vmem:[%s19788_s1 + $0x840] sm:$0xff] }
  0x5f   :  { %10236 = vmatpush1.bf16.msra.mxu1 %v12418_v18  ;;  %9704 = vmatprep.subr.bf16.mxu0 %v12425_v19  ;;  %v12483_v18 = vcombine.high %v436_v13, %v440_v59  ;;  %v443_v19 = vld [vmem:[%s19788_s1 + $0x7c0] sm:$0xff]  ;;  %v14775_v23 = vld [vmem:[%s19787_s0 + $0x8] sm:$0xff] }
  0x60   :  { %10237 = vmatprep.subr.bf16.mxu1 %v12427_v20  ;;  %v447_v20 = vld [vmem:[%s19788_s1 + $0x7e0] sm:$0xff]  ;;  %v14785_v31 = vrot.slane %v14775_v23, %v14432_v53  ;;  %v452_v63 = vld [vmem:[%s19788_s1 + $0x808] sm:$0xff] }
  0x61   :  { %v456_v32 = vld [vmem:[%s19788_s1 + $0x828] sm:$0xff]  ;;  %v463_v39 = vld [vmem:[%s19788_s1 + $0x860] sm:$0xff] }
  0x62   :  { %9705 = vmatpush1.bf16.msra.mxu0 %v12424_v26  ;;  %v12482_v26 = vcombine.low %v436_v13, %v440_v59  ;;  %v68_v40 = vcombine.high %v14785_v31, %v14785_v31  ;;  %v12505_v47 = vcombine.high %v459_v38, %v463_v39  ;;  %v467_v15 = vld [vmem:[%s19788_s1 + $0x880] sm:$0xff] }
  0x63   :  { %10238 = vmatpush1.bf16.msra.mxu1 %v12426_v27  ;;  %9706 = vmatprep.subr.bf16.mxu0 %v12433_v28  ;;  %v12489_v27 = vcombine.high %v443_v19, %v447_v20  ;;  %v12491_v28 = vcombine.high %v444_v21, %v448_v22  ;;  %v471_v49 = vld [vmem:[%s19788_s1 + $0x8a0] sm:$0xff] }
  0x64   :  { %10239 = vmatprep.subr.bf16.mxu1 %v12435_v29  ;;  %v451_v29 = vld [vmem:[%s19788_s1 + $0x800] sm:$0xff]  ;;  %v14817_v50 = vpack.c.bf16 %v68_v40, %v68_v40  ;;  %v12513_v56 = vcombine.high %v467_v15, %v471_v49 }
  0x65   :  { %v475_v58 = vld [vmem:[%s19788_s1 + $0x8c0] sm:$0xff] }
  0x66   :  { %9707 = vmatpush1.bf16.msra.mxu0 %v12432_v34  ;;  %v12488_v34 = vcombine.low %v443_v19, %v447_v20  ;;  %v479_v60 = vld [vmem:[%s19788_s1 + $0x8e0] sm:$0xff] }
  0x67   :  { %10240 = vmatpush1.bf16.msra.mxu1 %v12434_v35  ;;  %9708 = vmatprep.subr.bf16.mxu0 %v12441_v36  ;;  %v12490_v35 = vcombine.low %v444_v21, %v448_v22  ;;  %v12497_v36 = vcombine.high %v451_v29, %v455_v30  ;;  %v12521_v2 = vcombine.high %v475_v58, %v479_v60  ;;  %v483_v4 = vld [vmem:[%s19788_s1 + $0x900] sm:$0xff] }
  0x68   :  { %10241 = vmatprep.subr.bf16.mxu1 %v12443_v37  ;;  %v12499_v37 = vcombine.high %v452_v63, %v456_v32  ;;  %v487_v5 = vld [vmem:[%s19788_s1 + $0x920] sm:$0xff] }
  0x69   :  { %v12529_v11 = vcombine.high %v483_v4, %v487_v5  ;;  %v491_v13 = vld [vmem:[%s19788_s1 + $0x940] sm:$0xff] }
  0x6a   :  { %9709 = vmatpush1.bf16.msra.mxu0 %v12440_v42  ;;  %v460_v42 = vld [vmem:[%s19788_s1 + $0x848] sm:$0xff]  ;;  %v495_v59 = vld [vmem:[%s19788_s1 + $0x960] sm:$0xff] }
  0x6b   :  { %10242 = vmatpush1.bf16.msra.mxu1 %v12442_v43  ;;  %9710 = vmatprep.subr.bf16.mxu0 %v12449_v45  ;;  %v464_v43 = vld [vmem:[%s19788_s1 + $0x868] sm:$0xff]  ;;  %v12496_v45 = vcombine.low %v451_v29, %v455_v30  ;;  %v12537_v19 = vcombine.high %v491_v13, %v495_v59  ;;  %v499_v21 = vld [vmem:[%s19788_s1 + $0x980] sm:$0xff] }
  0x6c   :  { %10243 = vmatprep.subr.bf16.mxu1 %v12451_v46  ;;  %v12498_v46 = vcombine.low %v452_v63, %v456_v32  ;;  %v12507_v48 = vcombine.high %v460_v42, %v464_v43  ;;  %v503_v22 = vld [vmem:[%s19788_s1 + $0x9a0] sm:$0xff] }
  0x6d   :  { %v12545_v29 = vcombine.high %v499_v21, %v503_v22  ;;  %v507_v63 = vld [vmem:[%s19788_s1 + $0x9c0] sm:$0xff] }
  0x6e   :  { %9711 = vmatpush1.bf16.msra.mxu0 %v12448_v51  ;;  %v468_v51 = vld [vmem:[%s19788_s1 + $0x888] sm:$0xff]  ;;  %v511_v32 = vld [vmem:[%s19788_s1 + $0x9e0] sm:$0xff] }
  0x6f   :  { %10244 = vmatpush1.bf16.msra.mxu1 %v12450_v52  ;;  %9712 = vmatprep.subr.bf16.mxu0 %v12457_v54  ;;  %v472_v52 = vld [vmem:[%s19788_s1 + $0x8a8] sm:$0xff]  ;;  %v12504_v54 = vcombine.low %v459_v38, %v463_v39  ;;  %v12553_v38 = vcombine.high %v507_v63, %v511_v32  ;;  %v515_v40 = vld [vmem:[%s19788_s1 + $0xa00] sm:$0xff] }
  0x70   :  { %10245 = vmatprep.subr.bf16.mxu1 %v12459_v55  ;;  %v12506_v55 = vcombine.low %v460_v42, %v464_v43  ;;  %v12515_v57 = vcombine.high %v468_v51, %v472_v52  ;;  %v519_v42 = vld [vmem:[%s19788_s1 + $0xa20] sm:$0xff]  ;;  %v516_v43 = vld [vmem:[%s19788_s1 + $0xa08] sm:$0xff] }
  0x72   :  { %9713 = vmatpush1.bf16.msra.mxu0 %v12456_v61  ;;  %v476_v61 = vld [vmem:[%s19788_s1 + $0x8c8] sm:$0xff] }
  0x73   :  { %10246 = vmatpush1.bf16.msra.mxu1 %v12458_v62  ;;  %9714 = vmatprep.subr.bf16.mxu0 %v12465_v0  ;;  %v480_v62 = vld [vmem:[%s19788_s1 + $0x8e8] sm:$0xff]  ;;  %v12512_v0 = vcombine.low %v467_v15, %v471_v49  ;;  %v523_v49 = vld [vmem:[%s19788_s1 + $0xa40] sm:$0xff] }
  0x74   :  { %10247 = vmatprep.subr.bf16.mxu1 %v12467_v1  ;;  %v12514_v1 = vcombine.low %v468_v51, %v472_v52  ;;  %v12523_v3 = vcombine.high %v476_v61, %v480_v62  ;;  %v527_v51 = vld [vmem:[%s19788_s1 + $0xa60] sm:$0xff]  ;;  %v524_v52 = vld [vmem:[%s19788_s1 + $0xa48] sm:$0xff] }
  0x76   :  { %9715 = vmatpush1.bf16.msra.mxu0 %v12464_v6  ;;  %v484_v6 = vld [vmem:[%s19788_s1 + $0x908] sm:$0xff] }
  0x77   :  { %10248 = vmatpush1.bf16.msra.mxu1 %v12466_v7  ;;  %9716 = vmatprep.subr.bf16.mxu0 %v12473_v8  ;;  %v488_v7 = vld [vmem:[%s19788_s1 + $0x928] sm:$0xff]  ;;  %v12520_v8 = vcombine.low %v475_v58, %v479_v60  ;;  %v531_v60 = vld [vmem:[%s19788_s1 + $0xa80] sm:$0xff] }
  0x78   :  { %10249 = vmatprep.subr.bf16.mxu1 %v12475_v10  ;;  %v12522_v10 = vcombine.low %v476_v61, %v480_v62  ;;  %v12531_v12 = vcombine.high %v484_v6, %v488_v7  ;;  %v535_v61 = vld [vmem:[%s19788_s1 + $0xaa0] sm:$0xff]  ;;  %v532_v62 = vld [vmem:[%s19788_s1 + $0xa88] sm:$0xff] }
  0x7a   :  { %9717 = vmatpush1.bf16.msra.mxu0 %v12472_v14  ;;  %v492_v14 = vld [vmem:[%s19788_s1 + $0x948] sm:$0xff] }
  0x7b   :  { %10250 = vmatpush1.bf16.msra.mxu1 %v12474_v16  ;;  %9718 = vmatprep.subr.bf16.mxu0 %v12481_v17  ;;  %v496_v16 = vld [vmem:[%s19788_s1 + $0x968] sm:$0xff]  ;;  %v12528_v17 = vcombine.low %v483_v4, %v487_v5  ;;  %v539_v5 = vld [vmem:[%s19788_s1 + $0xac0] sm:$0xff] }
  0x7c   :  { %10251 = vmatprep.subr.bf16.mxu1 %v12483_v18  ;;  %v12530_v18 = vcombine.low %v484_v6, %v488_v7  ;;  %v12539_v20 = vcombine.high %v492_v14, %v496_v16  ;;  %v543_v6 = vld [vmem:[%s19788_s1 + $0xae0] sm:$0xff]  ;;  %v540_v7 = vld [vmem:[%s19788_s1 + $0xac8] sm:$0xff] }
  0x7e   :  { %9719 = vmatpush1.bf16.msra.mxu0 %v12480_v24  ;;  %v500_v24 = vld [vmem:[%s19788_s1 + $0x988] sm:$0xff] }
  0x7f   :  { %10252 = vmatpush1.bf16.msra.mxu1 %v12482_v26  ;;  %9720 = vmatprep.subr.bf16.mxu0 %v12489_v27  ;;  %v504_v26 = vld [vmem:[%s19788_s1 + $0x9a8] sm:$0xff]  ;;  %v12536_v27 = vcombine.low %v491_v13, %v495_v59  ;;  %v547_v59 = vld [vmem:[%s19788_s1 + $0xb00] sm:$0xff] }
  0x80   :  { %10253 = vmatprep.subr.bf16.mxu1 %v12491_v28  ;;  %v12538_v28 = vcombine.low %v492_v14, %v496_v16  ;;  %v12547_v30 = vcombine.high %v500_v24, %v504_v26  ;;  %v551_v14 = vld [vmem:[%s19788_s1 + $0xb20] sm:$0xff]  ;;  %v548_v16 = vld [vmem:[%s19788_s1 + $0xb08] sm:$0xff] }
  0x82   :  { %9721 = vmatpush1.bf16.msra.mxu0 %v12488_v34  ;;  %v508_v34 = vld [vmem:[%s19788_s1 + $0x9c8] sm:$0xff] }
  0x83   :  { %10254 = vmatpush1.bf16.msra.mxu1 %v12490_v35  ;;  %9731 = vmatprep.subr.bf16.mxu0 %v12497_v36  ;;  %v512_v35 = vld [vmem:[%s19788_s1 + $0x9e8] sm:$0xff]  ;;  %v12544_v36 = vcombine.low %v499_v21, %v503_v22  ;;  %v555_v22 = vld [vmem:[%s19788_s1 + $0xb40] sm:$0xff] }
  0x84   :  { %10264 = vmatprep.subr.bf16.mxu1 %v12499_v37  ;;  %v12546_v37 = vcombine.low %v500_v24, %v504_v26  ;;  %v12555_v39 = vcombine.high %v508_v34, %v512_v35  ;;  %v559_v24 = vld [vmem:[%s19788_s1 + $0xb60] sm:$0xff]  ;;  %v556_v26 = vld [vmem:[%s19788_s1 + $0xb48] sm:$0xff] }
  0x85   :  { %9723 = vmatmul.mubr.bf16.vlgmr.msra.gmra.mrb[0].mxu0 %v14803_v41 }
  0x86   :  { %9732 = vmatpush1.bf16.msra.mxu0 %v12496_v45  ;;  %10256 = vmatmul.mubr.bf16.vlgmr.msra.gmra.mrb[0].mxu1 %v14803_v41  ;;  %v520_v45 = vld [vmem:[%s19788_s1 + $0xa28] sm:$0xff] }
  0x87   :  { %10265 = vmatpush1.bf16.msra.mxu1 %v12498_v46  ;;  %9733 = vmatprep.subr.bf16.mxu0 %v12505_v47  ;;  %v12552_v46 = vcombine.low %v507_v63, %v511_v32  ;;  %v12554_v47 = vcombine.low %v508_v34, %v512_v35  ;;  %v12563_v15 = vcombine.high %v516_v43, %v520_v45  ;;  %v563_v32 = vld [vmem:[%s19788_s1 + $0xb80] sm:$0xff]  ;;  %v564_v35 = vld [vmem:[%s19788_s1 + $0xb88] sm:$0xff] }
  0x88   :  { %10266 = vmatprep.subr.bf16.mxu1 %v12507_v48  ;;  %9763 = vmatprep.mubr.bf16.mxu0 %v14817_v50  ;;  %v12561_v48 = vcombine.high %v515_v40, %v519_v42  ;;  %v567_v34 = vld [vmem:[%s19788_s1 + $0xba0] sm:$0xff] }
  0x89   :  { %10296 = vmatprep.mubr.bf16.mxu1 %v14817_v50 }
  0x8a   :  { %9734 = vmatpush1.bf16.msra.mxu0 %v12504_v54  ;;  %v528_v54 = vld [vmem:[%s19788_s1 + $0xa68] sm:$0xff] }
  0x8b   :  { %10267 = vmatpush1.bf16.msra.mxu1 %v12506_v55  ;;  %9735 = vmatprep.subr.bf16.mxu0 %v12513_v56  ;;  %v12560_v55 = vcombine.low %v515_v40, %v519_v42  ;;  %v12562_v56 = vcombine.low %v516_v43, %v520_v45  ;;  %v12571_v58 = vcombine.high %v524_v52, %v528_v54  ;;  %v571_v42 = vld [vmem:[%s19788_s1 + $0xbc0] sm:$0xff] }
  0x8c   :  { %10268 = vmatprep.subr.bf16.mxu1 %v12515_v57  ;;  %v12569_v57 = vcombine.high %v523_v49, %v527_v51  ;;  %v575_v43 = vld [vmem:[%s19788_s1 + $0xbe0] sm:$0xff]  ;;  %v53_v45 = vcombine.high %v14775_v23, %v14775_v23 }
  0x8d   :  { %v579_v23 = vld [vmem:[%s19788_s1 + $0xc00] sm:$0xff] }
  0x8e   :  { %9736 = vmatpush1.bf16.msra.mxu0 %v12512_v0  ;;  %v536_v0 = vld [vmem:[%s19788_s1 + $0xaa8] sm:$0xff] }
  0x8f   :  { %10269 = vmatpush1.bf16.msra.mxu1 %v12514_v1  ;;  %9737 = vmatprep.subr.bf16.mxu0 %v12521_v2  ;;  %v12568_v1 = vcombine.low %v523_v49, %v527_v51  ;;  %v12570_v2 = vcombine.low %v524_v52, %v528_v54  ;;  %v12579_v4 = vcombine.high %v532_v62, %v536_v0  ;;  %v583_v52 = vld [vmem:[%s19788_s1 + $0xc20] sm:$0xff] }
  0x90   :  { %10270 = vmatprep.subr.bf16.mxu1 %v12523_v3  ;;  %v12577_v3 = vcombine.high %v531_v60, %v535_v61  ;;  %v12617_v49 = vcombine.high %v571_v42, %v575_v43  ;;  %v14994_v54 = vrot.slane %v53_v45, %v14432_v53 }
  0x92   :  { %9738 = vmatpush1.bf16.msra.mxu0 %v12520_v8  ;;  %v544_v8 = vld [vmem:[%s19788_s1 + $0xae8] sm:$0xff] }
  0x93   :  { %10271 = vmatpush1.bf16.msra.mxu1 %v12522_v10  ;;  %9739 = vmatprep.subr.bf16.mxu0 %v12529_v11  ;;  %v12576_v10 = vcombine.low %v531_v60, %v535_v61  ;;  %v12578_v11 = vcombine.low %v532_v62, %v536_v0  ;;  %v12587_v13 = vcombine.high %v540_v7, %v544_v8  ;;  %v587_v62 = vld [vmem:[%s19788_s1 + $0xc40] sm:$0xff] }
  0x94   :  { %10272 = vmatprep.subr.bf16.mxu1 %v12531_v12  ;;  %v12585_v12 = vcombine.high %v539_v5, %v543_v6  ;;  %v12625_v60 = vcombine.high %v579_v23, %v583_v52  ;;  %v591_v0 = vld [vmem:[%s19788_s1 + $0xc60] sm:$0xff] }
  0x96   :  { %9740 = vmatpush1.bf16.msra.mxu0 %v12528_v17  ;;  %v552_v17 = vld [vmem:[%s19788_s1 + $0xb28] sm:$0xff] }
  0x97   :  { %10273 = vmatpush1.bf16.msra.mxu1 %v12530_v18  ;;  %9741 = vmatprep.subr.bf16.mxu0 %v12537_v19  ;;  %v12584_v18 = vcombine.low %v539_v5, %v543_v6  ;;  %v12586_v19 = vcombine.low %v540_v7, %v544_v8  ;;  %v12595_v21 = vcombine.high %v548_v16, %v552_v17 }
  0x98   :  { %10274 = vmatprep.subr.bf16.mxu1 %v12539_v20  ;;  %v12593_v20 = vcombine.high %v547_v59, %v551_v14  ;;  %v12624_v5 = vcombine.low %v579_v23, %v583_v52  ;;  %v12633_v7 = vcombine.high %v587_v62, %v591_v0 }
  0x9a   :  { %9742 = vmatpush1.bf16.msra.mxu0 %v12536_v27  ;;  %v560_v27 = vld [vmem:[%s19788_s1 + $0xb68] sm:$0xff] }
  0x9b   :  { %10275 = vmatpush1.bf16.msra.mxu1 %v12538_v28  ;;  %9743 = vmatprep.subr.bf16.mxu0 %v12545_v29  ;;  %v12592_v28 = vcombine.low %v547_v59, %v551_v14  ;;  %v12594_v29 = vcombine.low %v548_v16, %v552_v17  ;;  %v12603_v63 = vcombine.high %v556_v26, %v560_v27 }
  0x9c   :  { %10276 = vmatprep.subr.bf16.mxu1 %v12547_v30  ;;  %v12601_v30 = vcombine.high %v555_v22, %v559_v24  ;;  %v12632_v59 = vcombine.low %v587_v62, %v591_v0 }
  0x9e   :  { %9744 = vmatpush1.bf16.msra.mxu0 %v12544_v36  ;;  %v568_v36 = vld [vmem:[%s19788_s1 + $0xba8] sm:$0xff] }
  0x9f   :  { %10277 = vmatpush1.bf16.msra.mxu1 %v12546_v37  ;;  %9745 = vmatprep.subr.bf16.mxu0 %v12553_v38  ;;  %v12600_v37 = vcombine.low %v555_v22, %v559_v24  ;;  %v12602_v38 = vcombine.low %v556_v26, %v560_v27  ;;  %v12611_v40 = vcombine.high %v564_v35, %v568_v36 }
  0xa0   :  { %10278 = vmatprep.subr.bf16.mxu1 %v12555_v39  ;;  %v12609_v39 = vcombine.high %v563_v32, %v567_v34 }
  0xa2   :  { %9746 = vmatpush1.bf16.msra.mxu0 %v12552_v46  ;;  %v572_v46 = vld [vmem:[%s19788_s1 + $0xbc8] sm:$0xff] }
  0xa3   :  { %10279 = vmatpush1.bf16.msra.mxu1 %v12554_v47  ;;  %9747 = vmatprep.subr.bf16.mxu0 %v12561_v48  ;;  %v576_v47 = vld [vmem:[%s19788_s1 + $0xbe8] sm:$0xff]  ;;  %v12608_v48 = vcombine.low %v563_v32, %v567_v34 }
  0xa4   :  { %10280 = vmatprep.subr.bf16.mxu1 %v12563_v15  ;;  %v12610_v15 = vcombine.low %v564_v35, %v568_v36  ;;  %v12619_v51 = vcombine.high %v572_v46, %v576_v47 }
  0xa6   :  { %9748 = vmatpush1.bf16.msra.mxu0 %v12560_v55  ;;  %v580_v55 = vld [vmem:[%s19788_s1 + $0xc08] sm:$0xff] }
  0xa7   :  { %10281 = vmatpush1.bf16.msra.mxu1 %v12562_v56  ;;  %9749 = vmatprep.subr.bf16.mxu0 %v12569_v57  ;;  %v584_v56 = vld [vmem:[%s19788_s1 + $0xc28] sm:$0xff]  ;;  %v12616_v57 = vcombine.low %v571_v42, %v575_v43 }
  0xa8   :  { %10282 = vmatprep.subr.bf16.mxu1 %v12571_v58  ;;  %v12618_v58 = vcombine.low %v572_v46, %v576_v47  ;;  %v12627_v61 = vcombine.high %v580_v55, %v584_v56  ;;  %v12626_v6 = vcombine.low %v580_v55, %v584_v56  ;;  %v627_v47 = vld [vmem:[%s19788_s1 + $0xd80] sm:$0xff] }
  0xa9   :  { %v635_v56 = vld [vmem:[%s19788_s1 + $0xdc0] sm:$0xff] }
  0xaa   :  { %9750 = vmatpush1.bf16.msra.mxu0 %v12568_v1  ;;  %v69_v1 = vcombine.high %v14994_v54, %v14994_v54 }
  0xab   :  { %10283 = vmatpush1.bf16.msra.mxu1 %v12570_v2  ;;  %9751 = vmatprep.subr.bf16.mxu0 %v12577_v3  ;;  %v15012_v2 = vpack.c.bf16 %v14785_v31, %v14785_v31  ;;  %v588_v3 = vld [vmem:[%s19788_s1 + $0xc48] sm:$0xff]  ;;  %v595_v31 = vld [vmem:[%s19788_s1 + $0xc80] sm:$0xff] }
  0xac   :  { %10284 = vmatprep.subr.bf16.mxu1 %v12579_v4  ;;  %v592_v4 = vld [vmem:[%s19788_s1 + $0xc68] sm:$0xff] }
  0xad   :  { %v12635_v8 = vcombine.high %v588_v3, %v592_v4  ;;  %v12634_v14 = vcombine.low %v588_v3, %v592_v4  ;;  %v643_v3 = vld [vmem:[%s19788_s1 + $0xe00] sm:$0xff] }
  0xae   :  { %9752 = vmatpush1.bf16.msra.mxu0 %v12576_v10  ;;  %v599_v10 = vld [vmem:[%s19788_s1 + $0xca0] sm:$0xff] }
  0xaf   :  { %10285 = vmatpush1.bf16.msra.mxu1 %v12578_v11  ;;  %9753 = vmatprep.subr.bf16.mxu0 %v12585_v12  ;;  %v15026_v11 = vpack.c.bf16 %v69_v1, %v69_v1  ;;  %v596_v12 = vld [vmem:[%s19788_s1 + $0xc88] sm:$0xff]  ;;  %v12641_v16 = vcombine.high %v595_v31, %v599_v10  ;;  %v12640_v22 = vcombine.low %v595_v31, %v599_v10  ;;  %v647_v4 = vld [vmem:[%s19788_s1 + $0xe20] sm:$0xff] }
  0xb0   :  { %10286 = vmatprep.subr.bf16.mxu1 %v12587_v13  ;;  %v600_v13 = vld [vmem:[%s19788_s1 + $0xca8] sm:$0xff]  ;;  %v12689_v31 = vcombine.high %v643_v3, %v647_v4 }
  0xb1   :  { %v12643_v17 = vcombine.high %v596_v12, %v600_v13  ;;  %v12642_v24 = vcombine.low %v596_v12, %v600_v13  ;;  %v651_v12 = vld [vmem:[%s19788_s1 + $0xe40] sm:$0xff] }
  0xb2   :  { %9754 = vmatpush1.bf16.msra.mxu0 %v12584_v18  ;;  %v603_v18 = vld [vmem:[%s19788_s1 + $0xcc0] sm:$0xff] }
  0xb3   :  { %10287 = vmatpush1.bf16.msra.mxu1 %v12586_v19  ;;  %9755 = vmatprep.subr.bf16.mxu0 %v12593_v20  ;;  %v607_v19 = vld [vmem:[%s19788_s1 + $0xce0] sm:$0xff]  ;;  %v604_v20 = vld [vmem:[%s19788_s1 + $0xcc8] sm:$0xff] }
  0xb4   :  { %10288 = vmatprep.subr.bf16.mxu1 %v12595_v21  ;;  %v608_v21 = vld [vmem:[%s19788_s1 + $0xce8] sm:$0xff]  ;;  %v12649_v26 = vcombine.high %v603_v18, %v607_v19  ;;  %v12648_v32 = vcombine.low %v603_v18, %v607_v19  ;;  %v655_v13 = vld [vmem:[%s19788_s1 + $0xe60] sm:$0xff] }
  0xb5   :  { %v12651_v27 = vcombine.high %v604_v20, %v608_v21  ;;  %v12650_v34 = vcombine.low %v604_v20, %v608_v21  ;;  %v12697_v18 = vcombine.high %v651_v12, %v655_v13  ;;  %v659_v20 = vld [vmem:[%s19788_s1 + $0xe80] sm:$0xff] }
  0xb6   :  { %9756 = vmatpush1.bf16.msra.mxu0 %v12592_v28  ;;  %v611_v28 = vld [vmem:[%s19788_s1 + $0xd00] sm:$0xff] }
  0xb7   :  { %10289 = vmatpush1.bf16.msra.mxu1 %v12594_v29  ;;  %9757 = vmatprep.subr.bf16.mxu0 %v12601_v30  ;;  %v615_v29 = vld [vmem:[%s19788_s1 + $0xd20] sm:$0xff]  ;;  %v612_v30 = vld [vmem:[%s19788_s1 + $0xd08] sm:$0xff] }
  0xb8   :  { %10290 = vmatprep.subr.bf16.mxu1 %v12603_v63  ;;  %v616_v63 = vld [vmem:[%s19788_s1 + $0xd28] sm:$0xff]  ;;  %v12657_v35 = vcombine.high %v611_v28, %v615_v29  ;;  %v12656_v42 = vcombine.low %v611_v28, %v615_v29  ;;  %v663_v21 = vld [vmem:[%s19788_s1 + $0xea0] sm:$0xff] }
  0xb9   :  { %v12659_v36 = vcombine.high %v612_v30, %v616_v63  ;;  %v12658_v43 = vcombine.low %v612_v30, %v616_v63  ;;  %v12705_v28 = vcombine.high %v659_v20, %v663_v21  ;;  %v667_v30 = vld [vmem:[%s19788_s1 + $0xec0] sm:$0xff] }
  0xba   :  { %9758 = vmatpush1.bf16.msra.mxu0 %v12600_v37  ;;  %v619_v37 = vld [vmem:[%s19788_s1 + $0xd40] sm:$0xff] }
  0xbb   :  { %10291 = vmatpush1.bf16.msra.mxu1 %v12602_v38  ;;  %9759 = vmatprep.subr.bf16.mxu0 %v12609_v39  ;;  %v623_v38 = vld [vmem:[%s19788_s1 + $0xd60] sm:$0xff]  ;;  %v620_v39 = vld [vmem:[%s19788_s1 + $0xd48] sm:$0xff] }
  0xbc   :  { %10292 = vmatprep.subr.bf16.mxu1 %v12611_v40  ;;  %v624_v40 = vld [vmem:[%s19788_s1 + $0xd68] sm:$0xff]  ;;  %v12665_v45 = vcombine.high %v619_v37, %v623_v38  ;;  %v671_v63 = vld [vmem:[%s19788_s1 + $0xee0] sm:$0xff] }
  0xbd   :  { %v12667_v46 = vcombine.high %v620_v39, %v624_v40  ;;  %v12666_v23 = vcombine.low %v620_v39, %v624_v40  ;;  %v675_v39 = vld [vmem:[%s19788_s1 + $0xf00] sm:$0xff] }
  0xbe   :  { %9760 = vmatpush1.bf16.msra.mxu0 %v12608_v48  ;;  %v631_v48 = vld [vmem:[%s19788_s1 + $0xda0] sm:$0xff] }
  0xbf   :  { %10293 = vmatpush1.bf16.msra.mxu1 %v12610_v15  ;;  %9761 = vmatprep.subr.bf16.mxu0 %v12617_v49  ;;  %v628_v15 = vld [vmem:[%s19788_s1 + $0xd88] sm:$0xff]  ;;  %v12673_v52 = vcombine.high %v627_v47, %v631_v48  ;;  %v679_v40 = vld [vmem:[%s19788_s1 + $0xf20] sm:$0xff] }
  0xc0   :  { %10294 = vmatprep.subr.bf16.mxu1 %v12619_v51  ;;  %v632_v49 = vld [vmem:[%s19788_s1 + $0xda8] sm:$0xff]  ;;  %v12664_v51 = vcombine.low %v619_v37, %v623_v38  ;;  %v12713_v37 = vcombine.high %v667_v30, %v671_v63 }
  0xc1   :  { %v12675_v55 = vcombine.high %v628_v15, %v632_v49  ;;  %v12674_v62 = vcombine.low %v628_v15, %v632_v49  ;;  %v683_v15 = vld [vmem:[%s19788_s1 + $0xf40] sm:$0xff] }
  0xc2   :  { %9762 = vmatpush1.bf16.msra.mxu0 %v12616_v57  ;;  %v639_v57 = vld [vmem:[%s19788_s1 + $0xde0] sm:$0xff] }
  0xc3   :  { %10295 = vmatpush1.bf16.msra.mxu1 %v12618_v58  ;;  %9772 = vmatprep.subr.bf16.mxu0 %v12625_v60  ;;  %v636_v58 = vld [vmem:[%s19788_s1 + $0xdc8] sm:$0xff]  ;;  %v12681_v0 = vcombine.high %v635_v56, %v639_v57  ;;  %v687_v49 = vld [vmem:[%s19788_s1 + $0xf60] sm:$0xff] }
  0xc4   :  { %10305 = vmatprep.subr.bf16.mxu1 %v12627_v61  ;;  %v640_v60 = vld [vmem:[%s19788_s1 + $0xde8] sm:$0xff]  ;;  %v12672_v61 = vcombine.low %v627_v47, %v631_v48  ;;  %v12721_v47 = vcombine.high %v675_v39, %v679_v40 }
  0xc5   :  { %9764 = vmatmul.mubr.bf16.vlgmr.msra.gmra.mrb[0].mxu0 %v15012_v2  ;;  %v12683_v1 = vcombine.high %v636_v58, %v640_v60 }
  0xc6   :  { %9773 = vmatpush1.bf16.msra.mxu0 %v12624_v5  ;;  %10297 = vmatmul.mubr.bf16.vlgmr.msra.gmra.mrb[0].mxu1 %v15012_v2  ;;  %v644_v5 = vld [vmem:[%s19788_s1 + $0xe08] sm:$0xff] }
  0xc7   :  { %10306 = vmatpush1.bf16.msra.mxu1 %v12626_v6  ;;  %9774 = vmatprep.subr.bf16.mxu0 %v12633_v7  ;;  %v648_v6 = vld [vmem:[%s19788_s1 + $0xe28] sm:$0xff]  ;;  %v12680_v7 = vcombine.low %v635_v56, %v639_v57  ;;  %v12729_v56 = vcombine.high %v683_v15, %v687_v49 }
  0xc8   :  { %10307 = vmatprep.subr.bf16.mxu1 %v12635_v8  ;;  %9804 = vmatprep.mubr.bf16.mxu0 %v15026_v11  ;;  %v12682_v8 = vcombine.low %v636_v58, %v640_v60  ;;  %v12691_v10 = vcombine.high %v644_v5, %v648_v6  ;;  %v691_v58 = vld [vmem:[%s19788_s1 + $0xf80] sm:$0xff] }
  0xc9   :  { %10337 = vmatprep.mubr.bf16.mxu1 %v15026_v11  ;;  %v695_v60 = vld [vmem:[%s19788_s1 + $0xfa0] sm:$0xff] }
  0xca   :  { %9775 = vmatpush1.bf16.msra.mxu0 %v12632_v59  ;;  %v652_v59 = vld [vmem:[%s19788_s1 + $0xe48] sm:$0xff] }
  0xcb   :  { %10308 = vmatpush1.bf16.msra.mxu1 %v12634_v14  ;;  %9776 = vmatprep.subr.bf16.mxu0 %v12641_v16  ;;  %v656_v14 = vld [vmem:[%s19788_s1 + $0xe68] sm:$0xff]  ;;  %v12688_v16 = vcombine.low %v643_v3, %v647_v4  ;;  %v12737_v3 = vcombine.high %v691_v58, %v695_v60 }
  0xcc   :  { %10309 = vmatprep.subr.bf16.mxu1 %v12643_v17  ;;  %v12690_v17 = vcombine.low %v644_v5, %v648_v6  ;;  %v12699_v19 = vcombine.high %v652_v59, %v656_v14  ;;  %v699_v5 = vld [vmem:[%s19788_s1 + $0xfc0] sm:$0xff] }
  0xcd   :  { %v703_v6 = vld [vmem:[%s19788_s1 + $0xfe0] sm:$0xff] }
  0xce   :  { %9777 = vmatpush1.bf16.msra.mxu0 %v12640_v22  ;;  %v660_v22 = vld [vmem:[%s19788_s1 + $0xe88] sm:$0xff] }
  0xcf   :  { %10310 = vmatpush1.bf16.msra.mxu1 %v12642_v24  ;;  %9778 = vmatprep.subr.bf16.mxu0 %v12649_v26  ;;  %v664_v24 = vld [vmem:[%s19788_s1 + $0xea8] sm:$0xff]  ;;  %v12696_v26 = vcombine.low %v651_v12, %v655_v13  ;;  %v12745_v13 = vcombine.high %v699_v5, %v703_v6 }
  0xd0   :  { %10311 = vmatprep.subr.bf16.mxu1 %v12651_v27  ;;  %v12698_v27 = vcombine.low %v652_v59, %v656_v14  ;;  %v12707_v29 = vcombine.high %v660_v22, %v664_v24  ;;  %v707_v14 = vld [vmem:[%s19788_s1 + $0x1000] sm:$0xff] }
  0xd2   :  { %9779 = vmatpush1.bf16.msra.mxu0 %v12648_v32  ;;  %v668_v32 = vld [vmem:[%s19788_s1 + $0xec8] sm:$0xff] }
  0xd3   :  { %10312 = vmatpush1.bf16.msra.mxu1 %v12650_v34  ;;  %9780 = vmatprep.subr.bf16.mxu0 %v12657_v35  ;;  %v672_v34 = vld [vmem:[%s19788_s1 + $0xee8] sm:$0xff]  ;;  %v12704_v35 = vcombine.low %v659_v20, %v663_v21  ;;  %v12744_v20 = vcombine.low %v699_v5, %v703_v6 }
  0xd4   :  { %10313 = vmatprep.subr.bf16.mxu1 %v12659_v36  ;;  %v12706_v36 = vcombine.low %v660_v22, %v664_v24  ;;  %v12715_v38 = vcombine.high %v668_v32, %v672_v34  ;;  %v748_v5 = vld [vmem:[%s19788_s1 + $0x1148] sm:$0xff] }
  0xd5   :  { %v752_v6 = vld [vmem:[%s19788_s1 + $0x1168] sm:$0xff] }
  0xd6   :  { %9781 = vmatpush1.bf16.msra.mxu0 %v12656_v42  ;;  %v676_v42 = vld [vmem:[%s19788_s1 + $0xf08] sm:$0xff] }
  0xd7   :  { %10314 = vmatpush1.bf16.msra.mxu1 %v12658_v43  ;;  %9782 = vmatprep.subr.bf16.mxu0 %v12665_v45  ;;  %v680_v43 = vld [vmem:[%s19788_s1 + $0xf28] sm:$0xff]  ;;  %v12712_v45 = vcombine.low %v667_v30, %v671_v63 }
  0xd8   :  { %10315 = vmatprep.subr.bf16.mxu1 %v12667_v46  ;;  %v12714_v46 = vcombine.low %v668_v32, %v672_v34  ;;  %v12723_v48 = vcombine.high %v676_v42, %v680_v43  ;;  %v716_v30 = vld [vmem:[%s19788_s1 + $0x1048] sm:$0xff] }
  0xd9   :  { %v720_v63 = vld [vmem:[%s19788_s1 + $0x1068] sm:$0xff] }
  0xda   :  { %9783 = vmatpush1.bf16.msra.mxu0 %v12664_v51  ;;  %v684_v51 = vld [vmem:[%s19788_s1 + $0xf48] sm:$0xff] }
  0xdb   :  { %10316 = vmatpush1.bf16.msra.mxu1 %v12666_v23  ;;  %9784 = vmatprep.subr.bf16.mxu0 %v12673_v52  ;;  %v688_v23 = vld [vmem:[%s19788_s1 + $0xf68] sm:$0xff]  ;;  %v12720_v52 = vcombine.low %v675_v39, %v679_v40 }
  0xdc   :  { %10317 = vmatprep.subr.bf16.mxu1 %v12675_v55  ;;  %v12722_v55 = vcombine.low %v676_v42, %v680_v43  ;;  %v12731_v57 = vcombine.high %v684_v51, %v688_v23  ;;  %v724_v39 = vld [vmem:[%s19788_s1 + $0x1088] sm:$0xff]  ;;  %v12762_v43 = vcombine.low %v716_v30, %v720_v63 }
  0xdd   :  { %v728_v40 = vld [vmem:[%s19788_s1 + $0x10a8] sm:$0xff] }
  0xde   :  { %9785 = vmatpush1.bf16.msra.mxu0 %v12672_v61  ;;  %v692_v61 = vld [vmem:[%s19788_s1 + $0xf88] sm:$0xff] }
  0xdf   :  { %10318 = vmatpush1.bf16.msra.mxu1 %v12674_v62  ;;  %9786 = vmatprep.subr.bf16.mxu0 %v12681_v0  ;;  %v696_v62 = vld [vmem:[%s19788_s1 + $0xfa8] sm:$0xff]  ;;  %v12728_v0 = vcombine.low %v683_v15, %v687_v49 }
  0xe0   :  { %10319 = vmatprep.subr.bf16.mxu1 %v12683_v1  ;;  %v12730_v1 = vcombine.low %v684_v51, %v688_v23  ;;  %v12739_v4 = vcombine.high %v692_v61, %v696_v62  ;;  %v12738_v12 = vcombine.low %v692_v61, %v696_v62  ;;  %v732_v15 = vld [vmem:[%s19788_s1 + $0x10c8] sm:$0xff]  ;;  %v12770_v23 = vcombine.low %v724_v39, %v728_v40 }
  0xe1   :  { %v736_v49 = vld [vmem:[%s19788_s1 + $0x10e8] sm:$0xff] }
  0xe2   :  { %9787 = vmatpush1.bf16.msra.mxu0 %v12680_v7  ;;  %v700_v7 = vld [vmem:[%s19788_s1 + $0xfc8] sm:$0xff]  ;;  %v12778_v62 = vcombine.low %v732_v15, %v736_v49 }
  0xe3   :  { %10320 = vmatpush1.bf16.msra.mxu1 %v12682_v8  ;;  %9788 = vmatprep.subr.bf16.mxu0 %v12689_v31  ;;  %v704_v8 = vld [vmem:[%s19788_s1 + $0xfe8] sm:$0xff]  ;;  %v15197_v31 = vld [vmem:[%s19787_s0 + $0x10] sm:$0xff] }
  0xe4   :  { %10321 = vmatprep.subr.bf16.mxu1 %v12691_v10  ;;  %v12736_v10 = vcombine.low %v691_v58, %v695_v60  ;;  %v12747_v59 = vcombine.high %v700_v7, %v704_v8  ;;  %v12746_v21 = vcombine.low %v700_v7, %v704_v8  ;;  %v740_v58 = vld [vmem:[%s19788_s1 + $0x1108] sm:$0xff] }
  0xe5   :  { %v744_v60 = vld [vmem:[%s19788_s1 + $0x1128] sm:$0xff] }
  0xe6   :  { %9789 = vmatpush1.bf16.msra.mxu0 %v12688_v16  ;;  %v711_v16 = vld [vmem:[%s19788_s1 + $0x1020] sm:$0xff]  ;;  %v12786_v8 = vcombine.low %v740_v58, %v744_v60 }
  0xe7   :  { %10322 = vmatpush1.bf16.msra.mxu1 %v12690_v17  ;;  %9790 = vmatprep.subr.bf16.mxu0 %v12697_v18  ;;  %v15207_v17 = vrot.slane %v15197_v31, %v14432_v53  ;;  %v708_v18 = vld [vmem:[%s19788_s1 + $0x1008] sm:$0xff]  ;;  %v12753_v22 = vcombine.high %v707_v14, %v711_v16  ;;  %v12752_v32 = vcombine.low %v707_v14, %v711_v16 }
  0xe8   :  { %10323 = vmatprep.subr.bf16.mxu1 %v12699_v19  ;;  %v712_v19 = vld [vmem:[%s19788_s1 + $0x1028] sm:$0xff] }
  0xe9   :  { %v12755_v24 = vcombine.high %v708_v18, %v712_v19  ;;  %v12754_v34 = vcombine.low %v708_v18, %v712_v19  ;;  %v756_v14 = vld [vmem:[%s19788_s1 + $0x1188] sm:$0xff]  ;;  %v12794_v19 = vcombine.low %v748_v5, %v752_v6 }
  0xea   :  { %9791 = vmatpush1.bf16.msra.mxu0 %v12696_v26  ;;  %v715_v26 = vld [vmem:[%s19788_s1 + $0x1040] sm:$0xff]  ;;  %v760_v16 = vld [vmem:[%s19788_s1 + $0x11a8] sm:$0xff] }
  0xeb   :  { %10324 = vmatpush1.bf16.msra.mxu1 %v12698_v27  ;;  %9792 = vmatprep.subr.bf16.mxu0 %v12705_v28  ;;  %v719_v27 = vld [vmem:[%s19788_s1 + $0x1060] sm:$0xff]  ;;  %v85_v28 = vcombine.high %v15207_v17, %v15207_v17 }
  0xec   :  { %10325 = vmatprep.subr.bf16.mxu1 %v12707_v29  ;;  %v15225_v29 = vpack.c.bf16 %v14994_v54, %v14994_v54  ;;  %v723_v54 = vld [vmem:[%s19788_s1 + $0x1080] sm:$0xff]  ;;  %v12760_v42 = vcombine.low %v715_v26, %v719_v27 }
  0xee   :  { %9793 = vmatpush1.bf16.msra.mxu0 %v12704_v35  ;;  %v12761_v35 = vcombine.high %v715_v26, %v719_v27  ;;  %v764_v26 = vld [vmem:[%s19788_s1 + $0x11c8] sm:$0xff] }
  0xef   :  { %10326 = vmatpush1.bf16.msra.mxu1 %v12706_v36  ;;  %9794 = vmatprep.subr.bf16.mxu0 %v12713_v37  ;;  %v12763_v36 = vcombine.high %v716_v30, %v720_v63  ;;  %v727_v37 = vld [vmem:[%s19788_s1 + $0x10a0] sm:$0xff]  ;;  %v768_v27 = vld [vmem:[%s19788_s1 + $0x11e8] sm:$0xff]  ;;  %v12802_v30 = vcombine.low %v756_v14, %v760_v16 }
  0xf0   :  { %10327 = vmatprep.subr.bf16.mxu1 %v12715_v38  ;;  %v15239_v38 = vpack.c.bf16 %v85_v28, %v85_v28  ;;  %v12768_v51 = vcombine.low %v723_v54, %v727_v37 }
  0xf2   :  { %9795 = vmatpush1.bf16.msra.mxu0 %v12712_v45  ;;  %v12769_v45 = vcombine.high %v723_v54, %v727_v37  ;;  %v776_v54 = vld [vmem:[%s19788_s1 + $0x1228] sm:$0xff] }
  0xf3   :  { %10328 = vmatpush1.bf16.msra.mxu1 %v12714_v46  ;;  %9796 = vmatprep.subr.bf16.mxu0 %v12721_v47  ;;  %v12771_v46 = vcombine.high %v724_v39, %v728_v40  ;;  %v731_v47 = vld [vmem:[%s19788_s1 + $0x10c0] sm:$0xff]  ;;  %v12810_v39 = vcombine.low %v764_v26, %v768_v27 }
  0xf4   :  { %10329 = vmatprep.subr.bf16.mxu1 %v12723_v48  ;;  %v735_v48 = vld [vmem:[%s19788_s1 + $0x10e0] sm:$0xff] }
  0xf5   :  { %v12776_v61 = vcombine.low %v731_v47, %v735_v48 }
  0xf6   :  { %9797 = vmatpush1.bf16.msra.mxu0 %v12720_v52  ;;  %v12777_v52 = vcombine.high %v731_v47, %v735_v48  ;;  %v784_v47 = vld [vmem:[%s19788_s1 + $0x1268] sm:$0xff] }
  0xf7   :  { %10330 = vmatpush1.bf16.msra.mxu1 %v12722_v55  ;;  %9798 = vmatprep.subr.bf16.mxu0 %v12729_v56  ;;  %v12779_v55 = vcombine.high %v732_v15, %v736_v49  ;;  %v739_v56 = vld [vmem:[%s19788_s1 + $0x1100] sm:$0xff] }
  0xf8   :  { %10331 = vmatprep.subr.bf16.mxu1 %v12731_v57  ;;  %v743_v57 = vld [vmem:[%s19788_s1 + $0x1120] sm:$0xff] }
  0xf9   :  { %v12784_v7 = vcombine.low %v739_v56, %v743_v57 }
  0xfa   :  { %9799 = vmatpush1.bf16.msra.mxu0 %v12728_v0  ;;  %v12785_v0 = vcombine.high %v739_v56, %v743_v57  ;;  %v792_v56 = vld [vmem:[%s19788_s1 + $0x12a8] sm:$0xff] }
  0xfb   :  { %10332 = vmatpush1.bf16.msra.mxu1 %v12730_v1  ;;  %9800 = vmatprep.subr.bf16.mxu0 %v12737_v3  ;;  %v12787_v1 = vcombine.high %v740_v58, %v744_v60  ;;  %v747_v3 = vld [vmem:[%s19788_s1 + $0x1140] sm:$0xff] }
  0xfc   :  { %10333 = vmatprep.subr.bf16.mxu1 %v12739_v4  ;;  %v751_v4 = vld [vmem:[%s19788_s1 + $0x1160] sm:$0xff] }
  0xfd   :  { %v12792_v18 = vcombine.low %v747_v3, %v751_v4 }
  0xfe   :  { %9801 = vmatpush1.bf16.msra.mxu0 %v12736_v10  ;;  %v12793_v10 = vcombine.high %v747_v3, %v751_v4  ;;  %v800_v3 = vld [vmem:[%s19788_s1 + $0x12e8] sm:$0xff] }
  0xff   :  { %10334 = vmatpush1.bf16.msra.mxu1 %v12738_v12  ;;  %9802 = vmatprep.subr.bf16.mxu0 %v12745_v13  ;;  %v12795_v12 = vcombine.high %v748_v5, %v752_v6  ;;  %v755_v13 = vld [vmem:[%s19788_s1 + $0x1180] sm:$0xff] }
 0x100   :  { %10335 = vmatprep.subr.bf16.mxu1 %v12747_v59  ;;  %v759_v59 = vld [vmem:[%s19788_s1 + $0x11a0] sm:$0xff] }
 0x101   :  { %v12800_v28 = vcombine.low %v755_v13, %v759_v59 }
 0x102   :  { %9803 = vmatpush1.bf16.msra.mxu0 %v12744_v20  ;;  %v12801_v20 = vcombine.high %v755_v13, %v759_v59  ;;  %v808_v13 = vld [vmem:[%s19788_s1 + $0x1328] sm:$0xff] }
 0x103   :  { %10336 = vmatpush1.bf16.msra.mxu1 %v12746_v21  ;;  %9813 = vmatprep.subr.bf16.mxu0 %v12753_v22  ;;  %v12803_v21 = vcombine.high %v756_v14, %v760_v16  ;;  %v763_v22 = vld [vmem:[%s19788_s1 + $0x11c0] sm:$0xff] }
 0x104   :  { %10346 = vmatprep.subr.bf16.mxu1 %v12755_v24  ;;  %v767_v24 = vld [vmem:[%s19788_s1 + $0x11e0] sm:$0xff] }
 0x105   :  { %9805 = vmatmul.mubr.bf16.vlgmr.msra.gmra.mrb[0].mxu0 %v15225_v29  ;;  %v12809_v63 = vcombine.high %v763_v22, %v767_v24  ;;  %v12808_v37 = vcombine.low %v763_v22, %v767_v24  ;;  %v816_v22 = vld [vmem:[%s19788_s1 + $0x1368] sm:$0xff] }
 0x106   :  { %9814 = vmatpush1.bf16.msra.mxu0 %v12752_v32  ;;  %10338 = vmatmul.mubr.bf16.vlgmr.msra.gmra.mrb[0].mxu1 %v15225_v29  ;;  %v12811_v32 = vcombine.high %v764_v26, %v768_v27 }
 0x107   :  { %10347 = vmatpush1.bf16.msra.mxu1 %v12754_v34  ;;  %9815 = vmatprep.subr.bf16.mxu0 %v12761_v35  ;;  %v771_v34 = vld [vmem:[%s19788_s1 + $0x1200] sm:$0xff] }
 0x108   :  { %10348 = vmatprep.subr.bf16.mxu1 %v12763_v36  ;;  %9845 = vmatprep.mubr.bf16.mxu0 %v15239_v38  ;;  %v775_v35 = vld [vmem:[%s19788_s1 + $0x1220] sm:$0xff]  ;;  %v772_v36 = vld [vmem:[%s19788_s1 + $0x1208] sm:$0xff] }
 0x109   :  { %10378 = vmatprep.mubr.bf16.mxu1 %v15239_v38  ;;  %v12817_v40 = vcombine.high %v771_v34, %v775_v35  ;;  %v12816_v48 = vcombine.low %v771_v34, %v775_v35  ;;  %v12818_v15 = vcombine.low %v772_v36, %v776_v54  ;;  %v824_v34 = vld [vmem:[%s19788_s1 + $0x13a8] sm:$0xff] }
 0x10a   :  { %9816 = vmatpush1.bf16.msra.mxu0 %v12760_v42  ;;  %v12819_v42 = vcombine.high %v772_v36, %v776_v54 }
 0x10b   :  { %10349 = vmatpush1.bf16.msra.mxu1 %v12762_v43  ;;  %9817 = vmatprep.subr.bf16.mxu0 %v12769_v45  ;;  %v779_v43 = vld [vmem:[%s19788_s1 + $0x1240] sm:$0xff] }
 0x10c   :  { %10350 = vmatprep.subr.bf16.mxu1 %v12771_v46  ;;  %v783_v45 = vld [vmem:[%s19788_s1 + $0x1260] sm:$0xff]  ;;  %v780_v46 = vld [vmem:[%s19788_s1 + $0x1248] sm:$0xff] }
 0x10d   :  { %v12825_v49 = vcombine.high %v779_v43, %v783_v45  ;;  %v12824_v57 = vcombine.low %v779_v43, %v783_v45  ;;  %v12826_v58 = vcombine.low %v780_v46, %v784_v47  ;;  %v828_v43 = vld [vmem:[%s19788_s1 + $0x13c8] sm:$0xff] }
 0x10e   :  { %9818 = vmatpush1.bf16.msra.mxu0 %v12768_v51  ;;  %v12827_v51 = vcombine.high %v780_v46, %v784_v47  ;;  %v832_v45 = vld [vmem:[%s19788_s1 + $0x13e8] sm:$0xff] }
 0x10f   :  { %10351 = vmatpush1.bf16.msra.mxu1 %v12770_v23  ;;  %9819 = vmatprep.subr.bf16.mxu0 %v12777_v52  ;;  %v787_v23 = vld [vmem:[%s19788_s1 + $0x1280] sm:$0xff] }
 0x110   :  { %10352 = vmatprep.subr.bf16.mxu1 %v12779_v55  ;;  %v791_v52 = vld [vmem:[%s19788_s1 + $0x12a0] sm:$0xff]  ;;  %v788_v55 = vld [vmem:[%s19788_s1 + $0x1288] sm:$0xff] }
 0x111   :  { %v12833_v60 = vcombine.high %v787_v23, %v791_v52  ;;  %v12832_v4 = vcombine.low %v787_v23, %v791_v52  ;;  %v12834_v5 = vcombine.low %v788_v55, %v792_v56  ;;  %v836_v23 = vld [vmem:[%s19788_s1 + $0x1408] sm:$0xff] }
 0x112   :  { %9820 = vmatpush1.bf16.msra.mxu0 %v12776_v61  ;;  %v12835_v61 = vcombine.high %v788_v55, %v792_v56  ;;  %v840_v52 = vld [vmem:[%s19788_s1 + $0x1428] sm:$0xff]  ;;  %v12874_v56 = vcombine.low %v828_v43, %v832_v45 }
 0x113   :  { %10353 = vmatpush1.bf16.msra.mxu1 %v12778_v62  ;;  %9821 = vmatprep.subr.bf16.mxu0 %v12785_v0  ;;  %v795_v62 = vld [vmem:[%s19788_s1 + $0x12c0] sm:$0xff] }
 0x114   :  { %10354 = vmatprep.subr.bf16.mxu1 %v12787_v1  ;;  %v799_v0 = vld [vmem:[%s19788_s1 + $0x12e0] sm:$0xff]  ;;  %v796_v1 = vld [vmem:[%s19788_s1 + $0x12c8] sm:$0xff] }
 0x115   :  { %v12841_v6 = vcombine.high %v795_v62, %v799_v0  ;;  %v12840_v59 = vcombine.low %v795_v62, %v799_v0  ;;  %v12842_v14 = vcombine.low %v796_v1, %v800_v3  ;;  %v15434_v0 = vpack.c.bf16 %v15207_v17, %v15207_v17  ;;  %v851_v17 = vld [vmem:[%s19788_s1 + $0x1480] sm:$0xff] }
 0x116   :  { %9822 = vmatpush1.bf16.msra.mxu0 %v12784_v7  ;;  %v12843_v7 = vcombine.high %v796_v1, %v800_v3  ;;  %v844_v1 = vld [vmem:[%s19788_s1 + $0x1448] sm:$0xff] }
 0x117   :  { %10355 = vmatpush1.bf16.msra.mxu1 %v12786_v8  ;;  %9823 = vmatprep.subr.bf16.mxu0 %v12793_v10  ;;  %v803_v8 = vld [vmem:[%s19788_s1 + $0x1300] sm:$0xff]  ;;  %v848_v3 = vld [vmem:[%s19788_s1 + $0x1468] sm:$0xff] }
 0x118   :  { %10356 = vmatprep.subr.bf16.mxu1 %v12795_v12  ;;  %v807_v10 = vld [vmem:[%s19788_s1 + $0x1320] sm:$0xff]  ;;  %v804_v12 = vld [vmem:[%s19788_s1 + $0x1308] sm:$0xff] }
 0x119   :  { %v12849_v16 = vcombine.high %v803_v8, %v807_v10  ;;  %v12848_v24 = vcombine.low %v803_v8, %v807_v10  ;;  %v12850_v26 = vcombine.low %v804_v12, %v808_v13  ;;  %v855_v8 = vld [vmem:[%s19788_s1 + $0x14a0] sm:$0xff] }
 0x11a   :  { %9824 = vmatpush1.bf16.msra.mxu0 %v12792_v18  ;;  %v12851_v18 = vcombine.high %v804_v12, %v808_v13  ;;  %v852_v12 = vld [vmem:[%s19788_s1 + $0x1488] sm:$0xff] }
 0x11b   :  { %10357 = vmatpush1.bf16.msra.mxu1 %v12794_v19  ;;  %9825 = vmatprep.subr.bf16.mxu0 %v12801_v20  ;;  %v811_v19 = vld [vmem:[%s19788_s1 + $0x1340] sm:$0xff]  ;;  %v856_v13 = vld [vmem:[%s19788_s1 + $0x14a8] sm:$0xff] }
 0x11c   :  { %10358 = vmatprep.subr.bf16.mxu1 %v12803_v21  ;;  %v815_v20 = vld [vmem:[%s19788_s1 + $0x1360] sm:$0xff]  ;;  %v812_v21 = vld [vmem:[%s19788_s1 + $0x1348] sm:$0xff] }
 0x11d   :  { %v12857_v27 = vcombine.high %v811_v19, %v815_v20  ;;  %v12856_v35 = vcombine.low %v811_v19, %v815_v20  ;;  %v12858_v36 = vcombine.low %v812_v21, %v816_v22  ;;  %v859_v19 = vld [vmem:[%s19788_s1 + $0x14c0] sm:$0xff] }
 0x11e   :  { %9826 = vmatpush1.bf16.msra.mxu0 %v12800_v28  ;;  %v12859_v28 = vcombine.high %v812_v21, %v816_v22  ;;  %v863_v20 = vld [vmem:[%s19788_s1 + $0x14e0] sm:$0xff]  ;;  %v860_v21 = vld [vmem:[%s19788_s1 + $0x14c8] sm:$0xff] }
 0x11f   :  { %10359 = vmatpush1.bf16.msra.mxu1 %v12802_v30  ;;  %9827 = vmatprep.subr.bf16.mxu0 %v12809_v63  ;;  %v819_v30 = vld [vmem:[%s19788_s1 + $0x1380] sm:$0xff]  ;;  %v864_v22 = vld [vmem:[%s19788_s1 + $0x14e8] sm:$0xff] }
 0x120   :  { %10360 = vmatprep.subr.bf16.mxu1 %v12811_v32  ;;  %v823_v63 = vld [vmem:[%s19788_s1 + $0x13a0] sm:$0xff]  ;;  %v820_v32 = vld [vmem:[%s19788_s1 + $0x1388] sm:$0xff] }
 0x121   :  { %v12865_v54 = vcombine.high %v819_v30, %v823_v63  ;;  %v12864_v46 = vcombine.low %v819_v30, %v823_v63  ;;  %v12866_v47 = vcombine.low %v820_v32, %v824_v34  ;;  %v867_v30 = vld [vmem:[%s19788_s1 + $0x1500] sm:$0xff] }
 0x122   :  { %9828 = vmatpush1.bf16.msra.mxu0 %v12808_v37  ;;  %v12867_v37 = vcombine.high %v820_v32, %v824_v34  ;;  %v871_v63 = vld [vmem:[%s19788_s1 + $0x1520] sm:$0xff]  ;;  %v868_v32 = vld [vmem:[%s19788_s1 + $0x1508] sm:$0xff] }
 0x123   :  { %10361 = vmatpush1.bf16.msra.mxu1 %v12810_v39  ;;  %9829 = vmatprep.subr.bf16.mxu0 %v12817_v40  ;;  %v827_v39 = vld [vmem:[%s19788_s1 + $0x13c0] sm:$0xff]  ;;  %v872_v34 = vld [vmem:[%s19788_s1 + $0x1528] sm:$0xff] }
 0x124   :  { %10362 = vmatprep.subr.bf16.mxu1 %v12819_v42  ;;  %v831_v40 = vld [vmem:[%s19788_s1 + $0x13e0] sm:$0xff]  ;;  %v70_v42 = vcombine.high %v15197_v31, %v15197_v31 }
 0x125   :  { %v835_v31 = vld [vmem:[%s19788_s1 + $0x1400] sm:$0xff]  ;;  %v12872_v55 = vcombine.low %v827_v39, %v831_v40 }
 0x126   :  { %9830 = vmatpush1.bf16.msra.mxu0 %v12816_v48  ;;  %v12873_v48 = vcombine.high %v827_v39, %v831_v40  ;;  %v875_v39 = vld [vmem:[%s19788_s1 + $0x1540] sm:$0xff] }
 0x127   :  { %10363 = vmatpush1.bf16.msra.mxu1 %v12818_v15  ;;  %9831 = vmatprep.subr.bf16.mxu0 %v12825_v49  ;;  %v12875_v15 = vcombine.high %v828_v43, %v832_v45  ;;  %v839_v49 = vld [vmem:[%s19788_s1 + $0x1420] sm:$0xff]  ;;  %v880_v43 = vld [vmem:[%s19788_s1 + $0x1568] sm:$0xff]  ;;  %v12912_v45 = vcombine.low %v867_v30, %v871_v63 }
 0x128   :  { %10364 = vmatprep.subr.bf16.mxu1 %v12827_v51  ;;  %v15416_v51 = vrot.slane %v70_v42, %v14432_v53  ;;  %v879_v40 = vld [vmem:[%s19788_s1 + $0x1560] sm:$0xff]  ;;  %v876_v42 = vld [vmem:[%s19788_s1 + $0x1548] sm:$0xff] }
 0x12a   :  { %9832 = vmatpush1.bf16.msra.mxu0 %v12824_v57  ;;  %v12881_v57 = vcombine.high %v835_v31, %v839_v49  ;;  %v86_v62 = vcombine.high %v15416_v51, %v15416_v51 }
 0x12b   :  { %10365 = vmatpush1.bf16.msra.mxu1 %v12826_v58  ;;  %9833 = vmatprep.subr.bf16.mxu0 %v12833_v60  ;;  %v12883_v58 = vcombine.high %v836_v23, %v840_v52  ;;  %v843_v60 = vld [vmem:[%s19788_s1 + $0x1440] sm:$0xff] }
 0x12c   :  { %10366 = vmatprep.subr.bf16.mxu1 %v12835_v61  ;;  %v847_v61 = vld [vmem:[%s19788_s1 + $0x1460] sm:$0xff]  ;;  %v15448_v10 = vpack.c.bf16 %v86_v62, %v86_v62  ;;  %v896_v62 = vld [vmem:[%s19788_s1 + $0x15e8] sm:$0xff] }
 0x12e   :  { %9834 = vmatpush1.bf16.msra.mxu0 %v12832_v4  ;;  %v12880_v4 = vcombine.low %v835_v31, %v839_v49  ;;  %v887_v31 = vld [vmem:[%s19788_s1 + $0x15a0] sm:$0xff]  ;;  %v884_v49 = vld [vmem:[%s19788_s1 + $0x1588] sm:$0xff] }
 0x12f   :  { %10367 = vmatpush1.bf16.msra.mxu1 %v12834_v5  ;;  %9835 = vmatprep.subr.bf16.mxu0 %v12841_v6  ;;  %v12882_v5 = vcombine.low %v836_v23, %v840_v52  ;;  %v12889_v6 = vcombine.high %v843_v60, %v847_v61  ;;  %v888_v23 = vld [vmem:[%s19788_s1 + $0x15a8] sm:$0xff]  ;;  %v12920_v52 = vcombine.low %v875_v39, %v879_v40 }
 0x130   :  { %10368 = vmatprep.subr.bf16.mxu1 %v12843_v7  ;;  %v12891_v7 = vcombine.high %v844_v1, %v848_v3 }
 0x132   :  { %9836 = vmatpush1.bf16.msra.mxu0 %v12840_v59  ;;  %v12888_v59 = vcombine.low %v843_v60, %v847_v61  ;;  %v895_v60 = vld [vmem:[%s19788_s1 + $0x15e0] sm:$0xff]  ;;  %v892_v61 = vld [vmem:[%s19788_s1 + $0x15c8] sm:$0xff] }
 0x133   :  { %10369 = vmatpush1.bf16.msra.mxu1 %v12842_v14  ;;  %9837 = vmatprep.subr.bf16.mxu0 %v12849_v16  ;;  %v12890_v14 = vcombine.low %v844_v1, %v848_v3  ;;  %v12897_v16 = vcombine.high %v851_v17, %v855_v8  ;;  %v12930_v3 = vcombine.low %v884_v49, %v888_v23 }
 0x134   :  { %10370 = vmatprep.subr.bf16.mxu1 %v12851_v18  ;;  %v12899_v18 = vcombine.high %v852_v12, %v856_v13 }
 0x136   :  { %9838 = vmatpush1.bf16.msra.mxu0 %v12848_v24  ;;  %v12896_v24 = vcombine.low %v851_v17, %v855_v8  ;;  %v900_v17 = vld [vmem:[%s19788_s1 + $0x1608] sm:$0xff] }
 0x137   :  { %10371 = vmatpush1.bf16.msra.mxu1 %v12850_v26  ;;  %9839 = vmatprep.subr.bf16.mxu0 %v12857_v27  ;;  %v12898_v26 = vcombine.low %v852_v12, %v856_v13  ;;  %v12905_v27 = vcombine.high %v859_v19, %v863_v20  ;;  %v904_v8 = vld [vmem:[%s19788_s1 + $0x1628] sm:$0xff]  ;;  %v12938_v13 = vcombine.low %v892_v61, %v896_v62 }
 0x138   :  { %10372 = vmatprep.subr.bf16.mxu1 %v12859_v28  ;;  %v12907_v28 = vcombine.high %v860_v21, %v864_v22 }
 0x13a   :  { %9840 = vmatpush1.bf16.msra.mxu0 %v12856_v35  ;;  %v12904_v35 = vcombine.low %v859_v19, %v863_v20  ;;  %v908_v19 = vld [vmem:[%s19788_s1 + $0x1648] sm:$0xff] }
 0x13b   :  { %10373 = vmatpush1.bf16.msra.mxu1 %v12858_v36  ;;  %9841 = vmatprep.subr.bf16.mxu0 %v12865_v54  ;;  %v12906_v36 = vcombine.low %v860_v21, %v864_v22  ;;  %v12913_v54 = vcombine.high %v867_v30, %v871_v63  ;;  %v912_v20 = vld [vmem:[%s19788_s1 + $0x1668] sm:$0xff]  ;;  %v12946_v22 = vcombine.low %v900_v17, %v904_v8 }
 0x13c   :  { %10374 = vmatprep.subr.bf16.mxu1 %v12867_v37  ;;  %v12915_v37 = vcombine.high %v868_v32, %v872_v34  ;;  %v916_v30 = vld [vmem:[%s19788_s1 + $0x1688] sm:$0xff] }
 0x13d   :  { %v920_v63 = vld [vmem:[%s19788_s1 + $0x16a8] sm:$0xff] }
 0x13e   :  { %9842 = vmatpush1.bf16.msra.mxu0 %v12864_v46  ;;  %v12914_v46 = vcombine.low %v868_v32, %v872_v34  ;;  %v12954_v34 = vcombine.low %v908_v19, %v912_v20 }
 0x13f   :  { %10375 = vmatpush1.bf16.msra.mxu1 %v12866_v47  ;;  %9843 = vmatprep.subr.bf16.mxu0 %v12873_v48  ;;  %v12921_v47 = vcombine.high %v875_v39, %v879_v40  ;;  %v12923_v48 = vcombine.high %v876_v42, %v880_v43  ;;  %v924_v39 = vld [vmem:[%s19788_s1 + $0x16c8] sm:$0xff] }
 0x140   :  { %10376 = vmatprep.subr.bf16.mxu1 %v12875_v15  ;;  %v883_v15 = vld [vmem:[%s19788_s1 + $0x1580] sm:$0xff]  ;;  %v928_v40 = vld [vmem:[%s19788_s1 + $0x16e8] sm:$0xff] }
 0x141   :  { %v12928_v1 = vcombine.low %v883_v15, %v887_v31 }
 0x142   :  { %9844 = vmatpush1.bf16.msra.mxu0 %v12872_v55  ;;  %v12922_v55 = vcombine.low %v876_v42, %v880_v43  ;;  %v12962_v43 = vcombine.low %v916_v30, %v920_v63 }
 0x143   :  { %10377 = vmatpush1.bf16.msra.mxu1 %v12874_v56  ;;  %9854 = vmatprep.subr.bf16.mxu0 %v12881_v57  ;;  %v12929_v56 = vcombine.high %v883_v15, %v887_v31  ;;  %v12931_v57 = vcombine.high %v884_v49, %v888_v23  ;;  %v932_v15 = vld [vmem:[%s19788_s1 + $0x1708] sm:$0xff]  ;;  %v12970_v23 = vcombine.low %v924_v39, %v928_v40 }
 0x144   :  { %10387 = vmatprep.subr.bf16.mxu1 %v12883_v58  ;;  %v891_v58 = vld [vmem:[%s19788_s1 + $0x15c0] sm:$0xff]  ;;  %v936_v31 = vld [vmem:[%s19788_s1 + $0x1728] sm:$0xff] }
 0x145   :  { %9846 = vmatmul.mubr.bf16.vlgmr.msra.gmra.mrb[0].mxu0 %v15434_v0  ;;  %v12936_v12 = vcombine.low %v891_v58, %v895_v60 }
 0x146   :  { %9855 = vmatpush1.bf16.msra.mxu0 %v12880_v4  ;;  %10379 = vmatmul.mubr.bf16.vlgmr.msra.gmra.mrb[0].mxu1 %v15434_v0  ;;  %v12937_v4 = vcombine.high %v891_v58, %v895_v60  ;;  %v940_v58 = vld [vmem:[%s19788_s1 + $0x1748] sm:$0xff] }
 0x147   :  { %10388 = vmatpush1.bf16.msra.mxu1 %v12882_v5  ;;  %9856 = vmatprep.subr.bf16.mxu0 %v12889_v6  ;;  %v12939_v5 = vcombine.high %v892_v61, %v896_v62  ;;  %v899_v6 = vld [vmem:[%s19788_s1 + $0x1600] sm:$0xff]  ;;  %v944_v60 = vld [vmem:[%s19788_s1 + $0x1768] sm:$0xff]  ;;  %v12978_v62 = vcombine.low %v932_v15, %v936_v31 }
 0x148   :  { %10389 = vmatprep.subr.bf16.mxu1 %v12891_v7  ;;  %9886 = vmatprep.mubr.bf16.mxu0 %v15448_v10  ;;  %v903_v7 = vld [vmem:[%s19788_s1 + $0x1620] sm:$0xff] }
 0x149   :  { %10419 = vmatprep.mubr.bf16.mxu1 %v15448_v10  ;;  %v12944_v21 = vcombine.low %v899_v6, %v903_v7 }
 0x14a   :  { %9857 = vmatpush1.bf16.msra.mxu0 %v12888_v59  ;;  %v12945_v59 = vcombine.high %v899_v6, %v903_v7  ;;  %v948_v6 = vld [vmem:[%s19788_s1 + $0x1788] sm:$0xff] }
 0x14b   :  { %10390 = vmatpush1.bf16.msra.mxu1 %v12890_v14  ;;  %9858 = vmatprep.subr.bf16.mxu0 %v12897_v16  ;;  %v12947_v14 = vcombine.high %v900_v17, %v904_v8  ;;  %v907_v16 = vld [vmem:[%s19788_s1 + $0x1640] sm:$0xff]  ;;  %v952_v7 = vld [vmem:[%s19788_s1 + $0x17a8] sm:$0xff]  ;;  %v12986_v8 = vcombine.low %v940_v58, %v944_v60 }
 0x14c   :  { %10391 = vmatprep.subr.bf16.mxu1 %v12899_v18  ;;  %v911_v18 = vld [vmem:[%s19788_s1 + $0x1660] sm:$0xff] }
 0x14d   :  { %v12952_v32 = vcombine.low %v907_v16, %v911_v18 }
 0x14e   :  { %9859 = vmatpush1.bf16.msra.mxu0 %v12896_v24  ;;  %v12953_v24 = vcombine.high %v907_v16, %v911_v18  ;;  %v956_v16 = vld [vmem:[%s19788_s1 + $0x17c8] sm:$0xff] }
 0x14f   :  { %10392 = vmatpush1.bf16.msra.mxu1 %v12898_v26  ;;  %9860 = vmatprep.subr.bf16.mxu0 %v12905_v27  ;;  %v12955_v26 = vcombine.high %v908_v19, %v912_v20  ;;  %v915_v27 = vld [vmem:[%s19788_s1 + $0x1680] sm:$0xff]  ;;  %v960_v18 = vld [vmem:[%s19788_s1 + $0x17e8] sm:$0xff]  ;;  %v15619_v19 = vld [vmem:[%s19787_s0 + $0x18] sm:$0xff] }
 0x150   :  { %10393 = vmatprep.subr.bf16.mxu1 %v12907_v28  ;;  %v919_v28 = vld [vmem:[%s19788_s1 + $0x16a0] sm:$0xff] }
 0x151   :  { %v12960_v42 = vcombine.low %v915_v27, %v919_v28 }
 0x152   :  { %9861 = vmatpush1.bf16.msra.mxu0 %v12904_v35  ;;  %v12961_v35 = vcombine.high %v915_v27, %v919_v28  ;;  %v967_v27 = vld [vmem:[%s19788_s1 + $0x1820] sm:$0xff]  ;;  %v15629_v28 = vrot.slane %v15619_v19, %v14432_v53 }
 0x153   :  { %10394 = vmatpush1.bf16.msra.mxu1 %v12906_v36  ;;  %9862 = vmatprep.subr.bf16.mxu0 %v12913_v54  ;;  %v12963_v36 = vcombine.high %v916_v30, %v920_v63  ;;  %v923_v54 = vld [vmem:[%s19788_s1 + $0x16c0] sm:$0xff]  ;;  %v964_v30 = vld [vmem:[%s19788_s1 + $0x1808] sm:$0xff] }
 0x154   :  { %10395 = vmatprep.subr.bf16.mxu1 %v12915_v37  ;;  %v927_v37 = vld [vmem:[%s19788_s1 + $0x16e0] sm:$0xff]  ;;  %v968_v63 = vld [vmem:[%s19788_s1 + $0x1828] sm:$0xff] }
 0x155   :  { %v12968_v49 = vcombine.low %v923_v54, %v927_v37 }
 0x156   :  { %9863 = vmatpush1.bf16.msra.mxu0 %v12912_v45  ;;  %v12969_v45 = vcombine.high %v923_v54, %v927_v37  ;;  %v971_v54 = vld [vmem:[%s19788_s1 + $0x1840] sm:$0xff] }
 0x157   :  { %10396 = vmatpush1.bf16.msra.mxu1 %v12914_v46  ;;  %9864 = vmatprep.subr.bf16.mxu0 %v12921_v47  ;;  %v12971_v46 = vcombine.high %v924_v39, %v928_v40  ;;  %v931_v47 = vld [vmem:[%s19788_s1 + $0x1700] sm:$0xff]  ;;  %v102_v39 = vcombine.high %v15629_v28, %v15629_v28  ;;  %v15647_v40 = vpack.c.bf16 %v15416_v51, %v15416_v51 }
 0x158   :  { %10397 = vmatprep.subr.bf16.mxu1 %v12923_v48  ;;  %v935_v48 = vld [vmem:[%s19788_s1 + $0x1720] sm:$0xff] }
 0x159   :  { %v12976_v61 = vcombine.low %v931_v47, %v935_v48  ;;  %v975_v37 = vld [vmem:[%s19788_s1 + $0x1860] sm:$0xff] }
 0x15a   :  { %9865 = vmatpush1.bf16.msra.mxu0 %v12920_v52  ;;  %v12977_v52 = vcombine.high %v931_v47, %v935_v48  ;;  %v13017_v47 = vcombine.high %v971_v54, %v975_v37  ;;  %v979_v51 = vld [vmem:[%s19788_s1 + $0x1880] sm:$0xff] }
 0x15b   :  { %10398 = vmatpush1.bf16.msra.mxu1 %v12922_v55  ;;  %9866 = vmatprep.subr.bf16.mxu0 %v12929_v56  ;;  %v12979_v55 = vcombine.high %v932_v15, %v936_v31  ;;  %v939_v56 = vld [vmem:[%s19788_s1 + $0x1740] sm:$0xff]  ;;  %v15661_v31 = vpack.c.bf16 %v102_v39, %v102_v39 }
 0x15c   :  { %10399 = vmatprep.subr.bf16.mxu1 %v12931_v57  ;;  %v943_v57 = vld [vmem:[%s19788_s1 + $0x1760] sm:$0xff] }
 0x15d   :  { %v12984_v17 = vcombine.low %v939_v56, %v943_v57  ;;  %v983_v15 = vld [vmem:[%s19788_s1 + $0x18a0] sm:$0xff] }
 0x15e   :  { %9867 = vmatpush1.bf16.msra.mxu0 %v12928_v1  ;;  %v12985_v1 = vcombine.high %v939_v56, %v943_v57  ;;  %v13025_v56 = vcombine.high %v979_v51, %v983_v15  ;;  %v1019_v39 = vld [vmem:[%s19788_s1 + $0x19c0] sm:$0xff] }
 0x15f   :  { %10400 = vmatpush1.bf16.msra.mxu1 %v12930_v3  ;;  %9868 = vmatprep.subr.bf16.mxu0 %v12937_v4  ;;  %v12987_v3 = vcombine.high %v940_v58, %v944_v60  ;;  %v947_v4 = vld [vmem:[%s19788_s1 + $0x1780] sm:$0xff] }
 0x160   :  { %10401 = vmatprep.subr.bf16.mxu1 %v12939_v5  ;;  %v951_v5 = vld [vmem:[%s19788_s1 + $0x17a0] sm:$0xff] }
 0x161   :  { %v12992_v20 = vcombine.low %v947_v4, %v951_v5  ;;  %v987_v58 = vld [vmem:[%s19788_s1 + $0x18c0] sm:$0xff] }
 0x162   :  { %9869 = vmatpush1.bf16.msra.mxu0 %v12936_v12  ;;  %v12993_v12 = vcombine.high %v947_v4, %v951_v5  ;;  %v991_v60 = vld [vmem:[%s19788_s1 + $0x18e0] sm:$0xff] }
 0x163   :  { %10402 = vmatpush1.bf16.msra.mxu1 %v12938_v13  ;;  %9870 = vmatprep.subr.bf16.mxu0 %v12945_v59  ;;  %v12995_v13 = vcombine.high %v948_v6, %v952_v7  ;;  %v955_v59 = vld [vmem:[%s19788_s1 + $0x17c0] sm:$0xff]  ;;  %v13033_v4 = vcombine.high %v987_v58, %v991_v60 }
 0x164   :  { %10403 = vmatprep.subr.bf16.mxu1 %v12947_v14  ;;  %v959_v14 = vld [vmem:[%s19788_s1 + $0x17e0] sm:$0xff] }
 0x166   :  { %9871 = vmatpush1.bf16.msra.mxu0 %v12944_v21  ;;  %v12994_v21 = vcombine.low %v948_v6, %v952_v7  ;;  %v995_v6 = vld [vmem:[%s19788_s1 + $0x1900] sm:$0xff] }
 0x167   :  { %10404 = vmatpush1.bf16.msra.mxu1 %v12946_v22  ;;  %9872 = vmatprep.subr.bf16.mxu0 %v12953_v24  ;;  %v13001_v22 = vcombine.high %v955_v59, %v959_v14  ;;  %v13003_v24 = vcombine.high %v956_v16, %v960_v18  ;;  %v999_v7 = vld [vmem:[%s19788_s1 + $0x1920] sm:$0xff] }
 0x168   :  { %10405 = vmatprep.subr.bf16.mxu1 %v12955_v26  ;;  %v963_v26 = vld [vmem:[%s19788_s1 + $0x1800] sm:$0xff] }
 0x16a   :  { %9873 = vmatpush1.bf16.msra.mxu0 %v12952_v32  ;;  %v13000_v32 = vcombine.low %v955_v59, %v959_v14  ;;  %v13041_v59 = vcombine.high %v995_v6, %v999_v7 }
 0x16b   :  { %10406 = vmatpush1.bf16.msra.mxu1 %v12954_v34  ;;  %9874 = vmatprep.subr.bf16.mxu0 %v12961_v35  ;;  %v13002_v34 = vcombine.low %v956_v16, %v960_v18  ;;  %v13009_v35 = vcombine.high %v963_v26, %v967_v27  ;;  %v1003_v16 = vld [vmem:[%s19788_s1 + $0x1940] sm:$0xff] }
 0x16c   :  { %10407 = vmatprep.subr.bf16.mxu1 %v12963_v36  ;;  %v13011_v36 = vcombine.high %v964_v30, %v968_v63  ;;  %v1007_v18 = vld [vmem:[%s19788_s1 + $0x1960] sm:$0xff] }
 0x16e   :  { %9875 = vmatpush1.bf16.msra.mxu0 %v12960_v42  ;;  %v972_v42 = vld [vmem:[%s19788_s1 + $0x1848] sm:$0xff] }
 0x16f   :  { %10408 = vmatpush1.bf16.msra.mxu1 %v12962_v43  ;;  %9876 = vmatprep.subr.bf16.mxu0 %v12969_v45  ;;  %v976_v43 = vld [vmem:[%s19788_s1 + $0x1868] sm:$0xff]  ;;  %v13008_v45 = vcombine.low %v963_v26, %v967_v27  ;;  %v13049_v26 = vcombine.high %v1003_v16, %v1007_v18 }
 0x170   :  { %10409 = vmatprep.subr.bf16.mxu1 %v12971_v46  ;;  %v13010_v46 = vcombine.low %v964_v30, %v968_v63  ;;  %v13019_v48 = vcombine.high %v972_v42, %v976_v43  ;;  %v1011_v30 = vld [vmem:[%s19788_s1 + $0x1980] sm:$0xff] }
 0x171   :  { %v1015_v63 = vld [vmem:[%s19788_s1 + $0x19a0] sm:$0xff] }
 0x172   :  { %9877 = vmatpush1.bf16.msra.mxu0 %v12968_v49  ;;  %v980_v49 = vld [vmem:[%s19788_s1 + $0x1888] sm:$0xff] }
 0x173   :  { %10410 = vmatpush1.bf16.msra.mxu1 %v12970_v23  ;;  %9878 = vmatprep.subr.bf16.mxu0 %v12977_v52  ;;  %v984_v23 = vld [vmem:[%s19788_s1 + $0x18a8] sm:$0xff]  ;;  %v13016_v52 = vcombine.low %v971_v54, %v975_v37  ;;  %v13057_v54 = vcombine.high %v1011_v30, %v1015_v63 }
 0x174   :  { %10411 = vmatprep.subr.bf16.mxu1 %v12979_v55  ;;  %v13018_v55 = vcombine.low %v972_v42, %v976_v43  ;;  %v13027_v57 = vcombine.high %v980_v49, %v984_v23  ;;  %v1023_v42 = vld [vmem:[%s19788_s1 + $0x19e0] sm:$0xff]  ;;  %v1020_v43 = vld [vmem:[%s19788_s1 + $0x19c8] sm:$0xff] }
 0x176   :  { %9879 = vmatpush1.bf16.msra.mxu0 %v12976_v61  ;;  %v988_v61 = vld [vmem:[%s19788_s1 + $0x18c8] sm:$0xff] }
 0x177   :  { %10412 = vmatpush1.bf16.msra.mxu1 %v12978_v62  ;;  %9880 = vmatprep.subr.bf16.mxu0 %v12985_v1  ;;  %v992_v62 = vld [vmem:[%s19788_s1 + $0x18e8] sm:$0xff]  ;;  %v13024_v1 = vcombine.low %v979_v51, %v983_v15  ;;  %v1027_v15 = vld [vmem:[%s19788_s1 + $0x1a00] sm:$0xff] }
 0x178   :  { %10413 = vmatprep.subr.bf16.mxu1 %v12987_v3  ;;  %v13026_v3 = vcombine.low %v980_v49, %v984_v23  ;;  %v13035_v5 = vcombine.high %v988_v61, %v992_v62  ;;  %v1031_v49 = vld [vmem:[%s19788_s1 + $0x1a20] sm:$0xff]  ;;  %v1028_v23 = vld [vmem:[%s19788_s1 + $0x1a08] sm:$0xff] }
 0x17a   :  { %9881 = vmatpush1.bf16.msra.mxu0 %v12984_v17  ;;  %v996_v17 = vld [vmem:[%s19788_s1 + $0x1908] sm:$0xff] }
 0x17b   :  { %10414 = vmatpush1.bf16.msra.mxu1 %v12986_v8  ;;  %9882 = vmatprep.subr.bf16.mxu0 %v12993_v12  ;;  %v1000_v8 = vld [vmem:[%s19788_s1 + $0x1928] sm:$0xff]  ;;  %v13032_v12 = vcombine.low %v987_v58, %v991_v60  ;;  %v1035_v60 = vld [vmem:[%s19788_s1 + $0x1a40] sm:$0xff] }
 0x17c   :  { %10415 = vmatprep.subr.bf16.mxu1 %v12995_v13  ;;  %v13034_v13 = vcombine.low %v988_v61, %v992_v62  ;;  %v13043_v14 = vcombine.high %v996_v17, %v1000_v8  ;;  %v1039_v61 = vld [vmem:[%s19788_s1 + $0x1a60] sm:$0xff]  ;;  %v1036_v62 = vld [vmem:[%s19788_s1 + $0x1a48] sm:$0xff] }
 0x17e   :  { %9883 = vmatpush1.bf16.msra.mxu0 %v12992_v20  ;;  %v1004_v20 = vld [vmem:[%s19788_s1 + $0x1948] sm:$0xff] }
 0x17f   :  { %10416 = vmatpush1.bf16.msra.mxu1 %v12994_v21  ;;  %9884 = vmatprep.subr.bf16.mxu0 %v13001_v22  ;;  %v1008_v21 = vld [vmem:[%s19788_s1 + $0x1968] sm:$0xff]  ;;  %v13040_v22 = vcombine.low %v995_v6, %v999_v7  ;;  %v1043_v7 = vld [vmem:[%s19788_s1 + $0x1a80] sm:$0xff] }
 0x180   :  { %10417 = vmatprep.subr.bf16.mxu1 %v13003_v24  ;;  %v13042_v24 = vcombine.low %v996_v17, %v1000_v8  ;;  %v13051_v27 = vcombine.high %v1004_v20, %v1008_v21  ;;  %v1047_v17 = vld [vmem:[%s19788_s1 + $0x1aa0] sm:$0xff]  ;;  %v1044_v8 = vld [vmem:[%s19788_s1 + $0x1a88] sm:$0xff] }
 0x182   :  { %9885 = vmatpush1.bf16.msra.mxu0 %v13000_v32  ;;  %v1012_v32 = vld [vmem:[%s19788_s1 + $0x1988] sm:$0xff] }
 0x183   :  { %10418 = vmatpush1.bf16.msra.mxu1 %v13002_v34  ;;  %9895 = vmatprep.subr.bf16.mxu0 %v13009_v35  ;;  %v1016_v34 = vld [vmem:[%s19788_s1 + $0x19a8] sm:$0xff]  ;;  %v13048_v35 = vcombine.low %v1003_v16, %v1007_v18  ;;  %v1051_v18 = vld [vmem:[%s19788_s1 + $0x1ac0] sm:$0xff] }
 0x184   :  { %10428 = vmatprep.subr.bf16.mxu1 %v13011_v36  ;;  %v13050_v36 = vcombine.low %v1004_v20, %v1008_v21  ;;  %v13059_v37 = vcombine.high %v1012_v32, %v1016_v34  ;;  %v1055_v20 = vld [vmem:[%s19788_s1 + $0x1ae0] sm:$0xff]  ;;  %v1052_v21 = vld [vmem:[%s19788_s1 + $0x1ac8] sm:$0xff] }
 0x185   :  { %9887 = vmatmul.mubr.bf16.vlgmr.msra.gmra.mrb[0].mxu0 %v15647_v40 }
 0x186   :  { %9896 = vmatpush1.bf16.msra.mxu0 %v13008_v45  ;;  %10420 = vmatmul.mubr.bf16.vlgmr.msra.gmra.mrb[0].mxu1 %v15647_v40  ;;  %v1024_v45 = vld [vmem:[%s19788_s1 + $0x19e8] sm:$0xff] }
 0x187   :  { %10429 = vmatpush1.bf16.msra.mxu1 %v13010_v46  ;;  %9897 = vmatprep.subr.bf16.mxu0 %v13017_v47  ;;  %v13056_v46 = vcombine.low %v1011_v30, %v1015_v63  ;;  %v13058_v47 = vcombine.low %v1012_v32, %v1016_v34  ;;  %v13067_v51 = vcombine.high %v1020_v43, %v1024_v45  ;;  %v1059_v63 = vld [vmem:[%s19788_s1 + $0x1b00] sm:$0xff]  ;;  %v1060_v34 = vld [vmem:[%s19788_s1 + $0x1b08] sm:$0xff] }
 0x188   :  { %10430 = vmatprep.subr.bf16.mxu1 %v13019_v48  ;;  %9927 = vmatprep.mubr.bf16.mxu0 %v15661_v31  ;;  %v13065_v48 = vcombine.high %v1019_v39, %v1023_v42  ;;  %v1063_v32 = vld [vmem:[%s19788_s1 + $0x1b20] sm:$0xff] }
 0x189   :  { %10460 = vmatprep.mubr.bf16.mxu1 %v15661_v31 }
 0x18a   :  { %9898 = vmatpush1.bf16.msra.mxu0 %v13016_v52  ;;  %v1032_v52 = vld [vmem:[%s19788_s1 + $0x1a28] sm:$0xff] }
 0x18b   :  { %10431 = vmatpush1.bf16.msra.mxu1 %v13018_v55  ;;  %9899 = vmatprep.subr.bf16.mxu0 %v13025_v56  ;;  %v13064_v55 = vcombine.low %v1019_v39, %v1023_v42  ;;  %v13066_v56 = vcombine.low %v1020_v43, %v1024_v45  ;;  %v13075_v58 = vcombine.high %v1028_v23, %v1032_v52  ;;  %v1067_v42 = vld [vmem:[%s19788_s1 + $0x1b40] sm:$0xff]  ;;  %v1068_v45 = vld [vmem:[%s19788_s1 + $0x1b48] sm:$0xff] }
 0x18c   :  { %10432 = vmatprep.subr.bf16.mxu1 %v13027_v57  ;;  %v13073_v57 = vcombine.high %v1027_v15, %v1031_v49  ;;  %v1071_v43 = vld [vmem:[%s19788_s1 + $0x1b60] sm:$0xff] }
 0x18e   :  { %9900 = vmatpush1.bf16.msra.mxu0 %v13024_v1  ;;  %v1040_v1 = vld [vmem:[%s19788_s1 + $0x1a68] sm:$0xff] }
 0x18f   :  { %10433 = vmatpush1.bf16.msra.mxu1 %v13026_v3  ;;  %9901 = vmatprep.subr.bf16.mxu0 %v13033_v4  ;;  %v13072_v3 = vcombine.low %v1027_v15, %v1031_v49  ;;  %v13074_v4 = vcombine.low %v1028_v23, %v1032_v52  ;;  %v13083_v6 = vcombine.high %v1036_v62, %v1040_v1  ;;  %v1075_v49 = vld [vmem:[%s19788_s1 + $0x1b80] sm:$0xff]  ;;  %v1076_v52 = vld [vmem:[%s19788_s1 + $0x1b88] sm:$0xff] }
 0x190   :  { %10434 = vmatprep.subr.bf16.mxu1 %v13035_v5  ;;  %v13081_v5 = vcombine.high %v1035_v60, %v1039_v61  ;;  %v1079_v23 = vld [vmem:[%s19788_s1 + $0x1ba0] sm:$0xff] }
 0x192   :  { %9902 = vmatpush1.bf16.msra.mxu0 %v13032_v12  ;;  %v1048_v12 = vld [vmem:[%s19788_s1 + $0x1aa8] sm:$0xff] }
 0x193   :  { %10435 = vmatpush1.bf16.msra.mxu1 %v13034_v13  ;;  %9903 = vmatprep.subr.bf16.mxu0 %v13041_v59  ;;  %v13080_v13 = vcombine.low %v1035_v60, %v1039_v61  ;;  %v13082_v59 = vcombine.low %v1036_v62, %v1040_v1  ;;  %v13091_v16 = vcombine.high %v1044_v8, %v1048_v12  ;;  %v1083_v61 = vld [vmem:[%s19788_s1 + $0x1bc0] sm:$0xff] }
 0x194   :  { %10436 = vmatprep.subr.bf16.mxu1 %v13043_v14  ;;  %v13089_v14 = vcombine.high %v1043_v7, %v1047_v17  ;;  %v1087_v62 = vld [vmem:[%s19788_s1 + $0x1be0] sm:$0xff]  ;;  %v87_v1 = vcombine.high %v15619_v19, %v15619_v19 }
 0x195   :  { %v1091_v19 = vld [vmem:[%s19788_s1 + $0x1c00] sm:$0xff] }
 0x196   :  { %9904 = vmatpush1.bf16.msra.mxu0 %v13040_v22  ;;  %v1056_v22 = vld [vmem:[%s19788_s1 + $0x1ae8] sm:$0xff] }
 0x197   :  { %10437 = vmatpush1.bf16.msra.mxu1 %v13042_v24  ;;  %9905 = vmatprep.subr.bf16.mxu0 %v13049_v26  ;;  %v13088_v24 = vcombine.low %v1043_v7, %v1047_v17  ;;  %v13090_v26 = vcombine.low %v1044_v8, %v1048_v12  ;;  %v13099_v30 = vcombine.high %v1052_v21, %v1056_v22  ;;  %v1095_v8 = vld [vmem:[%s19788_s1 + $0x1c20] sm:$0xff] }
 0x198   :  { %10438 = vmatprep.subr.bf16.mxu1 %v13051_v27  ;;  %v13097_v27 = vcombine.high %v1051_v18, %v1055_v20  ;;  %v13129_v7 = vcombine.high %v1083_v61, %v1087_v62  ;;  %v15838_v12 = vrot.slane %v87_v1, %v14432_v53 }
 0x19a   :  { %9906 = vmatpush1.bf16.msra.mxu0 %v13048_v35  ;;  %v1064_v35 = vld [vmem:[%s19788_s1 + $0x1b28] sm:$0xff] }
 0x19b   :  { %10439 = vmatpush1.bf16.msra.mxu1 %v13050_v36  ;;  %9907 = vmatprep.subr.bf16.mxu0 %v13057_v54  ;;  %v13096_v36 = vcombine.low %v1051_v18, %v1055_v20  ;;  %v13098_v54 = vcombine.low %v1052_v21, %v1056_v22  ;;  %v13107_v39 = vcombine.high %v1060_v34, %v1064_v35  ;;  %v1099_v21 = vld [vmem:[%s19788_s1 + $0x1c40] sm:$0xff] }
 0x19c   :  { %10440 = vmatprep.subr.bf16.mxu1 %v13059_v37  ;;  %v13105_v37 = vcombine.high %v1059_v63, %v1063_v32  ;;  %v13137_v18 = vcombine.high %v1091_v19, %v1095_v8  ;;  %v1103_v22 = vld [vmem:[%s19788_s1 + $0x1c60] sm:$0xff] }
 0x19e   :  { %9908 = vmatpush1.bf16.msra.mxu0 %v13056_v46  ;;  %v1072_v46 = vld [vmem:[%s19788_s1 + $0x1b68] sm:$0xff] }
 0x19f   :  { %10441 = vmatpush1.bf16.msra.mxu1 %v13058_v47  ;;  %9909 = vmatprep.subr.bf16.mxu0 %v13065_v48  ;;  %v13104_v47 = vcombine.low %v1059_v63, %v1063_v32  ;;  %v13106_v48 = vcombine.low %v1060_v34, %v1064_v35  ;;  %v13115_v15 = vcombine.high %v1068_v45, %v1072_v46 }
 0x1a0   :  { %10442 = vmatprep.subr.bf16.mxu1 %v13067_v51  ;;  %v13113_v51 = vcombine.high %v1067_v42, %v1071_v43  ;;  %v13136_v63 = vcombine.low %v1091_v19, %v1095_v8  ;;  %v13145_v34 = vcombine.high %v1099_v21, %v1103_v22 }
 0x1a2   :  { %9910 = vmatpush1.bf16.msra.mxu0 %v13064_v55  ;;  %v1080_v55 = vld [vmem:[%s19788_s1 + $0x1ba8] sm:$0xff] }
 0x1a3   :  { %10443 = vmatpush1.bf16.msra.mxu1 %v13066_v56  ;;  %9911 = vmatprep.subr.bf16.mxu0 %v13073_v57  ;;  %v13112_v56 = vcombine.low %v1067_v42, %v1071_v43  ;;  %v13114_v57 = vcombine.low %v1068_v45, %v1072_v46  ;;  %v13123_v60 = vcombine.high %v1076_v52, %v1080_v55 }
 0x1a4   :  { %10444 = vmatprep.subr.bf16.mxu1 %v13075_v58  ;;  %v13121_v58 = vcombine.high %v1075_v49, %v1079_v23  ;;  %v13144_v42 = vcombine.low %v1099_v21, %v1103_v22 }
 0x1a6   :  { %9912 = vmatpush1.bf16.msra.mxu0 %v13072_v3  ;;  %v1084_v3 = vld [vmem:[%s19788_s1 + $0x1bc8] sm:$0xff] }
 0x1a7   :  { %10445 = vmatpush1.bf16.msra.mxu1 %v13074_v4  ;;  %9913 = vmatprep.subr.bf16.mxu0 %v13081_v5  ;;  %v1088_v4 = vld [vmem:[%s19788_s1 + $0x1be8] sm:$0xff]  ;;  %v13120_v5 = vcombine.low %v1075_v49, %v1079_v23 }
 0x1a8   :  { %10446 = vmatprep.subr.bf16.mxu1 %v13083_v6  ;;  %v13122_v6 = vcombine.low %v1076_v52, %v1080_v55  ;;  %v13131_v17 = vcombine.high %v1084_v3, %v1088_v4 }
 0x1aa   :  { %9914 = vmatpush1.bf16.msra.mxu0 %v13080_v13  ;;  %v1092_v13 = vld [vmem:[%s19788_s1 + $0x1c08] sm:$0xff] }
 0x1ab   :  { %10447 = vmatpush1.bf16.msra.mxu1 %v13082_v59  ;;  %9915 = vmatprep.subr.bf16.mxu0 %v13089_v14  ;;  %v1096_v59 = vld [vmem:[%s19788_s1 + $0x1c28] sm:$0xff]  ;;  %v13128_v14 = vcombine.low %v1083_v61, %v1087_v62 }
 0x1ac   :  { %10448 = vmatprep.subr.bf16.mxu1 %v13091_v16  ;;  %v13130_v16 = vcombine.low %v1084_v3, %v1088_v4  ;;  %v13139_v20 = vcombine.high %v1092_v13, %v1096_v59  ;;  %v13138_v32 = vcombine.low %v1092_v13, %v1096_v59  ;;  %v1131_v4 = vld [vmem:[%s19788_s1 + $0x1d40] sm:$0xff] }
 0x1ad   :  { %v1139_v59 = vld [vmem:[%s19788_s1 + $0x1d80] sm:$0xff] }
 0x1ae   :  { %9916 = vmatpush1.bf16.msra.mxu0 %v13088_v24  ;;  %v103_v24 = vcombine.high %v15838_v12, %v15838_v12 }
 0x1af   :  { %10449 = vmatpush1.bf16.msra.mxu1 %v13090_v26  ;;  %9917 = vmatprep.subr.bf16.mxu0 %v13097_v27  ;;  %v15856_v26 = vpack.c.bf16 %v15629_v28, %v15629_v28  ;;  %v1100_v27 = vld [vmem:[%s19788_s1 + $0x1c48] sm:$0xff]  ;;  %v1107_v28 = vld [vmem:[%s19788_s1 + $0x1c80] sm:$0xff] }
 0x1b0   :  { %10450 = vmatprep.subr.bf16.mxu1 %v13099_v30  ;;  %v1104_v30 = vld [vmem:[%s19788_s1 + $0x1c68] sm:$0xff] }
 0x1b1   :  { %v13147_v35 = vcombine.high %v1100_v27, %v1104_v30  ;;  %v13146_v43 = vcombine.low %v1100_v27, %v1104_v30  ;;  %v1147_v27 = vld [vmem:[%s19788_s1 + $0x1dc0] sm:$0xff] }
 0x1b2   :  { %9918 = vmatpush1.bf16.msra.mxu0 %v13096_v36  ;;  %v1111_v36 = vld [vmem:[%s19788_s1 + $0x1ca0] sm:$0xff] }
 0x1b3   :  { %10451 = vmatpush1.bf16.msra.mxu1 %v13098_v54  ;;  %9919 = vmatprep.subr.bf16.mxu0 %v13105_v37  ;;  %v15870_v54 = vpack.c.bf16 %v103_v24, %v103_v24  ;;  %v1108_v37 = vld [vmem:[%s19788_s1 + $0x1c88] sm:$0xff]  ;;  %v13153_v45 = vcombine.high %v1107_v28, %v1111_v36  ;;  %v13152_v49 = vcombine.low %v1107_v28, %v1111_v36  ;;  %v1151_v30 = vld [vmem:[%s19788_s1 + $0x1de0] sm:$0xff] }
 0x1b4   :  { %10452 = vmatprep.subr.bf16.mxu1 %v13107_v39  ;;  %v1112_v39 = vld [vmem:[%s19788_s1 + $0x1ca8] sm:$0xff]  ;;  %v13193_v28 = vcombine.high %v1147_v27, %v1151_v30 }
 0x1b5   :  { %v13155_v46 = vcombine.high %v1108_v37, %v1112_v39  ;;  %v13154_v23 = vcombine.low %v1108_v37, %v1112_v39  ;;  %v1155_v37 = vld [vmem:[%s19788_s1 + $0x1e00] sm:$0xff] }
 0x1b6   :  { %9920 = vmatpush1.bf16.msra.mxu0 %v13104_v47  ;;  %v1115_v47 = vld [vmem:[%s19788_s1 + $0x1cc0] sm:$0xff] }
 0x1b7   :  { %10453 = vmatpush1.bf16.msra.mxu1 %v13106_v48  ;;  %9921 = vmatprep.subr.bf16.mxu0 %v13113_v51  ;;  %v1119_v48 = vld [vmem:[%s19788_s1 + $0x1ce0] sm:$0xff]  ;;  %v1116_v51 = vld [vmem:[%s19788_s1 + $0x1cc8] sm:$0xff] }
 0x1b8   :  { %10454 = vmatprep.subr.bf16.mxu1 %v13115_v15  ;;  %v1120_v15 = vld [vmem:[%s19788_s1 + $0x1ce8] sm:$0xff]  ;;  %v13161_v52 = vcombine.high %v1115_v47, %v1119_v48  ;;  %v13160_v61 = vcombine.low %v1115_v47, %v1119_v48  ;;  %v1159_v39 = vld [vmem:[%s19788_s1 + $0x1e20] sm:$0xff] }
 0x1b9   :  { %v13163_v55 = vcombine.high %v1116_v51, %v1120_v15  ;;  %v13162_v62 = vcombine.low %v1116_v51, %v1120_v15  ;;  %v13201_v47 = vcombine.high %v1155_v37, %v1159_v39  ;;  %v1163_v51 = vld [vmem:[%s19788_s1 + $0x1e40] sm:$0xff] }
 0x1ba   :  { %9922 = vmatpush1.bf16.msra.mxu0 %v13112_v56  ;;  %v1123_v56 = vld [vmem:[%s19788_s1 + $0x1d00] sm:$0xff] }
 0x1bb   :  { %10455 = vmatpush1.bf16.msra.mxu1 %v13114_v57  ;;  %9923 = vmatprep.subr.bf16.mxu0 %v13121_v58  ;;  %v1127_v57 = vld [vmem:[%s19788_s1 + $0x1d20] sm:$0xff]  ;;  %v1124_v58 = vld [vmem:[%s19788_s1 + $0x1d08] sm:$0xff] }
 0x1bc   :  { %10456 = vmatprep.subr.bf16.mxu1 %v13123_v60  ;;  %v1128_v60 = vld [vmem:[%s19788_s1 + $0x1d28] sm:$0xff]  ;;  %v13169_v1 = vcombine.high %v1123_v56, %v1127_v57  ;;  %v1167_v15 = vld [vmem:[%s19788_s1 + $0x1e60] sm:$0xff] }
 0x1bd   :  { %v13171_v3 = vcombine.high %v1124_v58, %v1128_v60  ;;  %v13170_v19 = vcombine.low %v1124_v58, %v1128_v60  ;;  %v1171_v58 = vld [vmem:[%s19788_s1 + $0x1e80] sm:$0xff] }
 0x1be   :  { %9924 = vmatpush1.bf16.msra.mxu0 %v13120_v5  ;;  %v1135_v5 = vld [vmem:[%s19788_s1 + $0x1d60] sm:$0xff] }
 0x1bf   :  { %10457 = vmatpush1.bf16.msra.mxu1 %v13122_v6  ;;  %9925 = vmatprep.subr.bf16.mxu0 %v13129_v7  ;;  %v1132_v6 = vld [vmem:[%s19788_s1 + $0x1d48] sm:$0xff]  ;;  %v13177_v8 = vcombine.high %v1131_v4, %v1135_v5  ;;  %v1175_v60 = vld [vmem:[%s19788_s1 + $0x1ea0] sm:$0xff] }
 0x1c0   :  { %10458 = vmatprep.subr.bf16.mxu1 %v13131_v17  ;;  %v1136_v7 = vld [vmem:[%s19788_s1 + $0x1d68] sm:$0xff]  ;;  %v13168_v17 = vcombine.low %v1123_v56, %v1127_v57  ;;  %v13209_v56 = vcombine.high %v1163_v51, %v1167_v15 }
 0x1c1   :  { %v13179_v13 = vcombine.high %v1132_v6, %v1136_v7  ;;  %v13178_v21 = vcombine.low %v1132_v6, %v1136_v7  ;;  %v1179_v6 = vld [vmem:[%s19788_s1 + $0x1ec0] sm:$0xff] }
 0x1c2   :  { %9926 = vmatpush1.bf16.msra.mxu0 %v13128_v14  ;;  %v1143_v14 = vld [vmem:[%s19788_s1 + $0x1da0] sm:$0xff] }
 0x1c3   :  { %10459 = vmatpush1.bf16.msra.mxu1 %v13130_v16  ;;  %9936 = vmatprep.subr.bf16.mxu0 %v13137_v18  ;;  %v1140_v16 = vld [vmem:[%s19788_s1 + $0x1d88] sm:$0xff]  ;;  %v13185_v22 = vcombine.high %v1139_v59, %v1143_v14  ;;  %v1183_v7 = vld [vmem:[%s19788_s1 + $0x1ee0] sm:$0xff] }
 0x1c4   :  { %10469 = vmatprep.subr.bf16.mxu1 %v13139_v20  ;;  %v1144_v18 = vld [vmem:[%s19788_s1 + $0x1da8] sm:$0xff]  ;;  %v13176_v20 = vcombine.low %v1131_v4, %v1135_v5  ;;  %v13217_v4 = vcombine.high %v1171_v58, %v1175_v60 }
 0x1c5   :  { %9928 = vmatmul.mubr.bf16.vlgmr.msra.gmra.mrb[0].mxu0 %v15856_v26  ;;  %v13187_v24 = vcombine.high %v1140_v16, %v1144_v18 }
 0x1c6   :  { %9937 = vmatpush1.bf16.msra.mxu0 %v13136_v63  ;;  %10461 = vmatmul.mubr.bf16.vlgmr.msra.gmra.mrb[0].mxu1 %v15856_v26  ;;  %v1148_v63 = vld [vmem:[%s19788_s1 + $0x1dc8] sm:$0xff] }
 0x1c7   :  { %10470 = vmatpush1.bf16.msra.mxu1 %v13138_v32  ;;  %9938 = vmatprep.subr.bf16.mxu0 %v13145_v34  ;;  %v1152_v32 = vld [vmem:[%s19788_s1 + $0x1de8] sm:$0xff]  ;;  %v13184_v34 = vcombine.low %v1139_v59, %v1143_v14  ;;  %v13225_v59 = vcombine.high %v1179_v6, %v1183_v7 }
 0x1c8   :  { %10471 = vmatprep.subr.bf16.mxu1 %v13147_v35  ;;  %9968 = vmatprep.mubr.bf16.mxu0 %v15870_v54  ;;  %v13186_v35 = vcombine.low %v1140_v16, %v1144_v18  ;;  %v13195_v36 = vcombine.high %v1148_v63, %v1152_v32  ;;  %v1187_v16 = vld [vmem:[%s19788_s1 + $0x1f00] sm:$0xff] }
 0x1c9   :  { %10501 = vmatprep.mubr.bf16.mxu1 %v15870_v54  ;;  %v1191_v18 = vld [vmem:[%s19788_s1 + $0x1f20] sm:$0xff] }
 0x1ca   :  { %9939 = vmatpush1.bf16.msra.mxu0 %v13144_v42  ;;  %v1156_v42 = vld [vmem:[%s19788_s1 + $0x1e08] sm:$0xff] }
 0x1cb   :  { %10472 = vmatpush1.bf16.msra.mxu1 %v13146_v43  ;;  %9940 = vmatprep.subr.bf16.mxu0 %v13153_v45  ;;  %v1160_v43 = vld [vmem:[%s19788_s1 + $0x1e28] sm:$0xff]  ;;  %v13192_v45 = vcombine.low %v1147_v27, %v1151_v30  ;;  %v13233_v27 = vcombine.high %v1187_v16, %v1191_v18 }
 0x1cc   :  { %10473 = vmatprep.subr.bf16.mxu1 %v13155_v46  ;;  %v13194_v46 = vcombine.low %v1148_v63, %v1152_v32  ;;  %v13203_v48 = vcombine.high %v1156_v42, %v1160_v43  ;;  %v1195_v63 = vld [vmem:[%s19788_s1 + $0x1f40] sm:$0xff] }
 0x1cd   :  { %v1199_v32 = vld [vmem:[%s19788_s1 + $0x1f60] sm:$0xff] }
 0x1ce   :  { %9941 = vmatpush1.bf16.msra.mxu0 %v13152_v49  ;;  %v1164_v49 = vld [vmem:[%s19788_s1 + $0x1e48] sm:$0xff] }
 0x1cf   :  { %10474 = vmatpush1.bf16.msra.mxu1 %v13154_v23  ;;  %9942 = vmatprep.subr.bf16.mxu0 %v13161_v52  ;;  %v1168_v23 = vld [vmem:[%s19788_s1 + $0x1e68] sm:$0xff]  ;;  %v13200_v52 = vcombine.low %v1155_v37, %v1159_v39  ;;  %v13241_v37 = vcombine.high %v1195_v63, %v1199_v32 }
 0x1d0   :  { %10475 = vmatprep.subr.bf16.mxu1 %v13163_v55  ;;  %v13202_v55 = vcombine.low %v1156_v42, %v1160_v43  ;;  %v13211_v57 = vcombine.high %v1164_v49, %v1168_v23  ;;  %v1203_v42 = vld [vmem:[%s19788_s1 + $0x1f80] sm:$0xff] }
 0x1d1   :  { %v1207_v43 = vld [vmem:[%s19788_s1 + $0x1fa0] sm:$0xff] }
 0x1d2   :  { %9943 = vmatpush1.bf16.msra.mxu0 %v13160_v61  ;;  %v1172_v61 = vld [vmem:[%s19788_s1 + $0x1e88] sm:$0xff] }
 0x1d3   :  { %10476 = vmatpush1.bf16.msra.mxu1 %v13162_v62  ;;  %9944 = vmatprep.subr.bf16.mxu0 %v13169_v1  ;;  %v1176_v62 = vld [vmem:[%s19788_s1 + $0x1ea8] sm:$0xff]  ;;  %v13208_v1 = vcombine.low %v1163_v51, %v1167_v15  ;;  %v13249_v51 = vcombine.high %v1203_v42, %v1207_v43 }
 0x1d4   :  { %10477 = vmatprep.subr.bf16.mxu1 %v13171_v3  ;;  %v13210_v3 = vcombine.low %v1164_v49, %v1168_v23  ;;  %v13219_v5 = vcombine.high %v1172_v61, %v1176_v62  ;;  %v1211_v49 = vld [vmem:[%s19788_s1 + $0x1fc0] sm:$0xff] }
 0x1d5   :  { %v1215_v23 = vld [vmem:[%s19788_s1 + $0x1fe0] sm:$0xff] }
 0x1d6   :  { %9945 = vmatpush1.bf16.msra.mxu0 %v13168_v17  ;;  %v1180_v17 = vld [vmem:[%s19788_s1 + $0x1ec8] sm:$0xff] }
 0x1d7   :  { %10478 = vmatpush1.bf16.msra.mxu1 %v13170_v19  ;;  %9946 = vmatprep.subr.bf16.mxu0 %v13177_v8  ;;  %v1184_v19 = vld [vmem:[%s19788_s1 + $0x1ee8] sm:$0xff]  ;;  %v13216_v8 = vcombine.low %v1171_v58, %v1175_v60  ;;  %v13257_v60 = vcombine.high %v1211_v49, %v1215_v23 }
 0x1d8   :  { %10479 = vmatprep.subr.bf16.mxu1 %v13179_v13  ;;  %v13218_v13 = vcombine.low %v1172_v61, %v1176_v62  ;;  %v13227_v14 = vcombine.high %v1180_v17, %v1184_v19  ;;  %v1219_v62 = vld [vmem:[%s19788_s1 + $0x2000] sm:$0xff] }
 0x1da   :  { %9947 = vmatpush1.bf16.msra.mxu0 %v13176_v20  ;;  %v1188_v20 = vld [vmem:[%s19788_s1 + $0x1f08] sm:$0xff] }
 0x1db   :  { %10480 = vmatpush1.bf16.msra.mxu1 %v13178_v21  ;;  %9948 = vmatprep.subr.bf16.mxu0 %v13185_v22  ;;  %v1192_v21 = vld [vmem:[%s19788_s1 + $0x1f28] sm:$0xff]  ;;  %v13224_v22 = vcombine.low %v1179_v6, %v1183_v7  ;;  %v13256_v6 = vcombine.low %v1211_v49, %v1215_v23 }
 0x1dc   :  { %10481 = vmatprep.subr.bf16.mxu1 %v13187_v24  ;;  %v13226_v24 = vcombine.low %v1180_v17, %v1184_v19  ;;  %v13235_v30 = vcombine.high %v1188_v20, %v1192_v21  ;;  %v1252_v49 = vld [vmem:[%s19788_s1 + $0x2108] sm:$0xff] }
 0x1dd   :  { %v1256_v23 = vld [vmem:[%s19788_s1 + $0x2128] sm:$0xff] }
 0x1de   :  { %9949 = vmatpush1.bf16.msra.mxu0 %v13184_v34  ;;  %v1196_v34 = vld [vmem:[%s19788_s1 + $0x1f48] sm:$0xff] }
 0x1df   :  { %10482 = vmatpush1.bf16.msra.mxu1 %v13186_v35  ;;  %9950 = vmatprep.subr.bf16.mxu0 %v13193_v28  ;;  %v1200_v35 = vld [vmem:[%s19788_s1 + $0x1f68] sm:$0xff]  ;;  %v13232_v28 = vcombine.low %v1187_v16, %v1191_v18 }
 0x1e0   :  { %10483 = vmatprep.subr.bf16.mxu1 %v13195_v36  ;;  %v13234_v36 = vcombine.low %v1188_v20, %v1192_v21  ;;  %v13243_v39 = vcombine.high %v1196_v34, %v1200_v35  ;;  %v1228_v16 = vld [vmem:[%s19788_s1 + $0x2048] sm:$0xff] }
 0x1e1   :  { %v1232_v18 = vld [vmem:[%s19788_s1 + $0x2068] sm:$0xff] }
 0x1e2   :  { %9951 = vmatpush1.bf16.msra.mxu0 %v13192_v45  ;;  %v1204_v45 = vld [vmem:[%s19788_s1 + $0x1f88] sm:$0xff] }
 0x1e3   :  { %10484 = vmatpush1.bf16.msra.mxu1 %v13194_v46  ;;  %9952 = vmatprep.subr.bf16.mxu0 %v13201_v47  ;;  %v1208_v46 = vld [vmem:[%s19788_s1 + $0x1fa8] sm:$0xff]  ;;  %v13240_v47 = vcombine.low %v1195_v63, %v1199_v32 }
 0x1e4   :  { %10485 = vmatprep.subr.bf16.mxu1 %v13203_v48  ;;  %v13242_v48 = vcombine.low %v1196_v34, %v1200_v35  ;;  %v13251_v15 = vcombine.high %v1204_v45, %v1208_v46  ;;  %v13250_v58 = vcombine.low %v1204_v45, %v1208_v46  ;;  %v1236_v63 = vld [vmem:[%s19788_s1 + $0x2088] sm:$0xff]  ;;  %v13274_v35 = vcombine.low %v1228_v16, %v1232_v18 }
 0x1e5   :  { %v1240_v32 = vld [vmem:[%s19788_s1 + $0x20a8] sm:$0xff] }
 0x1e6   :  { %9953 = vmatpush1.bf16.msra.mxu0 %v13200_v52  ;;  %v1212_v52 = vld [vmem:[%s19788_s1 + $0x1fc8] sm:$0xff]  ;;  %v13282_v46 = vcombine.low %v1236_v63, %v1240_v32 }
 0x1e7   :  { %10486 = vmatpush1.bf16.msra.mxu1 %v13202_v55  ;;  %9954 = vmatprep.subr.bf16.mxu0 %v13209_v56  ;;  %v1216_v55 = vld [vmem:[%s19788_s1 + $0x1fe8] sm:$0xff]  ;;  %v16041_v56 = vld [vmem:[%s19787_s0 + $0x20] sm:$0xff] }
 0x1e8   :  { %10487 = vmatprep.subr.bf16.mxu1 %v13211_v57  ;;  %v13248_v57 = vcombine.low %v1203_v42, %v1207_v43  ;;  %v13259_v61 = vcombine.high %v1212_v52, %v1216_v55  ;;  %v13258_v7 = vcombine.low %v1212_v52, %v1216_v55  ;;  %v1244_v42 = vld [vmem:[%s19788_s1 + $0x20c8] sm:$0xff] }
 0x1e9   :  { %v1248_v43 = vld [vmem:[%s19788_s1 + $0x20e8] sm:$0xff] }
 0x1ea   :  { %9955 = vmatpush1.bf16.msra.mxu0 %v13208_v1  ;;  %v1223_v1 = vld [vmem:[%s19788_s1 + $0x2020] sm:$0xff]  ;;  %v13290_v55 = vcombine.low %v1244_v42, %v1248_v43 }
 0x1eb   :  { %10488 = vmatpush1.bf16.msra.mxu1 %v13210_v3  ;;  %9956 = vmatprep.subr.bf16.mxu0 %v13217_v4  ;;  %v16051_v3 = vrot.slane %v16041_v56, %v14432_v53  ;;  %v1220_v4 = vld [vmem:[%s19788_s1 + $0x2008] sm:$0xff]  ;;  %v13265_v17 = vcombine.high %v1219_v62, %v1223_v1  ;;  %v13264_v20 = vcombine.low %v1219_v62, %v1223_v1 }
 0x1ec   :  { %10489 = vmatprep.subr.bf16.mxu1 %v13219_v5  ;;  %v1224_v5 = vld [vmem:[%s19788_s1 + $0x2028] sm:$0xff] }
 0x1ed   :  { %v13267_v19 = vcombine.high %v1220_v4, %v1224_v5  ;;  %v13266_v21 = vcombine.low %v1220_v4, %v1224_v5  ;;  %v1260_v62 = vld [vmem:[%s19788_s1 + $0x2148] sm:$0xff]  ;;  %v13298_v5 = vcombine.low %v1252_v49, %v1256_v23 }
 0x1ee   :  { %9957 = vmatpush1.bf16.msra.mxu0 %v13216_v8  ;;  %v1227_v8 = vld [vmem:[%s19788_s1 + $0x2040] sm:$0xff]  ;;  %v1264_v1 = vld [vmem:[%s19788_s1 + $0x2168] sm:$0xff] }
 0x1ef   :  { %10490 = vmatpush1.bf16.msra.mxu1 %v13218_v13  ;;  %9958 = vmatprep.subr.bf16.mxu0 %v13225_v59  ;;  %v1231_v13 = vld [vmem:[%s19788_s1 + $0x2060] sm:$0xff]  ;;  %v119_v59 = vcombine.high %v16051_v3, %v16051_v3 }
 0x1f0   :  { %10491 = vmatprep.subr.bf16.mxu1 %v13227_v14  ;;  %v16069_v14 = vpack.c.bf16 %v15838_v12, %v15838_v12  ;;  %v1235_v12 = vld [vmem:[%s19788_s1 + $0x2080] sm:$0xff]  ;;  %v13272_v34 = vcombine.low %v1227_v8, %v1231_v13 }
 0x1f2   :  { %9959 = vmatpush1.bf16.msra.mxu0 %v13224_v22  ;;  %v13273_v22 = vcombine.high %v1227_v8, %v1231_v13  ;;  %v1268_v8 = vld [vmem:[%s19788_s1 + $0x2188] sm:$0xff] }
 0x1f3   :  { %10492 = vmatpush1.bf16.msra.mxu1 %v13226_v24  ;;  %9960 = vmatprep.subr.bf16.mxu0 %v13233_v27  ;;  %v13275_v24 = vcombine.high %v1228_v16, %v1232_v18  ;;  %v1239_v27 = vld [vmem:[%s19788_s1 + $0x20a0] sm:$0xff]  ;;  %v1272_v13 = vld [vmem:[%s19788_s1 + $0x21a8] sm:$0xff]  ;;  %v13306_v16 = vcombine.low %v1260_v62, %v1264_v1 }
 0x1f4   :  { %10493 = vmatprep.subr.bf16.mxu1 %v13235_v30  ;;  %v16083_v30 = vpack.c.bf16 %v119_v59, %v119_v59  ;;  %v13280_v45 = vcombine.low %v1235_v12, %v1239_v27 }
 0x1f6   :  { %9961 = vmatpush1.bf16.msra.mxu0 %v13232_v28  ;;  %v13281_v28 = vcombine.high %v1235_v12, %v1239_v27  ;;  %v1280_v12 = vld [vmem:[%s19788_s1 + $0x21e8] sm:$0xff] }
 0x1f7   :  { %10494 = vmatpush1.bf16.msra.mxu1 %v13234_v36  ;;  %9962 = vmatprep.subr.bf16.mxu0 %v13241_v37  ;;  %v13283_v36 = vcombine.high %v1236_v63, %v1240_v32  ;;  %v1243_v37 = vld [vmem:[%s19788_s1 + $0x20c0] sm:$0xff]  ;;  %v13314_v63 = vcombine.low %v1268_v8, %v1272_v13 }
 0x1f8   :  { %10495 = vmatprep.subr.bf16.mxu1 %v13243_v39  ;;  %v1247_v39 = vld [vmem:[%s19788_s1 + $0x20e0] sm:$0xff] }
 0x1f9   :  { %v13288_v52 = vcombine.low %v1243_v37, %v1247_v39 }
 0x1fa   :  { %9963 = vmatpush1.bf16.msra.mxu0 %v13240_v47  ;;  %v13289_v47 = vcombine.high %v1243_v37, %v1247_v39  ;;  %v1288_v37 = vld [vmem:[%s19788_s1 + $0x2228] sm:$0xff] }
 0x1fb   :  { %10496 = vmatpush1.bf16.msra.mxu1 %v13242_v48  ;;  %9964 = vmatprep.subr.bf16.mxu0 %v13249_v51  ;;  %v13291_v48 = vcombine.high %v1244_v42, %v1248_v43  ;;  %v1251_v51 = vld [vmem:[%s19788_s1 + $0x2100] sm:$0xff] }
 0x1fc   :  { %10497 = vmatprep.subr.bf16.mxu1 %v13251_v15  ;;  %v1255_v15 = vld [vmem:[%s19788_s1 + $0x2120] sm:$0xff] }
 0x1fd   :  { %v13296_v4 = vcombine.low %v1251_v51, %v1255_v15 }
 0x1fe   :  { %9965 = vmatpush1.bf16.msra.mxu0 %v13248_v57  ;;  %v13297_v57 = vcombine.high %v1251_v51, %v1255_v15  ;;  %v1296_v51 = vld [vmem:[%s19788_s1 + $0x2268] sm:$0xff] }
 0x1ff   :  { %10498 = vmatpush1.bf16.msra.mxu1 %v13250_v58  ;;  %9966 = vmatprep.subr.bf16.mxu0 %v13257_v60  ;;  %v13299_v58 = vcombine.high %v1252_v49, %v1256_v23  ;;  %v1259_v60 = vld [vmem:[%s19788_s1 + $0x2140] sm:$0xff] }
 0x200   :  { %10499 = vmatprep.subr.bf16.mxu1 %v13259_v61  ;;  %v1263_v61 = vld [vmem:[%s19788_s1 + $0x2160] sm:$0xff] }
 0x201   :  { %v13304_v59 = vcombine.low %v1259_v60, %v1263_v61 }
 0x202   :  { %9967 = vmatpush1.bf16.msra.mxu0 %v13256_v6  ;;  %v13305_v6 = vcombine.high %v1259_v60, %v1263_v61  ;;  %v1304_v60 = vld [vmem:[%s19788_s1 + $0x22a8] sm:$0xff] }
 0x203   :  { %10500 = vmatpush1.bf16.msra.mxu1 %v13258_v7  ;;  %9977 = vmatprep.subr.bf16.mxu0 %v13265_v17  ;;  %v13307_v7 = vcombine.high %v1260_v62, %v1264_v1  ;;  %v1267_v17 = vld [vmem:[%s19788_s1 + $0x2180] sm:$0xff] }
 0x204   :  { %10510 = vmatprep.subr.bf16.mxu1 %v13267_v19  ;;  %v1271_v19 = vld [vmem:[%s19788_s1 + $0x21a0] sm:$0xff] }
 0x205   :  { %9969 = vmatmul.mubr.bf16.vlgmr.msra.gmra.mrb[0].mxu0 %v16069_v14  ;;  %v13313_v18 = vcombine.high %v1267_v17, %v1271_v19  ;;  %v13312_v27 = vcombine.low %v1267_v17, %v1271_v19  ;;  %v1312_v17 = vld [vmem:[%s19788_s1 + $0x22e8] sm:$0xff] }
 0x206   :  { %9978 = vmatpush1.bf16.msra.mxu0 %v13264_v20  ;;  %10502 = vmatmul.mubr.bf16.vlgmr.msra.gmra.mrb[0].mxu1 %v16069_v14  ;;  %v13315_v20 = vcombine.high %v1268_v8, %v1272_v13 }
 0x207   :  { %10511 = vmatpush1.bf16.msra.mxu1 %v13266_v21  ;;  %9979 = vmatprep.subr.bf16.mxu0 %v13273_v22  ;;  %v1275_v21 = vld [vmem:[%s19788_s1 + $0x21c0] sm:$0xff] }
 0x208   :  { %10512 = vmatprep.subr.bf16.mxu1 %v13275_v24  ;;  %10009 = vmatprep.mubr.bf16.mxu0 %v16083_v30  ;;  %v1279_v22 = vld [vmem:[%s19788_s1 + $0x21e0] sm:$0xff]  ;;  %v1276_v24 = vld [vmem:[%s19788_s1 + $0x21c8] sm:$0xff] }
 0x209   :  { %10542 = vmatprep.mubr.bf16.mxu1 %v16083_v30  ;;  %v13321_v32 = vcombine.high %v1275_v21, %v1279_v22  ;;  %v13320_v39 = vcombine.low %v1275_v21, %v1279_v22  ;;  %v13322_v42 = vcombine.low %v1276_v24, %v1280_v12  ;;  %v1320_v21 = vld [vmem:[%s19788_s1 + $0x2328] sm:$0xff] }
 0x20a   :  { %9980 = vmatpush1.bf16.msra.mxu0 %v13272_v34  ;;  %v13323_v34 = vcombine.high %v1276_v24, %v1280_v12 }
 0x20b   :  { %10513 = vmatpush1.bf16.msra.mxu1 %v13274_v35  ;;  %9981 = vmatprep.subr.bf16.mxu0 %v13281_v28  ;;  %v1283_v35 = vld [vmem:[%s19788_s1 + $0x2200] sm:$0xff] }
 0x20c   :  { %10514 = vmatprep.subr.bf16.mxu1 %v13283_v36  ;;  %v1287_v28 = vld [vmem:[%s19788_s1 + $0x2220] sm:$0xff]  ;;  %v1284_v36 = vld [vmem:[%s19788_s1 + $0x2208] sm:$0xff] }
 0x20d   :  { %v13329_v43 = vcombine.high %v1283_v35, %v1287_v28  ;;  %v13328_v15 = vcombine.low %v1283_v35, %v1287_v28  ;;  %v13330_v49 = vcombine.low %v1284_v36, %v1288_v37  ;;  %v1328_v35 = vld [vmem:[%s19788_s1 + $0x2368] sm:$0xff] }
 0x20e   :  { %9982 = vmatpush1.bf16.msra.mxu0 %v13280_v45  ;;  %v13331_v45 = vcombine.high %v1284_v36, %v1288_v37 }
 0x20f   :  { %10515 = vmatpush1.bf16.msra.mxu1 %v13282_v46  ;;  %9983 = vmatprep.subr.bf16.mxu0 %v13289_v47  ;;  %v1291_v46 = vld [vmem:[%s19788_s1 + $0x2240] sm:$0xff] }
 0x210   :  { %10516 = vmatprep.subr.bf16.mxu1 %v13291_v48  ;;  %v1295_v47 = vld [vmem:[%s19788_s1 + $0x2260] sm:$0xff]  ;;  %v1292_v48 = vld [vmem:[%s19788_s1 + $0x2248] sm:$0xff] }
 0x211   :  { %v13337_v23 = vcombine.high %v1291_v46, %v1295_v47  ;;  %v13336_v61 = vcombine.low %v1291_v46, %v1295_v47  ;;  %v13338_v62 = vcombine.low %v1292_v48, %v1296_v51  ;;  %v1336_v46 = vld [vmem:[%s19788_s1 + $0x23a8] sm:$0xff] }
 0x212   :  { %9984 = vmatpush1.bf16.msra.mxu0 %v13288_v52  ;;  %v13339_v52 = vcombine.high %v1292_v48, %v1296_v51 }
 0x213   :  { %10517 = vmatpush1.bf16.msra.mxu1 %v13290_v55  ;;  %9985 = vmatprep.subr.bf16.mxu0 %v13297_v57  ;;  %v1299_v55 = vld [vmem:[%s19788_s1 + $0x2280] sm:$0xff] }
 0x214   :  { %10518 = vmatprep.subr.bf16.mxu1 %v13299_v58  ;;  %v1303_v57 = vld [vmem:[%s19788_s1 + $0x22a0] sm:$0xff]  ;;  %v1300_v58 = vld [vmem:[%s19788_s1 + $0x2288] sm:$0xff] }
 0x215   :  { %v13345_v1 = vcombine.high %v1299_v55, %v1303_v57  ;;  %v13344_v19 = vcombine.low %v1299_v55, %v1303_v57  ;;  %v13346_v8 = vcombine.low %v1300_v58, %v1304_v60  ;;  %v1340_v55 = vld [vmem:[%s19788_s1 + $0x23c8] sm:$0xff] }
 0x216   :  { %9986 = vmatpush1.bf16.msra.mxu0 %v13296_v4  ;;  %v13347_v4 = vcombine.high %v1300_v58, %v1304_v60  ;;  %v1344_v57 = vld [vmem:[%s19788_s1 + $0x23e8] sm:$0xff] }
 0x217   :  { %10519 = vmatpush1.bf16.msra.mxu1 %v13298_v5  ;;  %9987 = vmatprep.subr.bf16.mxu0 %v13305_v6  ;;  %v1307_v5 = vld [vmem:[%s19788_s1 + $0x22c0] sm:$0xff] }
 0x218   :  { %10520 = vmatprep.subr.bf16.mxu1 %v13307_v7  ;;  %v1311_v6 = vld [vmem:[%s19788_s1 + $0x22e0] sm:$0xff]  ;;  %v1308_v7 = vld [vmem:[%s19788_s1 + $0x22c8] sm:$0xff] }
 0x219   :  { %v13353_v13 = vcombine.high %v1307_v5, %v1311_v6  ;;  %v13352_v22 = vcombine.low %v1307_v5, %v1311_v6  ;;  %v13354_v24 = vcombine.low %v1308_v7, %v1312_v17  ;;  %v1348_v5 = vld [vmem:[%s19788_s1 + $0x2408] sm:$0xff] }
 0x21a   :  { %9988 = vmatpush1.bf16.msra.mxu0 %v13304_v59  ;;  %v13355_v59 = vcombine.high %v1308_v7, %v1312_v17  ;;  %v1352_v6 = vld [vmem:[%s19788_s1 + $0x2428] sm:$0xff]  ;;  %v13386_v17 = vcombine.low %v1340_v55, %v1344_v57 }
 0x21b   :  { %10521 = vmatpush1.bf16.msra.mxu1 %v13306_v16  ;;  %9989 = vmatprep.subr.bf16.mxu0 %v13313_v18  ;;  %v1315_v16 = vld [vmem:[%s19788_s1 + $0x2300] sm:$0xff] }
 0x21c   :  { %10522 = vmatprep.subr.bf16.mxu1 %v13315_v20  ;;  %v1319_v18 = vld [vmem:[%s19788_s1 + $0x2320] sm:$0xff]  ;;  %v1316_v20 = vld [vmem:[%s19788_s1 + $0x2308] sm:$0xff] }
 0x21d   :  { %v13361_v12 = vcombine.high %v1315_v16, %v1319_v18  ;;  %v13360_v28 = vcombine.low %v1315_v16, %v1319_v18  ;;  %v13362_v36 = vcombine.low %v1316_v20, %v1320_v21  ;;  %v16278_v18 = vpack.c.bf16 %v16051_v3, %v16051_v3  ;;  %v1363_v3 = vld [vmem:[%s19788_s1 + $0x2480] sm:$0xff] }
 0x21e   :  { %9990 = vmatpush1.bf16.msra.mxu0 %v13312_v27  ;;  %v13363_v27 = vcombine.high %v1316_v20, %v1320_v21  ;;  %v1356_v20 = vld [vmem:[%s19788_s1 + $0x2448] sm:$0xff] }
 0x21f   :  { %10523 = vmatpush1.bf16.msra.mxu1 %v13314_v63  ;;  %9991 = vmatprep.subr.bf16.mxu0 %v13321_v32  ;;  %v1323_v63 = vld [vmem:[%s19788_s1 + $0x2340] sm:$0xff]  ;;  %v1360_v21 = vld [vmem:[%s19788_s1 + $0x2468] sm:$0xff] }
 0x220   :  { %10524 = vmatprep.subr.bf16.mxu1 %v13323_v34  ;;  %v1327_v32 = vld [vmem:[%s19788_s1 + $0x2360] sm:$0xff]  ;;  %v1324_v34 = vld [vmem:[%s19788_s1 + $0x2348] sm:$0xff] }
 0x221   :  { %v13369_v37 = vcombine.high %v1323_v63, %v1327_v32  ;;  %v13368_v47 = vcombine.low %v1323_v63, %v1327_v32  ;;  %v13370_v48 = vcombine.low %v1324_v34, %v1328_v35  ;;  %v1367_v63 = vld [vmem:[%s19788_s1 + $0x24a0] sm:$0xff] }
 0x222   :  { %9992 = vmatpush1.bf16.msra.mxu0 %v13320_v39  ;;  %v13371_v39 = vcombine.high %v1324_v34, %v1328_v35  ;;  %v1364_v34 = vld [vmem:[%s19788_s1 + $0x2488] sm:$0xff] }
 0x223   :  { %10525 = vmatpush1.bf16.msra.mxu1 %v13322_v42  ;;  %9993 = vmatprep.subr.bf16.mxu0 %v13329_v43  ;;  %v1331_v42 = vld [vmem:[%s19788_s1 + $0x2380] sm:$0xff]  ;;  %v1368_v35 = vld [vmem:[%s19788_s1 + $0x24a8] sm:$0xff] }
 0x224   :  { %10526 = vmatprep.subr.bf16.mxu1 %v13331_v45  ;;  %v1335_v43 = vld [vmem:[%s19788_s1 + $0x23a0] sm:$0xff]  ;;  %v1332_v45 = vld [vmem:[%s19788_s1 + $0x2388] sm:$0xff] }
 0x225   :  { %v13377_v51 = vcombine.high %v1331_v42, %v1335_v43  ;;  %v13376_v58 = vcombine.low %v1331_v42, %v1335_v43  ;;  %v13378_v60 = vcombine.low %v1332_v45, %v1336_v46  ;;  %v1371_v42 = vld [vmem:[%s19788_s1 + $0x24c0] sm:$0xff] }
 0x226   :  { %9994 = vmatpush1.bf16.msra.mxu0 %v13328_v15  ;;  %v13379_v15 = vcombine.high %v1332_v45, %v1336_v46  ;;  %v1375_v43 = vld [vmem:[%s19788_s1 + $0x24e0] sm:$0xff]  ;;  %v1372_v45 = vld [vmem:[%s19788_s1 + $0x24c8] sm:$0xff] }
 0x227   :  { %10527 = vmatpush1.bf16.msra.mxu1 %v13330_v49  ;;  %9995 = vmatprep.subr.bf16.mxu0 %v13337_v23  ;;  %v1339_v49 = vld [vmem:[%s19788_s1 + $0x23c0] sm:$0xff]  ;;  %v1376_v46 = vld [vmem:[%s19788_s1 + $0x24e8] sm:$0xff] }
 0x228   :  { %10528 = vmatprep.subr.bf16.mxu1 %v13339_v52  ;;  %v1343_v23 = vld [vmem:[%s19788_s1 + $0x23e0] sm:$0xff]  ;;  %v104_v52 = vcombine.high %v16041_v56, %v16041_v56 }
 0x229   :  { %v1347_v56 = vld [vmem:[%s19788_s1 + $0x2400] sm:$0xff]  ;;  %v13384_v7 = vcombine.low %v1339_v49, %v1343_v23 }
 0x22a   :  { %9996 = vmatpush1.bf16.msra.mxu0 %v13336_v61  ;;  %v13385_v61 = vcombine.high %v1339_v49, %v1343_v23  ;;  %v1379_v49 = vld [vmem:[%s19788_s1 + $0x2500] sm:$0xff] }
 0x22b   :  { %10529 = vmatpush1.bf16.msra.mxu1 %v13338_v62  ;;  %9997 = vmatprep.subr.bf16.mxu0 %v13345_v1  ;;  %v13387_v62 = vcombine.high %v1340_v55, %v1344_v57  ;;  %v1351_v1 = vld [vmem:[%s19788_s1 + $0x2420] sm:$0xff]  ;;  %v1384_v55 = vld [vmem:[%s19788_s1 + $0x2528] sm:$0xff]  ;;  %v13416_v57 = vcombine.low %v1371_v42, %v1375_v43 }
 0x22c   :  { %10530 = vmatprep.subr.bf16.mxu1 %v13347_v4  ;;  %v16260_v4 = vrot.slane %v104_v52, %v14432_v53  ;;  %v1383_v23 = vld [vmem:[%s19788_s1 + $0x2520] sm:$0xff]  ;;  %v1380_v52 = vld [vmem:[%s19788_s1 + $0x2508] sm:$0xff] }
 0x22e   :  { %9998 = vmatpush1.bf16.msra.mxu0 %v13344_v19  ;;  %v13393_v19 = vcombine.high %v1347_v56, %v1351_v1  ;;  %v120_v16 = vcombine.high %v16260_v4, %v16260_v4 }
 0x22f   :  { %10531 = vmatpush1.bf16.msra.mxu1 %v13346_v8  ;;  %9999 = vmatprep.subr.bf16.mxu0 %v13353_v13  ;;  %v13395_v8 = vcombine.high %v1348_v5, %v1352_v6  ;;  %v1355_v13 = vld [vmem:[%s19788_s1 + $0x2440] sm:$0xff] }
 0x230   :  { %10532 = vmatprep.subr.bf16.mxu1 %v13355_v59  ;;  %v1359_v59 = vld [vmem:[%s19788_s1 + $0x2460] sm:$0xff]  ;;  %v16292_v32 = vpack.c.bf16 %v120_v16, %v120_v16  ;;  %v1400_v16 = vld [vmem:[%s19788_s1 + $0x25a8] sm:$0xff] }
 0x232   :  { %10000 = vmatpush1.bf16.msra.mxu0 %v13352_v22  ;;  %v13392_v22 = vcombine.low %v1347_v56, %v1351_v1  ;;  %v1391_v56 = vld [vmem:[%s19788_s1 + $0x2560] sm:$0xff]  ;;  %v1388_v1 = vld [vmem:[%s19788_s1 + $0x2548] sm:$0xff] }
 0x233   :  { %10533 = vmatpush1.bf16.msra.mxu1 %v13354_v24  ;;  %10001 = vmatprep.subr.bf16.mxu0 %v13361_v12  ;;  %v13394_v24 = vcombine.low %v1348_v5, %v1352_v6  ;;  %v13401_v12 = vcombine.high %v1355_v13, %v1359_v59  ;;  %v1392_v5 = vld [vmem:[%s19788_s1 + $0x2568] sm:$0xff]  ;;  %v13424_v6 = vcombine.low %v1379_v49, %v1383_v23 }
 0x234   :  { %10534 = vmatprep.subr.bf16.mxu1 %v13363_v27  ;;  %v13403_v27 = vcombine.high %v1356_v20, %v1360_v21 }
 0x236   :  { %10002 = vmatpush1.bf16.msra.mxu0 %v13360_v28  ;;  %v13400_v28 = vcombine.low %v1355_v13, %v1359_v59  ;;  %v1399_v13 = vld [vmem:[%s19788_s1 + $0x25a0] sm:$0xff]  ;;  %v1396_v59 = vld [vmem:[%s19788_s1 + $0x2588] sm:$0xff] }
 0x237   :  { %10535 = vmatpush1.bf16.msra.mxu1 %v13362_v36  ;;  %10003 = vmatprep.subr.bf16.mxu0 %v13369_v37  ;;  %v13402_v36 = vcombine.low %v1356_v20, %v1360_v21  ;;  %v13409_v37 = vcombine.high %v1363_v3, %v1367_v63  ;;  %v13434_v21 = vcombine.low %v1388_v1, %v1392_v5 }
 0x238   :  { %10536 = vmatprep.subr.bf16.mxu1 %v13371_v39  ;;  %v13411_v39 = vcombine.high %v1364_v34, %v1368_v35 }
 0x23a   :  { %10004 = vmatpush1.bf16.msra.mxu0 %v13368_v47  ;;  %v13408_v47 = vcombine.low %v1363_v3, %v1367_v63  ;;  %v1404_v3 = vld [vmem:[%s19788_s1 + $0x25c8] sm:$0xff] }
 0x23b   :  { %10537 = vmatpush1.bf16.msra.mxu1 %v13370_v48  ;;  %10005 = vmatprep.subr.bf16.mxu0 %v13377_v51  ;;  %v13410_v48 = vcombine.low %v1364_v34, %v1368_v35  ;;  %v13417_v51 = vcombine.high %v1371_v42, %v1375_v43  ;;  %v1408_v63 = vld [vmem:[%s19788_s1 + $0x25e8] sm:$0xff]  ;;  %v13442_v35 = vcombine.low %v1396_v59, %v1400_v16 }
 0x23c   :  { %10538 = vmatprep.subr.bf16.mxu1 %v13379_v15  ;;  %v13419_v15 = vcombine.high %v1372_v45, %v1376_v46  ;;  %v1412_v42 = vld [vmem:[%s19788_s1 + $0x2608] sm:$0xff] }
 0x23d   :  { %v1416_v43 = vld [vmem:[%s19788_s1 + $0x2628] sm:$0xff] }
 0x23e   :  { %10006 = vmatpush1.bf16.msra.mxu0 %v13376_v58  ;;  %v13418_v58 = vcombine.low %v1372_v45, %v1376_v46  ;;  %v13450_v46 = vcombine.low %v1404_v3, %v1408_v63 }
 0x23f   :  { %10539 = vmatpush1.bf16.msra.mxu1 %v13378_v60  ;;  %10007 = vmatprep.subr.bf16.mxu0 %v13385_v61  ;;  %v13425_v60 = vcombine.high %v1379_v49, %v1383_v23  ;;  %v13427_v61 = vcombine.high %v1380_v52, %v1384_v55  ;;  %v1420_v49 = vld [vmem:[%s19788_s1 + $0x2648] sm:$0xff] }
 0x240   :  { %10540 = vmatprep.subr.bf16.mxu1 %v13387_v62  ;;  %v1387_v62 = vld [vmem:[%s19788_s1 + $0x2540] sm:$0xff]  ;;  %v1424_v23 = vld [vmem:[%s19788_s1 + $0x2668] sm:$0xff] }
 0x241   :  { %v13432_v20 = vcombine.low %v1387_v62, %v1391_v56 }
 0x242   :  { %10008 = vmatpush1.bf16.msra.mxu0 %v13384_v7  ;;  %v13426_v7 = vcombine.low %v1380_v52, %v1384_v55  ;;  %v13458_v55 = vcombine.low %v1412_v42, %v1416_v43 }
 0x243   :  { %10541 = vmatpush1.bf16.msra.mxu1 %v13386_v17  ;;  %10018 = vmatprep.subr.bf16.mxu0 %v13393_v19  ;;  %v13433_v17 = vcombine.high %v1387_v62, %v1391_v56  ;;  %v13435_v19 = vcombine.high %v1388_v1, %v1392_v5  ;;  %v1428_v62 = vld [vmem:[%s19788_s1 + $0x2688] sm:$0xff]  ;;  %v13466_v5 = vcombine.low %v1420_v49, %v1424_v23 }
 0x244   :  { %10551 = vmatprep.subr.bf16.mxu1 %v13395_v8  ;;  %v1395_v8 = vld [vmem:[%s19788_s1 + $0x2580] sm:$0xff]  ;;  %v1432_v56 = vld [vmem:[%s19788_s1 + $0x26a8] sm:$0xff] }
 0x245   :  { %10010 = vmatmul.mubr.bf16.vlgmr.msra.gmra.mrb[0].mxu0 %v16278_v18  ;;  %v13440_v34 = vcombine.low %v1395_v8, %v1399_v13 }
 0x246   :  { %10019 = vmatpush1.bf16.msra.mxu0 %v13392_v22  ;;  %10543 = vmatmul.mubr.bf16.vlgmr.msra.gmra.mrb[0].mxu1 %v16278_v18  ;;  %v13441_v22 = vcombine.high %v1395_v8, %v1399_v13  ;;  %v1436_v8 = vld [vmem:[%s19788_s1 + $0x26c8] sm:$0xff] }
 0x247   :  { %10552 = vmatpush1.bf16.msra.mxu1 %v13394_v24  ;;  %10020 = vmatprep.subr.bf16.mxu0 %v13401_v12  ;;  %v13443_v24 = vcombine.high %v1396_v59, %v1400_v16  ;;  %v1403_v12 = vld [vmem:[%s19788_s1 + $0x25c0] sm:$0xff]  ;;  %v1440_v13 = vld [vmem:[%s19788_s1 + $0x26e8] sm:$0xff]  ;;  %v13474_v16 = vcombine.low %v1428_v62, %v1432_v56 }
 0x248   :  { %10553 = vmatprep.subr.bf16.mxu1 %v13403_v27  ;;  %10050 = vmatprep.mubr.bf16.mxu0 %v16292_v32  ;;  %v1407_v27 = vld [vmem:[%s19788_s1 + $0x25e0] sm:$0xff] }
 0x249   :  { %10583 = vmatprep.mubr.bf16.mxu1 %v16292_v32  ;;  %v13448_v45 = vcombine.low %v1403_v12, %v1407_v27 }
 0x24a   :  { %10021 = vmatpush1.bf16.msra.mxu0 %v13400_v28  ;;  %v13449_v28 = vcombine.high %v1403_v12, %v1407_v27  ;;  %v1444_v12 = vld [vmem:[%s19788_s1 + $0x2708] sm:$0xff] }
 0x24b   :  { %10554 = vmatpush1.bf16.msra.mxu1 %v13402_v36  ;;  %10022 = vmatprep.subr.bf16.mxu0 %v13409_v37  ;;  %v13451_v36 = vcombine.high %v1404_v3, %v1408_v63  ;;  %v1411_v37 = vld [vmem:[%s19788_s1 + $0x2600] sm:$0xff]  ;;  %v1448_v27 = vld [vmem:[%s19788_s1 + $0x2728] sm:$0xff]  ;;  %v13482_v63 = vcombine.low %v1436_v8, %v1440_v13 }
 0x24c   :  { %10555 = vmatprep.subr.bf16.mxu1 %v13411_v39  ;;  %v1415_v39 = vld [vmem:[%s19788_s1 + $0x2620] sm:$0xff] }
 0x24d   :  { %v13456_v52 = vcombine.low %v1411_v37, %v1415_v39 }
 0x24e   :  { %10023 = vmatpush1.bf16.msra.mxu0 %v13408_v47  ;;  %v13457_v47 = vcombine.high %v1411_v37, %v1415_v39  ;;  %v1452_v37 = vld [vmem:[%s19788_s1 + $0x2748] sm:$0xff] }
 0x24f   :  { %10556 = vmatpush1.bf16.msra.mxu1 %v13410_v48  ;;  %10024 = vmatprep.subr.bf16.mxu0 %v13417_v51  ;;  %v13459_v48 = vcombine.high %v1412_v42, %v1416_v43  ;;  %v1419_v51 = vld [vmem:[%s19788_s1 + $0x2640] sm:$0xff]  ;;  %v1456_v39 = vld [vmem:[%s19788_s1 + $0x2768] sm:$0xff]  ;;  %v13490_v43 = vcombine.low %v1444_v12, %v1448_v27 }
 0x250   :  { %10557 = vmatprep.subr.bf16.mxu1 %v13419_v15  ;;  %v1423_v15 = vld [vmem:[%s19788_s1 + $0x2660] sm:$0xff] }
 0x251   :  { %v13464_v1 = vcombine.low %v1419_v51, %v1423_v15 }
 0x252   :  { %10025 = vmatpush1.bf16.msra.mxu0 %v13416_v57  ;;  %v13465_v57 = vcombine.high %v1419_v51, %v1423_v15  ;;  %v1460_v51 = vld [vmem:[%s19788_s1 + $0x2788] sm:$0xff] }
 0x253   :  { %10558 = vmatpush1.bf16.msra.mxu1 %v13418_v58  ;;  %10026 = vmatprep.subr.bf16.mxu0 %v13425_v60  ;;  %v13467_v58 = vcombine.high %v1420_v49, %v1424_v23  ;;  %v1427_v60 = vld [vmem:[%s19788_s1 + $0x2680] sm:$0xff]  ;;  %v1464_v15 = vld [vmem:[%s19788_s1 + $0x27a8] sm:$0xff]  ;;  %v13498_v23 = vcombine.low %v1452_v37, %v1456_v39 }
 0x254   :  { %10559 = vmatprep.subr.bf16.mxu1 %v13427_v61  ;;  %v1431_v61 = vld [vmem:[%s19788_s1 + $0x26a0] sm:$0xff] }
 0x255   :  { %v13472_v59 = vcombine.low %v1427_v60, %v1431_v61 }
 0x256   :  { %10027 = vmatpush1.bf16.msra.mxu0 %v13424_v6  ;;  %v13473_v6 = vcombine.high %v1427_v60, %v1431_v61  ;;  %v1468_v60 = vld [vmem:[%s19788_s1 + $0x27c8] sm:$0xff] }
 0x257   :  { %10560 = vmatpush1.bf16.msra.mxu1 %v13426_v7  ;;  %10028 = vmatprep.subr.bf16.mxu0 %v13433_v17  ;;  %v13475_v7 = vcombine.high %v1428_v62, %v1432_v56  ;;  %v1435_v17 = vld [vmem:[%s19788_s1 + $0x26c0] sm:$0xff]  ;;  %v1472_v61 = vld [vmem:[%s19788_s1 + $0x27e8] sm:$0xff] }
 0x258   :  { %10561 = vmatprep.subr.bf16.mxu1 %v13435_v19  ;;  %v1439_v19 = vld [vmem:[%s19788_s1 + $0x26e0] sm:$0xff]  ;;  %v16463_v62 = vld [vmem:[%s19787_s0 + $0x28] sm:$0xff] }
 0x259   :  { %v13480_v3 = vcombine.low %v1435_v17, %v1439_v19 }
 0x25a   :  { %10029 = vmatpush1.bf16.msra.mxu0 %v13432_v20  ;;  %v13481_v20 = vcombine.high %v1435_v17, %v1439_v19  ;;  %v1479_v17 = vld [vmem:[%s19788_s1 + $0x2820] sm:$0xff]  ;;  %v16473_v19 = vrot.slane %v16463_v62, %v14432_v53 }
 0x25b   :  { %10562 = vmatpush1.bf16.msra.mxu1 %v13434_v21  ;;  %10030 = vmatprep.subr.bf16.mxu0 %v13441_v22  ;;  %v13483_v21 = vcombine.high %v1436_v8, %v1440_v13  ;;  %v1443_v22 = vld [vmem:[%s19788_s1 + $0x2700] sm:$0xff]  ;;  %v1476_v8 = vld [vmem:[%s19788_s1 + $0x2808] sm:$0xff] }
 0x25c   :  { %10563 = vmatprep.subr.bf16.mxu1 %v13443_v24  ;;  %v1447_v24 = vld [vmem:[%s19788_s1 + $0x2720] sm:$0xff]  ;;  %v1480_v13 = vld [vmem:[%s19788_s1 + $0x2828] sm:$0xff] }
 0x25d   :  { %v13488_v42 = vcombine.low %v1443_v22, %v1447_v24 }
 0x25e   :  { %10031 = vmatpush1.bf16.msra.mxu0 %v13440_v34  ;;  %v13489_v34 = vcombine.high %v1443_v22, %v1447_v24  ;;  %v1483_v22 = vld [vmem:[%s19788_s1 + $0x2840] sm:$0xff] }
 0x25f   :  { %10564 = vmatpush1.bf16.msra.mxu1 %v13442_v35  ;;  %10032 = vmatprep.subr.bf16.mxu0 %v13449_v28  ;;  %v13491_v35 = vcombine.high %v1444_v12, %v1448_v27  ;;  %v1451_v28 = vld [vmem:[%s19788_s1 + $0x2740] sm:$0xff]  ;;  %v136_v12 = vcombine.high %v16473_v19, %v16473_v19  ;;  %v16491_v27 = vpack.c.bf16 %v16260_v4, %v16260_v4 }
 0x260   :  { %10565 = vmatprep.subr.bf16.mxu1 %v13451_v36  ;;  %v1455_v36 = vld [vmem:[%s19788_s1 + $0x2760] sm:$0xff] }
 0x261   :  { %v13496_v49 = vcombine.low %v1451_v28, %v1455_v36  ;;  %v1487_v24 = vld [vmem:[%s19788_s1 + $0x2860] sm:$0xff] }
 0x262   :  { %10033 = vmatpush1.bf16.msra.mxu0 %v13448_v45  ;;  %v13497_v45 = vcombine.high %v1451_v28, %v1455_v36  ;;  %v13529_v28 = vcombine.high %v1483_v22, %v1487_v24  ;;  %v1491_v4 = vld [vmem:[%s19788_s1 + $0x2880] sm:$0xff] }
 0x263   :  { %10566 = vmatpush1.bf16.msra.mxu1 %v13450_v46  ;;  %10034 = vmatprep.subr.bf16.mxu0 %v13457_v47  ;;  %v13499_v46 = vcombine.high %v1452_v37, %v1456_v39  ;;  %v1459_v47 = vld [vmem:[%s19788_s1 + $0x2780] sm:$0xff]  ;;  %v16505_v39 = vpack.c.bf16 %v136_v12, %v136_v12 }
 0x264   :  { %10567 = vmatprep.subr.bf16.mxu1 %v13459_v48  ;;  %v1463_v48 = vld [vmem:[%s19788_s1 + $0x27a0] sm:$0xff] }
 0x265   :  { %v13504_v56 = vcombine.low %v1459_v47, %v1463_v48  ;;  %v1495_v37 = vld [vmem:[%s19788_s1 + $0x28a0] sm:$0xff] }
 0x266   :  { %10035 = vmatpush1.bf16.msra.mxu0 %v13456_v52  ;;  %v13505_v52 = vcombine.high %v1459_v47, %v1463_v48  ;;  %v13537_v47 = vcombine.high %v1491_v4, %v1495_v37  ;;  %v1523_v12 = vld [vmem:[%s19788_s1 + $0x2980] sm:$0xff] }
 0x267   :  { %10568 = vmatpush1.bf16.msra.mxu1 %v13458_v55  ;;  %10036 = vmatprep.subr.bf16.mxu0 %v13465_v57  ;;  %v13507_v55 = vcombine.high %v1460_v51, %v1464_v15  ;;  %v1467_v57 = vld [vmem:[%s19788_s1 + $0x27c0] sm:$0xff] }
 0x268   :  { %10569 = vmatprep.subr.bf16.mxu1 %v13467_v58  ;;  %v1471_v58 = vld [vmem:[%s19788_s1 + $0x27e0] sm:$0xff] }
 0x26a   :  { %10037 = vmatpush1.bf16.msra.mxu0 %v13464_v1  ;;  %v13506_v1 = vcombine.low %v1460_v51, %v1464_v15  ;;  %v1499_v51 = vld [vmem:[%s19788_s1 + $0x28c0] sm:$0xff] }
 0x26b   :  { %10570 = vmatpush1.bf16.msra.mxu1 %v13466_v5  ;;  %10038 = vmatprep.subr.bf16.mxu0 %v13473_v6  ;;  %v13513_v5 = vcombine.high %v1467_v57, %v1471_v58  ;;  %v13515_v6 = vcombine.high %v1468_v60, %v1472_v61  ;;  %v1503_v15 = vld [vmem:[%s19788_s1 + $0x28e0] sm:$0xff] }
 0x26c   :  { %10571 = vmatprep.subr.bf16.mxu1 %v13475_v7  ;;  %v1475_v7 = vld [vmem:[%s19788_s1 + $0x2800] sm:$0xff] }
 0x26e   :  { %10039 = vmatpush1.bf16.msra.mxu0 %v13472_v59  ;;  %v13512_v59 = vcombine.low %v1467_v57, %v1471_v58  ;;  %v13545_v57 = vcombine.high %v1499_v51, %v1503_v15 }
 0x26f   :  { %10572 = vmatpush1.bf16.msra.mxu1 %v13474_v16  ;;  %10040 = vmatprep.subr.bf16.mxu0 %v13481_v20  ;;  %v13514_v16 = vcombine.low %v1468_v60, %v1472_v61  ;;  %v13521_v20 = vcombine.high %v1475_v7, %v1479_v17  ;;  %v1507_v60 = vld [vmem:[%s19788_s1 + $0x2900] sm:$0xff] }
 0x270   :  { %10573 = vmatprep.subr.bf16.mxu1 %v13483_v21  ;;  %v13523_v21 = vcombine.high %v1476_v8, %v1480_v13  ;;  %v1511_v61 = vld [vmem:[%s19788_s1 + $0x2920] sm:$0xff] }
 0x272   :  { %10041 = vmatpush1.bf16.msra.mxu0 %v13480_v3  ;;  %v1484_v3 = vld [vmem:[%s19788_s1 + $0x2848] sm:$0xff] }
 0x273   :  { %10574 = vmatpush1.bf16.msra.mxu1 %v13482_v63  ;;  %10042 = vmatprep.subr.bf16.mxu0 %v13489_v34  ;;  %v1488_v63 = vld [vmem:[%s19788_s1 + $0x2868] sm:$0xff]  ;;  %v13520_v34 = vcombine.low %v1475_v7, %v1479_v17  ;;  %v13553_v7 = vcombine.high %v1507_v60, %v1511_v61 }
 0x274   :  { %10575 = vmatprep.subr.bf16.mxu1 %v13491_v35  ;;  %v13522_v35 = vcombine.low %v1476_v8, %v1480_v13  ;;  %v13531_v36 = vcombine.high %v1484_v3, %v1488_v63  ;;  %v1515_v8 = vld [vmem:[%s19788_s1 + $0x2940] sm:$0xff] }
 0x275   :  { %v1519_v13 = vld [vmem:[%s19788_s1 + $0x2960] sm:$0xff] }
 0x276   :  { %10043 = vmatpush1.bf16.msra.mxu0 %v13488_v42  ;;  %v1492_v42 = vld [vmem:[%s19788_s1 + $0x2888] sm:$0xff] }
 0x277   :  { %10576 = vmatpush1.bf16.msra.mxu1 %v13490_v43  ;;  %10044 = vmatprep.subr.bf16.mxu0 %v13497_v45  ;;  %v1496_v43 = vld [vmem:[%s19788_s1 + $0x28a8] sm:$0xff]  ;;  %v13528_v45 = vcombine.low %v1483_v22, %v1487_v24  ;;  %v13561_v22 = vcombine.high %v1515_v8, %v1519_v13 }
 0x278   :  { %10577 = vmatprep.subr.bf16.mxu1 %v13499_v46  ;;  %v13530_v46 = vcombine.low %v1484_v3, %v1488_v63  ;;  %v13539_v48 = vcombine.high %v1492_v42, %v1496_v43  ;;  %v1527_v3 = vld [vmem:[%s19788_s1 + $0x29a0] sm:$0xff]  ;;  %v14318_v63 = vmov 0  }
 0x279   :  { %14285 = vset.pattern.permute.xlu1 %v14318_v63  ;;  %14286 = vset.pattern.permute.xlu0 %v14318_v63 }
 0x27a   :  { %10045 = vmatpush1.bf16.msra.mxu0 %v13496_v49  ;;  %v1500_v49 = vld [vmem:[%s19788_s1 + $0x28c8] sm:$0xff] }
 0x27b   :  { %10578 = vmatpush1.bf16.msra.mxu1 %v13498_v23  ;;  %10046 = vmatprep.subr.bf16.mxu0 %v13505_v52  ;;  %v1504_v23 = vld [vmem:[%s19788_s1 + $0x28e8] sm:$0xff]  ;;  %v13536_v52 = vcombine.low %v1491_v4, %v1495_v37  ;;  %v13569_v4 = vcombine.high %v1523_v12, %v1527_v3 }
 0x27c   :  { %10579 = vmatprep.subr.bf16.mxu1 %v13507_v55  ;;  %v13538_v55 = vcombine.low %v1492_v42, %v1496_v43  ;;  %v13547_v58 = vcombine.high %v1500_v49, %v1504_v23  ;;  %v1531_v42 = vld [vmem:[%s19788_s1 + $0x29c0] sm:$0xff] }
 0x27d   :  { %v1535_v43 = vld [vmem:[%s19788_s1 + $0x29e0] sm:$0xff] }
 0x27e   :  { %10047 = vmatpush1.bf16.msra.mxu0 %v13504_v56  ;;  %v1508_v56 = vld [vmem:[%s19788_s1 + $0x2908] sm:$0xff] }
 0x27f   :  { %10580 = vmatpush1.bf16.msra.mxu1 %v13506_v1  ;;  %10048 = vmatprep.subr.bf16.mxu0 %v13513_v5  ;;  %v1512_v1 = vld [vmem:[%s19788_s1 + $0x2928] sm:$0xff]  ;;  %v13544_v5 = vcombine.low %v1499_v51, %v1503_v15  ;;  %v13577_v51 = vcombine.high %v1531_v42, %v1535_v43 }
 0x280   :  { %10581 = vmatprep.subr.bf16.mxu1 %v13515_v6  ;;  %v13546_v6 = vcombine.low %v1500_v49, %v1504_v23  ;;  %v13555_v17 = vcombine.high %v1508_v56, %v1512_v1  ;;  %v1539_v49 = vld [vmem:[%s19788_s1 + $0x2a00] sm:$0xff] }
 0x281   :  { %v1543_v23 = vld [vmem:[%s19788_s1 + $0x2a20] sm:$0xff] }
 0x282   :  { %10049 = vmatpush1.bf16.msra.mxu0 %v13512_v59  ;;  %v1516_v59 = vld [vmem:[%s19788_s1 + $0x2948] sm:$0xff] }
 0x283   :  { %10582 = vmatpush1.bf16.msra.mxu1 %v13514_v16  ;;  %10059 = vmatprep.subr.bf16.mxu0 %v13521_v20  ;;  %v1520_v16 = vld [vmem:[%s19788_s1 + $0x2968] sm:$0xff]  ;;  %v13552_v20 = vcombine.low %v1507_v60, %v1511_v61  ;;  %v13585_v60 = vcombine.high %v1539_v49, %v1543_v23 }
 0x284   :  { %10592 = vmatprep.subr.bf16.mxu1 %v13523_v21  ;;  %v13554_v21 = vcombine.low %v1508_v56, %v1512_v1  ;;  %v13563_v24 = vcombine.high %v1516_v59, %v1520_v16  ;;  %v1547_v56 = vld [vmem:[%s19788_s1 + $0x2a40] sm:$0xff] }
 0x285   :  { %10051 = vmatmul.mubr.bf16.vlgmr.msra.gmra.mrb[0].mxu0 %v16491_v27  ;;  %v1551_v1 = vld [vmem:[%s19788_s1 + $0x2a60] sm:$0xff] }
 0x286   :  { %10060 = vmatpush1.bf16.msra.mxu0 %v13520_v34  ;;  %10584 = vmatmul.mubr.bf16.vlgmr.msra.gmra.mrb[0].mxu1 %v16491_v27  ;;  %v1524_v34 = vld [vmem:[%s19788_s1 + $0x2988] sm:$0xff] }
 0x287   :  { %10593 = vmatpush1.bf16.msra.mxu1 %v13522_v35  ;;  %10061 = vmatprep.subr.bf16.mxu0 %v13529_v28  ;;  %v1528_v35 = vld [vmem:[%s19788_s1 + $0x29a8] sm:$0xff]  ;;  %v13560_v28 = vcombine.low %v1515_v8, %v1519_v13  ;;  %v13593_v8 = vcombine.high %v1547_v56, %v1551_v1 }
 0x288   :  { %10594 = vmatprep.subr.bf16.mxu1 %v13531_v36  ;;  %10091 = vmatprep.mubr.bf16.mxu0 %v16505_v39  ;;  %v13562_v36 = vcombine.low %v1516_v59, %v1520_v16  ;;  %v13571_v37 = vcombine.high %v1524_v34, %v1528_v35  ;;  %v1555_v59 = vld [vmem:[%s19788_s1 + $0x2a80] sm:$0xff] }
 0x289   :  { %10624 = vmatprep.mubr.bf16.mxu1 %v16505_v39  ;;  %v1559_v16 = vld [vmem:[%s19788_s1 + $0x2aa0] sm:$0xff] }
 0x28a   :  { %10062 = vmatpush1.bf16.msra.mxu0 %v13528_v45  ;;  %v1532_v45 = vld [vmem:[%s19788_s1 + $0x29c8] sm:$0xff] }
 0x28b   :  { %10595 = vmatpush1.bf16.msra.mxu1 %v13530_v46  ;;  %10063 = vmatprep.subr.bf16.mxu0 %v13537_v47  ;;  %v1536_v46 = vld [vmem:[%s19788_s1 + $0x29e8] sm:$0xff]  ;;  %v13568_v47 = vcombine.low %v1523_v12, %v1527_v3  ;;  %v13601_v12 = vcombine.high %v1555_v59, %v1559_v16 }
 0x28c   :  { %10596 = vmatprep.subr.bf16.mxu1 %v13539_v48  ;;  %v13570_v48 = vcombine.low %v1524_v34, %v1528_v35  ;;  %v13579_v15 = vcombine.high %v1532_v45, %v1536_v46  ;;  %v1563_v34 = vld [vmem:[%s19788_s1 + $0x2ac0] sm:$0xff] }
 0x28d   :  { %v1567_v35 = vld [vmem:[%s19788_s1 + $0x2ae0] sm:$0xff] }
 0x28e   :  { %10064 = vmatpush1.bf16.msra.mxu0 %v13536_v52  ;;  %v1540_v52 = vld [vmem:[%s19788_s1 + $0x2a08] sm:$0xff] }
 0x28f   :  { %10597 = vmatpush1.bf16.msra.mxu1 %v13538_v55  ;;  %10065 = vmatprep.subr.bf16.mxu0 %v13545_v57  ;;  %v1544_v55 = vld [vmem:[%s19788_s1 + $0x2a28] sm:$0xff]  ;;  %v13576_v57 = vcombine.low %v1531_v42, %v1535_v43  ;;  %v13609_v42 = vcombine.high %v1563_v34, %v1567_v35 }
 0x290   :  { %10598 = vmatprep.subr.bf16.mxu1 %v13547_v58  ;;  %v13578_v58 = vcombine.low %v1532_v45, %v1536_v46  ;;  %v13587_v61 = vcombine.high %v1540_v52, %v1544_v55  ;;  %v1571_v45 = vld [vmem:[%s19788_s1 + $0x2b00] sm:$0xff] }
 0x291   :  { %v1575_v46 = vld [vmem:[%s19788_s1 + $0x2b20] sm:$0xff] }
 0x292   :  { %10066 = vmatpush1.bf16.msra.mxu0 %v13544_v5  ;;  %v1548_v5 = vld [vmem:[%s19788_s1 + $0x2a48] sm:$0xff] }
 0x293   :  { %10599 = vmatpush1.bf16.msra.mxu1 %v13546_v6  ;;  %10067 = vmatprep.subr.bf16.mxu0 %v13553_v7  ;;  %v1552_v6 = vld [vmem:[%s19788_s1 + $0x2a68] sm:$0xff]  ;;  %v13584_v7 = vcombine.low %v1539_v49, %v1543_v23  ;;  %v13617_v49 = vcombine.high %v1571_v45, %v1575_v46 }
 0x294   :  { %10600 = vmatprep.subr.bf16.mxu1 %v13555_v17  ;;  %v13586_v17 = vcombine.low %v1540_v52, %v1544_v55  ;;  %v13595_v13 = vcombine.high %v1548_v5, %v1552_v6  ;;  %v1579_v52 = vld [vmem:[%s19788_s1 + $0x2b40] sm:$0xff] }
 0x295   :  { %v1583_v55 = vld [vmem:[%s19788_s1 + $0x2b60] sm:$0xff] }
 0x296   :  { %10068 = vmatpush1.bf16.msra.mxu0 %v13552_v20  ;;  %v1556_v20 = vld [vmem:[%s19788_s1 + $0x2a88] sm:$0xff] }
 0x297   :  { %10601 = vmatpush1.bf16.msra.mxu1 %v13554_v21  ;;  %10069 = vmatprep.subr.bf16.mxu0 %v13561_v22  ;;  %v1560_v21 = vld [vmem:[%s19788_s1 + $0x2aa8] sm:$0xff]  ;;  %v13592_v22 = vcombine.low %v1547_v56, %v1551_v1  ;;  %v13625_v56 = vcombine.high %v1579_v52, %v1583_v55 }
 0x298   :  { %10602 = vmatprep.subr.bf16.mxu1 %v13563_v24  ;;  %v13594_v24 = vcombine.low %v1548_v5, %v1552_v6  ;;  %v13603_v3 = vcombine.high %v1556_v20, %v1560_v21  ;;  %v1587_v5 = vld [vmem:[%s19788_s1 + $0x2b80] sm:$0xff] }
 0x299   :  { %v1591_v6 = vld [vmem:[%s19788_s1 + $0x2ba0] sm:$0xff] }
 0x29a   :  { %10070 = vmatpush1.bf16.msra.mxu0 %v13560_v28  ;;  %v1564_v28 = vld [vmem:[%s19788_s1 + $0x2ac8] sm:$0xff] }
 0x29b   :  { %10603 = vmatpush1.bf16.msra.mxu1 %v13562_v36  ;;  %10071 = vmatprep.subr.bf16.mxu0 %v13569_v4  ;;  %v1568_v36 = vld [vmem:[%s19788_s1 + $0x2ae8] sm:$0xff]  ;;  %v13600_v4 = vcombine.low %v1555_v59, %v1559_v16  ;;  %v13633_v59 = vcombine.high %v1587_v5, %v1591_v6 }
 0x29c   :  { %10604 = vmatprep.subr.bf16.mxu1 %v13571_v37  ;;  %v13602_v37 = vcombine.low %v1556_v20, %v1560_v21  ;;  %v13611_v43 = vcombine.high %v1564_v28, %v1568_v36  ;;  %v1595_v20 = vld [vmem:[%s19788_s1 + $0x2bc0] sm:$0xff] }
 0x29d   :  { %v1599_v21 = vld [vmem:[%s19788_s1 + $0x2be0] sm:$0xff] }
 0x29e   :  { %10072 = vmatpush1.bf16.msra.mxu0 %v13568_v47  ;;  %v1572_v47 = vld [vmem:[%s19788_s1 + $0x2b08] sm:$0xff] }
 0x29f   :  { %10605 = vmatpush1.bf16.msra.mxu1 %v13570_v48  ;;  %10073 = vmatprep.subr.bf16.mxu0 %v13577_v51  ;;  %v1576_v48 = vld [vmem:[%s19788_s1 + $0x2b28] sm:$0xff]  ;;  %v13608_v51 = vcombine.low %v1563_v34, %v1567_v35  ;;  %v13641_v35 = vcombine.high %v1595_v20, %v1599_v21 }
 0x2a0   :  { %10606 = vmatprep.subr.bf16.mxu1 %v13579_v15  ;;  %v13610_v15 = vcombine.low %v1564_v28, %v1568_v36  ;;  %v13619_v23 = vcombine.high %v1572_v47, %v1576_v48  ;;  %v1607_v36 = vld [vmem:[%s19788_s1 + $0x2c20] sm:$0xff] }
 0x2a2   :  { %10074 = vmatpush1.bf16.msra.mxu0 %v13576_v57  ;;  %v1580_v57 = vld [vmem:[%s19788_s1 + $0x2b48] sm:$0xff] }
 0x2a3   :  { %10607 = vmatpush1.bf16.msra.mxu1 %v13578_v58  ;;  %10075 = vmatprep.subr.bf16.mxu0 %v13585_v60  ;;  %v1584_v58 = vld [vmem:[%s19788_s1 + $0x2b68] sm:$0xff]  ;;  %v13616_v60 = vcombine.low %v1571_v45, %v1575_v46 }
 0x2a4   :  { %10608 = vmatprep.subr.bf16.mxu1 %v13587_v61  ;;  %v13618_v61 = vcombine.low %v1572_v47, %v1576_v48  ;;  %v13627_v1 = vcombine.high %v1580_v57, %v1584_v58  ;;  %v1615_v48 = vld [vmem:[%s19788_s1 + $0x2c60] sm:$0xff] }
 0x2a6   :  { %10076 = vmatpush1.bf16.msra.mxu0 %v13584_v7  ;;  %v1588_v7 = vld [vmem:[%s19788_s1 + $0x2b88] sm:$0xff] }
 0x2a7   :  { %10609 = vmatpush1.bf16.msra.mxu1 %v13586_v17  ;;  %10077 = vmatprep.subr.bf16.mxu0 %v13593_v8  ;;  %v1592_v17 = vld [vmem:[%s19788_s1 + $0x2ba8] sm:$0xff]  ;;  %v13624_v8 = vcombine.low %v1579_v52, %v1583_v55 }
 0x2a8   :  { %10610 = vmatprep.subr.bf16.mxu1 %v13595_v13  ;;  %v13626_v13 = vcombine.low %v1580_v57, %v1584_v58  ;;  %v13635_v16 = vcombine.high %v1588_v7, %v1592_v17  ;;  %v13634_v34 = vcombine.low %v1588_v7, %v1592_v17 }
 0x2aa   :  { %10078 = vmatpush1.bf16.msra.mxu0 %v13592_v22  ;;  %v121_v22 = vcombine.high %v16463_v62, %v16463_v62  ;;  %v1603_v62 = vld [vmem:[%s19788_s1 + $0x2c00] sm:$0xff] }
 0x2ab   :  { %10611 = vmatpush1.bf16.msra.mxu1 %v13594_v24  ;;  %10079 = vmatprep.subr.bf16.mxu0 %v13601_v12  ;;  %v1596_v24 = vld [vmem:[%s19788_s1 + $0x2bc8] sm:$0xff]  ;;  %v13649_v46 = vcombine.high %v1603_v62, %v1607_v36  ;;  %v13648_v52 = vcombine.low %v1603_v62, %v1607_v36 }
 0x2ac   :  { %10612 = vmatprep.subr.bf16.mxu1 %v13603_v3  ;;  %v1600_v12 = vld [vmem:[%s19788_s1 + $0x2be8] sm:$0xff]  ;;  %v13632_v3 = vcombine.low %v1587_v5, %v1591_v6 }
 0x2ad   :  { %v13643_v28 = vcombine.high %v1596_v24, %v1600_v12  ;;  %v13642_v45 = vcombine.low %v1596_v24, %v1600_v12  ;;  %v1635_v12 = vld [vmem:[%s19788_s1 + $0x2d00] sm:$0xff] }
 0x2ae   :  { %10080 = vmatpush1.bf16.msra.mxu0 %v13600_v4  ;;  %v16684_v4 = vrot.slane %v121_v22, %v14432_v53  ;;  %v1611_v53 = vld [vmem:[%s19788_s1 + $0x2c40] sm:$0xff] }
 0x2af   :  { %10613 = vmatpush1.bf16.msra.mxu1 %v13602_v37  ;;  %10081 = vmatprep.subr.bf16.mxu0 %v13609_v42  ;;  %v1604_v37 = vld [vmem:[%s19788_s1 + $0x2c08] sm:$0xff]  ;;  %v13657_v57 = vcombine.high %v1611_v53, %v1615_v48  ;;  %v13656_v5 = vcombine.low %v1611_v53, %v1615_v48 }
 0x2b0   :  { %10614 = vmatprep.subr.bf16.mxu1 %v13611_v43  ;;  %v1608_v42 = vld [vmem:[%s19788_s1 + $0x2c28] sm:$0xff]  ;;  %v13640_v43 = vcombine.low %v1595_v20, %v1599_v21 }
 0x2b1   :  { %v13651_v47 = vcombine.high %v1604_v37, %v1608_v42  ;;  %v13650_v55 = vcombine.low %v1604_v37, %v1608_v42  ;;  %v1643_v42 = vld [vmem:[%s19788_s1 + $0x2d40] sm:$0xff] }
 0x2b2   :  { %10082 = vmatpush1.bf16.msra.mxu0 %v13608_v51  ;;  %v137_v51 = vcombine.high %v16684_v4, %v16684_v4 }
 0x2b3   :  { %10615 = vmatpush1.bf16.msra.mxu1 %v13610_v15  ;;  %10083 = vmatprep.subr.bf16.mxu0 %v13617_v49  ;;  %v16702_v15 = vpack.c.bf16 %v16473_v19, %v16473_v19  ;;  %v1612_v49 = vld [vmem:[%s19788_s1 + $0x2c48] sm:$0xff]  ;;  %v1619_v19 = vld [vmem:[%s19788_s1 + $0x2c80] sm:$0xff] }
 0x2b4   :  { %10616 = vmatprep.subr.bf16.mxu1 %v13619_v23  ;;  %v1616_v23 = vld [vmem:[%s19788_s1 + $0x2c68] sm:$0xff] }
 0x2b5   :  { %v13659_v58 = vcombine.high %v1612_v49, %v1616_v23  ;;  %v13658_v6 = vcombine.low %v1612_v49, %v1616_v23  ;;  %v1651_v49 = vld [vmem:[%s19788_s1 + $0x2d80] sm:$0xff] }
 0x2b6   :  { %10084 = vmatpush1.bf16.msra.mxu0 %v13616_v60  ;;  %v1623_v60 = vld [vmem:[%s19788_s1 + $0x2ca0] sm:$0xff] }
 0x2b7   :  { %10617 = vmatpush1.bf16.msra.mxu1 %v13618_v61  ;;  %10085 = vmatprep.subr.bf16.mxu0 %v13625_v56  ;;  %v16716_v61 = vpack.c.bf16 %v137_v51, %v137_v51  ;;  %v1620_v56 = vld [vmem:[%s19788_s1 + $0x2c88] sm:$0xff]  ;;  %v13665_v7 = vcombine.high %v1619_v19, %v1623_v60  ;;  %v13664_v20 = vcombine.low %v1619_v19, %v1623_v60  ;;  %v1655_v23 = vld [vmem:[%s19788_s1 + $0x2da0] sm:$0xff] }
 0x2b8   :  { %10618 = vmatprep.subr.bf16.mxu1 %v13627_v1  ;;  %v1624_v1 = vld [vmem:[%s19788_s1 + $0x2ca8] sm:$0xff]  ;;  %v13697_v19 = vcombine.high %v1651_v49, %v1655_v23 }
 0x2b9   :  { %v13667_v17 = vcombine.high %v1620_v56, %v1624_v1  ;;  %v13666_v21 = vcombine.low %v1620_v56, %v1624_v1  ;;  %v1659_v56 = vld [vmem:[%s19788_s1 + $0x2dc0] sm:$0xff] }
 0x2ba   :  { %10086 = vmatpush1.bf16.msra.mxu0 %v13624_v8  ;;  %v1627_v8 = vld [vmem:[%s19788_s1 + $0x2cc0] sm:$0xff] }
 0x2bb   :  { %10619 = vmatpush1.bf16.msra.mxu1 %v13626_v13  ;;  %10087 = vmatprep.subr.bf16.mxu0 %v13633_v59  ;;  %v1631_v13 = vld [vmem:[%s19788_s1 + $0x2ce0] sm:$0xff]  ;;  %v1628_v59 = vld [vmem:[%s19788_s1 + $0x2cc8] sm:$0xff] }
 0x2bc   :  { %10620 = vmatprep.subr.bf16.mxu1 %v13635_v16  ;;  %v1632_v16 = vld [vmem:[%s19788_s1 + $0x2ce8] sm:$0xff]  ;;  %v13673_v22 = vcombine.high %v1627_v8, %v1631_v13  ;;  %v1663_v1 = vld [vmem:[%s19788_s1 + $0x2de0] sm:$0xff] }
 0x2bd   :  { %v13675_v24 = vcombine.high %v1628_v59, %v1632_v16  ;;  %v13674_v62 = vcombine.low %v1628_v59, %v1632_v16  ;;  %v1667_v59 = vld [vmem:[%s19788_s1 + $0x2e00] sm:$0xff] }
 0x2be   :  { %10088 = vmatpush1.bf16.msra.mxu0 %v13632_v3  ;;  %v1639_v3 = vld [vmem:[%s19788_s1 + $0x2d20] sm:$0xff] }
 0x2bf   :  { %10621 = vmatpush1.bf16.msra.mxu1 %v13634_v34  ;;  %10089 = vmatprep.subr.bf16.mxu0 %v13641_v35  ;;  %v1636_v34 = vld [vmem:[%s19788_s1 + $0x2d08] sm:$0xff]  ;;  %v13681_v36 = vcombine.high %v1635_v12, %v1639_v3  ;;  %v1671_v16 = vld [vmem:[%s19788_s1 + $0x2e20] sm:$0xff] }
 0x2c0   :  { %10622 = vmatprep.subr.bf16.mxu1 %v13643_v28  ;;  %v1640_v35 = vld [vmem:[%s19788_s1 + $0x2d28] sm:$0xff]  ;;  %v13672_v28 = vcombine.low %v1627_v8, %v1631_v13  ;;  %v13705_v8 = vcombine.high %v1659_v56, %v1663_v1 }
 0x2c1   :  { %v13683_v37 = vcombine.high %v1636_v34, %v1640_v35  ;;  %v13682_v53 = vcombine.low %v1636_v34, %v1640_v35  ;;  %v1675_v34 = vld [vmem:[%s19788_s1 + $0x2e40] sm:$0xff] }
 0x2c2   :  { %10090 = vmatpush1.bf16.msra.mxu0 %v13640_v43  ;;  %v1647_v43 = vld [vmem:[%s19788_s1 + $0x2d60] sm:$0xff] }
 0x2c3   :  { %10623 = vmatpush1.bf16.msra.mxu1 %v13642_v45  ;;  %10100 = vmatprep.subr.bf16.mxu0 %v13649_v46  ;;  %v1644_v45 = vld [vmem:[%s19788_s1 + $0x2d48] sm:$0xff]  ;;  %v13689_v48 = vcombine.high %v1643_v42, %v1647_v43  ;;  %v1679_v35 = vld [vmem:[%s19788_s1 + $0x2e60] sm:$0xff] }
 0x2c4   :  { %10633 = vmatprep.subr.bf16.mxu1 %v13651_v47  ;;  %v1648_v46 = vld [vmem:[%s19788_s1 + $0x2d68] sm:$0xff]  ;;  %v13680_v47 = vcombine.low %v1635_v12, %v1639_v3  ;;  %v13713_v12 = vcombine.high %v1667_v59, %v1671_v16 }
 0x2c5   :  { %10092 = vmatmul.mubr.bf16.vlgmr.msra.gmra.mrb[0].mxu0 %v16702_v15  ;;  %v13691_v51 = vcombine.high %v1644_v45, %v1648_v46 }
 0x2c6   :  { %10101 = vmatpush1.bf16.msra.mxu0 %v13648_v52  ;;  %10625 = vmatmul.mubr.bf16.vlgmr.msra.gmra.mrb[0].mxu1 %v16702_v15  ;;  %v1652_v52 = vld [vmem:[%s19788_s1 + $0x2d88] sm:$0xff] }
 0x2c7   :  { %10634 = vmatpush1.bf16.msra.mxu1 %v13650_v55  ;;  %10102 = vmatprep.subr.bf16.mxu0 %v13657_v57  ;;  %v1656_v55 = vld [vmem:[%s19788_s1 + $0x2da8] sm:$0xff]  ;;  %v13688_v57 = vcombine.low %v1643_v42, %v1647_v43  ;;  %v13721_v42 = vcombine.high %v1675_v34, %v1679_v35 }
 0x2c8   :  { %10635 = vmatprep.subr.bf16.mxu1 %v13659_v58  ;;  %10132 = vmatprep.mubr.bf16.mxu0 %v16716_v61  ;;  %v13690_v58 = vcombine.low %v1644_v45, %v1648_v46  ;;  %v13699_v60 = vcombine.high %v1652_v52, %v1656_v55  ;;  %v1683_v45 = vld [vmem:[%s19788_s1 + $0x2e80] sm:$0xff] }
 0x2c9   :  { %10665 = vmatprep.mubr.bf16.mxu1 %v16716_v61  ;;  %v1687_v46 = vld [vmem:[%s19788_s1 + $0x2ea0] sm:$0xff] }
 0x2ca   :  { %10103 = vmatpush1.bf16.msra.mxu0 %v13656_v5  ;;  %v1660_v5 = vld [vmem:[%s19788_s1 + $0x2dc8] sm:$0xff] }
 0x2cb   :  { %10636 = vmatpush1.bf16.msra.mxu1 %v13658_v6  ;;  %10104 = vmatprep.subr.bf16.mxu0 %v13665_v7  ;;  %v1664_v6 = vld [vmem:[%s19788_s1 + $0x2de8] sm:$0xff]  ;;  %v13696_v7 = vcombine.low %v1651_v49, %v1655_v23  ;;  %v13729_v49 = vcombine.high %v1683_v45, %v1687_v46 }
 0x2cc   :  { %10637 = vmatprep.subr.bf16.mxu1 %v13667_v17  ;;  %v13698_v17 = vcombine.low %v1652_v52, %v1656_v55  ;;  %v13707_v13 = vcombine.high %v1660_v5, %v1664_v6  ;;  %v1691_v52 = vld [vmem:[%s19788_s1 + $0x2ec0] sm:$0xff] }
 0x2cd   :  { %v1695_v55 = vld [vmem:[%s19788_s1 + $0x2ee0] sm:$0xff] }
 0x2ce   :  { %10105 = vmatpush1.bf16.msra.mxu0 %v13664_v20  ;;  %v1668_v20 = vld [vmem:[%s19788_s1 + $0x2e08] sm:$0xff] }
 0x2cf   :  { %10638 = vmatpush1.bf16.msra.mxu1 %v13666_v21  ;;  %10106 = vmatprep.subr.bf16.mxu0 %v13673_v22  ;;  %v1672_v21 = vld [vmem:[%s19788_s1 + $0x2e28] sm:$0xff]  ;;  %v13704_v22 = vcombine.low %v1659_v56, %v1663_v1  ;;  %v13737_v56 = vcombine.high %v1691_v52, %v1695_v55 }
 0x2d0   :  { %10639 = vmatprep.subr.bf16.mxu1 %v13675_v24  ;;  %v13706_v24 = vcombine.low %v1660_v5, %v1664_v6  ;;  %v13715_v3 = vcombine.high %v1668_v20, %v1672_v21  ;;  %v1699_v5 = vld [vmem:[%s19788_s1 + $0x2f00] sm:$0xff] }
 0x2d1   :  { %v1703_v6 = vld [vmem:[%s19788_s1 + $0x2f20] sm:$0xff] }
 0x2d2   :  { %10107 = vmatpush1.bf16.msra.mxu0 %v13672_v28  ;;  %v1676_v28 = vld [vmem:[%s19788_s1 + $0x2e48] sm:$0xff] }
 0x2d3   :  { %10640 = vmatpush1.bf16.msra.mxu1 %v13674_v62  ;;  %10108 = vmatprep.subr.bf16.mxu0 %v13681_v36  ;;  %v1680_v62 = vld [vmem:[%s19788_s1 + $0x2e68] sm:$0xff]  ;;  %v13712_v36 = vcombine.low %v1667_v59, %v1671_v16  ;;  %v13745_v59 = vcombine.high %v1699_v5, %v1703_v6 }
 0x2d4   :  { %10641 = vmatprep.subr.bf16.mxu1 %v13683_v37  ;;  %v13714_v37 = vcombine.low %v1668_v20, %v1672_v21  ;;  %v13723_v43 = vcombine.high %v1676_v28, %v1680_v62  ;;  %v1707_v20 = vld [vmem:[%s19788_s1 + $0x2f40] sm:$0xff] }
 0x2d5   :  { %v1711_v21 = vld [vmem:[%s19788_s1 + $0x2f60] sm:$0xff] }
 0x2d6   :  { %10109 = vmatpush1.bf16.msra.mxu0 %v13680_v47  ;;  %v1684_v47 = vld [vmem:[%s19788_s1 + $0x2e88] sm:$0xff] }
 0x2d7   :  { %10642 = vmatpush1.bf16.msra.mxu1 %v13682_v53  ;;  %10110 = vmatprep.subr.bf16.mxu0 %v13689_v48  ;;  %v1688_v53 = vld [vmem:[%s19788_s1 + $0x2ea8] sm:$0xff]  ;;  %v13720_v48 = vcombine.low %v1675_v34, %v1679_v35  ;;  %v13753_v34 = vcombine.high %v1707_v20, %v1711_v21 }
 0x2d8   :  { %10643 = vmatprep.subr.bf16.mxu1 %v13691_v51  ;;  %v13722_v51 = vcombine.low %v1676_v28, %v1680_v62  ;;  %v13731_v23 = vcombine.high %v1684_v47, %v1688_v53  ;;  %v1715_v28 = vld [vmem:[%s19788_s1 + $0x2f80] sm:$0xff] }
 0x2d9   :  { %v1719_v62 = vld [vmem:[%s19788_s1 + $0x2fa0] sm:$0xff] }
 0x2da   :  { %10111 = vmatpush1.bf16.msra.mxu0 %v13688_v57  ;;  %v1692_v57 = vld [vmem:[%s19788_s1 + $0x2ec8] sm:$0xff] }
 0x2db   :  { %10644 = vmatpush1.bf16.msra.mxu1 %v13690_v58  ;;  %10112 = vmatprep.subr.bf16.mxu0 %v13697_v19  ;;  %v1696_v58 = vld [vmem:[%s19788_s1 + $0x2ee8] sm:$0xff]  ;;  %v13728_v19 = vcombine.low %v1683_v45, %v1687_v46  ;;  %v13761_v45 = vcombine.high %v1715_v28, %v1719_v62 }
 0x2dc   :  { %10645 = vmatprep.subr.bf16.mxu1 %v13699_v60  ;;  %v13730_v60 = vcombine.low %v1684_v47, %v1688_v53  ;;  %v13739_v1 = vcombine.high %v1692_v57, %v1696_v58  ;;  %v1723_v47 = vld [vmem:[%s19788_s1 + $0x2fc0] sm:$0xff] }
 0x2dd   :  { %v1727_v53 = vld [vmem:[%s19788_s1 + $0x2fe0] sm:$0xff] }
 0x2de   :  { %10113 = vmatpush1.bf16.msra.mxu0 %v13696_v7  ;;  %v1700_v7 = vld [vmem:[%s19788_s1 + $0x2f08] sm:$0xff] }
 0x2df   :  { %10646 = vmatpush1.bf16.msra.mxu1 %v13698_v17  ;;  %10114 = vmatprep.subr.bf16.mxu0 %v13705_v8  ;;  %v1704_v17 = vld [vmem:[%s19788_s1 + $0x2f28] sm:$0xff]  ;;  %v13736_v8 = vcombine.low %v1691_v52, %v1695_v55  ;;  %v13769_v52 = vcombine.high %v1723_v47, %v1727_v53 }
 0x2e0   :  { %10647 = vmatprep.subr.bf16.mxu1 %v13707_v13  ;;  %v13738_v13 = vcombine.low %v1692_v57, %v1696_v58  ;;  %v13747_v16 = vcombine.high %v1700_v7, %v1704_v17  ;;  %v1731_v57 = vld [vmem:[%s19788_s1 + $0x3000] sm:$0xff] }
 0x2e1   :  { %v1735_v58 = vld [vmem:[%s19788_s1 + $0x3020] sm:$0xff] }
 0x2e2   :  { %10115 = vmatpush1.bf16.msra.mxu0 %v13704_v22  ;;  %v1708_v22 = vld [vmem:[%s19788_s1 + $0x2f48] sm:$0xff] }
 0x2e3   :  { %10648 = vmatpush1.bf16.msra.mxu1 %v13706_v24  ;;  %10116 = vmatprep.subr.bf16.mxu0 %v13713_v12  ;;  %v1712_v24 = vld [vmem:[%s19788_s1 + $0x2f68] sm:$0xff]  ;;  %v13744_v12 = vcombine.low %v1699_v5, %v1703_v6  ;;  %v13777_v5 = vcombine.high %v1731_v57, %v1735_v58 }
 0x2e4   :  { %10649 = vmatprep.subr.bf16.mxu1 %v13715_v3  ;;  %v13746_v3 = vcombine.low %v1700_v7, %v1704_v17  ;;  %v13755_v35 = vcombine.high %v1708_v22, %v1712_v24  ;;  %v1739_v7 = vld [vmem:[%s19788_s1 + $0x3040] sm:$0xff] }
 0x2e5   :  { %v1743_v17 = vld [vmem:[%s19788_s1 + $0x3060] sm:$0xff] }
 0x2e6   :  { %10117 = vmatpush1.bf16.msra.mxu0 %v13712_v36  ;;  %v1716_v36 = vld [vmem:[%s19788_s1 + $0x2f88] sm:$0xff] }
 0x2e7   :  { %10650 = vmatpush1.bf16.msra.mxu1 %v13714_v37  ;;  %10118 = vmatprep.subr.bf16.mxu0 %v13721_v42  ;;  %v1720_v37 = vld [vmem:[%s19788_s1 + $0x2fa8] sm:$0xff]  ;;  %v13752_v42 = vcombine.low %v1707_v20, %v1711_v21  ;;  %v13785_v21 = vcombine.high %v1739_v7, %v1743_v17 }
 0x2e8   :  { %10651 = vmatprep.subr.bf16.mxu1 %v13723_v43  ;;  %v13754_v43 = vcombine.low %v1708_v22, %v1712_v24  ;;  %v13763_v46 = vcombine.high %v1716_v36, %v1720_v37  ;;  %v1751_v24 = vld [vmem:[%s19788_s1 + $0x30a0] sm:$0xff] }
 0x2ea   :  { %10119 = vmatpush1.bf16.msra.mxu0 %v13720_v48  ;;  %v1724_v48 = vld [vmem:[%s19788_s1 + $0x2fc8] sm:$0xff] }
 0x2eb   :  { %10652 = vmatpush1.bf16.msra.mxu1 %v13722_v51  ;;  %10120 = vmatprep.subr.bf16.mxu0 %v13729_v49  ;;  %v1728_v51 = vld [vmem:[%s19788_s1 + $0x2fe8] sm:$0xff]  ;;  %v13760_v49 = vcombine.low %v1715_v28, %v1719_v62 }
 0x2ec   :  { %10653 = vmatprep.subr.bf16.mxu1 %v13731_v23  ;;  %v13762_v23 = vcombine.low %v1716_v36, %v1720_v37  ;;  %v13771_v55 = vcombine.high %v1724_v48, %v1728_v51  ;;  %v1755_v36 = vld [vmem:[%s19788_s1 + $0x30c0] sm:$0xff] }
 0x2ed   :  { %v1759_v37 = vld [vmem:[%s19788_s1 + $0x30e0] sm:$0xff] }
 0x2ee   :  { %10121 = vmatpush1.bf16.msra.mxu0 %v13728_v19  ;;  %v1732_v19 = vld [vmem:[%s19788_s1 + $0x3008] sm:$0xff] }
 0x2ef   :  { %10654 = vmatpush1.bf16.msra.mxu1 %v13730_v60  ;;  %10122 = vmatprep.subr.bf16.mxu0 %v13737_v56  ;;  %v1736_v60 = vld [vmem:[%s19788_s1 + $0x3028] sm:$0xff]  ;;  %v13768_v56 = vcombine.low %v1723_v47, %v1727_v53  ;;  %v13801_v47 = vcombine.high %v1755_v36, %v1759_v37 }
 0x2f0   :  { %10655 = vmatprep.subr.bf16.mxu1 %v13739_v1  ;;  %v13770_v1 = vcombine.low %v1724_v48, %v1728_v51  ;;  %v13779_v6 = vcombine.high %v1732_v19, %v1736_v60  ;;  %v13778_v20 = vcombine.low %v1732_v19, %v1736_v60  ;;  %v197_v48 = vld [vmem:[%s19788_s1 + $0x10] sm:$0xff] }
 0x2f1   :  { %v201_v51 = vld [vmem:[%s19788_s1 + $0x30] sm:$0xff] }
 0x2f2   :  { %10123 = vmatpush1.bf16.msra.mxu0 %v13736_v8  ;;  %v16904_v8 = vpack.c.bf16 %v16684_v4, %v16684_v4  ;;  %v1747_v4 = vld [vmem:[%s19788_s1 + $0x3080] sm:$0xff]  ;;  %v205_v60 = vld [vmem:[%s19788_s1 + $0x50] sm:$0xff] }
 0x2f3   :  { %10656 = vmatpush1.bf16.msra.mxu1 %v13738_v13  ;;  %10124 = vmatprep.subr.bf16.mxu0 %v13745_v59  ;;  %v1740_v13 = vld [vmem:[%s19788_s1 + $0x3048] sm:$0xff]  ;;  %v13793_v28 = vcombine.high %v1747_v4, %v1751_v24 }
 0x2f4   :  { %10657 = vmatprep.subr.bf16.mxu1 %v13747_v16  ;;  %v1744_v59 = vld [vmem:[%s19788_s1 + $0x3068] sm:$0xff]  ;;  %v13776_v16 = vcombine.low %v1731_v57, %v1735_v58  ;;  %v12245_v58 = vcombine.high %v197_v48, %v201_v51 }
 0x2f5   :  { %v13787_v22 = vcombine.high %v1740_v13, %v1744_v59 }
 0x2f6   :  { %10125 = vmatpush1.bf16.msra.mxu0 %v13744_v12  ;;  %v1748_v12 = vld [vmem:[%s19788_s1 + $0x3088] sm:$0xff] }
 0x2f7   :  { %10658 = vmatpush1.bf16.msra.mxu1 %v13746_v3  ;;  %10126 = vmatprep.subr.bf16.mxu0 %v13753_v34  ;;  %v1752_v3 = vld [vmem:[%s19788_s1 + $0x30a8] sm:$0xff]  ;;  %v13784_v34 = vcombine.low %v1739_v7, %v1743_v17  ;;  %v12244_v7 = vcombine.low %v197_v48, %v201_v51 }
 0x2f8   :  { %10659 = vmatprep.subr.bf16.mxu1 %v13755_v35  ;;  %v13786_v35 = vcombine.low %v1740_v13, %v1744_v59  ;;  %v13795_v62 = vcombine.high %v1748_v12, %v1752_v3 }
 0x2fa   :  { %10127 = vmatpush1.bf16.msra.mxu0 %v13752_v42  ;;  %v1756_v42 = vld [vmem:[%s19788_s1 + $0x30c8] sm:$0xff] }
 0x2fb   :  { %10660 = vmatpush1.bf16.msra.mxu1 %v13754_v43  ;;  %10128 = vmatprep.subr.bf16.mxu0 %v13761_v45  ;;  %v1760_v43 = vld [vmem:[%s19788_s1 + $0x30e8] sm:$0xff]  ;;  %v13792_v45 = vcombine.low %v1747_v4, %v1751_v24 }
 0x2fc   :  { %10661 = vmatprep.subr.bf16.mxu1 %v13763_v46  ;;  %v13794_v46 = vcombine.low %v1748_v12, %v1752_v3  ;;  %v13803_v53 = vcombine.high %v1756_v42, %v1760_v43  ;;  %v13802_v57 = vcombine.low %v1756_v42, %v1760_v43 }
 0x2fe   :  { %10129 = vmatpush1.bf16.msra.mxu0 %v13760_v49  ;;  %v198_v49 = vld [vmem:[%s19788_s1 + $0x18] sm:$0xff] }
 0x2ff   :  { %10662 = vmatpush1.bf16.msra.mxu1 %v13762_v23  ;;  %10130 = vmatprep.subr.bf16.mxu0 %v13769_v52  ;;  %v202_v23 = vld [vmem:[%s19788_s1 + $0x38] sm:$0xff]  ;;  %v13800_v52 = vcombine.low %v1755_v36, %v1759_v37 }
 0x300   :  { %10663 = vmatprep.subr.bf16.mxu1 %v13771_v55  ;;  %v12239_v55 = vld.sshfl [vmem:[%s19787_s0 + $0x30] sm:$0x3 pattern:$0x76325410]  ;;  %v12247_v19 = vcombine.high %v198_v49, %v202_v23  ;;  %v12246_v17 = vcombine.low %v198_v49, %v202_v23 }
 0x301   :  { %v237_v23 = vld [vmem:[%s19788_s1 + $0x150] sm:$0xff] }
 0x302   :  { %10131 = vmatpush1.bf16.msra.mxu0 %v13768_v56  ;;  %v209_v56 = vld [vmem:[%s19788_s1 + $0x70] sm:$0xff] }
 0x303   :  { %10664 = vmatpush1.bf16.msra.mxu1 %v13770_v1  ;;  %10141 = vmatprep.subr.bf16.mxu0 %v13777_v5  ;;  %v16961_v1 = vpack.c.bf16 %v12239_v55, %v12239_v55  ;;  %v206_v5 = vld [vmem:[%s19788_s1 + $0x58] sm:$0xff]  ;;  %v12253_v13 = vcombine.high %v205_v60, %v209_v56  ;;  %v12252_v4 = vcombine.low %v205_v60, %v209_v56 }
 0x304   :  { %10674 = vmatprep.subr.bf16.mxu1 %v13779_v6  ;;  %v210_v6 = vld [vmem:[%s19788_s1 + $0x78] sm:$0xff] }
 0x305   :  { %10133 = vmatmul.mubr.bf16.vlgmr.msra.gmra.mrb[0].mxu0 %v16904_v8  ;;  %v12255_v59 = vcombine.high %v206_v5, %v210_v6  ;;  %v12254_v24 = vcombine.low %v206_v5, %v210_v6  ;;  %v238_v55 = vld [vmem:[%s19788_s1 + $0x158] sm:$0xff]  ;;  %v245_v5 = vld [vmem:[%s19788_s1 + $0x190] sm:$0xff] }
 0x306   :  { %10142 = vmatpush1.bf16.msra.mxu0 %v13776_v16  ;;  %10666 = vmatmul.mubr.bf16.vlgmr.msra.gmra.mrb[0].mxu1 %v16904_v8  ;;  %v213_v16 = vld [vmem:[%s19788_s1 + $0x90] sm:$0xff] }
 0x307   :  { %10675 = vmatpush1.bf16.msra.mxu1 %v13778_v20  ;;  %10143 = vmatprep.subr.bf16.mxu0 %v13785_v21  ;;  %v217_v20 = vld [vmem:[%s19788_s1 + $0xb0] sm:$0xff]  ;;  %v214_v21 = vld [vmem:[%s19788_s1 + $0x98] sm:$0xff] }
 0x308   :  { %10676 = vmatprep.subr.bf16.mxu1 %v13787_v22  ;;  %10173 = vmatprep.mubr.bf16.mxu0 %v14318_v63  ;;  %v218_v22 = vld [vmem:[%s19788_s1 + $0xb8] sm:$0xff]  ;;  %v12261_v12 = vcombine.high %v213_v16, %v217_v20  ;;  %v12260_v36 = vcombine.low %v213_v16, %v217_v20  ;;  %v249_v6 = vld [vmem:[%s19788_s1 + $0x1b0] sm:$0xff] }
 0x309   :  { %10706 = vmatprep.mubr.bf16.mxu1 %v14318_v63  ;;  %v12263_v3 = vcombine.high %v214_v21, %v218_v22  ;;  %v12262_v37 = vcombine.low %v214_v21, %v218_v22  ;;  %v12293_v16 = vcombine.high %v245_v5, %v249_v6  ;;  %v253_v21 = vld [vmem:[%s19788_s1 + $0x1d0] sm:$0xff] }
 0x30a   :  { %10144 = vmatpush1.bf16.msra.mxu0 %v13784_v34  ;;  %v221_v34 = vld [vmem:[%s19788_s1 + $0xd0] sm:$0xff] }
 0x30b   :  { %10677 = vmatpush1.bf16.msra.mxu1 %v13786_v35  ;;  %10145 = vmatprep.subr.bf16.mxu0 %v13793_v28  ;;  %v225_v35 = vld [vmem:[%s19788_s1 + $0xf0] sm:$0xff]  ;;  %v222_v28 = vld [vmem:[%s19788_s1 + $0xd8] sm:$0xff] }
 0x30c   :  { %10678 = vmatprep.subr.bf16.mxu1 %v13795_v62  ;;  %v226_v62 = vld [vmem:[%s19788_s1 + $0xf8] sm:$0xff]  ;;  %v12269_v42 = vcombine.high %v221_v34, %v225_v35  ;;  %v257_v22 = vld [vmem:[%s19788_s1 + $0x1f0] sm:$0xff] }
 0x30d   :  { %v12271_v43 = vcombine.high %v222_v28, %v226_v62  ;;  %v12270_v48 = vcombine.low %v222_v28, %v226_v62  ;;  %v261_v28 = vld [vmem:[%s19788_s1 + $0x210] sm:$0xff] }
 0x30e   :  { %10146 = vmatpush1.bf16.msra.mxu0 %v13792_v45  ;;  %v229_v45 = vld [vmem:[%s19788_s1 + $0x110] sm:$0xff] }
 0x30f   :  { %10679 = vmatpush1.bf16.msra.mxu1 %v13794_v46  ;;  %10147 = vmatprep.subr.bf16.mxu0 %v13801_v47  ;;  %v233_v46 = vld [vmem:[%s19788_s1 + $0x130] sm:$0xff]  ;;  %v234_v47 = vld [vmem:[%s19788_s1 + $0x138] sm:$0xff] }
 0x310   :  { %10680 = vmatprep.subr.bf16.mxu1 %v13803_v53  ;;  %v12268_v53 = vcombine.low %v221_v34, %v225_v35  ;;  %v12277_v51 = vcombine.high %v229_v45, %v233_v46  ;;  %v12301_v34 = vcombine.high %v253_v21, %v257_v22  ;;  %v265_v62 = vld [vmem:[%s19788_s1 + $0x230] sm:$0xff] }
 0x312   :  { %10148 = vmatpush1.bf16.msra.mxu0 %v13800_v52  ;;  %v241_v52 = vld [vmem:[%s19788_s1 + $0x170] sm:$0xff] }
 0x313   :  { %10681 = vmatpush1.bf16.msra.mxu1 %v13802_v57  ;;  %10715 = vmatprep.subr.bf16.mxu0 %v12245_v58  ;;  %v242_v57 = vld [vmem:[%s19788_s1 + $0x178] sm:$0xff]  ;;  %v12276_v58 = vcombine.low %v229_v45, %v233_v46  ;;  %v12285_v60 = vcombine.high %v237_v23, %v241_v52  ;;  %v12309_v45 = vcombine.high %v261_v28, %v265_v62 }
 0x314   :  { %11248 = vmatprep.subr.bf16.mxu1 %v12247_v19  ;;  %v12287_v56 = vcombine.high %v238_v55, %v242_v57 }
 0x315   :  { %13808 = vmatmul.mubr.msk.bf16.vlgmr.msra.gmra.mrb[0].mxu0 %vm9645_vm0, %v16961_v1 }
 0x316   :  { %13809 = vmatmul.mubr.msk.bf16.vlgmr.msra.gmra.mrb[0].mxu1 %vm9645_vm0, %v16961_v1  ;;  %10716 = vmatpush1.bf16.msra.mxu0 %v12244_v7  ;;  %v246_v7 = vld [vmem:[%s19788_s1 + $0x198] sm:$0xff] }
 0x317   :  { %11249 = vmatpush1.bf16.msra.mxu1 %v12246_v17  ;;  %10717 = vmatprep.subr.bf16.mxu0 %v12253_v13  ;;  %v250_v17 = vld [vmem:[%s19788_s1 + $0x1b8] sm:$0xff]  ;;  %v12284_v13 = vcombine.low %v237_v23, %v241_v52 }
 0x318   :  { %11250 = vmatprep.subr.bf16.mxu1 %v12255_v59  ;;  %10747 = vmatprep.mubr.bf16.mxu0 %v14469_v9  ;;  %v12286_v59 = vcombine.low %v238_v55, %v242_v57  ;;  %v12295_v20 = vcombine.high %v246_v7, %v250_v17  ;;  %v277_v55 = vld [vmem:[%s19788_s1 + $0x290] sm:$0xff] }
 0x319   :  { %11280 = vmatprep.mubr.bf16.mxu1 %v14469_v9  ;;  %v230_v9 = vld [vmem:[%s19788_s1 + $0x118] sm:$0xff]  ;;  %v281_v57 = vld [vmem:[%s19788_s1 + $0x2b0] sm:$0xff] }
 0x31a   :  { %10718 = vmatpush1.bf16.msra.mxu0 %v12252_v4  ;;  %v12279_v49 = vcombine.high %v230_v9, %v234_v47  ;;  %v12278_v19 = vcombine.low %v230_v9, %v234_v47  ;;  %v254_v4 = vld [vmem:[%s19788_s1 + $0x1d8] sm:$0xff]  ;;  %v269_v9 = vld [vmem:[%s19788_s1 + $0x250] sm:$0xff] }
 0x31b   :  { %11251 = vmatpush1.bf16.msra.mxu1 %v12254_v24  ;;  %10719 = vmatprep.subr.bf16.mxu0 %v12261_v12  ;;  %v258_v24 = vld [vmem:[%s19788_s1 + $0x1f8] sm:$0xff]  ;;  %v12292_v12 = vcombine.low %v245_v5, %v249_v6  ;;  %v273_v47 = vld [vmem:[%s19788_s1 + $0x270] sm:$0xff]  ;;  %v12325_v5 = vcombine.high %v277_v55, %v281_v57 }
 0x31c   :  { %11252 = vmatprep.subr.bf16.mxu1 %v12263_v3  ;;  %v12294_v3 = vcombine.low %v246_v7, %v250_v17  ;;  %v12303_v35 = vcombine.high %v254_v4, %v258_v24  ;;  %v12317_v23 = vcombine.high %v269_v9, %v273_v47  ;;  %v285_v7 = vld [vmem:[%s19788_s1 + $0x2d0] sm:$0xff] }
 0x31d   :  { %v289_v17 = vld [vmem:[%s19788_s1 + $0x2f0] sm:$0xff] }
 0x31e   :  { %10720 = vmatpush1.bf16.msra.mxu0 %v12260_v36  ;;  %v262_v36 = vld [vmem:[%s19788_s1 + $0x218] sm:$0xff] }
 0x31f   :  { %11253 = vmatpush1.bf16.msra.mxu1 %v12262_v37  ;;  %10721 = vmatprep.subr.bf16.mxu0 %v12269_v42  ;;  %v266_v37 = vld [vmem:[%s19788_s1 + $0x238] sm:$0xff]  ;;  %v12300_v42 = vcombine.low %v253_v21, %v257_v22  ;;  %v12333_v21 = vcombine.high %v285_v7, %v289_v17 }
 0x320   :  { %11254 = vmatprep.subr.bf16.mxu1 %v12271_v43  ;;  %v12302_v43 = vcombine.low %v254_v4, %v258_v24  ;;  %v12311_v46 = vcombine.high %v262_v36, %v266_v37  ;;  %v293_v4 = vld [vmem:[%s19788_s1 + $0x310] sm:$0xff] }
 0x321   :  { %v297_v24 = vld [vmem:[%s19788_s1 + $0x330] sm:$0xff] }
 0x322   :  { %10722 = vmatpush1.bf16.msra.mxu0 %v12268_v53  ;;  %v270_v53 = vld [vmem:[%s19788_s1 + $0x258] sm:$0xff] }
 0x323   :  { %11255 = vmatpush1.bf16.msra.mxu1 %v12270_v48  ;;  %10723 = vmatprep.subr.bf16.mxu0 %v12277_v51  ;;  %v274_v48 = vld [vmem:[%s19788_s1 + $0x278] sm:$0xff]  ;;  %v12308_v51 = vcombine.low %v261_v28, %v265_v62  ;;  %v12341_v28 = vcombine.high %v293_v4, %v297_v24 }
 0x324   :  { %11256 = vmatprep.subr.bf16.mxu1 %v12279_v49  ;;  %v12310_v49 = vcombine.low %v262_v36, %v266_v37  ;;  %v12319_v52 = vcombine.high %v270_v53, %v274_v48  ;;  %v301_v36 = vld [vmem:[%s19788_s1 + $0x350] sm:$0xff] }
 0x325   :  { %v305_v37 = vld [vmem:[%s19788_s1 + $0x370] sm:$0xff] }
 0x326   :  { %10724 = vmatpush1.bf16.msra.mxu0 %v12276_v58  ;;  %v278_v58 = vld [vmem:[%s19788_s1 + $0x298] sm:$0xff] }
 0x327   :  { %11257 = vmatpush1.bf16.msra.mxu1 %v12278_v19  ;;  %10725 = vmatprep.subr.bf16.mxu0 %v12285_v60  ;;  %v282_v19 = vld [vmem:[%s19788_s1 + $0x2b8] sm:$0xff]  ;;  %v12316_v60 = vcombine.low %v269_v9, %v273_v47  ;;  %v12349_v9 = vcombine.high %v301_v36, %v305_v37 }
 0x328   :  { %11258 = vmatprep.subr.bf16.mxu1 %v12287_v56  ;;  %v12318_v56 = vcombine.low %v270_v53, %v274_v48  ;;  %v12327_v6 = vcombine.high %v278_v58, %v282_v19  ;;  %v309_v53 = vld [vmem:[%s19788_s1 + $0x390] sm:$0xff] }
 0x329   :  { %v313_v48 = vld [vmem:[%s19788_s1 + $0x3b0] sm:$0xff] }
 0x32a   :  { %10726 = vmatpush1.bf16.msra.mxu0 %v12284_v13  ;;  %v286_v13 = vld [vmem:[%s19788_s1 + $0x2d8] sm:$0xff] }
 0x32b   :  { %11259 = vmatpush1.bf16.msra.mxu1 %v12286_v59  ;;  %10727 = vmatprep.subr.bf16.mxu0 %v12293_v16  ;;  %v290_v59 = vld [vmem:[%s19788_s1 + $0x2f8] sm:$0xff]  ;;  %v12324_v16 = vcombine.low %v277_v55, %v281_v57  ;;  %v12357_v55 = vcombine.high %v309_v53, %v313_v48 }
 0x32c   :  { %11260 = vmatprep.subr.bf16.mxu1 %v12295_v20  ;;  %v12326_v20 = vcombine.low %v278_v58, %v282_v19  ;;  %v12335_v22 = vcombine.high %v286_v13, %v290_v59  ;;  %v317_v58 = vld [vmem:[%s19788_s1 + $0x3d0] sm:$0xff] }
 0x32d   :  { %v321_v19 = vld [vmem:[%s19788_s1 + $0x3f0] sm:$0xff] }
 0x32e   :  { %10728 = vmatpush1.bf16.msra.mxu0 %v12292_v12  ;;  %v294_v12 = vld [vmem:[%s19788_s1 + $0x318] sm:$0xff] }
 0x32f   :  { %11261 = vmatpush1.bf16.msra.mxu1 %v12294_v3  ;;  %10729 = vmatprep.subr.bf16.mxu0 %v12301_v34  ;;  %v298_v3 = vld [vmem:[%s19788_s1 + $0x338] sm:$0xff]  ;;  %v12332_v34 = vcombine.low %v285_v7, %v289_v17  ;;  %v12365_v7 = vcombine.high %v317_v58, %v321_v19 }
 0x330   :  { %11262 = vmatprep.subr.bf16.mxu1 %v12303_v35  ;;  %v12334_v35 = vcombine.low %v286_v13, %v290_v59  ;;  %v12343_v62 = vcombine.high %v294_v12, %v298_v3  ;;  %v325_v13 = vld [vmem:[%s19788_s1 + $0x410] sm:$0xff] }
 0x331   :  { %v329_v59 = vld [vmem:[%s19788_s1 + $0x430] sm:$0xff] }
 0x332   :  { %10730 = vmatpush1.bf16.msra.mxu0 %v12300_v42  ;;  %v302_v42 = vld [vmem:[%s19788_s1 + $0x358] sm:$0xff] }
 0x333   :  { %11263 = vmatpush1.bf16.msra.mxu1 %v12302_v43  ;;  %10731 = vmatprep.subr.bf16.mxu0 %v12309_v45  ;;  %v306_v43 = vld [vmem:[%s19788_s1 + $0x378] sm:$0xff]  ;;  %v12340_v45 = vcombine.low %v293_v4, %v297_v24  ;;  %v12373_v4 = vcombine.high %v325_v13, %v329_v59 }
 0x334   :  { %11264 = vmatprep.subr.bf16.mxu1 %v12311_v46  ;;  %v12342_v46 = vcombine.low %v294_v12, %v298_v3  ;;  %v12351_v47 = vcombine.high %v302_v42, %v306_v43  ;;  %v333_v12 = vld [vmem:[%s19788_s1 + $0x450] sm:$0xff] }
 0x335   :  { %v337_v3 = vld [vmem:[%s19788_s1 + $0x470] sm:$0xff] }
 0x336   :  { %10732 = vmatpush1.bf16.msra.mxu0 %v12308_v51  ;;  %v310_v51 = vld [vmem:[%s19788_s1 + $0x398] sm:$0xff] }
 0x337   :  { %11265 = vmatpush1.bf16.msra.mxu1 %v12310_v49  ;;  %10733 = vmatprep.subr.bf16.mxu0 %v12317_v23  ;;  %v314_v49 = vld [vmem:[%s19788_s1 + $0x3b8] sm:$0xff]  ;;  %v12348_v23 = vcombine.low %v301_v36, %v305_v37  ;;  %v12381_v36 = vcombine.high %v333_v12, %v337_v3 }
 0x338   :  { %11266 = vmatprep.subr.bf16.mxu1 %v12319_v52  ;;  %v12350_v52 = vcombine.low %v302_v42, %v306_v43  ;;  %v12359_v57 = vcombine.high %v310_v51, %v314_v49  ;;  %v341_v42 = vld [vmem:[%s19788_s1 + $0x490] sm:$0xff] }
 0x339   :  { %v345_v43 = vld [vmem:[%s19788_s1 + $0x4b0] sm:$0xff] }
 0x33a   :  { %10734 = vmatpush1.bf16.msra.mxu0 %v12316_v60  ;;  %v318_v60 = vld [vmem:[%s19788_s1 + $0x3d8] sm:$0xff] }
 0x33b   :  { %11267 = vmatpush1.bf16.msra.mxu1 %v12318_v56  ;;  %10735 = vmatprep.subr.bf16.mxu0 %v12325_v5  ;;  %v322_v56 = vld [vmem:[%s19788_s1 + $0x3f8] sm:$0xff]  ;;  %v12356_v5 = vcombine.low %v309_v53, %v313_v48  ;;  %v12389_v53 = vcombine.high %v341_v42, %v345_v43 }
 0x33c   :  { %11268 = vmatprep.subr.bf16.mxu1 %v12327_v6  ;;  %v12358_v6 = vcombine.low %v310_v51, %v314_v49  ;;  %v12367_v17 = vcombine.high %v318_v60, %v322_v56  ;;  %v349_v51 = vld [vmem:[%s19788_s1 + $0x4d0] sm:$0xff] }
 0x33d   :  { %v353_v49 = vld [vmem:[%s19788_s1 + $0x4f0] sm:$0xff] }
 0x33e   :  { %10736 = vmatpush1.bf16.msra.mxu0 %v12324_v16  ;;  %v326_v16 = vld [vmem:[%s19788_s1 + $0x418] sm:$0xff] }
 0x33f   :  { %11269 = vmatpush1.bf16.msra.mxu1 %v12326_v20  ;;  %10737 = vmatprep.subr.bf16.mxu0 %v12333_v21  ;;  %v330_v20 = vld [vmem:[%s19788_s1 + $0x438] sm:$0xff]  ;;  %v12364_v21 = vcombine.low %v317_v58, %v321_v19  ;;  %v357_v19 = vld [vmem:[%s19788_s1 + $0x510] sm:$0xff] }
 0x340   :  { %11270 = vmatprep.subr.bf16.mxu1 %v12335_v22  ;;  %v12366_v22 = vcombine.low %v318_v60, %v322_v56  ;;  %v12375_v24 = vcombine.high %v326_v16, %v330_v20  ;;  %v361_v60 = vld [vmem:[%s19788_s1 + $0x530] sm:$0xff]  ;;  %v362_v56 = vld [vmem:[%s19788_s1 + $0x538] sm:$0xff] }
 0x342   :  { %10738 = vmatpush1.bf16.msra.mxu0 %v12332_v34  ;;  %v334_v34 = vld [vmem:[%s19788_s1 + $0x458] sm:$0xff] }
 0x343   :  { %11271 = vmatpush1.bf16.msra.mxu1 %v12334_v35  ;;  %10739 = vmatprep.subr.bf16.mxu0 %v12341_v28  ;;  %v338_v35 = vld [vmem:[%s19788_s1 + $0x478] sm:$0xff]  ;;  %v12372_v28 = vcombine.low %v325_v13, %v329_v59  ;;  %v365_v13 = vld [vmem:[%s19788_s1 + $0x550] sm:$0xff] }
 0x344   :  { %11272 = vmatprep.subr.bf16.mxu1 %v12343_v62  ;;  %v12374_v62 = vcombine.low %v326_v16, %v330_v20  ;;  %v12383_v37 = vcombine.high %v334_v34, %v338_v35  ;;  %v369_v59 = vld [vmem:[%s19788_s1 + $0x570] sm:$0xff]  ;;  %v366_v16 = vld [vmem:[%s19788_s1 + $0x558] sm:$0xff] }
 0x345   :  { %v370_v20 = vld [vmem:[%s19788_s1 + $0x578] sm:$0xff] }
 0x346   :  { %10740 = vmatpush1.bf16.msra.mxu0 %v12340_v45  ;;  %v342_v45 = vld [vmem:[%s19788_s1 + $0x498] sm:$0xff] }
 0x347   :  { %11273 = vmatpush1.bf16.msra.mxu1 %v12342_v46  ;;  %10741 = vmatprep.subr.bf16.mxu0 %v12349_v9  ;;  %v346_v46 = vld [vmem:[%s19788_s1 + $0x4b8] sm:$0xff]  ;;  %v12380_v9 = vcombine.low %v333_v12, %v337_v3  ;;  %v373_v12 = vld [vmem:[%s19788_s1 + $0x590] sm:$0xff] }
 0x348   :  { %11274 = vmatprep.subr.bf16.mxu1 %v12351_v47  ;;  %v12382_v47 = vcombine.low %v334_v34, %v338_v35  ;;  %v12391_v48 = vcombine.high %v342_v45, %v346_v46  ;;  %v377_v3 = vld [vmem:[%s19788_s1 + $0x5b0] sm:$0xff]  ;;  %v374_v34 = vld [vmem:[%s19788_s1 + $0x598] sm:$0xff] }
 0x349   :  { %v378_v35 = vld [vmem:[%s19788_s1 + $0x5b8] sm:$0xff] }
 0x34a   :  { %10742 = vmatpush1.bf16.msra.mxu0 %v12348_v23  ;;  %v354_v23 = vld [vmem:[%s19788_s1 + $0x4f8] sm:$0xff] }
 0x34b   :  { %11275 = vmatpush1.bf16.msra.mxu1 %v12350_v52  ;;  %10743 = vmatprep.subr.bf16.mxu0 %v12357_v55  ;;  %v12388_v52 = vcombine.low %v341_v42, %v345_v43  ;;  %v12390_v55 = vcombine.low %v342_v45, %v346_v46  ;;  %v381_v42 = vld [vmem:[%s19788_s1 + $0x5d0] sm:$0xff]  ;;  %v382_v45 = vld [vmem:[%s19788_s1 + $0x5d8] sm:$0xff] }
 0x34c   :  { %11276 = vmatprep.subr.bf16.mxu1 %v12359_v57  ;;  %v12397_v57 = vcombine.high %v349_v51, %v353_v49  ;;  %v385_v43 = vld [vmem:[%s19788_s1 + $0x5f0] sm:$0xff]  ;;  %v386_v46 = vld [vmem:[%s19788_s1 + $0x5f8] sm:$0xff] }
 0x34e   :  { %10744 = vmatpush1.bf16.msra.mxu0 %v12356_v5  ;;  %v12396_v5 = vcombine.low %v349_v51, %v353_v49  ;;  %v389_v51 = vld [vmem:[%s19788_s1 + $0x610] sm:$0xff] }
 0x34f   :  { %11277 = vmatpush1.bf16.msra.mxu1 %v12358_v6  ;;  %10745 = vmatprep.subr.bf16.mxu0 %v12365_v7  ;;  %v12405_v7 = vcombine.high %v357_v19, %v361_v60  ;;  %v393_v49 = vld [vmem:[%s19788_s1 + $0x630] sm:$0xff] }
 0x350   :  { %11278 = vmatprep.subr.bf16.mxu1 %v12367_v17 }
 0x352   :  { %10746 = vmatpush1.bf16.msra.mxu0 %v12364_v21  ;;  %v12404_v21 = vcombine.low %v357_v19, %v361_v60  ;;  %v397_v19 = vld [vmem:[%s19788_s1 + $0x650] sm:$0xff] }
 0x353   :  { %11279 = vmatpush1.bf16.msra.mxu1 %v12366_v22  ;;  %10756 = vmatprep.subr.bf16.mxu0 %v12373_v4  ;;  %v12413_v4 = vcombine.high %v365_v13, %v369_v59  ;;  %v401_v60 = vld [vmem:[%s19788_s1 + $0x670] sm:$0xff] }
 0x354   :  { %11289 = vmatprep.subr.bf16.mxu1 %v12375_v24  ;;  %v12415_v24 = vcombine.high %v366_v16, %v370_v20 }
 0x355   :  { %10748 = vmatmul.mubr.bf16.vlgmr.msra.gmra.mrb[4].mxu0 %v14590_v25 }
 0x356   :  { %10757 = vmatpush1.bf16.msra.mxu0 %v12372_v28  ;;  %11281 = vmatmul.mubr.bf16.vlgmr.msra.gmra.mrb[4].mxu1 %v14590_v25  ;;  %v350_v25 = vld [vmem:[%s19788_s1 + $0x4d8] sm:$0xff]  ;;  %v12412_v28 = vcombine.low %v365_v13, %v369_v59  ;;  %v405_v13 = vld [vmem:[%s19788_s1 + $0x690] sm:$0xff] }
 0x357   :  { %11290 = vmatpush1.bf16.msra.mxu1 %v12374_v62  ;;  %10758 = vmatprep.subr.bf16.mxu0 %v12381_v36  ;;  %v12399_v58 = vcombine.high %v350_v25, %v354_v23  ;;  %v12398_v6 = vcombine.low %v350_v25, %v354_v23  ;;  %v12414_v62 = vcombine.low %v366_v16, %v370_v20  ;;  %v390_v25 = vld [vmem:[%s19788_s1 + $0x618] sm:$0xff]  ;;  %v409_v59 = vld [vmem:[%s19788_s1 + $0x6b0] sm:$0xff] }
 0x358   :  { %11291 = vmatprep.subr.bf16.mxu1 %v12383_v37  ;;  %10788 = vmatprep.mubr.bf16.mxu0 %v14604_v33  ;;  %v12421_v36 = vcombine.high %v373_v12, %v377_v3  ;;  %v12423_v37 = vcombine.high %v374_v34, %v378_v35  ;;  %v394_v23 = vld [vmem:[%s19788_s1 + $0x638] sm:$0xff] }
 0x359   :  { %11321 = vmatprep.mubr.bf16.mxu1 %v14604_v33  ;;  %v358_v33 = vld [vmem:[%s19788_s1 + $0x518] sm:$0xff] }
 0x35a   :  { %10759 = vmatpush1.bf16.msra.mxu0 %v12380_v9  ;;  %v12407_v17 = vcombine.high %v358_v33, %v362_v56  ;;  %v12406_v22 = vcombine.low %v358_v33, %v362_v56  ;;  %v12420_v9 = vcombine.low %v373_v12, %v377_v3  ;;  %v398_v33 = vld [vmem:[%s19788_s1 + $0x658] sm:$0xff]  ;;  %v413_v12 = vld [vmem:[%s19788_s1 + $0x6d0] sm:$0xff] }
 0x35b   :  { %11292 = vmatpush1.bf16.msra.mxu1 %v12382_v47  ;;  %10760 = vmatprep.subr.bf16.mxu0 %v12389_v53  ;;  %v12422_v47 = vcombine.low %v374_v34, %v378_v35  ;;  %v12429_v53 = vcombine.high %v381_v42, %v385_v43  ;;  %v402_v56 = vld [vmem:[%s19788_s1 + $0x678] sm:$0xff]  ;;  %v417_v3 = vld [vmem:[%s19788_s1 + $0x6f0] sm:$0xff] }
 0x35c   :  { %11293 = vmatprep.subr.bf16.mxu1 %v12391_v48  ;;  %v12431_v48 = vcombine.high %v382_v45, %v386_v46  ;;  %v406_v16 = vld [vmem:[%s19788_s1 + $0x698] sm:$0xff] }
 0x35d   :  { %v410_v20 = vld [vmem:[%s19788_s1 + $0x6b8] sm:$0xff] }
 0x35e   :  { %10761 = vmatpush1.bf16.msra.mxu0 %v12388_v52  ;;  %v12428_v52 = vcombine.low %v381_v42, %v385_v43  ;;  %v414_v34 = vld [vmem:[%s19788_s1 + $0x6d8] sm:$0xff]  ;;  %v421_v42 = vld [vmem:[%s19788_s1 + $0x710] sm:$0xff] }
 0x35f   :  { %11294 = vmatpush1.bf16.msra.mxu1 %v12390_v55  ;;  %10762 = vmatprep.subr.bf16.mxu0 %v12397_v57  ;;  %v12430_v55 = vcombine.low %v382_v45, %v386_v46  ;;  %v12437_v57 = vcombine.high %v389_v51, %v393_v49  ;;  %v418_v35 = vld [vmem:[%s19788_s1 + $0x6f8] sm:$0xff]  ;;  %v425_v43 = vld [vmem:[%s19788_s1 + $0x730] sm:$0xff] }
 0x360   :  { %11295 = vmatprep.subr.bf16.mxu1 %v12399_v58  ;;  %v12439_v58 = vcombine.high %v390_v25, %v394_v23  ;;  %v422_v45 = vld [vmem:[%s19788_s1 + $0x718] sm:$0xff] }
 0x361   :  { %v426_v46 = vld [vmem:[%s19788_s1 + $0x738] sm:$0xff] }
 0x362   :  { %10763 = vmatpush1.bf16.msra.mxu0 %v12396_v5  ;;  %v12436_v5 = vcombine.low %v389_v51, %v393_v49  ;;  %v429_v51 = vld [vmem:[%s19788_s1 + $0x750] sm:$0xff] }
 0x363   :  { %11296 = vmatpush1.bf16.msra.mxu1 %v12398_v6  ;;  %10764 = vmatprep.subr.bf16.mxu0 %v12405_v7  ;;  %v12438_v6 = vcombine.low %v390_v25, %v394_v23  ;;  %v12445_v7 = vcombine.high %v397_v19, %v401_v60  ;;  %v433_v49 = vld [vmem:[%s19788_s1 + $0x770] sm:$0xff]  ;;  %v430_v25 = vld [vmem:[%s19788_s1 + $0x758] sm:$0xff] }
 0x364   :  { %11297 = vmatprep.subr.bf16.mxu1 %v12407_v17  ;;  %v12447_v17 = vcombine.high %v398_v33, %v402_v56  ;;  %v434_v23 = vld [vmem:[%s19788_s1 + $0x778] sm:$0xff] }
 0x366   :  { %10765 = vmatpush1.bf16.msra.mxu0 %v12404_v21  ;;  %v12444_v21 = vcombine.low %v397_v19, %v401_v60  ;;  %v437_v19 = vld [vmem:[%s19788_s1 + $0x790] sm:$0xff] }
 0x367   :  { %11298 = vmatpush1.bf16.msra.mxu1 %v12406_v22  ;;  %10766 = vmatprep.subr.bf16.mxu0 %v12413_v4  ;;  %v12446_v22 = vcombine.low %v398_v33, %v402_v56  ;;  %v12453_v4 = vcombine.high %v405_v13, %v409_v59  ;;  %v441_v60 = vld [vmem:[%s19788_s1 + $0x7b0] sm:$0xff]  ;;  %v438_v33 = vld [vmem:[%s19788_s1 + $0x798] sm:$0xff] }
 0x368   :  { %11299 = vmatprep.subr.bf16.mxu1 %v12415_v24  ;;  %v12455_v24 = vcombine.high %v406_v16, %v410_v20  ;;  %v442_v56 = vld [vmem:[%s19788_s1 + $0x7b8] sm:$0xff] }
 0x36a   :  { %10767 = vmatpush1.bf16.msra.mxu0 %v12412_v28  ;;  %v12452_v28 = vcombine.low %v405_v13, %v409_v59  ;;  %v445_v13 = vld [vmem:[%s19788_s1 + $0x7d0] sm:$0xff] }
 0x36b   :  { %11300 = vmatpush1.bf16.msra.mxu1 %v12414_v62  ;;  %10768 = vmatprep.subr.bf16.mxu0 %v12421_v36  ;;  %v12454_v62 = vcombine.low %v406_v16, %v410_v20  ;;  %v12461_v36 = vcombine.high %v413_v12, %v417_v3  ;;  %v449_v59 = vld [vmem:[%s19788_s1 + $0x7f0] sm:$0xff]  ;;  %v446_v16 = vld [vmem:[%s19788_s1 + $0x7d8] sm:$0xff] }
 0x36c   :  { %11301 = vmatprep.subr.bf16.mxu1 %v12423_v37  ;;  %v12463_v37 = vcombine.high %v414_v34, %v418_v35  ;;  %v450_v20 = vld [vmem:[%s19788_s1 + $0x7f8] sm:$0xff] }
 0x36e   :  { %10769 = vmatpush1.bf16.msra.mxu0 %v12420_v9  ;;  %v12460_v9 = vcombine.low %v413_v12, %v417_v3  ;;  %v453_v12 = vld [vmem:[%s19788_s1 + $0x810] sm:$0xff] }
 0x36f   :  { %11302 = vmatpush1.bf16.msra.mxu1 %v12422_v47  ;;  %10770 = vmatprep.subr.bf16.mxu0 %v12429_v53  ;;  %v12462_v47 = vcombine.low %v414_v34, %v418_v35  ;;  %v12469_v53 = vcombine.high %v421_v42, %v425_v43  ;;  %v457_v3 = vld [vmem:[%s19788_s1 + $0x830] sm:$0xff]  ;;  %v454_v34 = vld [vmem:[%s19788_s1 + $0x818] sm:$0xff] }
 0x370   :  { %11303 = vmatprep.subr.bf16.mxu1 %v12431_v48  ;;  %v12471_v48 = vcombine.high %v422_v45, %v426_v46  ;;  %v458_v35 = vld [vmem:[%s19788_s1 + $0x838] sm:$0xff] }
 0x372   :  { %10771 = vmatpush1.bf16.msra.mxu0 %v12428_v52  ;;  %v12468_v52 = vcombine.low %v421_v42, %v425_v43  ;;  %v461_v42 = vld [vmem:[%s19788_s1 + $0x850] sm:$0xff] }
 0x373   :  { %11304 = vmatpush1.bf16.msra.mxu1 %v12430_v55  ;;  %10772 = vmatprep.subr.bf16.mxu0 %v12437_v57  ;;  %v12470_v55 = vcombine.low %v422_v45, %v426_v46  ;;  %v12477_v57 = vcombine.high %v429_v51, %v433_v49  ;;  %v465_v43 = vld [vmem:[%s19788_s1 + $0x870] sm:$0xff]  ;;  %v462_v45 = vld [vmem:[%s19788_s1 + $0x858] sm:$0xff] }
 0x374   :  { %11305 = vmatprep.subr.bf16.mxu1 %v12439_v58  ;;  %v12479_v58 = vcombine.high %v430_v25, %v434_v23  ;;  %v466_v46 = vld [vmem:[%s19788_s1 + $0x878] sm:$0xff] }
 0x376   :  { %10773 = vmatpush1.bf16.msra.mxu0 %v12436_v5  ;;  %v12476_v5 = vcombine.low %v429_v51, %v433_v49  ;;  %v469_v51 = vld [vmem:[%s19788_s1 + $0x890] sm:$0xff] }
 0x377   :  { %11306 = vmatpush1.bf16.msra.mxu1 %v12438_v6  ;;  %10774 = vmatprep.subr.bf16.mxu0 %v12445_v7  ;;  %v12478_v6 = vcombine.low %v430_v25, %v434_v23  ;;  %v12485_v7 = vcombine.high %v437_v19, %v441_v60  ;;  %v473_v49 = vld [vmem:[%s19788_s1 + $0x8b0] sm:$0xff]  ;;  %v470_v25 = vld [vmem:[%s19788_s1 + $0x898] sm:$0xff] }
 0x378   :  { %11307 = vmatprep.subr.bf16.mxu1 %v12447_v17  ;;  %v12487_v17 = vcombine.high %v438_v33, %v442_v56  ;;  %v474_v23 = vld [vmem:[%s19788_s1 + $0x8b8] sm:$0xff] }
 0x37a   :  { %10775 = vmatpush1.bf16.msra.mxu0 %v12444_v21  ;;  %v12484_v21 = vcombine.low %v437_v19, %v441_v60  ;;  %v477_v19 = vld [vmem:[%s19788_s1 + $0x8d0] sm:$0xff] }
 0x37b   :  { %11308 = vmatpush1.bf16.msra.mxu1 %v12446_v22  ;;  %10776 = vmatprep.subr.bf16.mxu0 %v12453_v4  ;;  %v12486_v22 = vcombine.low %v438_v33, %v442_v56  ;;  %v12493_v4 = vcombine.high %v445_v13, %v449_v59  ;;  %v481_v60 = vld [vmem:[%s19788_s1 + $0x8f0] sm:$0xff]  ;;  %v482_v33 = vld [vmem:[%s19788_s1 + $0x8f8] sm:$0xff]  ;;  %v12516_v56 = vcombine.low %v469_v51, %v473_v49 }
 0x37c   :  { %11309 = vmatprep.subr.bf16.mxu1 %v12455_v24  ;;  %v12495_v24 = vcombine.high %v446_v16, %v450_v20 }
 0x37e   :  { %10777 = vmatpush1.bf16.msra.mxu0 %v12452_v28  ;;  %v12492_v28 = vcombine.low %v445_v13, %v449_v59  ;;  %v489_v13 = vld [vmem:[%s19788_s1 + $0x930] sm:$0xff]  ;;  %v490_v59 = vld [vmem:[%s19788_s1 + $0x938] sm:$0xff] }
 0x37f   :  { %11310 = vmatpush1.bf16.msra.mxu1 %v12454_v62  ;;  %10778 = vmatprep.subr.bf16.mxu0 %v12461_v36  ;;  %v12494_v62 = vcombine.low %v446_v16, %v450_v20  ;;  %v12501_v36 = vcombine.high %v453_v12, %v457_v3  ;;  %v12524_v16 = vcombine.low %v477_v19, %v481_v60 }
 0x380   :  { %11311 = vmatprep.subr.bf16.mxu1 %v12463_v37  ;;  %v12503_v37 = vcombine.high %v454_v34, %v458_v35 }
 0x382   :  { %10779 = vmatpush1.bf16.msra.mxu0 %v12460_v9  ;;  %v12500_v9 = vcombine.low %v453_v12, %v457_v3  ;;  %v494_v12 = vld [vmem:[%s19788_s1 + $0x958] sm:$0xff] }
 0x383   :  { %11312 = vmatpush1.bf16.msra.mxu1 %v12462_v47  ;;  %10780 = vmatprep.subr.bf16.mxu0 %v12469_v53  ;;  %v12502_v47 = vcombine.low %v454_v34, %v458_v35  ;;  %v12509_v53 = vcombine.high %v461_v42, %v465_v43  ;;  %v498_v3 = vld [vmem:[%s19788_s1 + $0x978] sm:$0xff] }
 0x384   :  { %11313 = vmatprep.subr.bf16.mxu1 %v12471_v48  ;;  %v12511_v48 = vcombine.high %v462_v45, %v466_v46 }
 0x386   :  { %10781 = vmatpush1.bf16.msra.mxu0 %v12468_v52  ;;  %v12508_v52 = vcombine.low %v461_v42, %v465_v43  ;;  %v502_v42 = vld [vmem:[%s19788_s1 + $0x998] sm:$0xff] }
 0x387   :  { %11314 = vmatpush1.bf16.msra.mxu1 %v12470_v55  ;;  %10782 = vmatprep.subr.bf16.mxu0 %v12477_v57  ;;  %v12510_v55 = vcombine.low %v462_v45, %v466_v46  ;;  %v12517_v57 = vcombine.high %v469_v51, %v473_v49  ;;  %v506_v43 = vld [vmem:[%s19788_s1 + $0x9b8] sm:$0xff]  ;;  %v12542_v46 = vcombine.low %v494_v12, %v498_v3 }
 0x388   :  { %11315 = vmatprep.subr.bf16.mxu1 %v12479_v58  ;;  %v12519_v58 = vcombine.high %v470_v25, %v474_v23  ;;  %v510_v51 = vld [vmem:[%s19788_s1 + $0x9d8] sm:$0xff] }
 0x389   :  { %v514_v49 = vld [vmem:[%s19788_s1 + $0x9f8] sm:$0xff] }
 0x38a   :  { %10783 = vmatpush1.bf16.msra.mxu0 %v12476_v5  ;;  %v12518_v5 = vcombine.low %v470_v25, %v474_v23  ;;  %v12550_v23 = vcombine.low %v502_v42, %v506_v43 }
 0x38b   :  { %11316 = vmatpush1.bf16.msra.mxu1 %v12478_v6  ;;  %10784 = vmatprep.subr.bf16.mxu0 %v12485_v7  ;;  %v12525_v6 = vcombine.high %v477_v19, %v481_v60  ;;  %v518_v19 = vld [vmem:[%s19788_s1 + $0xa18] sm:$0xff] }
 0x38c   :  { %11317 = vmatprep.subr.bf16.mxu1 %v12487_v17  ;;  %v485_v17 = vld [vmem:[%s19788_s1 + $0x910] sm:$0xff]  ;;  %v522_v60 = vld [vmem:[%s19788_s1 + $0xa38] sm:$0xff] }
 0x38d   :  { %v12532_v34 = vcombine.low %v485_v17, %v489_v13 }
 0x38e   :  { %10785 = vmatpush1.bf16.msra.mxu0 %v12484_v21  ;;  %v12533_v21 = vcombine.high %v485_v17, %v489_v13  ;;  %v526_v17 = vld [vmem:[%s19788_s1 + $0xa58] sm:$0xff] }
 0x38f   :  { %11318 = vmatpush1.bf16.msra.mxu1 %v12486_v22  ;;  %10786 = vmatprep.subr.bf16.mxu0 %v12493_v4  ;;  %v493_v4 = vld [vmem:[%s19788_s1 + $0x950] sm:$0xff]  ;;  %v530_v13 = vld [vmem:[%s19788_s1 + $0xa78] sm:$0xff] }
 0x390   :  { %11319 = vmatprep.subr.bf16.mxu1 %v12495_v24  ;;  %v497_v24 = vld [vmem:[%s19788_s1 + $0x970] sm:$0xff] }
 0x391   :  { %v12540_v45 = vcombine.low %v493_v4, %v497_v24 }
 0x392   :  { %10787 = vmatpush1.bf16.msra.mxu0 %v12492_v28  ;;  %v12541_v28 = vcombine.high %v493_v4, %v497_v24  ;;  %v534_v4 = vld [vmem:[%s19788_s1 + $0xa98] sm:$0xff] }
 0x393   :  { %11320 = vmatpush1.bf16.msra.mxu1 %v12494_v62  ;;  %10797 = vmatprep.subr.bf16.mxu0 %v12501_v36  ;;  %v12543_v62 = vcombine.high %v494_v12, %v498_v3  ;;  %v501_v36 = vld [vmem:[%s19788_s1 + $0x990] sm:$0xff]  ;;  %v538_v24 = vld [vmem:[%s19788_s1 + $0xab8] sm:$0xff]  ;;  %v12574_v3 = vcombine.low %v526_v17, %v530_v13 }
 0x394   :  { %11330 = vmatprep.subr.bf16.mxu1 %v12503_v37  ;;  %v505_v37 = vld [vmem:[%s19788_s1 + $0x9b0] sm:$0xff] }
 0x395   :  { %10789 = vmatmul.mubr.bf16.vlgmr.msra.gmra.mrb[4].mxu0 %v14803_v41  ;;  %v12548_v25 = vcombine.low %v501_v36, %v505_v37 }
 0x396   :  { %10798 = vmatpush1.bf16.msra.mxu0 %v12500_v9  ;;  %11322 = vmatmul.mubr.bf16.vlgmr.msra.gmra.mrb[4].mxu1 %v14803_v41  ;;  %v478_v41 = vld [vmem:[%s19788_s1 + $0x8d8] sm:$0xff]  ;;  %v12549_v9 = vcombine.high %v501_v36, %v505_v37 }
 0x397   :  { %11331 = vmatpush1.bf16.msra.mxu1 %v12502_v47  ;;  %10799 = vmatprep.subr.bf16.mxu0 %v12509_v53  ;;  %v12527_v7 = vcombine.high %v478_v41, %v482_v33  ;;  %v12526_v20 = vcombine.low %v478_v41, %v482_v33  ;;  %v12551_v47 = vcombine.high %v502_v42, %v506_v43  ;;  %v509_v53 = vld [vmem:[%s19788_s1 + $0x9d0] sm:$0xff]  ;;  %v542_v36 = vld [vmem:[%s19788_s1 + $0xad8] sm:$0xff] }
 0x398   :  { %11332 = vmatprep.subr.bf16.mxu1 %v12511_v48  ;;  %10829 = vmatprep.mubr.bf16.mxu0 %v14817_v50  ;;  %v513_v48 = vld [vmem:[%s19788_s1 + $0x9f0] sm:$0xff]  ;;  %v12558_v33 = vcombine.low %v510_v51, %v514_v49  ;;  %v546_v37 = vld [vmem:[%s19788_s1 + $0xaf8] sm:$0xff]  ;;  %v12582_v43 = vcombine.low %v534_v4, %v538_v24 }
 0x399   :  { %11362 = vmatprep.mubr.bf16.mxu1 %v14817_v50  ;;  %v486_v50 = vld [vmem:[%s19788_s1 + $0x918] sm:$0xff]  ;;  %v12556_v41 = vcombine.low %v509_v53, %v513_v48 }
 0x39a   :  { %10800 = vmatpush1.bf16.msra.mxu0 %v12508_v52  ;;  %v12535_v22 = vcombine.high %v486_v50, %v490_v59  ;;  %v12534_v35 = vcombine.low %v486_v50, %v490_v59  ;;  %v12557_v52 = vcombine.high %v509_v53, %v513_v48  ;;  %v12566_v59 = vcombine.low %v518_v19, %v522_v60  ;;  %v550_v53 = vld [vmem:[%s19788_s1 + $0xb18] sm:$0xff] }
 0x39b   :  { %11333 = vmatpush1.bf16.msra.mxu1 %v12510_v55  ;;  %10801 = vmatprep.subr.bf16.mxu0 %v12517_v57  ;;  %v12559_v55 = vcombine.high %v510_v51, %v514_v49  ;;  %v517_v57 = vld [vmem:[%s19788_s1 + $0xa10] sm:$0xff]  ;;  %v554_v48 = vld [vmem:[%s19788_s1 + $0xb38] sm:$0xff]  ;;  %v12590_v49 = vcombine.low %v542_v36, %v546_v37 }
 0x39c   :  { %11334 = vmatprep.subr.bf16.mxu1 %v12519_v58  ;;  %v521_v58 = vld [vmem:[%s19788_s1 + $0xa30] sm:$0xff] }
 0x39d   :  { %v12564_v50 = vcombine.low %v517_v57, %v521_v58 }
 0x39e   :  { %10802 = vmatpush1.bf16.msra.mxu0 %v12516_v56  ;;  %v12565_v56 = vcombine.high %v517_v57, %v521_v58  ;;  %v558_v57 = vld [vmem:[%s19788_s1 + $0xb58] sm:$0xff] }
 0x39f   :  { %11335 = vmatpush1.bf16.msra.mxu1 %v12518_v5  ;;  %10803 = vmatprep.subr.bf16.mxu0 %v12525_v6  ;;  %v12567_v5 = vcombine.high %v518_v19, %v522_v60  ;;  %v525_v6 = vld [vmem:[%s19788_s1 + $0xa50] sm:$0xff]  ;;  %v562_v58 = vld [vmem:[%s19788_s1 + $0xb78] sm:$0xff]  ;;  %v12598_v60 = vcombine.low %v550_v53, %v554_v48 }
 0x3a0   :  { %11336 = vmatprep.subr.bf16.mxu1 %v12527_v7  ;;  %v529_v7 = vld [vmem:[%s19788_s1 + $0xa70] sm:$0xff] }
 0x3a1   :  { %v12572_v12 = vcombine.low %v525_v6, %v529_v7 }
 0x3a2   :  { %10804 = vmatpush1.bf16.msra.mxu0 %v12524_v16  ;;  %v12573_v16 = vcombine.high %v525_v6, %v529_v7  ;;  %v566_v6 = vld [vmem:[%s19788_s1 + $0xb98] sm:$0xff] }
 0x3a3   :  { %11337 = vmatpush1.bf16.msra.mxu1 %v12526_v20  ;;  %10805 = vmatprep.subr.bf16.mxu0 %v12533_v21  ;;  %v12575_v20 = vcombine.high %v526_v17, %v530_v13  ;;  %v533_v21 = vld [vmem:[%s19788_s1 + $0xa90] sm:$0xff]  ;;  %v570_v7 = vld [vmem:[%s19788_s1 + $0xbb8] sm:$0xff]  ;;  %v12606_v13 = vcombine.low %v558_v57, %v562_v58 }
 0x3a4   :  { %11338 = vmatprep.subr.bf16.mxu1 %v12535_v22  ;;  %v537_v22 = vld [vmem:[%s19788_s1 + $0xab0] sm:$0xff] }
 0x3a5   :  { %v12580_v42 = vcombine.low %v533_v21, %v537_v22 }
 0x3a6   :  { %10806 = vmatpush1.bf16.msra.mxu0 %v12532_v34  ;;  %v12581_v34 = vcombine.high %v533_v21, %v537_v22  ;;  %v574_v21 = vld [vmem:[%s19788_s1 + $0xbd8] sm:$0xff] }
 0x3a7   :  { %11339 = vmatpush1.bf16.msra.mxu1 %v12534_v35  ;;  %10807 = vmatprep.subr.bf16.mxu0 %v12541_v28  ;;  %v12583_v35 = vcombine.high %v534_v4, %v538_v24  ;;  %v541_v28 = vld [vmem:[%s19788_s1 + $0xad0] sm:$0xff]  ;;  %v578_v22 = vld [vmem:[%s19788_s1 + $0xbf8] sm:$0xff]  ;;  %v12614_v24 = vcombine.low %v566_v6, %v570_v7 }
 0x3a8   :  { %11340 = vmatprep.subr.bf16.mxu1 %v12543_v62  ;;  %v545_v62 = vld [vmem:[%s19788_s1 + $0xaf0] sm:$0xff] }
 0x3a9   :  { %v12588_v51 = vcombine.low %v541_v28, %v545_v62 }
 0x3aa   :  { %10808 = vmatpush1.bf16.msra.mxu0 %v12540_v45  ;;  %v12589_v45 = vcombine.high %v541_v28, %v545_v62  ;;  %v582_v28 = vld [vmem:[%s19788_s1 + $0xc18] sm:$0xff] }
 0x3ab   :  { %11341 = vmatpush1.bf16.msra.mxu1 %v12542_v46  ;;  %10809 = vmatprep.subr.bf16.mxu0 %v12549_v9  ;;  %v12591_v46 = vcombine.high %v542_v36, %v546_v37  ;;  %v549_v9 = vld [vmem:[%s19788_s1 + $0xb10] sm:$0xff]  ;;  %v586_v62 = vld [vmem:[%s19788_s1 + $0xc38] sm:$0xff]  ;;  %v12622_v37 = vcombine.low %v574_v21, %v578_v22 }
 0x3ac   :  { %11342 = vmatprep.subr.bf16.mxu1 %v12551_v47  ;;  %v553_v47 = vld [vmem:[%s19788_s1 + $0xb30] sm:$0xff] }
 0x3ad   :  { %v12596_v19 = vcombine.low %v549_v9, %v553_v47 }
 0x3ae   :  { %10810 = vmatpush1.bf16.msra.mxu0 %v12548_v25  ;;  %v12597_v25 = vcombine.high %v549_v9, %v553_v47  ;;  %v590_v9 = vld [vmem:[%s19788_s1 + $0xc58] sm:$0xff] }
 0x3af   :  { %11343 = vmatpush1.bf16.msra.mxu1 %v12550_v23  ;;  %10811 = vmatprep.subr.bf16.mxu0 %v12557_v52  ;;  %v12599_v23 = vcombine.high %v550_v53, %v554_v48  ;;  %v557_v52 = vld [vmem:[%s19788_s1 + $0xb50] sm:$0xff]  ;;  %v594_v47 = vld [vmem:[%s19788_s1 + $0xc78] sm:$0xff]  ;;  %v12630_v48 = vcombine.low %v582_v28, %v586_v62 }
 0x3b0   :  { %11344 = vmatprep.subr.bf16.mxu1 %v12559_v55  ;;  %v561_v55 = vld [vmem:[%s19788_s1 + $0xb70] sm:$0xff] }
 0x3b1   :  { %v12604_v17 = vcombine.low %v557_v52, %v561_v55 }
 0x3b2   :  { %10812 = vmatpush1.bf16.msra.mxu0 %v12556_v41  ;;  %v12605_v41 = vcombine.high %v557_v52, %v561_v55  ;;  %v598_v52 = vld [vmem:[%s19788_s1 + $0xc98] sm:$0xff] }
 0x3b3   :  { %11345 = vmatpush1.bf16.msra.mxu1 %v12558_v33  ;;  %10813 = vmatprep.subr.bf16.mxu0 %v12565_v56  ;;  %v12607_v33 = vcombine.high %v558_v57, %v562_v58  ;;  %v565_v56 = vld [vmem:[%s19788_s1 + $0xb90] sm:$0xff]  ;;  %v602_v55 = vld [vmem:[%s19788_s1 + $0xcb8] sm:$0xff]  ;;  %v12638_v58 = vcombine.low %v590_v9, %v594_v47 }
 0x3b4   :  { %11346 = vmatprep.subr.bf16.mxu1 %v12567_v5  ;;  %v569_v5 = vld [vmem:[%s19788_s1 + $0xbb0] sm:$0xff] }
 0x3b5   :  { %v12612_v4 = vcombine.low %v565_v56, %v569_v5 }
 0x3b6   :  { %10814 = vmatpush1.bf16.msra.mxu0 %v12564_v50  ;;  %v12613_v50 = vcombine.high %v565_v56, %v569_v5  ;;  %v610_v56 = vld [vmem:[%s19788_s1 + $0xcf8] sm:$0xff] }
 0x3b7   :  { %11347 = vmatpush1.bf16.msra.mxu1 %v12566_v59  ;;  %10815 = vmatprep.subr.bf16.mxu0 %v12573_v16  ;;  %v12615_v59 = vcombine.high %v566_v6, %v570_v7  ;;  %v573_v16 = vld [vmem:[%s19788_s1 + $0xbd0] sm:$0xff]  ;;  %v12646_v6 = vcombine.low %v598_v52, %v602_v55 }
 0x3b8   :  { %11348 = vmatprep.subr.bf16.mxu1 %v12575_v20  ;;  %v577_v20 = vld [vmem:[%s19788_s1 + $0xbf0] sm:$0xff] }
 0x3b9   :  { %v12620_v36 = vcombine.low %v573_v16, %v577_v20 }
 0x3ba   :  { %10816 = vmatpush1.bf16.msra.mxu0 %v12572_v12  ;;  %v12621_v12 = vcombine.high %v573_v16, %v577_v20 }
 0x3bb   :  { %11349 = vmatpush1.bf16.msra.mxu1 %v12574_v3  ;;  %10817 = vmatprep.subr.bf16.mxu0 %v12581_v34  ;;  %v12623_v3 = vcombine.high %v574_v21, %v578_v22  ;;  %v581_v34 = vld [vmem:[%s19788_s1 + $0xc10] sm:$0xff] }
 0x3bc   :  { %11350 = vmatprep.subr.bf16.mxu1 %v12583_v35  ;;  %v585_v35 = vld [vmem:[%s19788_s1 + $0xc30] sm:$0xff] }
 0x3bd   :  { %v12628_v53 = vcombine.low %v581_v34, %v585_v35 }
 0x3be   :  { %10818 = vmatpush1.bf16.msra.mxu0 %v12580_v42  ;;  %v12629_v42 = vcombine.high %v581_v34, %v585_v35 }
 0x3bf   :  { %11351 = vmatpush1.bf16.msra.mxu1 %v12582_v43  ;;  %10819 = vmatprep.subr.bf16.mxu0 %v12589_v45  ;;  %v12631_v43 = vcombine.high %v582_v28, %v586_v62  ;;  %v589_v45 = vld [vmem:[%s19788_s1 + $0xc50] sm:$0xff] }
 0x3c0   :  { %11352 = vmatprep.subr.bf16.mxu1 %v12591_v46  ;;  %v593_v46 = vld [vmem:[%s19788_s1 + $0xc70] sm:$0xff] }
 0x3c1   :  { %v12636_v57 = vcombine.low %v589_v45, %v593_v46 }
 0x3c2   :  { %10820 = vmatpush1.bf16.msra.mxu0 %v12588_v51  ;;  %v12637_v51 = vcombine.high %v589_v45, %v593_v46 }
 0x3c3   :  { %11353 = vmatpush1.bf16.msra.mxu1 %v12590_v49  ;;  %10821 = vmatprep.subr.bf16.mxu0 %v12597_v25  ;;  %v12639_v49 = vcombine.high %v590_v9, %v594_v47  ;;  %v597_v25 = vld [vmem:[%s19788_s1 + $0xc90] sm:$0xff] }
 0x3c4   :  { %11354 = vmatprep.subr.bf16.mxu1 %v12599_v23  ;;  %v601_v23 = vld [vmem:[%s19788_s1 + $0xcb0] sm:$0xff] }
 0x3c5   :  { %v12644_v5 = vcombine.low %v597_v25, %v601_v23 }
 0x3c6   :  { %10822 = vmatpush1.bf16.msra.mxu0 %v12596_v19  ;;  %v12645_v19 = vcombine.high %v597_v25, %v601_v23  ;;  %v638_v23 = vld [vmem:[%s19788_s1 + $0xdd8] sm:$0xff] }
 0x3c7   :  { %11355 = vmatpush1.bf16.msra.mxu1 %v12598_v60  ;;  %10823 = vmatprep.subr.bf16.mxu0 %v12605_v41  ;;  %v12647_v60 = vcombine.high %v598_v52, %v602_v55  ;;  %v605_v41 = vld [vmem:[%s19788_s1 + $0xcd0] sm:$0xff]  ;;  %v642_v52 = vld [vmem:[%s19788_s1 + $0xdf8] sm:$0xff] }
 0x3c8   :  { %11356 = vmatprep.subr.bf16.mxu1 %v12607_v33  ;;  %v609_v33 = vld [vmem:[%s19788_s1 + $0xcf0] sm:$0xff] }
 0x3c9   :  { %v12653_v7 = vcombine.high %v605_v41, %v609_v33  ;;  %v12652_v16 = vcombine.low %v605_v41, %v609_v33 }
 0x3ca   :  { %10824 = vmatpush1.bf16.msra.mxu0 %v12604_v17 }
 0x3cb   :  { %11357 = vmatpush1.bf16.msra.mxu1 %v12606_v13  ;;  %10825 = vmatprep.subr.bf16.mxu0 %v12613_v50  ;;  %v613_v13 = vld [vmem:[%s19788_s1 + $0xd10] sm:$0xff] }
 0x3cc   :  { %11358 = vmatprep.subr.bf16.mxu1 %v12615_v59  ;;  %v617_v50 = vld [vmem:[%s19788_s1 + $0xd30] sm:$0xff]  ;;  %v618_v59 = vld [vmem:[%s19788_s1 + $0xd38] sm:$0xff] }
 0x3cd   :  { %v12661_v21 = vcombine.high %v613_v13, %v617_v50  ;;  %v12660_v34 = vcombine.low %v613_v13, %v617_v50  ;;  %v12686_v50 = vcombine.low %v638_v23, %v642_v52 }
 0x3ce   :  { %10826 = vmatpush1.bf16.msra.mxu0 %v12612_v4  ;;  %v621_v4 = vld [vmem:[%s19788_s1 + $0xd50] sm:$0xff] }
 0x3cf   :  { %11359 = vmatpush1.bf16.msra.mxu1 %v12614_v24  ;;  %10827 = vmatprep.subr.bf16.mxu0 %v12621_v12  ;;  %v625_v24 = vld [vmem:[%s19788_s1 + $0xd70] sm:$0xff]  ;;  %v622_v12 = vld [vmem:[%s19788_s1 + $0xd58] sm:$0xff] }
 0x3d0   :  { %11360 = vmatprep.subr.bf16.mxu1 %v12623_v3  ;;  %v626_v3 = vld [vmem:[%s19788_s1 + $0xd78] sm:$0xff]  ;;  %v12669_v28 = vcombine.high %v621_v4, %v625_v24  ;;  %v12668_v45 = vcombine.low %v621_v4, %v625_v24 }
 0x3d1   :  { %v12671_v62 = vcombine.high %v622_v12, %v626_v3  ;;  %v12670_v46 = vcombine.low %v622_v12, %v626_v3 }
 0x3d2   :  { %10828 = vmatpush1.bf16.msra.mxu0 %v12620_v36  ;;  %v629_v36 = vld [vmem:[%s19788_s1 + $0xd90] sm:$0xff] }
 0x3d3   :  { %11361 = vmatpush1.bf16.msra.mxu1 %v12622_v37  ;;  %10838 = vmatprep.subr.bf16.mxu0 %v12629_v42  ;;  %v633_v37 = vld [vmem:[%s19788_s1 + $0xdb0] sm:$0xff]  ;;  %v630_v42 = vld [vmem:[%s19788_s1 + $0xd98] sm:$0xff] }
 0x3d4   :  { %11371 = vmatprep.subr.bf16.mxu1 %v12631_v43  ;;  %v634_v43 = vld [vmem:[%s19788_s1 + $0xdb8] sm:$0xff]  ;;  %v12677_v9 = vcombine.high %v629_v36, %v633_v37 }
 0x3d5   :  { %10830 = vmatmul.mubr.bf16.vlgmr.msra.gmra.mrb[4].mxu0 %v15012_v2  ;;  %v12678_v41 = vcombine.low %v630_v42, %v634_v43 }
 0x3d6   :  { %10839 = vmatpush1.bf16.msra.mxu0 %v12628_v53  ;;  %11363 = vmatmul.mubr.bf16.vlgmr.msra.gmra.mrb[4].mxu1 %v15012_v2  ;;  %v606_v2 = vld [vmem:[%s19788_s1 + $0xcd8] sm:$0xff]  ;;  %v12679_v53 = vcombine.high %v630_v42, %v634_v43 }
 0x3d7   :  { %11372 = vmatpush1.bf16.msra.mxu1 %v12630_v48  ;;  %10840 = vmatprep.subr.bf16.mxu0 %v12637_v51  ;;  %v12655_v17 = vcombine.high %v606_v2, %v610_v56  ;;  %v12654_v20 = vcombine.low %v606_v2, %v610_v56  ;;  %v637_v48 = vld [vmem:[%s19788_s1 + $0xdd0] sm:$0xff]  ;;  %v12687_v56 = vcombine.high %v638_v23, %v642_v52 }
 0x3d8   :  { %11373 = vmatprep.subr.bf16.mxu1 %v12639_v49  ;;  %10870 = vmatprep.mubr.bf16.mxu0 %v15026_v11  ;;  %v641_v51 = vld [vmem:[%s19788_s1 + $0xdf0] sm:$0xff] }
 0x3d9   :  { %11403 = vmatprep.mubr.bf16.mxu1 %v15026_v11  ;;  %v614_v11 = vld [vmem:[%s19788_s1 + $0xd18] sm:$0xff]  ;;  %v12685_v33 = vcombine.high %v637_v48, %v641_v51  ;;  %v12684_v13 = vcombine.low %v637_v48, %v641_v51 }
 0x3da   :  { %10841 = vmatpush1.bf16.msra.mxu0 %v12636_v57  ;;  %v12663_v22 = vcombine.high %v614_v11, %v618_v59  ;;  %v12662_v35 = vcombine.low %v614_v11, %v618_v59 }
 0x3db   :  { %11374 = vmatpush1.bf16.msra.mxu1 %v12638_v58  ;;  %10842 = vmatprep.subr.bf16.mxu0 %v12645_v19  ;;  %v12676_v58 = vcombine.low %v629_v36, %v633_v37 }
 0x3dc   :  { %11375 = vmatprep.subr.bf16.mxu1 %v12647_v60 }
 0x3de   :  { %10843 = vmatpush1.bf16.msra.mxu0 %v12644_v5  ;;  %v645_v5 = vld [vmem:[%s19788_s1 + $0xe10] sm:$0xff] }
 0x3df   :  { %11376 = vmatpush1.bf16.msra.mxu1 %v12646_v6  ;;  %10844 = vmatprep.subr.bf16.mxu0 %v12653_v7  ;;  %v649_v6 = vld [vmem:[%s19788_s1 + $0xe30] sm:$0xff]  ;;  %v646_v7 = vld [vmem:[%s19788_s1 + $0xe18] sm:$0xff] }
 0x3e0   :  { %11377 = vmatprep.subr.bf16.mxu1 %v12655_v17  ;;  %v650_v17 = vld [vmem:[%s19788_s1 + $0xe38] sm:$0xff]  ;;  %v12693_v11 = vcombine.high %v645_v5, %v649_v6  ;;  %v12692_v4 = vcombine.low %v645_v5, %v649_v6  ;;  %v685_v5 = vld [vmem:[%s19788_s1 + $0xf50] sm:$0xff] }
 0x3e1   :  { %v12695_v59 = vcombine.high %v646_v7, %v650_v17  ;;  %v12694_v24 = vcombine.low %v646_v7, %v650_v17  ;;  %v689_v6 = vld [vmem:[%s19788_s1 + $0xf70] sm:$0xff]  ;;  %v686_v7 = vld [vmem:[%s19788_s1 + $0xf58] sm:$0xff] }
 0x3e2   :  { %10845 = vmatpush1.bf16.msra.mxu0 %v12652_v16  ;;  %v653_v16 = vld [vmem:[%s19788_s1 + $0xe50] sm:$0xff]  ;;  %v690_v17 = vld [vmem:[%s19788_s1 + $0xf78] sm:$0xff] }
 0x3e3   :  { %11378 = vmatpush1.bf16.msra.mxu1 %v12654_v20  ;;  %10846 = vmatprep.subr.bf16.mxu0 %v12661_v21  ;;  %v657_v20 = vld [vmem:[%s19788_s1 + $0xe70] sm:$0xff]  ;;  %v654_v21 = vld [vmem:[%s19788_s1 + $0xe58] sm:$0xff] }
 0x3e4   :  { %11379 = vmatprep.subr.bf16.mxu1 %v12663_v22  ;;  %v658_v22 = vld [vmem:[%s19788_s1 + $0xe78] sm:$0xff]  ;;  %v12701_v12 = vcombine.high %v653_v16, %v657_v20  ;;  %v12700_v36 = vcombine.low %v653_v16, %v657_v20  ;;  %v693_v16 = vld [vmem:[%s19788_s1 + $0xf90] sm:$0xff] }
 0x3e5   :  { %v12703_v3 = vcombine.high %v654_v21, %v658_v22  ;;  %v12702_v37 = vcombine.low %v654_v21, %v658_v22  ;;  %v697_v20 = vld [vmem:[%s19788_s1 + $0xfb0] sm:$0xff]  ;;  %v694_v21 = vld [vmem:[%s19788_s1 + $0xf98] sm:$0xff] }
 0x3e6   :  { %10847 = vmatpush1.bf16.msra.mxu0 %v12660_v34  ;;  %v661_v34 = vld [vmem:[%s19788_s1 + $0xe90] sm:$0xff]  ;;  %v698_v22 = vld [vmem:[%s19788_s1 + $0xfb8] sm:$0xff] }
 0x3e7   :  { %11380 = vmatpush1.bf16.msra.mxu1 %v12662_v35  ;;  %10848 = vmatprep.subr.bf16.mxu0 %v12669_v28  ;;  %v665_v35 = vld [vmem:[%s19788_s1 + $0xeb0] sm:$0xff]  ;;  %v662_v28 = vld [vmem:[%s19788_s1 + $0xe98] sm:$0xff] }
 0x3e8   :  { %v17623_v47 = vpop.f32.mrb[0].mxu0  ;;  %11381 = vmatprep.subr.bf16.mxu1 %v12671_v62  ;;  %v666_v62 = vld [vmem:[%s19788_s1 + $0xeb8] sm:$0xff]  ;;  %v12709_v42 = vcombine.high %v661_v34, %v665_v35  ;;  %v12708_v48 = vcombine.low %v661_v34, %v665_v35  ;;  %v701_v34 = vld [vmem:[%s19788_s1 + $0xfd0] sm:$0xff] }
 0x3e9   :  { %v17631_v49 = vpop.f32.mrb[0].mxu1  ;;  %v17633_v25 = vpop.f32.mrb[1].mxu0  ;;  %v12711_v43 = vcombine.high %v662_v28, %v666_v62  ;;  %v12710_v51 = vcombine.low %v662_v28, %v666_v62  ;;  %v705_v35 = vld [vmem:[%s19788_s1 + $0xff0] sm:$0xff]  ;;  %v702_v28 = vld [vmem:[%s19788_s1 + $0xfd8] sm:$0xff] }
 0x3ea   :  { %v17641_v55 = vpop.f32.mrb[1].mxu1  ;;  %v10179_v57 = vpop.f32.mrb[2].mxu0  ;;  %10849 = vmatpush1.bf16.msra.mxu0 %v12668_v45  ;;  %v669_v45 = vld [vmem:[%s19788_s1 + $0xed0] sm:$0xff]  ;;  %v706_v62 = vld [vmem:[%s19788_s1 + $0xff8] sm:$0xff] }
 0x3eb   :  { %v10712_v19 = vpop.f32.mrb[2].mxu1  ;;  %11382 = vmatpush1.bf16.msra.mxu1 %v12670_v46  ;;  %v10180_v60 = vpop.f32.mrb[3].mxu0  ;;  %10850 = vmatprep.subr.bf16.mxu0 %v12677_v9  ;;  %v673_v46 = vld [vmem:[%s19788_s1 + $0xef0] sm:$0xff]  ;;  %v670_v9 = vld [vmem:[%s19788_s1 + $0xed8] sm:$0xff] }
 0x3ec   :  { %v10713_v2 = vpop.f32.mrb[3].mxu1  ;;  %11383 = vmatprep.subr.bf16.mxu1 %v12679_v53  ;;  %v674_v53 = vld [vmem:[%s19788_s1 + $0xef8] sm:$0xff]  ;;  %v12717_v23 = vcombine.high %v669_v45, %v673_v46  ;;  %v677_v57 = vld [vmem:[%s19788_s1 + $0xf10] sm:$0xff] }
 0x3ed   :  { %v12719_v52 = vcombine.high %v670_v9, %v674_v53  ;;  %v678_v19 = vld [vmem:[%s19788_s1 + $0xf18] sm:$0xff] }
 0x3ee   :  { %10851 = vmatpush1.bf16.msra.mxu0 %v12676_v58  ;;  %v681_v58 = vld [vmem:[%s19788_s1 + $0xf30] sm:$0xff]  ;;  %v682_v60 = vld [vmem:[%s19788_s1 + $0xf38] sm:$0xff] }
 0x3ef   :  { %11384 = vmatpush1.bf16.msra.mxu1 %v12678_v41  ;;  %10852 = vmatprep.subr.bf16.mxu0 %v12685_v33  ;;  %v12716_v41 = vcombine.low %v669_v45, %v673_v46  ;;  %v12718_v33 = vcombine.low %v670_v9, %v674_v53  ;;  %v12725_v2 = vcombine.high %v677_v57, %v681_v58  ;;  %v709_v45 = vld [vmem:[%s19788_s1 + $0x1010] sm:$0xff]  ;;  %v710_v9 = vld [vmem:[%s19788_s1 + $0x1018] sm:$0xff] }
 0x3f0   :  { %11385 = vmatprep.subr.bf16.mxu1 %v12687_v56  ;;  %v12727_v56 = vcombine.high %v678_v19, %v682_v60  ;;  %v713_v46 = vld [vmem:[%s19788_s1 + $0x1030] sm:$0xff]  ;;  %v714_v53 = vld [vmem:[%s19788_s1 + $0x1038] sm:$0xff] }
 0x3f2   :  { %10853 = vmatpush1.bf16.msra.mxu0 %v12684_v13  ;;  %v12724_v13 = vcombine.low %v677_v57, %v681_v58  ;;  %v717_v57 = vld [vmem:[%s19788_s1 + $0x1050] sm:$0xff] }
 0x3f3   :  { %11386 = vmatpush1.bf16.msra.mxu1 %v12686_v50  ;;  %10854 = vmatprep.subr.bf16.mxu0 %v12693_v11  ;;  %v12726_v50 = vcombine.low %v678_v19, %v682_v60  ;;  %v12733_v11 = vcombine.high %v685_v5, %v689_v6  ;;  %v721_v58 = vld [vmem:[%s19788_s1 + $0x1070] sm:$0xff]  ;;  %v718_v19 = vld [vmem:[%s19788_s1 + $0x1058] sm:$0xff] }
 0x3f4   :  { %11387 = vmatprep.subr.bf16.mxu1 %v12695_v59  ;;  %v12735_v59 = vcombine.high %v686_v7, %v690_v17  ;;  %v722_v60 = vld [vmem:[%s19788_s1 + $0x1078] sm:$0xff] }
 0x3f6   :  { %10855 = vmatpush1.bf16.msra.mxu0 %v12692_v4  ;;  %v12732_v4 = vcombine.low %v685_v5, %v689_v6  ;;  %v725_v5 = vld [vmem:[%s19788_s1 + $0x1090] sm:$0xff] }
 0x3f7   :  { %11388 = vmatpush1.bf16.msra.mxu1 %v12694_v24  ;;  %10856 = vmatprep.subr.bf16.mxu0 %v12701_v12  ;;  %v12734_v24 = vcombine.low %v686_v7, %v690_v17  ;;  %v12741_v12 = vcombine.high %v693_v16, %v697_v20  ;;  %v729_v6 = vld [vmem:[%s19788_s1 + $0x10b0] sm:$0xff]  ;;  %v726_v7 = vld [vmem:[%s19788_s1 + $0x1098] sm:$0xff] }
 0x3f8   :  { %11389 = vmatprep.subr.bf16.mxu1 %v12703_v3  ;;  %v12743_v3 = vcombine.high %v694_v21, %v698_v22  ;;  %v730_v17 = vld [vmem:[%s19788_s1 + $0x10b8] sm:$0xff] }
 0x3fa   :  { %10857 = vmatpush1.bf16.msra.mxu0 %v12700_v36  ;;  %v12740_v36 = vcombine.low %v693_v16, %v697_v20  ;;  %v733_v16 = vld [vmem:[%s19788_s1 + $0x10d0] sm:$0xff] }
 0x3fb   :  { %11390 = vmatpush1.bf16.msra.mxu1 %v12702_v37  ;;  %10858 = vmatprep.subr.bf16.mxu0 %v12709_v42  ;;  %v12742_v37 = vcombine.low %v694_v21, %v698_v22  ;;  %v12749_v42 = vcombine.high %v701_v34, %v705_v35  ;;  %v737_v20 = vld [vmem:[%s19788_s1 + $0x10f0] sm:$0xff]  ;;  %v738_v21 = vld [vmem:[%s19788_s1 + $0x10f8] sm:$0xff]  ;;  %v12772_v22 = vcombine.low %v725_v5, %v729_v6 }
 0x3fc   :  { %11391 = vmatprep.subr.bf16.mxu1 %v12711_v43  ;;  %v12751_v43 = vcombine.high %v702_v28, %v706_v62 }
 0x3fe   :  { %10859 = vmatpush1.bf16.msra.mxu0 %v12708_v48  ;;  %v12748_v48 = vcombine.low %v701_v34, %v705_v35  ;;  %v745_v34 = vld [vmem:[%s19788_s1 + $0x1130] sm:$0xff]  ;;  %v746_v35 = vld [vmem:[%s19788_s1 + $0x1138] sm:$0xff] }
 0x3ff   :  { %11392 = vmatpush1.bf16.msra.mxu1 %v12710_v51  ;;  %10860 = vmatprep.subr.bf16.mxu0 %v12717_v23  ;;  %v12750_v51 = vcombine.low %v702_v28, %v706_v62  ;;  %v12757_v23 = vcombine.high %v709_v45, %v713_v46  ;;  %v12780_v28 = vcombine.low %v733_v16, %v737_v20 }
 0x400   :  { %11393 = vmatprep.subr.bf16.mxu1 %v12719_v52  ;;  %v12759_v52 = vcombine.high %v710_v9, %v714_v53 }
 0x402   :  { %10861 = vmatpush1.bf16.msra.mxu0 %v12716_v41  ;;  %v12756_v41 = vcombine.low %v709_v45, %v713_v46  ;;  %v750_v45 = vld [vmem:[%s19788_s1 + $0x1158] sm:$0xff] }
 0x403   :  { %11394 = vmatpush1.bf16.msra.mxu1 %v12718_v33  ;;  %10862 = vmatprep.subr.bf16.mxu0 %v12725_v2  ;;  %v12758_v33 = vcombine.low %v710_v9, %v714_v53  ;;  %v12765_v2 = vcombine.high %v717_v57, %v721_v58  ;;  %v754_v46 = vld [vmem:[%s19788_s1 + $0x1178] sm:$0xff] }
 0x404   :  { %11395 = vmatprep.subr.bf16.mxu1 %v12727_v56  ;;  %v12767_v56 = vcombine.high %v718_v19, %v722_v60 }
 0x406   :  { %10863 = vmatpush1.bf16.msra.mxu0 %v12724_v13  ;;  %v12764_v13 = vcombine.low %v717_v57, %v721_v58  ;;  %v758_v57 = vld [vmem:[%s19788_s1 + $0x1198] sm:$0xff] }
 0x407   :  { %11396 = vmatpush1.bf16.msra.mxu1 %v12726_v50  ;;  %10864 = vmatprep.subr.bf16.mxu0 %v12733_v11  ;;  %v12766_v50 = vcombine.low %v718_v19, %v722_v60  ;;  %v12773_v11 = vcombine.high %v725_v5, %v729_v6  ;;  %v762_v58 = vld [vmem:[%s19788_s1 + $0x11b8] sm:$0xff]  ;;  %v12798_v60 = vcombine.low %v750_v45, %v754_v46 }
 0x408   :  { %11397 = vmatprep.subr.bf16.mxu1 %v12735_v59  ;;  %v12775_v59 = vcombine.high %v726_v7, %v730_v17  ;;  %v766_v5 = vld [vmem:[%s19788_s1 + $0x11d8] sm:$0xff] }
 0x409   :  { %v770_v6 = vld [vmem:[%s19788_s1 + $0x11f8] sm:$0xff] }
 0x40a   :  { %10865 = vmatpush1.bf16.msra.mxu0 %v12732_v4  ;;  %v12774_v4 = vcombine.low %v726_v7, %v730_v17  ;;  %v12806_v17 = vcombine.low %v758_v57, %v762_v58 }
 0x40b   :  { %11398 = vmatpush1.bf16.msra.mxu1 %v12734_v24  ;;  %10866 = vmatprep.subr.bf16.mxu0 %v12741_v12  ;;  %v12781_v24 = vcombine.high %v733_v16, %v737_v20  ;;  %v774_v16 = vld [vmem:[%s19788_s1 + $0x1218] sm:$0xff] }
 0x40c   :  { %11399 = vmatprep.subr.bf16.mxu1 %v12743_v3  ;;  %v741_v3 = vld [vmem:[%s19788_s1 + $0x1110] sm:$0xff]  ;;  %v778_v20 = vld [vmem:[%s19788_s1 + $0x1238] sm:$0xff] }
 0x40d   :  { %v12788_v9 = vcombine.low %v741_v3, %v745_v34 }
 0x40e   :  { %10867 = vmatpush1.bf16.msra.mxu0 %v12740_v36  ;;  %v12789_v36 = vcombine.high %v741_v3, %v745_v34  ;;  %v782_v3 = vld [vmem:[%s19788_s1 + $0x1258] sm:$0xff] }
 0x40f   :  { %11400 = vmatpush1.bf16.msra.mxu1 %v12742_v37  ;;  %10868 = vmatprep.subr.bf16.mxu0 %v12749_v42  ;;  %v749_v42 = vld [vmem:[%s19788_s1 + $0x1150] sm:$0xff]  ;;  %v786_v34 = vld [vmem:[%s19788_s1 + $0x1278] sm:$0xff] }
 0x410   :  { %11401 = vmatprep.subr.bf16.mxu1 %v12751_v43  ;;  %v753_v43 = vld [vmem:[%s19788_s1 + $0x1170] sm:$0xff] }
 0x411   :  { %v12796_v19 = vcombine.low %v749_v42, %v753_v43 }
 0x412   :  { %10869 = vmatpush1.bf16.msra.mxu0 %v12748_v48  ;;  %v12797_v48 = vcombine.high %v749_v42, %v753_v43  ;;  %v790_v42 = vld [vmem:[%s19788_s1 + $0x1298] sm:$0xff] }
 0x413   :  { %11402 = vmatpush1.bf16.msra.mxu1 %v12750_v51  ;;  %10879 = vmatprep.subr.bf16.mxu0 %v12757_v23  ;;  %v12799_v51 = vcombine.high %v750_v45, %v754_v46  ;;  %v757_v23 = vld [vmem:[%s19788_s1 + $0x1190] sm:$0xff]  ;;  %v794_v43 = vld [vmem:[%s19788_s1 + $0x12b8] sm:$0xff]  ;;  %v12830_v46 = vcombine.low %v782_v3, %v786_v34 }
 0x414   :  { %11412 = vmatprep.subr.bf16.mxu1 %v12759_v52  ;;  %v761_v52 = vld [vmem:[%s19788_s1 + $0x11b0] sm:$0xff] }
 0x415   :  { %10871 = vmatmul.mubr.bf16.vlgmr.msra.gmra.mrb[4].mxu0 %v15225_v29  ;;  %v12804_v7 = vcombine.low %v757_v23, %v761_v52 }
 0x416   :  { %10880 = vmatpush1.bf16.msra.mxu0 %v12756_v41  ;;  %11404 = vmatmul.mubr.bf16.vlgmr.msra.gmra.mrb[4].mxu1 %v15225_v29  ;;  %v734_v29 = vld [vmem:[%s19788_s1 + $0x10d8] sm:$0xff]  ;;  %v12805_v41 = vcombine.high %v757_v23, %v761_v52 }
 0x417   :  { %11413 = vmatpush1.bf16.msra.mxu1 %v12758_v33  ;;  %10881 = vmatprep.subr.bf16.mxu0 %v12765_v2  ;;  %v12783_v12 = vcombine.high %v734_v29, %v738_v21  ;;  %v12782_v62 = vcombine.low %v734_v29, %v738_v21  ;;  %v12807_v33 = vcombine.high %v758_v57, %v762_v58  ;;  %v765_v2 = vld [vmem:[%s19788_s1 + $0x11d0] sm:$0xff]  ;;  %v798_v23 = vld [vmem:[%s19788_s1 + $0x12d8] sm:$0xff] }
 0x418   :  { %11414 = vmatprep.subr.bf16.mxu1 %v12767_v56  ;;  %10911 = vmatprep.mubr.bf16.mxu0 %v15239_v38  ;;  %v769_v56 = vld [vmem:[%s19788_s1 + $0x11f0] sm:$0xff]  ;;  %v12814_v21 = vcombine.low %v766_v5, %v770_v6  ;;  %v802_v52 = vld [vmem:[%s19788_s1 + $0x12f8] sm:$0xff]  ;;  %v12838_v58 = vcombine.low %v790_v42, %v794_v43 }
 0x419   :  { %11444 = vmatprep.mubr.bf16.mxu1 %v15239_v38  ;;  %v742_v38 = vld [vmem:[%s19788_s1 + $0x1118] sm:$0xff]  ;;  %v12812_v29 = vcombine.low %v765_v2, %v769_v56 }
 0x41a   :  { %10882 = vmatpush1.bf16.msra.mxu0 %v12764_v13  ;;  %v12791_v37 = vcombine.high %v742_v38, %v746_v35  ;;  %v12790_v53 = vcombine.low %v742_v38, %v746_v35  ;;  %v12813_v13 = vcombine.high %v765_v2, %v769_v56  ;;  %v12822_v35 = vcombine.low %v774_v16, %v778_v20  ;;  %v806_v2 = vld [vmem:[%s19788_s1 + $0x1318] sm:$0xff] }
 0x41b   :  { %11415 = vmatpush1.bf16.msra.mxu1 %v12766_v50  ;;  %10883 = vmatprep.subr.bf16.mxu0 %v12773_v11  ;;  %v12815_v50 = vcombine.high %v766_v5, %v770_v6  ;;  %v773_v11 = vld [vmem:[%s19788_s1 + $0x1210] sm:$0xff]  ;;  %v810_v56 = vld [vmem:[%s19788_s1 + $0x1338] sm:$0xff]  ;;  %v12846_v6 = vcombine.low %v798_v23, %v802_v52 }
 0x41c   :  { %11416 = vmatprep.subr.bf16.mxu1 %v12775_v59  ;;  %v777_v59 = vld [vmem:[%s19788_s1 + $0x1230] sm:$0xff] }
 0x41d   :  { %v12820_v38 = vcombine.low %v773_v11, %v777_v59 }
 0x41e   :  { %10884 = vmatpush1.bf16.msra.mxu0 %v12772_v22  ;;  %v12821_v22 = vcombine.high %v773_v11, %v777_v59  ;;  %v814_v11 = vld [vmem:[%s19788_s1 + $0x1358] sm:$0xff] }
 0x41f   :  { %11417 = vmatpush1.bf16.msra.mxu1 %v12774_v4  ;;  %10885 = vmatprep.subr.bf16.mxu0 %v12781_v24  ;;  %v12823_v4 = vcombine.high %v774_v16, %v778_v20  ;;  %v781_v24 = vld [vmem:[%s19788_s1 + $0x1250] sm:$0xff]  ;;  %v818_v59 = vld [vmem:[%s19788_s1 + $0x1378] sm:$0xff]  ;;  %v12854_v20 = vcombine.low %v806_v2, %v810_v56 }
 0x420   :  { %11418 = vmatprep.subr.bf16.mxu1 %v12783_v12  ;;  %v785_v12 = vld [vmem:[%s19788_s1 + $0x1270] sm:$0xff] }
 0x421   :  { %v12828_v45 = vcombine.low %v781_v24, %v785_v12 }
 0x422   :  { %10886 = vmatpush1.bf16.msra.mxu0 %v12780_v28  ;;  %v12829_v28 = vcombine.high %v781_v24, %v785_v12  ;;  %v822_v24 = vld [vmem:[%s19788_s1 + $0x1398] sm:$0xff] }
 0x423   :  { %11419 = vmatpush1.bf16.msra.mxu1 %v12782_v62  ;;  %10887 = vmatprep.subr.bf16.mxu0 %v12789_v36  ;;  %v12831_v62 = vcombine.high %v782_v3, %v786_v34  ;;  %v789_v36 = vld [vmem:[%s19788_s1 + $0x1290] sm:$0xff]  ;;  %v826_v12 = vld [vmem:[%s19788_s1 + $0x13b8] sm:$0xff]  ;;  %v12862_v34 = vcombine.low %v814_v11, %v818_v59 }
 0x424   :  { %11420 = vmatprep.subr.bf16.mxu1 %v12791_v37  ;;  %v793_v37 = vld [vmem:[%s19788_s1 + $0x12b0] sm:$0xff] }
 0x425   :  { %v12836_v57 = vcombine.low %v789_v36, %v793_v37 }
 0x426   :  { %10888 = vmatpush1.bf16.msra.mxu0 %v12788_v9  ;;  %v12837_v9 = vcombine.high %v789_v36, %v793_v37  ;;  %v830_v36 = vld [vmem:[%s19788_s1 + $0x13d8] sm:$0xff] }
 0x427   :  { %11421 = vmatpush1.bf16.msra.mxu1 %v12790_v53  ;;  %10889 = vmatprep.subr.bf16.mxu0 %v12797_v48  ;;  %v12839_v53 = vcombine.high %v790_v42, %v794_v43  ;;  %v797_v48 = vld [vmem:[%s19788_s1 + $0x12d0] sm:$0xff]  ;;  %v834_v37 = vld [vmem:[%s19788_s1 + $0x13f8] sm:$0xff]  ;;  %v12870_v43 = vcombine.low %v822_v24, %v826_v12 }
 0x428   :  { %11422 = vmatprep.subr.bf16.mxu1 %v12799_v51  ;;  %v801_v51 = vld [vmem:[%s19788_s1 + $0x12f0] sm:$0xff] }
 0x429   :  { %v12844_v5 = vcombine.low %v797_v48, %v801_v51 }
 0x42a   :  { %10890 = vmatpush1.bf16.msra.mxu0 %v12796_v19  ;;  %v12845_v19 = vcombine.high %v797_v48, %v801_v51  ;;  %v838_v48 = vld [vmem:[%s19788_s1 + $0x1418] sm:$0xff] }
 0x42b   :  { %11423 = vmatpush1.bf16.msra.mxu1 %v12798_v60  ;;  %10891 = vmatprep.subr.bf16.mxu0 %v12805_v41  ;;  %v12847_v60 = vcombine.high %v798_v23, %v802_v52  ;;  %v805_v41 = vld [vmem:[%s19788_s1 + $0x1310] sm:$0xff]  ;;  %v842_v51 = vld [vmem:[%s19788_s1 + $0x1438] sm:$0xff]  ;;  %v12878_v52 = vcombine.low %v830_v36, %v834_v37 }
 0x42c   :  { %11424 = vmatprep.subr.bf16.mxu1 %v12807_v33  ;;  %v809_v33 = vld [vmem:[%s19788_s1 + $0x1330] sm:$0xff] }
 0x42d   :  { %v12852_v16 = vcombine.low %v805_v41, %v809_v33 }
 0x42e   :  { %10892 = vmatpush1.bf16.msra.mxu0 %v12804_v7  ;;  %v12853_v7 = vcombine.high %v805_v41, %v809_v33  ;;  %v846_v41 = vld [vmem:[%s19788_s1 + $0x1458] sm:$0xff] }
 0x42f   :  { %11425 = vmatpush1.bf16.msra.mxu1 %v12806_v17  ;;  %10893 = vmatprep.subr.bf16.mxu0 %v12813_v13  ;;  %v12855_v17 = vcombine.high %v806_v2, %v810_v56  ;;  %v813_v13 = vld [vmem:[%s19788_s1 + $0x1350] sm:$0xff]  ;;  %v850_v33 = vld [vmem:[%s19788_s1 + $0x1478] sm:$0xff]  ;;  %v12886_v56 = vcombine.low %v838_v48, %v842_v51 }
 0x430   :  { %11426 = vmatprep.subr.bf16.mxu1 %v12815_v50  ;;  %v817_v50 = vld [vmem:[%s19788_s1 + $0x1370] sm:$0xff] }
 0x431   :  { %v12860_v3 = vcombine.low %v813_v13, %v817_v50 }
 0x432   :  { %10894 = vmatpush1.bf16.msra.mxu0 %v12812_v29  ;;  %v12861_v29 = vcombine.high %v813_v13, %v817_v50  ;;  %v854_v13 = vld [vmem:[%s19788_s1 + $0x1498] sm:$0xff] }
 0x433   :  { %11427 = vmatpush1.bf16.msra.mxu1 %v12814_v21  ;;  %10895 = vmatprep.subr.bf16.mxu0 %v12821_v22  ;;  %v12863_v21 = vcombine.high %v814_v11, %v818_v59  ;;  %v821_v22 = vld [vmem:[%s19788_s1 + $0x1390] sm:$0xff]  ;;  %v858_v50 = vld [vmem:[%s19788_s1 + $0x14b8] sm:$0xff]  ;;  %v12894_v59 = vcombine.low %v846_v41, %v850_v33 }
 0x434   :  { %11428 = vmatprep.subr.bf16.mxu1 %v12823_v4  ;;  %v825_v4 = vld [vmem:[%s19788_s1 + $0x13b0] sm:$0xff] }
 0x435   :  { %v12868_v42 = vcombine.low %v821_v22, %v825_v4 }
 0x436   :  { %10896 = vmatpush1.bf16.msra.mxu0 %v12820_v38  ;;  %v12869_v38 = vcombine.high %v821_v22, %v825_v4  ;;  %v866_v22 = vld [vmem:[%s19788_s1 + $0x14f8] sm:$0xff] }
 0x437   :  { %11429 = vmatpush1.bf16.msra.mxu1 %v12822_v35  ;;  %10897 = vmatprep.subr.bf16.mxu0 %v12829_v28  ;;  %v12871_v35 = vcombine.high %v822_v24, %v826_v12  ;;  %v829_v28 = vld [vmem:[%s19788_s1 + $0x13d0] sm:$0xff]  ;;  %v12902_v24 = vcombine.low %v854_v13, %v858_v50 }
 0x438   :  { %11430 = vmatprep.subr.bf16.mxu1 %v12831_v62  ;;  %v833_v62 = vld [vmem:[%s19788_s1 + $0x13f0] sm:$0xff] }
 0x439   :  { %v12876_v23 = vcombine.low %v829_v28, %v833_v62 }
 0x43a   :  { %10898 = vmatpush1.bf16.msra.mxu0 %v12828_v45  ;;  %v12877_v45 = vcombine.high %v829_v28, %v833_v62 }
 0x43b   :  { %11431 = vmatpush1.bf16.msra.mxu1 %v12830_v46  ;;  %10899 = vmatprep.subr.bf16.mxu0 %v12837_v9  ;;  %v12879_v46 = vcombine.high %v830_v36, %v834_v37  ;;  %v837_v9 = vld [vmem:[%s19788_s1 + $0x1410] sm:$0xff] }
 0x43c   :  { %11432 = vmatprep.subr.bf16.mxu1 %v12839_v53  ;;  %v841_v53 = vld [vmem:[%s19788_s1 + $0x1430] sm:$0xff] }
 0x43d   :  { %v12884_v2 = vcombine.low %v837_v9, %v841_v53 }
 0x43e   :  { %10900 = vmatpush1.bf16.msra.mxu0 %v12836_v57  ;;  %v12885_v57 = vcombine.high %v837_v9, %v841_v53 }
 0x43f   :  { %11433 = vmatpush1.bf16.msra.mxu1 %v12838_v58  ;;  %10901 = vmatprep.subr.bf16.mxu0 %v12845_v19  ;;  %v12887_v58 = vcombine.high %v838_v48, %v842_v51  ;;  %v845_v19 = vld [vmem:[%s19788_s1 + $0x1450] sm:$0xff] }
 0x440   :  { %11434 = vmatprep.subr.bf16.mxu1 %v12847_v60  ;;  %v849_v60 = vld [vmem:[%s19788_s1 + $0x1470] sm:$0xff] }
 0x441   :  { %v12892_v11 = vcombine.low %v845_v19, %v849_v60 }
 0x442   :  { %10902 = vmatpush1.bf16.msra.mxu0 %v12844_v5  ;;  %v12893_v5 = vcombine.high %v845_v19, %v849_v60 }
 0x443   :  { %11435 = vmatpush1.bf16.msra.mxu1 %v12846_v6  ;;  %10903 = vmatprep.subr.bf16.mxu0 %v12853_v7  ;;  %v12895_v6 = vcombine.high %v846_v41, %v850_v33  ;;  %v853_v7 = vld [vmem:[%s19788_s1 + $0x1490] sm:$0xff] }
 0x444   :  { %11436 = vmatprep.subr.bf16.mxu1 %v12855_v17  ;;  %v857_v17 = vld [vmem:[%s19788_s1 + $0x14b0] sm:$0xff] }
 0x445   :  { %v12900_v4 = vcombine.low %v853_v7, %v857_v17 }
 0x446   :  { %10904 = vmatpush1.bf16.msra.mxu0 %v12852_v16  ;;  %v12901_v16 = vcombine.high %v853_v7, %v857_v17 }
 0x447   :  { %11437 = vmatpush1.bf16.msra.mxu1 %v12854_v20  ;;  %10905 = vmatprep.subr.bf16.mxu0 %v12861_v29  ;;  %v12903_v20 = vcombine.high %v854_v13, %v858_v50  ;;  %v861_v29 = vld [vmem:[%s19788_s1 + $0x14d0] sm:$0xff] }
 0x448   :  { %11438 = vmatprep.subr.bf16.mxu1 %v12863_v21  ;;  %v865_v21 = vld [vmem:[%s19788_s1 + $0x14f0] sm:$0xff] }
 0x449   :  { %v12909_v12 = vcombine.high %v861_v29, %v865_v21  ;;  %v12908_v28 = vcombine.low %v861_v29, %v865_v21 }
 0x44a   :  { %10906 = vmatpush1.bf16.msra.mxu0 %v12860_v3 }
 0x44b   :  { %11439 = vmatpush1.bf16.msra.mxu1 %v12862_v34  ;;  %10907 = vmatprep.subr.bf16.mxu0 %v12869_v38  ;;  %v869_v34 = vld [vmem:[%s19788_s1 + $0x1510] sm:$0xff] }
 0x44c   :  { %11440 = vmatprep.subr.bf16.mxu1 %v12871_v35  ;;  %v873_v38 = vld [vmem:[%s19788_s1 + $0x1530] sm:$0xff]  ;;  %v874_v35 = vld [vmem:[%s19788_s1 + $0x1538] sm:$0xff] }
 0x44d   :  { %v12917_v36 = vcombine.high %v869_v34, %v873_v38  ;;  %v12916_v9 = vcombine.low %v869_v34, %v873_v38 }
 0x44e   :  { %10908 = vmatpush1.bf16.msra.mxu0 %v12868_v42  ;;  %v877_v42 = vld [vmem:[%s19788_s1 + $0x1550] sm:$0xff] }
 0x44f   :  { %11441 = vmatpush1.bf16.msra.mxu1 %v12870_v43  ;;  %10909 = vmatprep.subr.bf16.mxu0 %v12877_v45  ;;  %v881_v43 = vld [vmem:[%s19788_s1 + $0x1570] sm:$0xff]  ;;  %v878_v45 = vld [vmem:[%s19788_s1 + $0x1558] sm:$0xff] }
 0x450   :  { %11442 = vmatprep.subr.bf16.mxu1 %v12879_v46  ;;  %v882_v46 = vld [vmem:[%s19788_s1 + $0x1578] sm:$0xff]  ;;  %v12925_v48 = vcombine.high %v877_v42, %v881_v43  ;;  %v12924_v19 = vcombine.low %v877_v42, %v881_v43 }
 0x451   :  { %v12927_v51 = vcombine.high %v878_v45, %v882_v46  ;;  %v12926_v60 = vcombine.low %v878_v45, %v882_v46 }
 0x452   :  { %10910 = vmatpush1.bf16.msra.mxu0 %v12876_v23  ;;  %v885_v23 = vld [vmem:[%s19788_s1 + $0x1590] sm:$0xff] }
 0x453   :  { %11443 = vmatpush1.bf16.msra.mxu1 %v12878_v52  ;;  %10920 = vmatprep.subr.bf16.mxu0 %v12885_v57  ;;  %v889_v52 = vld [vmem:[%s19788_s1 + $0x15b0] sm:$0xff]  ;;  %v886_v57 = vld [vmem:[%s19788_s1 + $0x1598] sm:$0xff] }
 0x454   :  { %11453 = vmatprep.subr.bf16.mxu1 %v12887_v58  ;;  %v890_v58 = vld [vmem:[%s19788_s1 + $0x15b8] sm:$0xff]  ;;  %v12933_v41 = vcombine.high %v885_v23, %v889_v52  ;;  %v12932_v7 = vcombine.low %v885_v23, %v889_v52 }
 0x455   :  { %10912 = vmatmul.mubr.bf16.vlgmr.msra.gmra.mrb[4].mxu0 %v15434_v0  ;;  %v12935_v33 = vcombine.high %v886_v57, %v890_v58  ;;  %v12934_v17 = vcombine.low %v886_v57, %v890_v58 }
 0x456   :  { %10921 = vmatpush1.bf16.msra.mxu0 %v12884_v2  ;;  %11445 = vmatmul.mubr.bf16.vlgmr.msra.gmra.mrb[4].mxu1 %v15434_v0  ;;  %v862_v0 = vld [vmem:[%s19788_s1 + $0x14d8] sm:$0xff]  ;;  %v893_v2 = vld [vmem:[%s19788_s1 + $0x15d0] sm:$0xff] }
 0x457   :  { %11454 = vmatpush1.bf16.msra.mxu1 %v12886_v56  ;;  %10922 = vmatprep.subr.bf16.mxu0 %v12893_v5  ;;  %v12911_v3 = vcombine.high %v862_v0, %v866_v22  ;;  %v12910_v62 = vcombine.low %v862_v0, %v866_v22  ;;  %v897_v56 = vld [vmem:[%s19788_s1 + $0x15f0] sm:$0xff]  ;;  %v894_v5 = vld [vmem:[%s19788_s1 + $0x15d8] sm:$0xff] }
 0x458   :  { %11455 = vmatprep.subr.bf16.mxu1 %v12895_v6  ;;  %10952 = vmatprep.mubr.bf16.mxu0 %v15448_v10  ;;  %v898_v6 = vld [vmem:[%s19788_s1 + $0x15f8] sm:$0xff]  ;;  %v12941_v13 = vcombine.high %v893_v2, %v897_v56  ;;  %v12940_v29 = vcombine.low %v893_v2, %v897_v56 }
 0x459   :  { %11485 = vmatprep.mubr.bf16.mxu1 %v15448_v10  ;;  %v870_v10 = vld [vmem:[%s19788_s1 + $0x1518] sm:$0xff]  ;;  %v12943_v50 = vcombine.high %v894_v5, %v898_v6  ;;  %v12942_v21 = vcombine.low %v894_v5, %v898_v6 }
 0x45a   :  { %10923 = vmatpush1.bf16.msra.mxu0 %v12892_v11  ;;  %v12919_v37 = vcombine.high %v870_v10, %v874_v35  ;;  %v12918_v53 = vcombine.low %v870_v10, %v874_v35  ;;  %v901_v11 = vld [vmem:[%s19788_s1 + $0x1610] sm:$0xff] }
 0x45b   :  { %11456 = vmatpush1.bf16.msra.mxu1 %v12894_v59  ;;  %10924 = vmatprep.subr.bf16.mxu0 %v12901_v16  ;;  %v905_v59 = vld [vmem:[%s19788_s1 + $0x1630] sm:$0xff]  ;;  %v902_v16 = vld [vmem:[%s19788_s1 + $0x1618] sm:$0xff] }
 0x45c   :  { %11457 = vmatprep.subr.bf16.mxu1 %v12903_v20  ;;  %v906_v20 = vld [vmem:[%s19788_s1 + $0x1638] sm:$0xff]  ;;  %v12949_v0 = vcombine.high %v901_v11, %v905_v59  ;;  %v12948_v34 = vcombine.low %v901_v11, %v905_v59 }
 0x45d   :  { %v12951_v22 = vcombine.high %v902_v16, %v906_v20  ;;  %v12950_v38 = vcombine.low %v902_v16, %v906_v20 }
 0x45e   :  { %10925 = vmatpush1.bf16.msra.mxu0 %v12900_v4  ;;  %v909_v4 = vld [vmem:[%s19788_s1 + $0x1650] sm:$0xff] }
 0x45f   :  { %11458 = vmatpush1.bf16.msra.mxu1 %v12902_v24  ;;  %10926 = vmatprep.subr.bf16.mxu0 %v12909_v12  ;;  %v913_v24 = vld [vmem:[%s19788_s1 + $0x1670] sm:$0xff]  ;;  %v910_v12 = vld [vmem:[%s19788_s1 + $0x1658] sm:$0xff] }
 0x460   :  { %11459 = vmatprep.subr.bf16.mxu1 %v12911_v3  ;;  %v914_v3 = vld [vmem:[%s19788_s1 + $0x1678] sm:$0xff]  ;;  %v12957_v10 = vcombine.high %v909_v4, %v913_v24  ;;  %v12956_v42 = vcombine.low %v909_v4, %v913_v24 }
 0x461   :  { %v12959_v35 = vcombine.high %v910_v12, %v914_v3  ;;  %v12958_v43 = vcombine.low %v910_v12, %v914_v3 }
 0x462   :  { %10927 = vmatpush1.bf16.msra.mxu0 %v12908_v28  ;;  %v917_v28 = vld [vmem:[%s19788_s1 + $0x1690] sm:$0xff] }
 0x463   :  { %11460 = vmatpush1.bf16.msra.mxu1 %v12910_v62  ;;  %10928 = vmatprep.subr.bf16.mxu0 %v12917_v36  ;;  %v921_v62 = vld [vmem:[%s19788_s1 + $0x16b0] sm:$0xff]  ;;  %v918_v36 = vld [vmem:[%s19788_s1 + $0x1698] sm:$0xff] }
 0x464   :  { %11461 = vmatprep.subr.bf16.mxu1 %v12919_v37  ;;  %v922_v37 = vld [vmem:[%s19788_s1 + $0x16b8] sm:$0xff]  ;;  %v12965_v45 = vcombine.high %v917_v28, %v921_v62  ;;  %v12964_v23 = vcombine.low %v917_v28, %v921_v62 }
 0x465   :  { %v12967_v46 = vcombine.high %v918_v36, %v922_v37  ;;  %v12966_v52 = vcombine.low %v918_v36, %v922_v37 }
 0x466   :  { %10929 = vmatpush1.bf16.msra.mxu0 %v12916_v9  ;;  %v925_v9 = vld [vmem:[%s19788_s1 + $0x16d0] sm:$0xff] }
 0x467   :  { %11462 = vmatpush1.bf16.msra.mxu1 %v12918_v53  ;;  %10930 = vmatprep.subr.bf16.mxu0 %v12925_v48  ;;  %v929_v53 = vld [vmem:[%s19788_s1 + $0x16f0] sm:$0xff]  ;;  %v926_v48 = vld [vmem:[%s19788_s1 + $0x16d8] sm:$0xff] }
 0x468   :  { %11463 = vmatprep.subr.bf16.mxu1 %v12927_v51  ;;  %v930_v51 = vld [vmem:[%s19788_s1 + $0x16f8] sm:$0xff]  ;;  %v12973_v57 = vcombine.high %v925_v9, %v929_v53  ;;  %v12972_v2 = vcombine.low %v925_v9, %v929_v53 }
 0x469   :  { %v12975_v58 = vcombine.high %v926_v48, %v930_v51  ;;  %v12974_v56 = vcombine.low %v926_v48, %v930_v51 }
 0x46a   :  { %10931 = vmatpush1.bf16.msra.mxu0 %v12924_v19  ;;  %v933_v19 = vld [vmem:[%s19788_s1 + $0x1710] sm:$0xff] }
 0x46b   :  { %11464 = vmatpush1.bf16.msra.mxu1 %v12926_v60  ;;  %10932 = vmatprep.subr.bf16.mxu0 %v12933_v41  ;;  %v937_v60 = vld [vmem:[%s19788_s1 + $0x1730] sm:$0xff]  ;;  %v934_v41 = vld [vmem:[%s19788_s1 + $0x1718] sm:$0xff] }
 0x46c   :  { %11465 = vmatprep.subr.bf16.mxu1 %v12935_v33  ;;  %v938_v33 = vld [vmem:[%s19788_s1 + $0x1738] sm:$0xff]  ;;  %v12981_v5 = vcombine.high %v933_v19, %v937_v60  ;;  %v12980_v11 = vcombine.low %v933_v19, %v937_v60 }
 0x46d   :  { %v12983_v6 = vcombine.high %v934_v41, %v938_v33  ;;  %v12982_v59 = vcombine.low %v934_v41, %v938_v33 }
 0x46e   :  { %10933 = vmatpush1.bf16.msra.mxu0 %v12932_v7  ;;  %v941_v7 = vld [vmem:[%s19788_s1 + $0x1750] sm:$0xff] }
 0x46f   :  { %11466 = vmatpush1.bf16.msra.mxu1 %v12934_v17  ;;  %10934 = vmatprep.subr.bf16.mxu0 %v12941_v13  ;;  %v945_v17 = vld [vmem:[%s19788_s1 + $0x1770] sm:$0xff]  ;;  %v942_v13 = vld [vmem:[%s19788_s1 + $0x1758] sm:$0xff] }
 0x470   :  { %11467 = vmatprep.subr.bf16.mxu1 %v12943_v50  ;;  %v946_v50 = vld [vmem:[%s19788_s1 + $0x1778] sm:$0xff]  ;;  %v12989_v16 = vcombine.high %v941_v7, %v945_v17  ;;  %v12988_v4 = vcombine.low %v941_v7, %v945_v17 }
 0x471   :  { %v12991_v20 = vcombine.high %v942_v13, %v946_v50  ;;  %v12990_v24 = vcombine.low %v942_v13, %v946_v50 }
 0x472   :  { %10935 = vmatpush1.bf16.msra.mxu0 %v12940_v29  ;;  %v949_v29 = vld [vmem:[%s19788_s1 + $0x1790] sm:$0xff] }
 0x473   :  { %11468 = vmatpush1.bf16.msra.mxu1 %v12942_v21  ;;  %10936 = vmatprep.subr.bf16.mxu0 %v12949_v0  ;;  %v953_v21 = vld [vmem:[%s19788_s1 + $0x17b0] sm:$0xff]  ;;  %v950_v0 = vld [vmem:[%s19788_s1 + $0x1798] sm:$0xff] }
 0x474   :  { %11469 = vmatprep.subr.bf16.mxu1 %v12951_v22  ;;  %v954_v22 = vld [vmem:[%s19788_s1 + $0x17b8] sm:$0xff]  ;;  %v12997_v12 = vcombine.high %v949_v29, %v953_v21  ;;  %v12996_v28 = vcombine.low %v949_v29, %v953_v21 }
 0x475   :  { %v12999_v3 = vcombine.high %v950_v0, %v954_v22  ;;  %v12998_v62 = vcombine.low %v950_v0, %v954_v22  ;;  %v997_v22 = vld [vmem:[%s19788_s1 + $0x1910] sm:$0xff] }
 0x476   :  { %10937 = vmatpush1.bf16.msra.mxu0 %v12948_v34  ;;  %v957_v34 = vld [vmem:[%s19788_s1 + $0x17d0] sm:$0xff] }
 0x477   :  { %11470 = vmatpush1.bf16.msra.mxu1 %v12950_v38  ;;  %10938 = vmatprep.subr.bf16.mxu0 %v12957_v10  ;;  %v961_v38 = vld [vmem:[%s19788_s1 + $0x17f0] sm:$0xff]  ;;  %v958_v10 = vld [vmem:[%s19788_s1 + $0x17d8] sm:$0xff] }
 0x478   :  { %11471 = vmatprep.subr.bf16.mxu1 %v12959_v35  ;;  %v962_v35 = vld [vmem:[%s19788_s1 + $0x17f8] sm:$0xff]  ;;  %v13005_v36 = vcombine.high %v957_v34, %v961_v38  ;;  %v13004_v9 = vcombine.low %v957_v34, %v961_v38 }
 0x479   :  { %v13007_v37 = vcombine.high %v958_v10, %v962_v35  ;;  %v13006_v53 = vcombine.low %v958_v10, %v962_v35  ;;  %v1005_v10 = vld [vmem:[%s19788_s1 + $0x1950] sm:$0xff] }
 0x47a   :  { %10939 = vmatpush1.bf16.msra.mxu0 %v12956_v42  ;;  %v965_v42 = vld [vmem:[%s19788_s1 + $0x1810] sm:$0xff] }
 0x47b   :  { %11472 = vmatpush1.bf16.msra.mxu1 %v12958_v43  ;;  %10940 = vmatprep.subr.bf16.mxu0 %v12965_v45  ;;  %v969_v43 = vld [vmem:[%s19788_s1 + $0x1830] sm:$0xff]  ;;  %v966_v45 = vld [vmem:[%s19788_s1 + $0x1818] sm:$0xff] }
 0x47c   :  { %11473 = vmatprep.subr.bf16.mxu1 %v12967_v46  ;;  %v970_v46 = vld [vmem:[%s19788_s1 + $0x1838] sm:$0xff]  ;;  %v13013_v48 = vcombine.high %v965_v42, %v969_v43  ;;  %v13012_v19 = vcombine.low %v965_v42, %v969_v43  ;;  %v1009_v35 = vld [vmem:[%s19788_s1 + $0x1970] sm:$0xff] }
 0x47d   :  { %v13015_v51 = vcombine.high %v966_v45, %v970_v46  ;;  %v13014_v60 = vcombine.low %v966_v45, %v970_v46  ;;  %v13053_v42 = vcombine.high %v1005_v10, %v1009_v35  ;;  %v1013_v45 = vld [vmem:[%s19788_s1 + $0x1990] sm:$0xff] }
 0x47e   :  { %10941 = vmatpush1.bf16.msra.mxu0 %v12964_v23  ;;  %v973_v23 = vld [vmem:[%s19788_s1 + $0x1850] sm:$0xff] }
 0x47f   :  { %11474 = vmatpush1.bf16.msra.mxu1 %v12966_v52  ;;  %10942 = vmatprep.subr.bf16.mxu0 %v12973_v57  ;;  %v977_v52 = vld [vmem:[%s19788_s1 + $0x1870] sm:$0xff]  ;;  %v974_v57 = vld [vmem:[%s19788_s1 + $0x1858] sm:$0xff] }
 0x480   :  { %11475 = vmatprep.subr.bf16.mxu1 %v12975_v58  ;;  %v978_v58 = vld [vmem:[%s19788_s1 + $0x1878] sm:$0xff]  ;;  %v13021_v41 = vcombine.high %v973_v23, %v977_v52  ;;  %v13020_v7 = vcombine.low %v973_v23, %v977_v52  ;;  %v1017_v46 = vld [vmem:[%s19788_s1 + $0x19b0] sm:$0xff] }
 0x481   :  { %v13023_v33 = vcombine.high %v974_v57, %v978_v58  ;;  %v13022_v17 = vcombine.low %v974_v57, %v978_v58  ;;  %v13061_v23 = vcombine.high %v1013_v45, %v1017_v46  ;;  %v1021_v57 = vld [vmem:[%s19788_s1 + $0x19d0] sm:$0xff] }
 0x482   :  { %10943 = vmatpush1.bf16.msra.mxu0 %v12972_v2  ;;  %v981_v2 = vld [vmem:[%s19788_s1 + $0x1890] sm:$0xff] }
 0x483   :  { %11476 = vmatpush1.bf16.msra.mxu1 %v12974_v56  ;;  %10944 = vmatprep.subr.bf16.mxu0 %v12981_v5  ;;  %v985_v56 = vld [vmem:[%s19788_s1 + $0x18b0] sm:$0xff]  ;;  %v982_v5 = vld [vmem:[%s19788_s1 + $0x1898] sm:$0xff] }
 0x484   :  { %11477 = vmatprep.subr.bf16.mxu1 %v12983_v6  ;;  %v986_v6 = vld [vmem:[%s19788_s1 + $0x18b8] sm:$0xff]  ;;  %v13029_v13 = vcombine.high %v981_v2, %v985_v56  ;;  %v1025_v58 = vld [vmem:[%s19788_s1 + $0x19f0] sm:$0xff] }
 0x485   :  { %v13031_v50 = vcombine.high %v982_v5, %v986_v6  ;;  %v13030_v29 = vcombine.low %v982_v5, %v986_v6  ;;  %v1029_v5 = vld [vmem:[%s19788_s1 + $0x1a10] sm:$0xff] }
 0x486   :  { %10945 = vmatpush1.bf16.msra.mxu0 %v12980_v11  ;;  %v989_v11 = vld [vmem:[%s19788_s1 + $0x18d0] sm:$0xff] }
 0x487   :  { %11478 = vmatpush1.bf16.msra.mxu1 %v12982_v59  ;;  %10946 = vmatprep.subr.bf16.mxu0 %v12989_v16  ;;  %v993_v59 = vld [vmem:[%s19788_s1 + $0x18f0] sm:$0xff]  ;;  %v994_v16 = vld [vmem:[%s19788_s1 + $0x18f8] sm:$0xff] }
 0x488   :  { %11479 = vmatprep.subr.bf16.mxu1 %v12991_v20  ;;  %v13028_v20 = vcombine.low %v981_v2, %v985_v56  ;;  %v13037_v21 = vcombine.high %v989_v11, %v993_v59  ;;  %v13069_v2 = vcombine.high %v1021_v57, %v1025_v58  ;;  %v1033_v6 = vld [vmem:[%s19788_s1 + $0x1a30] sm:$0xff] }
 0x48a   :  { %10947 = vmatpush1.bf16.msra.mxu0 %v12988_v4  ;;  %v1001_v4 = vld [vmem:[%s19788_s1 + $0x1930] sm:$0xff] }
 0x48b   :  { %11480 = vmatpush1.bf16.msra.mxu1 %v12990_v24  ;;  %10948 = vmatprep.subr.bf16.mxu0 %v12997_v12  ;;  %v1002_v24 = vld [vmem:[%s19788_s1 + $0x1938] sm:$0xff]  ;;  %v13036_v12 = vcombine.low %v989_v11, %v993_v59  ;;  %v13045_v34 = vcombine.high %v997_v22, %v1001_v4  ;;  %v13077_v11 = vcombine.high %v1029_v5, %v1033_v6 }
 0x48c   :  { %11481 = vmatprep.subr.bf16.mxu1 %v12999_v3 }
 0x48e   :  { %10949 = vmatpush1.bf16.msra.mxu0 %v12996_v28  ;;  %v1006_v28 = vld [vmem:[%s19788_s1 + $0x1958] sm:$0xff] }
 0x48f   :  { %11482 = vmatpush1.bf16.msra.mxu1 %v12998_v62  ;;  %10950 = vmatprep.subr.bf16.mxu0 %v13005_v36  ;;  %v1010_v62 = vld [vmem:[%s19788_s1 + $0x1978] sm:$0xff]  ;;  %v13044_v36 = vcombine.low %v997_v22, %v1001_v4 }
 0x490   :  { %11483 = vmatprep.subr.bf16.mxu1 %v13007_v37  ;;  %v13055_v43 = vcombine.high %v1006_v28, %v1010_v62 }
 0x492   :  { %10951 = vmatpush1.bf16.msra.mxu0 %v13004_v9  ;;  %v1014_v9 = vld [vmem:[%s19788_s1 + $0x1998] sm:$0xff] }
 0x493   :  { %11484 = vmatpush1.bf16.msra.mxu1 %v13006_v53  ;;  %10961 = vmatprep.subr.bf16.mxu0 %v13013_v48  ;;  %v1018_v53 = vld [vmem:[%s19788_s1 + $0x19b8] sm:$0xff]  ;;  %v13052_v48 = vcombine.low %v1005_v10, %v1009_v35 }
 0x494   :  { %11494 = vmatprep.subr.bf16.mxu1 %v13015_v51  ;;  %v13054_v51 = vcombine.low %v1006_v28, %v1010_v62  ;;  %v13063_v52 = vcombine.high %v1014_v9, %v1018_v53  ;;  %v1053_v28 = vld [vmem:[%s19788_s1 + $0x1ad0] sm:$0xff] }
 0x495   :  { %10953 = vmatmul.mubr.bf16.vlgmr.msra.gmra.mrb[4].mxu0 %v15647_v40  ;;  %v1057_v62 = vld [vmem:[%s19788_s1 + $0x1af0] sm:$0xff] }
 0x496   :  { %10962 = vmatpush1.bf16.msra.mxu0 %v13012_v19  ;;  %11486 = vmatmul.mubr.bf16.vlgmr.msra.gmra.mrb[4].mxu1 %v15647_v40  ;;  %v990_v40 = vld [vmem:[%s19788_s1 + $0x18d8] sm:$0xff] }
 0x497   :  { %11495 = vmatpush1.bf16.msra.mxu1 %v13014_v60  ;;  %10963 = vmatprep.subr.bf16.mxu0 %v13021_v41  ;;  %v13039_v0 = vcombine.high %v990_v40, %v994_v16  ;;  %v13038_v3 = vcombine.low %v990_v40, %v994_v16  ;;  %v1022_v19 = vld [vmem:[%s19788_s1 + $0x19d8] sm:$0xff]  ;;  %v13060_v41 = vcombine.low %v1013_v45, %v1017_v46  ;;  %v1037_v40 = vld [vmem:[%s19788_s1 + $0x1a50] sm:$0xff] }
 0x498   :  { %11496 = vmatprep.subr.bf16.mxu1 %v13023_v33  ;;  %10993 = vmatprep.mubr.bf16.mxu0 %v15661_v31  ;;  %v1026_v60 = vld [vmem:[%s19788_s1 + $0x19f8] sm:$0xff]  ;;  %v13062_v33 = vcombine.low %v1014_v9, %v1018_v53  ;;  %v1041_v16 = vld [vmem:[%s19788_s1 + $0x1a70] sm:$0xff]  ;;  %v13101_v45 = vcombine.high %v1053_v28, %v1057_v62 }
 0x499   :  { %11526 = vmatprep.mubr.bf16.mxu1 %v15661_v31  ;;  %v998_v31 = vld [vmem:[%s19788_s1 + $0x1918] sm:$0xff]  ;;  %v13071_v56 = vcombine.high %v1022_v19, %v1026_v60  ;;  %v13085_v22 = vcombine.high %v1037_v40, %v1041_v16  ;;  %v1061_v9 = vld [vmem:[%s19788_s1 + $0x1b10] sm:$0xff] }
 0x49a   :  { %10964 = vmatpush1.bf16.msra.mxu0 %v13020_v7  ;;  %v13047_v38 = vcombine.high %v998_v31, %v1002_v24  ;;  %v13046_v37 = vcombine.low %v998_v31, %v1002_v24  ;;  %v1030_v7 = vld [vmem:[%s19788_s1 + $0x1a18] sm:$0xff]  ;;  %v1045_v31 = vld [vmem:[%s19788_s1 + $0x1a90] sm:$0xff] }
 0x49b   :  { %11497 = vmatpush1.bf16.msra.mxu1 %v13022_v17  ;;  %10965 = vmatprep.subr.bf16.mxu0 %v13029_v13  ;;  %v1034_v17 = vld [vmem:[%s19788_s1 + $0x1a38] sm:$0xff]  ;;  %v13068_v13 = vcombine.low %v1021_v57, %v1025_v58  ;;  %v1049_v24 = vld [vmem:[%s19788_s1 + $0x1ab0] sm:$0xff] }
 0x49c   :  { %11498 = vmatprep.subr.bf16.mxu1 %v13031_v50  ;;  %v13070_v50 = vcombine.low %v1022_v19, %v1026_v60  ;;  %v13079_v59 = vcombine.high %v1030_v7, %v1034_v17  ;;  %v13093_v10 = vcombine.high %v1045_v31, %v1049_v24  ;;  %v1065_v53 = vld [vmem:[%s19788_s1 + $0x1b30] sm:$0xff] }
 0x49d   :  { %v13109_v57 = vcombine.high %v1061_v9, %v1065_v53  ;;  %v1069_v19 = vld [vmem:[%s19788_s1 + $0x1b50] sm:$0xff] }
 0x49e   :  { %10966 = vmatpush1.bf16.msra.mxu0 %v13028_v20  ;;  %v1038_v20 = vld [vmem:[%s19788_s1 + $0x1a58] sm:$0xff]  ;;  %v1073_v60 = vld [vmem:[%s19788_s1 + $0x1b70] sm:$0xff] }
 0x49f   :  { %11499 = vmatpush1.bf16.msra.mxu1 %v13030_v29  ;;  %10967 = vmatprep.subr.bf16.mxu0 %v13037_v21  ;;  %v1042_v29 = vld [vmem:[%s19788_s1 + $0x1a78] sm:$0xff]  ;;  %v13076_v21 = vcombine.low %v1029_v5, %v1033_v6  ;;  %v13117_v5 = vcombine.high %v1069_v19, %v1073_v60 }
 0x4a0   :  { %11500 = vmatprep.subr.bf16.mxu1 %v13039_v0  ;;  %v13078_v0 = vcombine.low %v1030_v7, %v1034_v17  ;;  %v13087_v4 = vcombine.high %v1038_v20, %v1042_v29  ;;  %v1077_v7 = vld [vmem:[%s19788_s1 + $0x1b90] sm:$0xff] }
 0x4a1   :  { %v1081_v17 = vld [vmem:[%s19788_s1 + $0x1bb0] sm:$0xff] }
 0x4a2   :  { %10968 = vmatpush1.bf16.msra.mxu0 %v13036_v12  ;;  %v1046_v12 = vld [vmem:[%s19788_s1 + $0x1a98] sm:$0xff] }
 0x4a3   :  { %11501 = vmatpush1.bf16.msra.mxu1 %v13038_v3  ;;  %10969 = vmatprep.subr.bf16.mxu0 %v13045_v34  ;;  %v1050_v3 = vld [vmem:[%s19788_s1 + $0x1ab8] sm:$0xff]  ;;  %v13084_v34 = vcombine.low %v1037_v40, %v1041_v16  ;;  %v13125_v40 = vcombine.high %v1077_v7, %v1081_v17 }
 0x4a4   :  { %11502 = vmatprep.subr.bf16.mxu1 %v13047_v38  ;;  %v13086_v38 = vcombine.low %v1038_v20, %v1042_v29  ;;  %v13095_v35 = vcombine.high %v1046_v12, %v1050_v3  ;;  %v1085_v20 = vld [vmem:[%s19788_s1 + $0x1bd0] sm:$0xff] }
 0x4a5   :  { %v1089_v29 = vld [vmem:[%s19788_s1 + $0x1bf0] sm:$0xff] }
 0x4a6   :  { %10970 = vmatpush1.bf16.msra.mxu0 %v13044_v36  ;;  %v1054_v36 = vld [vmem:[%s19788_s1 + $0x1ad8] sm:$0xff] }
 0x4a7   :  { %11503 = vmatpush1.bf16.msra.mxu1 %v13046_v37  ;;  %10971 = vmatprep.subr.bf16.mxu0 %v13053_v42  ;;  %v1058_v37 = vld [vmem:[%s19788_s1 + $0x1af8] sm:$0xff]  ;;  %v13092_v42 = vcombine.low %v1045_v31, %v1049_v24  ;;  %v13133_v31 = vcombine.high %v1085_v20, %v1089_v29 }
 0x4a8   :  { %11504 = vmatprep.subr.bf16.mxu1 %v13055_v43  ;;  %v13094_v43 = vcombine.low %v1046_v12, %v1050_v3  ;;  %v13103_v46 = vcombine.high %v1054_v36, %v1058_v37  ;;  %v1093_v12 = vld [vmem:[%s19788_s1 + $0x1c10] sm:$0xff] }
 0x4a9   :  { %v1097_v3 = vld [vmem:[%s19788_s1 + $0x1c30] sm:$0xff] }
 0x4aa   :  { %10972 = vmatpush1.bf16.msra.mxu0 %v13052_v48  ;;  %v1062_v48 = vld [vmem:[%s19788_s1 + $0x1b18] sm:$0xff] }
 0x4ab   :  { %11505 = vmatpush1.bf16.msra.mxu1 %v13054_v51  ;;  %10973 = vmatprep.subr.bf16.mxu0 %v13061_v23  ;;  %v1066_v51 = vld [vmem:[%s19788_s1 + $0x1b38] sm:$0xff]  ;;  %v13100_v23 = vcombine.low %v1053_v28, %v1057_v62  ;;  %v13141_v28 = vcombine.high %v1093_v12, %v1097_v3 }
 0x4ac   :  { %11506 = vmatprep.subr.bf16.mxu1 %v13063_v52  ;;  %v13102_v52 = vcombine.low %v1054_v36, %v1058_v37  ;;  %v13111_v58 = vcombine.high %v1062_v48, %v1066_v51  ;;  %v1101_v36 = vld [vmem:[%s19788_s1 + $0x1c50] sm:$0xff] }
 0x4ad   :  { %v1105_v37 = vld [vmem:[%s19788_s1 + $0x1c70] sm:$0xff] }
 0x4ae   :  { %10974 = vmatpush1.bf16.msra.mxu0 %v13060_v41  ;;  %v1070_v41 = vld [vmem:[%s19788_s1 + $0x1b58] sm:$0xff] }
 0x4af   :  { %11507 = vmatpush1.bf16.msra.mxu1 %v13062_v33  ;;  %10975 = vmatprep.subr.bf16.mxu0 %v13069_v2  ;;  %v1074_v33 = vld [vmem:[%s19788_s1 + $0x1b78] sm:$0xff]  ;;  %v13108_v2 = vcombine.low %v1061_v9, %v1065_v53  ;;  %v13149_v9 = vcombine.high %v1101_v36, %v1105_v37 }
 0x4b0   :  { %11508 = vmatprep.subr.bf16.mxu1 %v13071_v56  ;;  %v13110_v56 = vcombine.low %v1062_v48, %v1066_v51  ;;  %v13119_v6 = vcombine.high %v1070_v41, %v1074_v33  ;;  %v1109_v48 = vld [vmem:[%s19788_s1 + $0x1c90] sm:$0xff] }
 0x4b1   :  { %v1113_v51 = vld [vmem:[%s19788_s1 + $0x1cb0] sm:$0xff] }
 0x4b2   :  { %10976 = vmatpush1.bf16.msra.mxu0 %v13068_v13  ;;  %v1078_v13 = vld [vmem:[%s19788_s1 + $0x1b98] sm:$0xff] }
 0x4b3   :  { %11509 = vmatpush1.bf16.msra.mxu1 %v13070_v50  ;;  %10977 = vmatprep.subr.bf16.mxu0 %v13077_v11  ;;  %v1082_v50 = vld [vmem:[%s19788_s1 + $0x1bb8] sm:$0xff]  ;;  %v13116_v11 = vcombine.low %v1069_v19, %v1073_v60  ;;  %v13157_v19 = vcombine.high %v1109_v48, %v1113_v51 }
 0x4b4   :  { %11510 = vmatprep.subr.bf16.mxu1 %v13079_v59  ;;  %v13118_v59 = vcombine.low %v1070_v41, %v1074_v33  ;;  %v13127_v16 = vcombine.high %v1078_v13, %v1082_v50  ;;  %v1117_v41 = vld [vmem:[%s19788_s1 + $0x1cd0] sm:$0xff] }
 0x4b5   :  { %v1121_v33 = vld [vmem:[%s19788_s1 + $0x1cf0] sm:$0xff] }
 0x4b6   :  { %10978 = vmatpush1.bf16.msra.mxu0 %v13076_v21  ;;  %v1086_v21 = vld [vmem:[%s19788_s1 + $0x1bd8] sm:$0xff] }
 0x4b7   :  { %11511 = vmatpush1.bf16.msra.mxu1 %v13078_v0  ;;  %10979 = vmatprep.subr.bf16.mxu0 %v13085_v22  ;;  %v1090_v0 = vld [vmem:[%s19788_s1 + $0x1bf8] sm:$0xff]  ;;  %v13124_v22 = vcombine.low %v1077_v7, %v1081_v17  ;;  %v1125_v17 = vld [vmem:[%s19788_s1 + $0x1d10] sm:$0xff] }
 0x4b8   :  { %11512 = vmatprep.subr.bf16.mxu1 %v13087_v4  ;;  %v13126_v4 = vcombine.low %v1078_v13, %v1082_v50  ;;  %v13135_v24 = vcombine.high %v1086_v21, %v1090_v0  ;;  %v1129_v13 = vld [vmem:[%s19788_s1 + $0x1d30] sm:$0xff]  ;;  %v1130_v50 = vld [vmem:[%s19788_s1 + $0x1d38] sm:$0xff] }
 0x4ba   :  { %10980 = vmatpush1.bf16.msra.mxu0 %v13084_v34  ;;  %v1094_v34 = vld [vmem:[%s19788_s1 + $0x1c18] sm:$0xff] }
 0x4bb   :  { %11513 = vmatpush1.bf16.msra.mxu1 %v13086_v38  ;;  %10981 = vmatprep.subr.bf16.mxu0 %v13093_v10  ;;  %v1098_v38 = vld [vmem:[%s19788_s1 + $0x1c38] sm:$0xff]  ;;  %v13132_v10 = vcombine.low %v1085_v20, %v1089_v29  ;;  %v1133_v20 = vld [vmem:[%s19788_s1 + $0x1d50] sm:$0xff] }
 0x4bc   :  { %11514 = vmatprep.subr.bf16.mxu1 %v13095_v35  ;;  %v13134_v35 = vcombine.low %v1086_v21, %v1090_v0  ;;  %v13143_v62 = vcombine.high %v1094_v34, %v1098_v38  ;;  %v1137_v29 = vld [vmem:[%s19788_s1 + $0x1d70] sm:$0xff]  ;;  %v1134_v21 = vld [vmem:[%s19788_s1 + $0x1d58] sm:$0xff] }
 0x4bd   :  { %v1138_v0 = vld [vmem:[%s19788_s1 + $0x1d78] sm:$0xff] }
 0x4be   :  { %10982 = vmatpush1.bf16.msra.mxu0 %v13092_v42  ;;  %v1102_v42 = vld [vmem:[%s19788_s1 + $0x1c58] sm:$0xff] }
 0x4bf   :  { %11515 = vmatpush1.bf16.msra.mxu1 %v13094_v43  ;;  %10983 = vmatprep.subr.bf16.mxu0 %v13101_v45  ;;  %v1106_v43 = vld [vmem:[%s19788_s1 + $0x1c78] sm:$0xff]  ;;  %v13140_v45 = vcombine.low %v1093_v12, %v1097_v3  ;;  %v1141_v12 = vld [vmem:[%s19788_s1 + $0x1d90] sm:$0xff] }
 0x4c0   :  { %11516 = vmatprep.subr.bf16.mxu1 %v13103_v46  ;;  %v13142_v46 = vcombine.low %v1094_v34, %v1098_v38  ;;  %v13151_v53 = vcombine.high %v1102_v42, %v1106_v43  ;;  %v1145_v3 = vld [vmem:[%s19788_s1 + $0x1db0] sm:$0xff]  ;;  %v1142_v34 = vld [vmem:[%s19788_s1 + $0x1d98] sm:$0xff] }
 0x4c1   :  { %v1146_v38 = vld [vmem:[%s19788_s1 + $0x1db8] sm:$0xff] }
 0x4c2   :  { %10984 = vmatpush1.bf16.msra.mxu0 %v13100_v23  ;;  %v1110_v23 = vld [vmem:[%s19788_s1 + $0x1c98] sm:$0xff] }
 0x4c3   :  { %11517 = vmatpush1.bf16.msra.mxu1 %v13102_v52  ;;  %10985 = vmatprep.subr.bf16.mxu0 %v13109_v57  ;;  %v1114_v52 = vld [vmem:[%s19788_s1 + $0x1cb8] sm:$0xff]  ;;  %v13148_v57 = vcombine.low %v1101_v36, %v1105_v37  ;;  %v1149_v36 = vld [vmem:[%s19788_s1 + $0x1dd0] sm:$0xff] }
 0x4c4   :  { %11518 = vmatprep.subr.bf16.mxu1 %v13111_v58  ;;  %v13150_v58 = vcombine.low %v1102_v42, %v1106_v43  ;;  %v13159_v60 = vcombine.high %v1110_v23, %v1114_v52  ;;  %v1153_v37 = vld [vmem:[%s19788_s1 + $0x1df0] sm:$0xff]  ;;  %v1150_v42 = vld [vmem:[%s19788_s1 + $0x1dd8] sm:$0xff] }
 0x4c5   :  { %v1154_v43 = vld [vmem:[%s19788_s1 + $0x1df8] sm:$0xff] }
 0x4c6   :  { %10986 = vmatpush1.bf16.msra.mxu0 %v13108_v2  ;;  %v1122_v2 = vld [vmem:[%s19788_s1 + $0x1cf8] sm:$0xff] }
 0x4c7   :  { %11519 = vmatpush1.bf16.msra.mxu1 %v13110_v56  ;;  %10987 = vmatprep.subr.bf16.mxu0 %v13117_v5  ;;  %v13156_v56 = vcombine.low %v1109_v48, %v1113_v51  ;;  %v13158_v5 = vcombine.low %v1110_v23, %v1114_v52  ;;  %v1157_v48 = vld [vmem:[%s19788_s1 + $0x1e10] sm:$0xff]  ;;  %v1158_v23 = vld [vmem:[%s19788_s1 + $0x1e18] sm:$0xff] }
 0x4c8   :  { %11520 = vmatprep.subr.bf16.mxu1 %v13119_v6  ;;  %v13165_v6 = vcombine.high %v1117_v41, %v1121_v33  ;;  %v1161_v51 = vld [vmem:[%s19788_s1 + $0x1e30] sm:$0xff]  ;;  %v1162_v52 = vld [vmem:[%s19788_s1 + $0x1e38] sm:$0xff] }
 0x4ca   :  { %10988 = vmatpush1.bf16.msra.mxu0 %v13116_v11  ;;  %v13164_v11 = vcombine.low %v1117_v41, %v1121_v33  ;;  %v1165_v41 = vld [vmem:[%s19788_s1 + $0x1e50] sm:$0xff] }
 0x4cb   :  { %11521 = vmatpush1.bf16.msra.mxu1 %v13118_v59  ;;  %10989 = vmatprep.subr.bf16.mxu0 %v13125_v40  ;;  %v13173_v40 = vcombine.high %v1125_v17, %v1129_v13  ;;  %v1169_v33 = vld [vmem:[%s19788_s1 + $0x1e70] sm:$0xff] }
 0x4cc   :  { %11522 = vmatprep.subr.bf16.mxu1 %v13127_v16 }
 0x4ce   :  { %10990 = vmatpush1.bf16.msra.mxu0 %v13124_v22  ;;  %v13172_v22 = vcombine.low %v1125_v17, %v1129_v13  ;;  %v1173_v17 = vld [vmem:[%s19788_s1 + $0x1e90] sm:$0xff] }
 0x4cf   :  { %11523 = vmatpush1.bf16.msra.mxu1 %v13126_v4  ;;  %10991 = vmatprep.subr.bf16.mxu0 %v13133_v31  ;;  %v13181_v31 = vcombine.high %v1133_v20, %v1137_v29  ;;  %v1177_v13 = vld [vmem:[%s19788_s1 + $0x1eb0] sm:$0xff] }
 0x4d0   :  { %11524 = vmatprep.subr.bf16.mxu1 %v13135_v24  ;;  %v13183_v24 = vcombine.high %v1134_v21, %v1138_v0 }
 0x4d2   :  { %10992 = vmatpush1.bf16.msra.mxu0 %v13132_v10  ;;  %v13180_v10 = vcombine.low %v1133_v20, %v1137_v29  ;;  %v1181_v20 = vld [vmem:[%s19788_s1 + $0x1ed0] sm:$0xff] }
 0x4d3   :  { %11525 = vmatpush1.bf16.msra.mxu1 %v13134_v35  ;;  %11002 = vmatprep.subr.bf16.mxu0 %v13141_v28  ;;  %v13182_v35 = vcombine.low %v1134_v21, %v1138_v0  ;;  %v13189_v28 = vcombine.high %v1141_v12, %v1145_v3  ;;  %v1185_v29 = vld [vmem:[%s19788_s1 + $0x1ef0] sm:$0xff]  ;;  %v1182_v21 = vld [vmem:[%s19788_s1 + $0x1ed8] sm:$0xff] }
 0x4d4   :  { %11535 = vmatprep.subr.bf16.mxu1 %v13143_v62  ;;  %v13191_v62 = vcombine.high %v1142_v34, %v1146_v38  ;;  %v1186_v0 = vld [vmem:[%s19788_s1 + $0x1ef8] sm:$0xff] }
 0x4d5   :  { %10994 = vmatmul.mubr.bf16.vlgmr.msra.gmra.mrb[4].mxu0 %v15856_v26 }
 0x4d6   :  { %11003 = vmatpush1.bf16.msra.mxu0 %v13140_v45  ;;  %11527 = vmatmul.mubr.bf16.vlgmr.msra.gmra.mrb[4].mxu1 %v15856_v26  ;;  %v1118_v26 = vld [vmem:[%s19788_s1 + $0x1cd8] sm:$0xff]  ;;  %v13188_v45 = vcombine.low %v1141_v12, %v1145_v3  ;;  %v1189_v12 = vld [vmem:[%s19788_s1 + $0x1f10] sm:$0xff] }
 0x4d7   :  { %11536 = vmatpush1.bf16.msra.mxu1 %v13142_v46  ;;  %11004 = vmatprep.subr.bf16.mxu0 %v13149_v9  ;;  %v13167_v7 = vcombine.high %v1118_v26, %v1122_v2  ;;  %v13166_v59 = vcombine.low %v1118_v26, %v1122_v2  ;;  %v13190_v46 = vcombine.low %v1142_v34, %v1146_v38  ;;  %v1166_v26 = vld [vmem:[%s19788_s1 + $0x1e58] sm:$0xff]  ;;  %v1193_v3 = vld [vmem:[%s19788_s1 + $0x1f30] sm:$0xff] }
 0x4d8   :  { %11537 = vmatprep.subr.bf16.mxu1 %v13151_v53  ;;  %11034 = vmatprep.mubr.bf16.mxu0 %v15870_v54  ;;  %v13197_v9 = vcombine.high %v1149_v36, %v1153_v37  ;;  %v13199_v53 = vcombine.high %v1150_v42, %v1154_v43  ;;  %v1170_v2 = vld [vmem:[%s19788_s1 + $0x1e78] sm:$0xff] }
 0x4d9   :  { %11567 = vmatprep.mubr.bf16.mxu1 %v15870_v54  ;;  %v1126_v54 = vld [vmem:[%s19788_s1 + $0x1d18] sm:$0xff] }
 0x4da   :  { %11005 = vmatpush1.bf16.msra.mxu0 %v13148_v57  ;;  %v13175_v16 = vcombine.high %v1126_v54, %v1130_v50  ;;  %v13174_v4 = vcombine.low %v1126_v54, %v1130_v50  ;;  %v13196_v57 = vcombine.low %v1149_v36, %v1153_v37  ;;  %v1174_v54 = vld [vmem:[%s19788_s1 + $0x1e98] sm:$0xff]  ;;  %v1197_v36 = vld [vmem:[%s19788_s1 + $0x1f50] sm:$0xff] }
 0x4db   :  { %11538 = vmatpush1.bf16.msra.mxu1 %v13150_v58  ;;  %11006 = vmatprep.subr.bf16.mxu0 %v13157_v19  ;;  %v13198_v58 = vcombine.low %v1150_v42, %v1154_v43  ;;  %v13205_v19 = vcombine.high %v1157_v48, %v1161_v51  ;;  %v1178_v50 = vld [vmem:[%s19788_s1 + $0x1eb8] sm:$0xff]  ;;  %v1201_v37 = vld [vmem:[%s19788_s1 + $0x1f70] sm:$0xff] }
 0x4dc   :  { %11539 = vmatprep.subr.bf16.mxu1 %v13159_v60  ;;  %v13207_v60 = vcombine.high %v1158_v23, %v1162_v52  ;;  %v1190_v34 = vld [vmem:[%s19788_s1 + $0x1f18] sm:$0xff] }
 0x4dd   :  { %v1194_v38 = vld [vmem:[%s19788_s1 + $0x1f38] sm:$0xff] }
 0x4de   :  { %11007 = vmatpush1.bf16.msra.mxu0 %v13156_v56  ;;  %v13204_v56 = vcombine.low %v1157_v48, %v1161_v51  ;;  %v1198_v42 = vld [vmem:[%s19788_s1 + $0x1f58] sm:$0xff]  ;;  %v1205_v48 = vld [vmem:[%s19788_s1 + $0x1f90] sm:$0xff] }
 0x4df   :  { %11540 = vmatpush1.bf16.msra.mxu1 %v13158_v5  ;;  %11008 = vmatprep.subr.bf16.mxu0 %v13165_v6  ;;  %v13206_v5 = vcombine.low %v1158_v23, %v1162_v52  ;;  %v13213_v6 = vcombine.high %v1165_v41, %v1169_v33  ;;  %v1202_v43 = vld [vmem:[%s19788_s1 + $0x1f78] sm:$0xff]  ;;  %v1209_v51 = vld [vmem:[%s19788_s1 + $0x1fb0] sm:$0xff] }
 0x4e0   :  { %11541 = vmatprep.subr.bf16.mxu1 %v13167_v7  ;;  %v13215_v7 = vcombine.high %v1166_v26, %v1170_v2  ;;  %v1206_v23 = vld [vmem:[%s19788_s1 + $0x1f98] sm:$0xff] }
 0x4e1   :  { %v1210_v52 = vld [vmem:[%s19788_s1 + $0x1fb8] sm:$0xff] }
 0x4e2   :  { %11009 = vmatpush1.bf16.msra.mxu0 %v13164_v11  ;;  %v13212_v11 = vcombine.low %v1165_v41, %v1169_v33  ;;  %v1213_v41 = vld [vmem:[%s19788_s1 + $0x1fd0] sm:$0xff] }
 0x4e3   :  { %11542 = vmatpush1.bf16.msra.mxu1 %v13166_v59  ;;  %11010 = vmatprep.subr.bf16.mxu0 %v13173_v40  ;;  %v13214_v59 = vcombine.low %v1166_v26, %v1170_v2  ;;  %v13221_v40 = vcombine.high %v1173_v17, %v1177_v13  ;;  %v1217_v33 = vld [vmem:[%s19788_s1 + $0x1ff0] sm:$0xff]  ;;  %v1214_v26 = vld [vmem:[%s19788_s1 + $0x1fd8] sm:$0xff] }
 0x4e4   :  { %11543 = vmatprep.subr.bf16.mxu1 %v13175_v16  ;;  %v13223_v16 = vcombine.high %v1174_v54, %v1178_v50  ;;  %v1218_v2 = vld [vmem:[%s19788_s1 + $0x1ff8] sm:$0xff] }
 0x4e6   :  { %11011 = vmatpush1.bf16.msra.mxu0 %v13172_v22  ;;  %v13220_v22 = vcombine.low %v1173_v17, %v1177_v13  ;;  %v1221_v17 = vld [vmem:[%s19788_s1 + $0x2010] sm:$0xff] }
 0x4e7   :  { %11544 = vmatpush1.bf16.msra.mxu1 %v13174_v4  ;;  %11012 = vmatprep.subr.bf16.mxu0 %v13181_v31  ;;  %v13222_v4 = vcombine.low %v1174_v54, %v1178_v50  ;;  %v13229_v31 = vcombine.high %v1181_v20, %v1185_v29  ;;  %v1225_v13 = vld [vmem:[%s19788_s1 + $0x2030] sm:$0xff]  ;;  %v1222_v54 = vld [vmem:[%s19788_s1 + $0x2018] sm:$0xff] }
 0x4e8   :  { %11545 = vmatprep.subr.bf16.mxu1 %v13183_v24  ;;  %v13231_v24 = vcombine.high %v1182_v21, %v1186_v0  ;;  %v1226_v50 = vld [vmem:[%s19788_s1 + $0x2038] sm:$0xff] }
 0x4ea   :  { %11013 = vmatpush1.bf16.msra.mxu0 %v13180_v10  ;;  %v13228_v10 = vcombine.low %v1181_v20, %v1185_v29  ;;  %v1229_v20 = vld [vmem:[%s19788_s1 + $0x2050] sm:$0xff] }
 0x4eb   :  { %11546 = vmatpush1.bf16.msra.mxu1 %v13182_v35  ;;  %11014 = vmatprep.subr.bf16.mxu0 %v13189_v28  ;;  %v13230_v35 = vcombine.low %v1182_v21, %v1186_v0  ;;  %v13237_v28 = vcombine.high %v1189_v12, %v1193_v3  ;;  %v1233_v29 = vld [vmem:[%s19788_s1 + $0x2070] sm:$0xff]  ;;  %v1230_v21 = vld [vmem:[%s19788_s1 + $0x2058] sm:$0xff] }
 0x4ec   :  { %11547 = vmatprep.subr.bf16.mxu1 %v13191_v62  ;;  %v13239_v62 = vcombine.high %v1190_v34, %v1194_v38  ;;  %v1234_v0 = vld [vmem:[%s19788_s1 + $0x2078] sm:$0xff] }
 0x4ee   :  { %11015 = vmatpush1.bf16.msra.mxu0 %v13188_v45  ;;  %v13236_v45 = vcombine.low %v1189_v12, %v1193_v3  ;;  %v1237_v12 = vld [vmem:[%s19788_s1 + $0x2090] sm:$0xff] }
 0x4ef   :  { %11548 = vmatpush1.bf16.msra.mxu1 %v13190_v46  ;;  %11016 = vmatprep.subr.bf16.mxu0 %v13197_v9  ;;  %v13238_v46 = vcombine.low %v1190_v34, %v1194_v38  ;;  %v13245_v9 = vcombine.high %v1197_v36, %v1201_v37  ;;  %v1241_v3 = vld [vmem:[%s19788_s1 + $0x20b0] sm:$0xff]  ;;  %v1238_v34 = vld [vmem:[%s19788_s1 + $0x2098] sm:$0xff] }
 0x4f0   :  { %11549 = vmatprep.subr.bf16.mxu1 %v13199_v53  ;;  %v13247_v53 = vcombine.high %v1198_v42, %v1202_v43  ;;  %v1242_v38 = vld [vmem:[%s19788_s1 + $0x20b8] sm:$0xff] }
 0x4f2   :  { %11017 = vmatpush1.bf16.msra.mxu0 %v13196_v57  ;;  %v13244_v57 = vcombine.low %v1197_v36, %v1201_v37  ;;  %v1245_v36 = vld [vmem:[%s19788_s1 + $0x20d0] sm:$0xff] }
 0x4f3   :  { %11550 = vmatpush1.bf16.msra.mxu1 %v13198_v58  ;;  %11018 = vmatprep.subr.bf16.mxu0 %v13205_v19  ;;  %v13246_v58 = vcombine.low %v1198_v42, %v1202_v43  ;;  %v13253_v19 = vcombine.high %v1205_v48, %v1209_v51  ;;  %v1249_v37 = vld [vmem:[%s19788_s1 + $0x20f0] sm:$0xff]  ;;  %v1250_v42 = vld [vmem:[%s19788_s1 + $0x20f8] sm:$0xff]  ;;  %v13284_v43 = vcombine.low %v1237_v12, %v1241_v3 }
 0x4f4   :  { %11551 = vmatprep.subr.bf16.mxu1 %v13207_v60  ;;  %v13255_v60 = vcombine.high %v1206_v23, %v1210_v52 }
 0x4f6   :  { %11019 = vmatpush1.bf16.msra.mxu0 %v13204_v56  ;;  %v13252_v56 = vcombine.low %v1205_v48, %v1209_v51  ;;  %v1257_v48 = vld [vmem:[%s19788_s1 + $0x2130] sm:$0xff]  ;;  %v1258_v51 = vld [vmem:[%s19788_s1 + $0x2138] sm:$0xff] }
 0x4f7   :  { %11552 = vmatpush1.bf16.msra.mxu1 %v13206_v5  ;;  %11020 = vmatprep.subr.bf16.mxu0 %v13213_v6  ;;  %v13254_v5 = vcombine.low %v1206_v23, %v1210_v52  ;;  %v13261_v6 = vcombine.high %v1213_v41, %v1217_v33  ;;  %v13292_v23 = vcombine.low %v1245_v36, %v1249_v37 }
 0x4f8   :  { %11553 = vmatprep.subr.bf16.mxu1 %v13215_v7  ;;  %v13263_v7 = vcombine.high %v1214_v26, %v1218_v2 }
 0x4fa   :  { %11021 = vmatpush1.bf16.msra.mxu0 %v13212_v11  ;;  %v13260_v11 = vcombine.low %v1213_v41, %v1217_v33  ;;  %v1262_v41 = vld [vmem:[%s19788_s1 + $0x2158] sm:$0xff] }
 0x4fb   :  { %11554 = vmatpush1.bf16.msra.mxu1 %v13214_v59  ;;  %11022 = vmatprep.subr.bf16.mxu0 %v13221_v40  ;;  %v13262_v59 = vcombine.low %v1214_v26, %v1218_v2  ;;  %v13269_v40 = vcombine.high %v1221_v17, %v1225_v13  ;;  %v1266_v33 = vld [vmem:[%s19788_s1 + $0x2178] sm:$0xff] }
 0x4fc   :  { %11555 = vmatprep.subr.bf16.mxu1 %v13223_v16  ;;  %v13271_v16 = vcombine.high %v1222_v54, %v1226_v50 }
 0x4fe   :  { %11023 = vmatpush1.bf16.msra.mxu0 %v13220_v22  ;;  %v13268_v22 = vcombine.low %v1221_v17, %v1225_v13  ;;  %v1270_v17 = vld [vmem:[%s19788_s1 + $0x2198] sm:$0xff] }
 0x4ff   :  { %11556 = vmatpush1.bf16.msra.mxu1 %v13222_v4  ;;  %11024 = vmatprep.subr.bf16.mxu0 %v13229_v31  ;;  %v13270_v4 = vcombine.low %v1222_v54, %v1226_v50  ;;  %v13277_v31 = vcombine.high %v1229_v20, %v1233_v29  ;;  %v1274_v13 = vld [vmem:[%s19788_s1 + $0x21b8] sm:$0xff]  ;;  %v13310_v50 = vcombine.low %v1262_v41, %v1266_v33 }
 0x500   :  { %11557 = vmatprep.subr.bf16.mxu1 %v13231_v24  ;;  %v13279_v24 = vcombine.high %v1230_v21, %v1234_v0 }
 0x502   :  { %11025 = vmatpush1.bf16.msra.mxu0 %v13228_v10  ;;  %v13276_v10 = vcombine.low %v1229_v20, %v1233_v29  ;;  %v1278_v20 = vld [vmem:[%s19788_s1 + $0x21d8] sm:$0xff] }
 0x503   :  { %11558 = vmatpush1.bf16.msra.mxu1 %v13230_v35  ;;  %11026 = vmatprep.subr.bf16.mxu0 %v13237_v28  ;;  %v13278_v35 = vcombine.low %v1230_v21, %v1234_v0  ;;  %v13285_v28 = vcombine.high %v1237_v12, %v1241_v3  ;;  %v1282_v29 = vld [vmem:[%s19788_s1 + $0x21f8] sm:$0xff]  ;;  %v13318_v0 = vcombine.low %v1270_v17, %v1274_v13 }
 0x504   :  { %11559 = vmatprep.subr.bf16.mxu1 %v13239_v62  ;;  %v13287_v62 = vcombine.high %v1238_v34, %v1242_v38  ;;  %v1286_v12 = vld [vmem:[%s19788_s1 + $0x2218] sm:$0xff] }
 0x505   :  { %v1290_v3 = vld [vmem:[%s19788_s1 + $0x2238] sm:$0xff] }
 0x506   :  { %11027 = vmatpush1.bf16.msra.mxu0 %v13236_v45  ;;  %v13286_v45 = vcombine.low %v1238_v34, %v1242_v38  ;;  %v13326_v38 = vcombine.low %v1278_v20, %v1282_v29 }
 0x507   :  { %11560 = vmatpush1.bf16.msra.mxu1 %v13238_v46  ;;  %11028 = vmatprep.subr.bf16.mxu0 %v13245_v9  ;;  %v13293_v46 = vcombine.high %v1245_v36, %v1249_v37  ;;  %v1294_v36 = vld [vmem:[%s19788_s1 + $0x2258] sm:$0xff] }
 0x508   :  { %11561 = vmatprep.subr.bf16.mxu1 %v13247_v53  ;;  %v1253_v53 = vld [vmem:[%s19788_s1 + $0x2110] sm:$0xff]  ;;  %v1298_v37 = vld [vmem:[%s19788_s1 + $0x2278] sm:$0xff] }
 0x509   :  { %v13300_v26 = vcombine.low %v1253_v53, %v1257_v48 }
 0x50a   :  { %11029 = vmatpush1.bf16.msra.mxu0 %v13244_v57  ;;  %v13301_v57 = vcombine.high %v1253_v53, %v1257_v48  ;;  %v1302_v53 = vld [vmem:[%s19788_s1 + $0x2298] sm:$0xff] }
 0x50b   :  { %11562 = vmatpush1.bf16.msra.mxu1 %v13246_v58  ;;  %11030 = vmatprep.subr.bf16.mxu0 %v13253_v19  ;;  %v1261_v19 = vld [vmem:[%s19788_s1 + $0x2150] sm:$0xff]  ;;  %v1306_v48 = vld [vmem:[%s19788_s1 + $0x22b8] sm:$0xff] }
 0x50c   :  { %11563 = vmatprep.subr.bf16.mxu1 %v13255_v60  ;;  %v1265_v60 = vld [vmem:[%s19788_s1 + $0x2170] sm:$0xff] }
 0x50d   :  { %v13308_v54 = vcombine.low %v1261_v19, %v1265_v60 }
 0x50e   :  { %11031 = vmatpush1.bf16.msra.mxu0 %v13252_v56  ;;  %v13309_v56 = vcombine.high %v1261_v19, %v1265_v60  ;;  %v1310_v19 = vld [vmem:[%s19788_s1 + $0x22d8] sm:$0xff] }
 0x50f   :  { %11564 = vmatpush1.bf16.msra.mxu1 %v13254_v5  ;;  %11032 = vmatprep.subr.bf16.mxu0 %v13261_v6  ;;  %v13311_v5 = vcombine.high %v1262_v41, %v1266_v33  ;;  %v1269_v6 = vld [vmem:[%s19788_s1 + $0x2190] sm:$0xff]  ;;  %v1314_v60 = vld [vmem:[%s19788_s1 + $0x22f8] sm:$0xff]  ;;  %v13350_v33 = vcombine.low %v1302_v53, %v1306_v48 }
 0x510   :  { %11565 = vmatprep.subr.bf16.mxu1 %v13263_v7  ;;  %v1273_v7 = vld [vmem:[%s19788_s1 + $0x21b0] sm:$0xff] }
 0x511   :  { %v13316_v21 = vcombine.low %v1269_v6, %v1273_v7 }
 0x512   :  { %11033 = vmatpush1.bf16.msra.mxu0 %v13260_v11  ;;  %v13317_v11 = vcombine.high %v1269_v6, %v1273_v7  ;;  %v1318_v6 = vld [vmem:[%s19788_s1 + $0x2318] sm:$0xff] }
 0x513   :  { %11566 = vmatpush1.bf16.msra.mxu1 %v13262_v59  ;;  %11043 = vmatprep.subr.bf16.mxu0 %v13269_v40  ;;  %v13319_v59 = vcombine.high %v1270_v17, %v1274_v13  ;;  %v1277_v40 = vld [vmem:[%s19788_s1 + $0x21d0] sm:$0xff]  ;;  %v1322_v7 = vld [vmem:[%s19788_s1 + $0x2338] sm:$0xff]  ;;  %v13358_v13 = vcombine.low %v1310_v19, %v1314_v60 }
 0x514   :  { %11576 = vmatprep.subr.bf16.mxu1 %v13271_v16  ;;  %v1281_v16 = vld [vmem:[%s19788_s1 + $0x21f0] sm:$0xff] }
 0x515   :  { %11035 = vmatmul.mubr.bf16.vlgmr.msra.gmra.mrb[4].mxu0 %v16069_v14  ;;  %v13324_v34 = vcombine.low %v1277_v40, %v1281_v16 }
 0x516   :  { %11044 = vmatpush1.bf16.msra.mxu0 %v13268_v22  ;;  %11568 = vmatmul.mubr.bf16.vlgmr.msra.gmra.mrb[4].mxu1 %v16069_v14  ;;  %v1246_v14 = vld [vmem:[%s19788_s1 + $0x20d8] sm:$0xff]  ;;  %v13325_v22 = vcombine.high %v1277_v40, %v1281_v16 }
 0x517   :  { %11577 = vmatpush1.bf16.msra.mxu1 %v13270_v4  ;;  %11045 = vmatprep.subr.bf16.mxu0 %v13277_v31  ;;  %v13295_v9 = vcombine.high %v1246_v14, %v1250_v42  ;;  %v13294_v52 = vcombine.low %v1246_v14, %v1250_v42  ;;  %v13327_v4 = vcombine.high %v1278_v20, %v1282_v29  ;;  %v1285_v31 = vld [vmem:[%s19788_s1 + $0x2210] sm:$0xff]  ;;  %v1326_v40 = vld [vmem:[%s19788_s1 + $0x2358] sm:$0xff] }
 0x518   :  { %11578 = vmatprep.subr.bf16.mxu1 %v13279_v24  ;;  %11075 = vmatprep.mubr.bf16.mxu0 %v16083_v30  ;;  %v1289_v24 = vld [vmem:[%s19788_s1 + $0x2230] sm:$0xff]  ;;  %v13334_v42 = vcombine.low %v1286_v12, %v1290_v3  ;;  %v1330_v16 = vld [vmem:[%s19788_s1 + $0x2378] sm:$0xff]  ;;  %v13366_v29 = vcombine.low %v1318_v6, %v1322_v7 }
 0x519   :  { %11608 = vmatprep.mubr.bf16.mxu1 %v16083_v30  ;;  %v1254_v30 = vld [vmem:[%s19788_s1 + $0x2118] sm:$0xff]  ;;  %v13332_v14 = vcombine.low %v1285_v31, %v1289_v24 }
 0x51a   :  { %11046 = vmatpush1.bf16.msra.mxu0 %v13276_v10  ;;  %v13303_v58 = vcombine.high %v1254_v30, %v1258_v51  ;;  %v13302_v2 = vcombine.low %v1254_v30, %v1258_v51  ;;  %v13333_v10 = vcombine.high %v1285_v31, %v1289_v24  ;;  %v13342_v51 = vcombine.low %v1294_v36, %v1298_v37  ;;  %v1334_v31 = vld [vmem:[%s19788_s1 + $0x2398] sm:$0xff] }
 0x51b   :  { %11579 = vmatpush1.bf16.msra.mxu1 %v13278_v35  ;;  %11047 = vmatprep.subr.bf16.mxu0 %v13285_v28  ;;  %v13335_v35 = vcombine.high %v1286_v12, %v1290_v3  ;;  %v1293_v28 = vld [vmem:[%s19788_s1 + $0x2250] sm:$0xff]  ;;  %v1338_v24 = vld [vmem:[%s19788_s1 + $0x23b8] sm:$0xff]  ;;  %v13374_v3 = vcombine.low %v1326_v40, %v1330_v16 }
 0x51c   :  { %11580 = vmatprep.subr.bf16.mxu1 %v13287_v62  ;;  %v1297_v62 = vld [vmem:[%s19788_s1 + $0x2270] sm:$0xff] }
 0x51d   :  { %v13340_v30 = vcombine.low %v1293_v28, %v1297_v62 }
 0x51e   :  { %11048 = vmatpush1.bf16.msra.mxu0 %v13284_v43  ;;  %v13341_v43 = vcombine.high %v1293_v28, %v1297_v62  ;;  %v1342_v28 = vld [vmem:[%s19788_s1 + $0x23d8] sm:$0xff] }
 0x51f   :  { %11581 = vmatpush1.bf16.msra.mxu1 %v13286_v45  ;;  %11049 = vmatprep.subr.bf16.mxu0 %v13293_v46  ;;  %v13343_v45 = vcombine.high %v1294_v36, %v1298_v37  ;;  %v1301_v46 = vld [vmem:[%s19788_s1 + $0x2290] sm:$0xff]  ;;  %v1346_v62 = vld [vmem:[%s19788_s1 + $0x23f8] sm:$0xff]  ;;  %v13382_v37 = vcombine.low %v1334_v31, %v1338_v24 }
 0x520   :  { %11582 = vmatprep.subr.bf16.mxu1 %v13295_v9  ;;  %v1305_v9 = vld [vmem:[%s19788_s1 + $0x22b0] sm:$0xff] }
 0x521   :  { %v13348_v41 = vcombine.low %v1301_v46, %v1305_v9 }
 0x522   :  { %11050 = vmatpush1.bf16.msra.mxu0 %v13292_v23  ;;  %v13349_v23 = vcombine.high %v1301_v46, %v1305_v9  ;;  %v1350_v46 = vld [vmem:[%s19788_s1 + $0x2418] sm:$0xff] }
 0x523   :  { %11583 = vmatpush1.bf16.msra.mxu1 %v13294_v52  ;;  %11051 = vmatprep.subr.bf16.mxu0 %v13301_v57  ;;  %v13351_v52 = vcombine.high %v1302_v53, %v1306_v48  ;;  %v1309_v57 = vld [vmem:[%s19788_s1 + $0x22d0] sm:$0xff]  ;;  %v1354_v9 = vld [vmem:[%s19788_s1 + $0x2438] sm:$0xff]  ;;  %v13390_v48 = vcombine.low %v1342_v28, %v1346_v62 }
 0x524   :  { %11584 = vmatprep.subr.bf16.mxu1 %v13303_v58  ;;  %v1313_v58 = vld [vmem:[%s19788_s1 + $0x22f0] sm:$0xff] }
 0x525   :  { %v13356_v17 = vcombine.low %v1309_v57, %v1313_v58 }
 0x526   :  { %11052 = vmatpush1.bf16.msra.mxu0 %v13300_v26  ;;  %v13357_v26 = vcombine.high %v1309_v57, %v1313_v58  ;;  %v1358_v57 = vld [vmem:[%s19788_s1 + $0x2458] sm:$0xff] }
 0x527   :  { %11585 = vmatpush1.bf16.msra.mxu1 %v13302_v2  ;;  %11053 = vmatprep.subr.bf16.mxu0 %v13309_v56  ;;  %v13359_v2 = vcombine.high %v1310_v19, %v1314_v60  ;;  %v1317_v56 = vld [vmem:[%s19788_s1 + $0x2310] sm:$0xff]  ;;  %v1362_v58 = vld [vmem:[%s19788_s1 + $0x2478] sm:$0xff]  ;;  %v13398_v60 = vcombine.low %v1350_v46, %v1354_v9 }
 0x528   :  { %11586 = vmatprep.subr.bf16.mxu1 %v13311_v5  ;;  %v1321_v5 = vld [vmem:[%s19788_s1 + $0x2330] sm:$0xff] }
 0x529   :  { %v13364_v20 = vcombine.low %v1317_v56, %v1321_v5 }
 0x52a   :  { %11054 = vmatpush1.bf16.msra.mxu0 %v13308_v54  ;;  %v13365_v54 = vcombine.high %v1317_v56, %v1321_v5  ;;  %v1366_v56 = vld [vmem:[%s19788_s1 + $0x2498] sm:$0xff] }
 0x52b   :  { %11587 = vmatpush1.bf16.msra.mxu1 %v13310_v50  ;;  %11055 = vmatprep.subr.bf16.mxu0 %v13317_v11  ;;  %v13367_v50 = vcombine.high %v1318_v6, %v1322_v7  ;;  %v1325_v11 = vld [vmem:[%s19788_s1 + $0x2350] sm:$0xff]  ;;  %v1370_v5 = vld [vmem:[%s19788_s1 + $0x24b8] sm:$0xff]  ;;  %v13406_v7 = vcombine.low %v1358_v57, %v1362_v58 }
 0x52c   :  { %11588 = vmatprep.subr.bf16.mxu1 %v13319_v59  ;;  %v1329_v59 = vld [vmem:[%s19788_s1 + $0x2370] sm:$0xff] }
 0x52d   :  { %v13372_v12 = vcombine.low %v1325_v11, %v1329_v59 }
 0x52e   :  { %11056 = vmatpush1.bf16.msra.mxu0 %v13316_v21  ;;  %v13373_v21 = vcombine.high %v1325_v11, %v1329_v59  ;;  %v1378_v11 = vld [vmem:[%s19788_s1 + $0x24f8] sm:$0xff] }
 0x52f   :  { %11589 = vmatpush1.bf16.msra.mxu1 %v13318_v0  ;;  %11057 = vmatprep.subr.bf16.mxu0 %v13325_v22  ;;  %v13375_v0 = vcombine.high %v1326_v40, %v1330_v16  ;;  %v1333_v22 = vld [vmem:[%s19788_s1 + $0x2390] sm:$0xff]  ;;  %v13414_v40 = vcombine.low %v1366_v56, %v1370_v5 }
 0x530   :  { %11590 = vmatprep.subr.bf16.mxu1 %v13327_v4  ;;  %v1337_v4 = vld [vmem:[%s19788_s1 + $0x23b0] sm:$0xff] }
 0x531   :  { %v13380_v36 = vcombine.low %v1333_v22, %v1337_v4 }
 0x532   :  { %11058 = vmatpush1.bf16.msra.mxu0 %v13324_v34  ;;  %v13381_v34 = vcombine.high %v1333_v22, %v1337_v4 }
 0x533   :  { %11591 = vmatpush1.bf16.msra.mxu1 %v13326_v38  ;;  %11059 = vmatprep.subr.bf16.mxu0 %v13333_v10  ;;  %v13383_v38 = vcombine.high %v1334_v31, %v1338_v24  ;;  %v1341_v10 = vld [vmem:[%s19788_s1 + $0x23d0] sm:$0xff] }
 0x534   :  { %11592 = vmatprep.subr.bf16.mxu1 %v13335_v35  ;;  %v1345_v35 = vld [vmem:[%s19788_s1 + $0x23f0] sm:$0xff] }
 0x535   :  { %v13388_v53 = vcombine.low %v1341_v10, %v1345_v35 }
 0x536   :  { %11060 = vmatpush1.bf16.msra.mxu0 %v13332_v14  ;;  %v13389_v14 = vcombine.high %v1341_v10, %v1345_v35 }
 0x537   :  { %11593 = vmatpush1.bf16.msra.mxu1 %v13334_v42  ;;  %11061 = vmatprep.subr.bf16.mxu0 %v13341_v43  ;;  %v13391_v42 = vcombine.high %v1342_v28, %v1346_v62  ;;  %v1349_v43 = vld [vmem:[%s19788_s1 + $0x2410] sm:$0xff] }
 0x538   :  { %11594 = vmatprep.subr.bf16.mxu1 %v13343_v45  ;;  %v1353_v45 = vld [vmem:[%s19788_s1 + $0x2430] sm:$0xff] }
 0x539   :  { %v13396_v19 = vcombine.low %v1349_v43, %v1353_v45 }
 0x53a   :  { %11062 = vmatpush1.bf16.msra.mxu0 %v13340_v30  ;;  %v13397_v30 = vcombine.high %v1349_v43, %v1353_v45 }
 0x53b   :  { %11595 = vmatpush1.bf16.msra.mxu1 %v13342_v51  ;;  %11063 = vmatprep.subr.bf16.mxu0 %v13349_v23  ;;  %v13399_v51 = vcombine.high %v1350_v46, %v1354_v9  ;;  %v1357_v23 = vld [vmem:[%s19788_s1 + $0x2450] sm:$0xff] }
 0x53c   :  { %11596 = vmatprep.subr.bf16.mxu1 %v13351_v52  ;;  %v1361_v52 = vld [vmem:[%s19788_s1 + $0x2470] sm:$0xff] }
 0x53d   :  { %v13404_v6 = vcombine.low %v1357_v23, %v1361_v52 }
 0x53e   :  { %11064 = vmatpush1.bf16.msra.mxu0 %v13348_v41  ;;  %v13405_v41 = vcombine.high %v1357_v23, %v1361_v52 }
 0x53f   :  { %11597 = vmatpush1.bf16.msra.mxu1 %v13350_v33  ;;  %11065 = vmatprep.subr.bf16.mxu0 %v13357_v26  ;;  %v13407_v33 = vcombine.high %v1358_v57, %v1362_v58  ;;  %v1365_v26 = vld [vmem:[%s19788_s1 + $0x2490] sm:$0xff] }
 0x540   :  { %11598 = vmatprep.subr.bf16.mxu1 %v13359_v2  ;;  %v1369_v2 = vld [vmem:[%s19788_s1 + $0x24b0] sm:$0xff] }
 0x541   :  { %v13412_v59 = vcombine.low %v1365_v26, %v1369_v2 }
 0x542   :  { %11066 = vmatpush1.bf16.msra.mxu0 %v13356_v17  ;;  %v13413_v17 = vcombine.high %v1365_v26, %v1369_v2 }
 0x543   :  { %11599 = vmatpush1.bf16.msra.mxu1 %v13358_v13  ;;  %11067 = vmatprep.subr.bf16.mxu0 %v13365_v54  ;;  %v13415_v13 = vcombine.high %v1366_v56, %v1370_v5  ;;  %v1373_v54 = vld [vmem:[%s19788_s1 + $0x24d0] sm:$0xff] }
 0x544   :  { %11600 = vmatprep.subr.bf16.mxu1 %v13367_v50  ;;  %v1377_v50 = vld [vmem:[%s19788_s1 + $0x24f0] sm:$0xff] }
 0x545   :  { %v13421_v16 = vcombine.high %v1373_v54, %v1377_v50  ;;  %v13420_v22 = vcombine.low %v1373_v54, %v1377_v50 }
 0x546   :  { %11068 = vmatpush1.bf16.msra.mxu0 %v13364_v20 }
 0x547   :  { %11601 = vmatpush1.bf16.msra.mxu1 %v13366_v29  ;;  %11069 = vmatprep.subr.bf16.mxu0 %v13373_v21  ;;  %v1381_v29 = vld [vmem:[%s19788_s1 + $0x2510] sm:$0xff] }
 0x548   :  { %11602 = vmatprep.subr.bf16.mxu1 %v13375_v0  ;;  %v1385_v21 = vld [vmem:[%s19788_s1 + $0x2530] sm:$0xff]  ;;  %v1386_v0 = vld [vmem:[%s19788_s1 + $0x2538] sm:$0xff] }
 0x549   :  { %v13429_v31 = vcombine.high %v1381_v29, %v1385_v21  ;;  %v13428_v10 = vcombine.low %v1381_v29, %v1385_v21 }
 0x54a   :  { %11070 = vmatpush1.bf16.msra.mxu0 %v13372_v12  ;;  %v1389_v12 = vld [vmem:[%s19788_s1 + $0x2550] sm:$0xff] }
 0x54b   :  { %11603 = vmatpush1.bf16.msra.mxu1 %v13374_v3  ;;  %11071 = vmatprep.subr.bf16.mxu0 %v13381_v34  ;;  %v1393_v3 = vld [vmem:[%s19788_s1 + $0x2570] sm:$0xff]  ;;  %v1390_v34 = vld [vmem:[%s19788_s1 + $0x2558] sm:$0xff] }
 0x54c   :  { %11604 = vmatprep.subr.bf16.mxu1 %v13383_v38  ;;  %v1394_v38 = vld [vmem:[%s19788_s1 + $0x2578] sm:$0xff]  ;;  %v13437_v28 = vcombine.high %v1389_v12, %v1393_v3  ;;  %v13436_v43 = vcombine.low %v1389_v12, %v1393_v3 }
 0x54d   :  { %v13439_v62 = vcombine.high %v1390_v34, %v1394_v38  ;;  %v13438_v45 = vcombine.low %v1390_v34, %v1394_v38 }
 0x54e   :  { %11072 = vmatpush1.bf16.msra.mxu0 %v13380_v36  ;;  %v1397_v36 = vld [vmem:[%s19788_s1 + $0x2590] sm:$0xff] }
 0x54f   :  { %11605 = vmatpush1.bf16.msra.mxu1 %v13382_v37  ;;  %11073 = vmatprep.subr.bf16.mxu0 %v13389_v14  ;;  %v1401_v37 = vld [vmem:[%s19788_s1 + $0x25b0] sm:$0xff]  ;;  %v1398_v14 = vld [vmem:[%s19788_s1 + $0x2598] sm:$0xff] }
 0x550   :  { %11606 = vmatprep.subr.bf16.mxu1 %v13391_v42  ;;  %v1402_v42 = vld [vmem:[%s19788_s1 + $0x25b8] sm:$0xff]  ;;  %v13445_v46 = vcombine.high %v1397_v36, %v1401_v37  ;;  %v13444_v23 = vcombine.low %v1397_v36, %v1401_v37 }
 0x551   :  { %v13447_v9 = vcombine.high %v1398_v14, %v1402_v42  ;;  %v13446_v52 = vcombine.low %v1398_v14, %v1402_v42 }
 0x552   :  { %11074 = vmatpush1.bf16.msra.mxu0 %v13388_v53  ;;  %v1405_v53 = vld [vmem:[%s19788_s1 + $0x25d0] sm:$0xff] }
 0x553   :  { %11607 = vmatpush1.bf16.msra.mxu1 %v13390_v48  ;;  %11084 = vmatprep.subr.bf16.mxu0 %v13397_v30  ;;  %v1409_v48 = vld [vmem:[%s19788_s1 + $0x25f0] sm:$0xff]  ;;  %v1406_v30 = vld [vmem:[%s19788_s1 + $0x25d8] sm:$0xff] }
 0x554   :  { %11617 = vmatprep.subr.bf16.mxu1 %v13399_v51  ;;  %v1410_v51 = vld [vmem:[%s19788_s1 + $0x25f8] sm:$0xff]  ;;  %v13453_v57 = vcombine.high %v1405_v53, %v1409_v48  ;;  %v13452_v26 = vcombine.low %v1405_v53, %v1409_v48 }
 0x555   :  { %11076 = vmatmul.mubr.bf16.vlgmr.msra.gmra.mrb[4].mxu0 %v16278_v18  ;;  %v13455_v58 = vcombine.high %v1406_v30, %v1410_v51  ;;  %v13454_v2 = vcombine.low %v1406_v30, %v1410_v51 }
 0x556   :  { %11085 = vmatpush1.bf16.msra.mxu0 %v13396_v19  ;;  %11609 = vmatmul.mubr.bf16.vlgmr.msra.gmra.mrb[4].mxu1 %v16278_v18  ;;  %v1374_v18 = vld [vmem:[%s19788_s1 + $0x24d8] sm:$0xff]  ;;  %v1413_v19 = vld [vmem:[%s19788_s1 + $0x2610] sm:$0xff] }
 0x557   :  { %11618 = vmatpush1.bf16.msra.mxu1 %v13398_v60  ;;  %11086 = vmatprep.subr.bf16.mxu0 %v13405_v41  ;;  %v13423_v20 = vcombine.high %v1374_v18, %v1378_v11  ;;  %v13422_v4 = vcombine.low %v1374_v18, %v1378_v11  ;;  %v1417_v60 = vld [vmem:[%s19788_s1 + $0x2630] sm:$0xff]  ;;  %v1414_v41 = vld [vmem:[%s19788_s1 + $0x2618] sm:$0xff] }
 0x558   :  { %11619 = vmatprep.subr.bf16.mxu1 %v13407_v33  ;;  %11116 = vmatprep.mubr.bf16.mxu0 %v16292_v32  ;;  %v1418_v33 = vld [vmem:[%s19788_s1 + $0x2638] sm:$0xff]  ;;  %v13461_v56 = vcombine.high %v1413_v19, %v1417_v60  ;;  %v13460_v54 = vcombine.low %v1413_v19, %v1417_v60 }
 0x559   :  { %11649 = vmatprep.mubr.bf16.mxu1 %v16292_v32  ;;  %v1382_v32 = vld [vmem:[%s19788_s1 + $0x2518] sm:$0xff]  ;;  %v13463_v5 = vcombine.high %v1414_v41, %v1418_v33  ;;  %v13462_v50 = vcombine.low %v1414_v41, %v1418_v33 }
 0x55a   :  { %11087 = vmatpush1.bf16.msra.mxu0 %v13404_v6  ;;  %v13431_v24 = vcombine.high %v1382_v32, %v1386_v0  ;;  %v13430_v35 = vcombine.low %v1382_v32, %v1386_v0  ;;  %v1421_v6 = vld [vmem:[%s19788_s1 + $0x2650] sm:$0xff] }
 0x55b   :  { %11620 = vmatpush1.bf16.msra.mxu1 %v13406_v7  ;;  %11088 = vmatprep.subr.bf16.mxu0 %v13413_v17  ;;  %v1425_v7 = vld [vmem:[%s19788_s1 + $0x2670] sm:$0xff]  ;;  %v1422_v17 = vld [vmem:[%s19788_s1 + $0x2658] sm:$0xff] }
 0x55c   :  { %11621 = vmatprep.subr.bf16.mxu1 %v13415_v13  ;;  %v1426_v13 = vld [vmem:[%s19788_s1 + $0x2678] sm:$0xff]  ;;  %v13469_v18 = vcombine.high %v1421_v6, %v1425_v7  ;;  %v13468_v29 = vcombine.low %v1421_v6, %v1425_v7 }
 0x55d   :  { %v13471_v11 = vcombine.high %v1422_v17, %v1426_v13  ;;  %v13470_v21 = vcombine.low %v1422_v17, %v1426_v13 }
 0x55e   :  { %11089 = vmatpush1.bf16.msra.mxu0 %v13412_v59  ;;  %v1429_v59 = vld [vmem:[%s19788_s1 + $0x2690] sm:$0xff] }
 0x55f   :  { %11622 = vmatpush1.bf16.msra.mxu1 %v13414_v40  ;;  %11090 = vmatprep.subr.bf16.mxu0 %v13421_v16  ;;  %v1433_v40 = vld [vmem:[%s19788_s1 + $0x26b0] sm:$0xff]  ;;  %v1430_v16 = vld [vmem:[%s19788_s1 + $0x2698] sm:$0xff] }
 0x560   :  { %11623 = vmatprep.subr.bf16.mxu1 %v13423_v20  ;;  %v1434_v20 = vld [vmem:[%s19788_s1 + $0x26b8] sm:$0xff]  ;;  %v13477_v32 = vcombine.high %v1429_v59, %v1433_v40  ;;  %v13476_v12 = vcombine.low %v1429_v59, %v1433_v40 }
 0x561   :  { %v13479_v0 = vcombine.high %v1430_v16, %v1434_v20  ;;  %v13478_v3 = vcombine.low %v1430_v16, %v1434_v20 }
 0x562   :  { %11091 = vmatpush1.bf16.msra.mxu0 %v13420_v22  ;;  %v1437_v22 = vld [vmem:[%s19788_s1 + $0x26d0] sm:$0xff] }
 0x563   :  { %11624 = vmatpush1.bf16.msra.mxu1 %v13422_v4  ;;  %11092 = vmatprep.subr.bf16.mxu0 %v13429_v31  ;;  %v1441_v4 = vld [vmem:[%s19788_s1 + $0x26f0] sm:$0xff]  ;;  %v1438_v31 = vld [vmem:[%s19788_s1 + $0x26d8] sm:$0xff] }
 0x564   :  { %11625 = vmatprep.subr.bf16.mxu1 %v13431_v24  ;;  %v1442_v24 = vld [vmem:[%s19788_s1 + $0x26f8] sm:$0xff]  ;;  %v13485_v34 = vcombine.high %v1437_v22, %v1441_v4  ;;  %v13484_v36 = vcombine.low %v1437_v22, %v1441_v4 }
 0x565   :  { %v13487_v38 = vcombine.high %v1438_v31, %v1442_v24  ;;  %v13486_v37 = vcombine.low %v1438_v31, %v1442_v24 }
 0x566   :  { %11093 = vmatpush1.bf16.msra.mxu0 %v13428_v10  ;;  %v1445_v10 = vld [vmem:[%s19788_s1 + $0x2710] sm:$0xff] }
 0x567   :  { %11626 = vmatpush1.bf16.msra.mxu1 %v13430_v35  ;;  %11094 = vmatprep.subr.bf16.mxu0 %v13437_v28  ;;  %v1449_v35 = vld [vmem:[%s19788_s1 + $0x2730] sm:$0xff]  ;;  %v1446_v28 = vld [vmem:[%s19788_s1 + $0x2718] sm:$0xff] }
 0x568   :  { %11627 = vmatprep.subr.bf16.mxu1 %v13439_v62  ;;  %v1450_v62 = vld [vmem:[%s19788_s1 + $0x2738] sm:$0xff]  ;;  %v13493_v14 = vcombine.high %v1445_v10, %v1449_v35  ;;  %v13492_v53 = vcombine.low %v1445_v10, %v1449_v35 }
 0x569   :  { %v13495_v42 = vcombine.high %v1446_v28, %v1450_v62  ;;  %v13494_v48 = vcombine.low %v1446_v28, %v1450_v62 }
 0x56a   :  { %11095 = vmatpush1.bf16.msra.mxu0 %v13436_v43  ;;  %v1453_v43 = vld [vmem:[%s19788_s1 + $0x2750] sm:$0xff] }
 0x56b   :  { %11628 = vmatpush1.bf16.msra.mxu1 %v13438_v45  ;;  %11096 = vmatprep.subr.bf16.mxu0 %v13445_v46  ;;  %v1457_v45 = vld [vmem:[%s19788_s1 + $0x2770] sm:$0xff]  ;;  %v1454_v46 = vld [vmem:[%s19788_s1 + $0x2758] sm:$0xff] }
 0x56c   :  { %11629 = vmatprep.subr.bf16.mxu1 %v13447_v9  ;;  %v1458_v9 = vld [vmem:[%s19788_s1 + $0x2778] sm:$0xff]  ;;  %v13501_v30 = vcombine.high %v1453_v43, %v1457_v45  ;;  %v13500_v19 = vcombine.low %v1453_v43, %v1457_v45 }
 0x56d   :  { %v13503_v51 = vcombine.high %v1454_v46, %v1458_v9  ;;  %v13502_v60 = vcombine.low %v1454_v46, %v1458_v9  ;;  %v1509_v9 = vld [vmem:[%s19788_s1 + $0x2910] sm:$0xff] }
 0x56e   :  { %11097 = vmatpush1.bf16.msra.mxu0 %v13444_v23  ;;  %v1461_v23 = vld [vmem:[%s19788_s1 + $0x2790] sm:$0xff] }
 0x56f   :  { %11630 = vmatpush1.bf16.msra.mxu1 %v13446_v52  ;;  %11098 = vmatprep.subr.bf16.mxu0 %v13453_v57  ;;  %v1465_v52 = vld [vmem:[%s19788_s1 + $0x27b0] sm:$0xff]  ;;  %v1462_v57 = vld [vmem:[%s19788_s1 + $0x2798] sm:$0xff] }
 0x570   :  { %11631 = vmatprep.subr.bf16.mxu1 %v13455_v58  ;;  %v1466_v58 = vld [vmem:[%s19788_s1 + $0x27b8] sm:$0xff]  ;;  %v13509_v41 = vcombine.high %v1461_v23, %v1465_v52  ;;  %v13508_v6 = vcombine.low %v1461_v23, %v1465_v52 }
 0x571   :  { %v13511_v33 = vcombine.high %v1462_v57, %v1466_v58  ;;  %v13510_v7 = vcombine.low %v1462_v57, %v1466_v58  ;;  %v1517_v57 = vld [vmem:[%s19788_s1 + $0x2950] sm:$0xff] }
 0x572   :  { %11099 = vmatpush1.bf16.msra.mxu0 %v13452_v26  ;;  %v1469_v26 = vld [vmem:[%s19788_s1 + $0x27d0] sm:$0xff] }
 0x573   :  { %11632 = vmatpush1.bf16.msra.mxu1 %v13454_v2  ;;  %11100 = vmatprep.subr.bf16.mxu0 %v13461_v56  ;;  %v1473_v2 = vld [vmem:[%s19788_s1 + $0x27f0] sm:$0xff]  ;;  %v1470_v56 = vld [vmem:[%s19788_s1 + $0x27d8] sm:$0xff] }
 0x574   :  { %11633 = vmatprep.subr.bf16.mxu1 %v13463_v5  ;;  %v1474_v5 = vld [vmem:[%s19788_s1 + $0x27f8] sm:$0xff]  ;;  %v13517_v17 = vcombine.high %v1469_v26, %v1473_v2  ;;  %v13516_v59 = vcombine.low %v1469_v26, %v1473_v2  ;;  %v1521_v58 = vld [vmem:[%s19788_s1 + $0x2970] sm:$0xff] }
 0x575   :  { %v13519_v13 = vcombine.high %v1470_v56, %v1474_v5  ;;  %v13518_v40 = vcombine.low %v1470_v56, %v1474_v5  ;;  %v13565_v26 = vcombine.high %v1517_v57, %v1521_v58  ;;  %v1525_v56 = vld [vmem:[%s19788_s1 + $0x2990] sm:$0xff] }
 0x576   :  { %11101 = vmatpush1.bf16.msra.mxu0 %v13460_v54  ;;  %v1477_v54 = vld [vmem:[%s19788_s1 + $0x2810] sm:$0xff] }
 0x577   :  { %11634 = vmatpush1.bf16.msra.mxu1 %v13462_v50  ;;  %11102 = vmatprep.subr.bf16.mxu0 %v13469_v18  ;;  %v1481_v50 = vld [vmem:[%s19788_s1 + $0x2830] sm:$0xff]  ;;  %v1478_v18 = vld [vmem:[%s19788_s1 + $0x2818] sm:$0xff] }
 0x578   :  { %11635 = vmatprep.subr.bf16.mxu1 %v13471_v11  ;;  %v1482_v11 = vld [vmem:[%s19788_s1 + $0x2838] sm:$0xff]  ;;  %v13525_v16 = vcombine.high %v1477_v54, %v1481_v50  ;;  %v13524_v22 = vcombine.low %v1477_v54, %v1481_v50  ;;  %v1529_v5 = vld [vmem:[%s19788_s1 + $0x29b0] sm:$0xff] }
 0x579   :  { %v13527_v20 = vcombine.high %v1478_v18, %v1482_v11  ;;  %v13526_v4 = vcombine.low %v1478_v18, %v1482_v11  ;;  %v13573_v54 = vcombine.high %v1525_v56, %v1529_v5  ;;  %v1533_v18 = vld [vmem:[%s19788_s1 + $0x29d0] sm:$0xff] }
 0x57a   :  { %11103 = vmatpush1.bf16.msra.mxu0 %v13468_v29  ;;  %v1485_v29 = vld [vmem:[%s19788_s1 + $0x2850] sm:$0xff] }
 0x57b   :  { %11636 = vmatpush1.bf16.msra.mxu1 %v13470_v21  ;;  %11104 = vmatprep.subr.bf16.mxu0 %v13477_v32  ;;  %v1489_v21 = vld [vmem:[%s19788_s1 + $0x2870] sm:$0xff]  ;;  %v1486_v32 = vld [vmem:[%s19788_s1 + $0x2858] sm:$0xff] }
 0x57c   :  { %11637 = vmatprep.subr.bf16.mxu1 %v13479_v0  ;;  %v1490_v0 = vld [vmem:[%s19788_s1 + $0x2878] sm:$0xff]  ;;  %v13533_v31 = vcombine.high %v1485_v29, %v1489_v21  ;;  %v13532_v10 = vcombine.low %v1485_v29, %v1489_v21  ;;  %v1537_v11 = vld [vmem:[%s19788_s1 + $0x29f0] sm:$0xff] }
 0x57d   :  { %v13535_v24 = vcombine.high %v1486_v32, %v1490_v0  ;;  %v13534_v35 = vcombine.low %v1486_v32, %v1490_v0  ;;  %v13581_v29 = vcombine.high %v1533_v18, %v1537_v11  ;;  %v1541_v32 = vld [vmem:[%s19788_s1 + $0x2a10] sm:$0xff] }
 0x57e   :  { %11105 = vmatpush1.bf16.msra.mxu0 %v13476_v12  ;;  %v1493_v12 = vld [vmem:[%s19788_s1 + $0x2890] sm:$0xff] }
 0x57f   :  { %11638 = vmatpush1.bf16.msra.mxu1 %v13478_v3  ;;  %11106 = vmatprep.subr.bf16.mxu0 %v13485_v34  ;;  %v1497_v3 = vld [vmem:[%s19788_s1 + $0x28b0] sm:$0xff]  ;;  %v1494_v34 = vld [vmem:[%s19788_s1 + $0x2898] sm:$0xff] }
 0x580   :  { %11639 = vmatprep.subr.bf16.mxu1 %v13487_v38  ;;  %v1498_v38 = vld [vmem:[%s19788_s1 + $0x28b8] sm:$0xff]  ;;  %v13541_v28 = vcombine.high %v1493_v12, %v1497_v3  ;;  %v1545_v0 = vld [vmem:[%s19788_s1 + $0x2a30] sm:$0xff] }
 0x581   :  { %v13543_v62 = vcombine.high %v1494_v34, %v1498_v38  ;;  %v13542_v43 = vcombine.low %v1494_v34, %v1498_v38  ;;  %v1549_v34 = vld [vmem:[%s19788_s1 + $0x2a50] sm:$0xff] }
 0x582   :  { %11107 = vmatpush1.bf16.msra.mxu0 %v13484_v36  ;;  %v1501_v36 = vld [vmem:[%s19788_s1 + $0x28d0] sm:$0xff] }
 0x583   :  { %11640 = vmatpush1.bf16.msra.mxu1 %v13486_v37  ;;  %11108 = vmatprep.subr.bf16.mxu0 %v13493_v14  ;;  %v1505_v37 = vld [vmem:[%s19788_s1 + $0x28f0] sm:$0xff]  ;;  %v1506_v14 = vld [vmem:[%s19788_s1 + $0x28f8] sm:$0xff] }
 0x584   :  { %11641 = vmatprep.subr.bf16.mxu1 %v13495_v42  ;;  %v13540_v42 = vcombine.low %v1493_v12, %v1497_v3  ;;  %v13549_v45 = vcombine.high %v1501_v36, %v1505_v37  ;;  %v13589_v12 = vcombine.high %v1541_v32, %v1545_v0  ;;  %v1553_v38 = vld [vmem:[%s19788_s1 + $0x2a70] sm:$0xff] }
 0x586   :  { %11109 = vmatpush1.bf16.msra.mxu0 %v13492_v53  ;;  %v1513_v53 = vld [vmem:[%s19788_s1 + $0x2930] sm:$0xff] }
 0x587   :  { %11642 = vmatpush1.bf16.msra.mxu1 %v13494_v48  ;;  %11110 = vmatprep.subr.bf16.mxu0 %v13501_v30  ;;  %v1514_v48 = vld [vmem:[%s19788_s1 + $0x2938] sm:$0xff]  ;;  %v13548_v30 = vcombine.low %v1501_v36, %v1505_v37  ;;  %v13557_v23 = vcombine.high %v1509_v9, %v1513_v53  ;;  %v13597_v36 = vcombine.high %v1549_v34, %v1553_v38 }
 0x588   :  { %11643 = vmatprep.subr.bf16.mxu1 %v13503_v51 }
 0x58a   :  { %11111 = vmatpush1.bf16.msra.mxu0 %v13500_v19  ;;  %v1518_v19 = vld [vmem:[%s19788_s1 + $0x2958] sm:$0xff] }
 0x58b   :  { %11644 = vmatpush1.bf16.msra.mxu1 %v13502_v60  ;;  %11112 = vmatprep.subr.bf16.mxu0 %v13509_v41  ;;  %v1522_v60 = vld [vmem:[%s19788_s1 + $0x2978] sm:$0xff]  ;;  %v13556_v41 = vcombine.low %v1509_v9, %v1513_v53 }
 0x58c   :  { %11645 = vmatprep.subr.bf16.mxu1 %v13511_v33  ;;  %v13567_v2 = vcombine.high %v1518_v19, %v1522_v60 }
 0x58e   :  { %11113 = vmatpush1.bf16.msra.mxu0 %v13508_v6  ;;  %v1526_v6 = vld [vmem:[%s19788_s1 + $0x2998] sm:$0xff] }
 0x58f   :  { %11646 = vmatpush1.bf16.msra.mxu1 %v13510_v7  ;;  %11114 = vmatprep.subr.bf16.mxu0 %v13517_v17  ;;  %v1530_v7 = vld [vmem:[%s19788_s1 + $0x29b8] sm:$0xff]  ;;  %v13564_v17 = vcombine.low %v1517_v57, %v1521_v58 }
 0x590   :  { %11647 = vmatprep.subr.bf16.mxu1 %v13519_v13  ;;  %v13566_v13 = vcombine.low %v1518_v19, %v1522_v60  ;;  %v13575_v50 = vcombine.high %v1526_v6, %v1530_v7  ;;  %v1573_v19 = vld [vmem:[%s19788_s1 + $0x2b10] sm:$0xff] }
 0x591   :  { %v1577_v60 = vld [vmem:[%s19788_s1 + $0x2b30] sm:$0xff] }
 0x592   :  { %11115 = vmatpush1.bf16.msra.mxu0 %v13516_v59  ;;  %v1534_v59 = vld [vmem:[%s19788_s1 + $0x29d8] sm:$0xff] }
 0x593   :  { %11648 = vmatpush1.bf16.msra.mxu1 %v13518_v40  ;;  %11125 = vmatprep.subr.bf16.mxu0 %v13525_v16  ;;  %v1538_v40 = vld [vmem:[%s19788_s1 + $0x29f8] sm:$0xff]  ;;  %v13572_v16 = vcombine.low %v1525_v56, %v1529_v5  ;;  %v13621_v56 = vcombine.high %v1573_v19, %v1577_v60 }
 0x594   :  { %11658 = vmatprep.subr.bf16.mxu1 %v13527_v20  ;;  %v13574_v20 = vcombine.low %v1526_v6, %v1530_v7  ;;  %v13583_v21 = vcombine.high %v1534_v59, %v1538_v40  ;;  %v1581_v6 = vld [vmem:[%s19788_s1 + $0x2b50] sm:$0xff] }
 0x595   :  { %11117 = vmatmul.mubr.bf16.vlgmr.msra.gmra.mrb[4].mxu0 %v16491_v27  ;;  %v1585_v7 = vld [vmem:[%s19788_s1 + $0x2b70] sm:$0xff] }
 0x596   :  { %11126 = vmatpush1.bf16.msra.mxu0 %v13524_v22  ;;  %11650 = vmatmul.mubr.bf16.vlgmr.msra.gmra.mrb[4].mxu1 %v16491_v27  ;;  %v1502_v27 = vld [vmem:[%s19788_s1 + $0x28d8] sm:$0xff] }
 0x597   :  { %11659 = vmatpush1.bf16.msra.mxu1 %v13526_v4  ;;  %11127 = vmatprep.subr.bf16.mxu0 %v13533_v31  ;;  %v13551_v46 = vcombine.high %v1502_v27, %v1506_v14  ;;  %v13550_v51 = vcombine.low %v1502_v27, %v1506_v14  ;;  %v1542_v22 = vld [vmem:[%s19788_s1 + $0x2a18] sm:$0xff]  ;;  %v13580_v31 = vcombine.low %v1533_v18, %v1537_v11  ;;  %v1557_v27 = vld [vmem:[%s19788_s1 + $0x2a90] sm:$0xff] }
 0x598   :  { %11660 = vmatprep.subr.bf16.mxu1 %v13535_v24  ;;  %11157 = vmatprep.mubr.bf16.mxu0 %v16505_v39  ;;  %v1546_v4 = vld [vmem:[%s19788_s1 + $0x2a38] sm:$0xff]  ;;  %v13582_v24 = vcombine.low %v1534_v59, %v1538_v40  ;;  %v1561_v14 = vld [vmem:[%s19788_s1 + $0x2ab0] sm:$0xff]  ;;  %v13629_v18 = vcombine.high %v1581_v6, %v1585_v7 }
 0x599   :  { %11690 = vmatprep.mubr.bf16.mxu1 %v16505_v39  ;;  %v1510_v39 = vld [vmem:[%s19788_s1 + $0x2918] sm:$0xff]  ;;  %v13591_v3 = vcombine.high %v1542_v22, %v1546_v4  ;;  %v13605_v9 = vcombine.high %v1557_v27, %v1561_v14  ;;  %v1589_v59 = vld [vmem:[%s19788_s1 + $0x2b90] sm:$0xff] }
 0x59a   :  { %11128 = vmatpush1.bf16.msra.mxu0 %v13532_v10  ;;  %v13559_v52 = vcombine.high %v1510_v39, %v1514_v48  ;;  %v13558_v33 = vcombine.low %v1510_v39, %v1514_v48  ;;  %v1550_v10 = vld [vmem:[%s19788_s1 + $0x2a58] sm:$0xff]  ;;  %v1565_v39 = vld [vmem:[%s19788_s1 + $0x2ad0] sm:$0xff] }
 0x59b   :  { %11661 = vmatpush1.bf16.msra.mxu1 %v13534_v35  ;;  %11129 = vmatprep.subr.bf16.mxu0 %v13541_v28  ;;  %v1554_v35 = vld [vmem:[%s19788_s1 + $0x2a78] sm:$0xff]  ;;  %v13588_v28 = vcombine.low %v1541_v32, %v1545_v0  ;;  %v1569_v48 = vld [vmem:[%s19788_s1 + $0x2af0] sm:$0xff] }
 0x59c   :  { %11662 = vmatprep.subr.bf16.mxu1 %v13543_v62  ;;  %v13590_v62 = vcombine.low %v1542_v22, %v1546_v4  ;;  %v13599_v37 = vcombine.high %v1550_v10, %v1554_v35  ;;  %v13613_v57 = vcombine.high %v1565_v39, %v1569_v48  ;;  %v1593_v40 = vld [vmem:[%s19788_s1 + $0x2bb0] sm:$0xff] }
 0x59d   :  { %v13637_v32 = vcombine.high %v1589_v59, %v1593_v40  ;;  %v1597_v22 = vld [vmem:[%s19788_s1 + $0x2bd0] sm:$0xff] }
 0x59e   :  { %11130 = vmatpush1.bf16.msra.mxu0 %v13540_v42  ;;  %v1558_v42 = vld [vmem:[%s19788_s1 + $0x2a98] sm:$0xff]  ;;  %v1601_v4 = vld [vmem:[%s19788_s1 + $0x2bf0] sm:$0xff] }
 0x59f   :  { %11663 = vmatpush1.bf16.msra.mxu1 %v13542_v43  ;;  %11131 = vmatprep.subr.bf16.mxu0 %v13549_v45  ;;  %v1562_v43 = vld [vmem:[%s19788_s1 + $0x2ab8] sm:$0xff]  ;;  %v13596_v45 = vcombine.low %v1549_v34, %v1553_v38  ;;  %v13645_v34 = vcombine.high %v1597_v22, %v1601_v4 }
 0x5a0   :  { %11664 = vmatprep.subr.bf16.mxu1 %v13551_v46  ;;  %v13598_v46 = vcombine.low %v1550_v10, %v1554_v35  ;;  %v13607_v53 = vcombine.high %v1558_v42, %v1562_v43  ;;  %v1605_v10 = vld [vmem:[%s19788_s1 + $0x2c10] sm:$0xff] }
 0x5a1   :  { %v1609_v35 = vld [vmem:[%s19788_s1 + $0x2c30] sm:$0xff] }
 0x5a2   :  { %11132 = vmatpush1.bf16.msra.mxu0 %v13548_v30  ;;  %v1566_v30 = vld [vmem:[%s19788_s1 + $0x2ad8] sm:$0xff] }
 0x5a3   :  { %11665 = vmatpush1.bf16.msra.mxu1 %v13550_v51  ;;  %11133 = vmatprep.subr.bf16.mxu0 %v13557_v23  ;;  %v1570_v51 = vld [vmem:[%s19788_s1 + $0x2af8] sm:$0xff]  ;;  %v13604_v23 = vcombine.low %v1557_v27, %v1561_v14  ;;  %v13653_v27 = vcombine.high %v1605_v10, %v1609_v35 }
 0x5a4   :  { %11666 = vmatprep.subr.bf16.mxu1 %v13559_v52  ;;  %v13606_v52 = vcombine.low %v1558_v42, %v1562_v43  ;;  %v13615_v58 = vcombine.high %v1566_v30, %v1570_v51  ;;  %v1613_v42 = vld [vmem:[%s19788_s1 + $0x2c50] sm:$0xff] }
 0x5a5   :  { %v1617_v43 = vld [vmem:[%s19788_s1 + $0x2c70] sm:$0xff] }
 0x5a6   :  { %11134 = vmatpush1.bf16.msra.mxu0 %v13556_v41  ;;  %v1574_v41 = vld [vmem:[%s19788_s1 + $0x2b18] sm:$0xff] }
 0x5a7   :  { %11667 = vmatpush1.bf16.msra.mxu1 %v13558_v33  ;;  %11135 = vmatprep.subr.bf16.mxu0 %v13565_v26  ;;  %v1578_v33 = vld [vmem:[%s19788_s1 + $0x2b38] sm:$0xff]  ;;  %v13612_v26 = vcombine.low %v1565_v39, %v1569_v48  ;;  %v13661_v39 = vcombine.high %v1613_v42, %v1617_v43 }
 0x5a8   :  { %11668 = vmatprep.subr.bf16.mxu1 %v13567_v2  ;;  %v13614_v2 = vcombine.low %v1566_v30, %v1570_v51  ;;  %v13623_v5 = vcombine.high %v1574_v41, %v1578_v33  ;;  %v1621_v30 = vld [vmem:[%s19788_s1 + $0x2c90] sm:$0xff] }
 0x5a9   :  { %v1625_v51 = vld [vmem:[%s19788_s1 + $0x2cb0] sm:$0xff] }
 0x5aa   :  { %11136 = vmatpush1.bf16.msra.mxu0 %v13564_v17  ;;  %v1582_v17 = vld [vmem:[%s19788_s1 + $0x2b58] sm:$0xff] }
 0x5ab   :  { %11669 = vmatpush1.bf16.msra.mxu1 %v13566_v13  ;;  %11137 = vmatprep.subr.bf16.mxu0 %v13573_v54  ;;  %v1586_v13 = vld [vmem:[%s19788_s1 + $0x2b78] sm:$0xff]  ;;  %v13620_v54 = vcombine.low %v1573_v19, %v1577_v60  ;;  %v13669_v19 = vcombine.high %v1621_v30, %v1625_v51 }
 0x5ac   :  { %11670 = vmatprep.subr.bf16.mxu1 %v13575_v50  ;;  %v13622_v50 = vcombine.low %v1574_v41, %v1578_v33  ;;  %v13631_v11 = vcombine.high %v1582_v17, %v1586_v13  ;;  %v1629_v41 = vld [vmem:[%s19788_s1 + $0x2cd0] sm:$0xff] }
 0x5ad   :  { %v1633_v33 = vld [vmem:[%s19788_s1 + $0x2cf0] sm:$0xff] }
 0x5ae   :  { %11138 = vmatpush1.bf16.msra.mxu0 %v13572_v16  ;;  %v1590_v16 = vld [vmem:[%s19788_s1 + $0x2b98] sm:$0xff] }
 0x5af   :  { %11671 = vmatpush1.bf16.msra.mxu1 %v13574_v20  ;;  %11139 = vmatprep.subr.bf16.mxu0 %v13581_v29  ;;  %v1594_v20 = vld [vmem:[%s19788_s1 + $0x2bb8] sm:$0xff]  ;;  %v13628_v29 = vcombine.low %v1581_v6, %v1585_v7  ;;  %v1637_v7 = vld [vmem:[%s19788_s1 + $0x2d10] sm:$0xff] }
 0x5b0   :  { %11672 = vmatprep.subr.bf16.mxu1 %v13583_v21  ;;  %v13630_v21 = vcombine.low %v1582_v17, %v1586_v13  ;;  %v13639_v0 = vcombine.high %v1590_v16, %v1594_v20  ;;  %v1641_v17 = vld [vmem:[%s19788_s1 + $0x2d30] sm:$0xff]  ;;  %v1642_v13 = vld [vmem:[%s19788_s1 + $0x2d38] sm:$0xff] }
 0x5b2   :  { %11140 = vmatpush1.bf16.msra.mxu0 %v13580_v31  ;;  %v1598_v31 = vld [vmem:[%s19788_s1 + $0x2bd8] sm:$0xff] }
 0x5b3   :  { %11673 = vmatpush1.bf16.msra.mxu1 %v13582_v24  ;;  %11141 = vmatprep.subr.bf16.mxu0 %v13589_v12  ;;  %v1602_v24 = vld [vmem:[%s19788_s1 + $0x2bf8] sm:$0xff]  ;;  %v13636_v12 = vcombine.low %v1589_v59, %v1593_v40  ;;  %v1645_v59 = vld [vmem:[%s19788_s1 + $0x2d50] sm:$0xff] }
 0x5b4   :  { %11674 = vmatprep.subr.bf16.mxu1 %v13591_v3  ;;  %v13638_v3 = vcombine.low %v1590_v16, %v1594_v20  ;;  %v13647_v38 = vcombine.high %v1598_v31, %v1602_v24  ;;  %v1649_v40 = vld [vmem:[%s19788_s1 + $0x2d70] sm:$0xff]  ;;  %v1646_v16 = vld [vmem:[%s19788_s1 + $0x2d58] sm:$0xff] }
 0x5b5   :  { %v1650_v20 = vld [vmem:[%s19788_s1 + $0x2d78] sm:$0xff] }
 0x5b6   :  { %11142 = vmatpush1.bf16.msra.mxu0 %v13588_v28  ;;  %v1606_v28 = vld [vmem:[%s19788_s1 + $0x2c18] sm:$0xff] }
 0x5b7   :  { %11675 = vmatpush1.bf16.msra.mxu1 %v13590_v62  ;;  %11143 = vmatprep.subr.bf16.mxu0 %v13597_v36  ;;  %v1610_v62 = vld [vmem:[%s19788_s1 + $0x2c38] sm:$0xff]  ;;  %v13644_v36 = vcombine.low %v1597_v22, %v1601_v4  ;;  %v1653_v22 = vld [vmem:[%s19788_s1 + $0x2d90] sm:$0xff] }
 0x5b8   :  { %11676 = vmatprep.subr.bf16.mxu1 %v13599_v37  ;;  %v13646_v37 = vcombine.low %v1598_v31, %v1602_v24  ;;  %v13655_v14 = vcombine.high %v1606_v28, %v1610_v62  ;;  %v1657_v4 = vld [vmem:[%s19788_s1 + $0x2db0] sm:$0xff]  ;;  %v1654_v31 = vld [vmem:[%s19788_s1 + $0x2d98] sm:$0xff] }
 0x5b9   :  { %v1658_v24 = vld [vmem:[%s19788_s1 + $0x2db8] sm:$0xff] }
 0x5ba   :  { %11144 = vmatpush1.bf16.msra.mxu0 %v13596_v45  ;;  %v1614_v45 = vld [vmem:[%s19788_s1 + $0x2c58] sm:$0xff] }
 0x5bb   :  { %11677 = vmatpush1.bf16.msra.mxu1 %v13598_v46  ;;  %11145 = vmatprep.subr.bf16.mxu0 %v13605_v9  ;;  %v1618_v46 = vld [vmem:[%s19788_s1 + $0x2c78] sm:$0xff]  ;;  %v13652_v9 = vcombine.low %v1605_v10, %v1609_v35  ;;  %v1661_v10 = vld [vmem:[%s19788_s1 + $0x2dd0] sm:$0xff] }
 0x5bc   :  { %11678 = vmatprep.subr.bf16.mxu1 %v13607_v53  ;;  %v13654_v53 = vcombine.low %v1606_v28, %v1610_v62  ;;  %v13663_v48 = vcombine.high %v1614_v45, %v1618_v46  ;;  %v1665_v35 = vld [vmem:[%s19788_s1 + $0x2df0] sm:$0xff]  ;;  %v1662_v28 = vld [vmem:[%s19788_s1 + $0x2dd8] sm:$0xff] }
 0x5bd   :  { %v1666_v62 = vld [vmem:[%s19788_s1 + $0x2df8] sm:$0xff] }
 0x5be   :  { %11146 = vmatpush1.bf16.msra.mxu0 %v13604_v23  ;;  %v1622_v23 = vld [vmem:[%s19788_s1 + $0x2c98] sm:$0xff] }
 0x5bf   :  { %11679 = vmatpush1.bf16.msra.mxu1 %v13606_v52  ;;  %11147 = vmatprep.subr.bf16.mxu0 %v13613_v57  ;;  %v1626_v52 = vld [vmem:[%s19788_s1 + $0x2cb8] sm:$0xff]  ;;  %v13660_v57 = vcombine.low %v1613_v42, %v1617_v43  ;;  %v1669_v42 = vld [vmem:[%s19788_s1 + $0x2e10] sm:$0xff] }
 0x5c0   :  { %11680 = vmatprep.subr.bf16.mxu1 %v13615_v58  ;;  %v13662_v58 = vcombine.low %v1614_v45, %v1618_v46  ;;  %v13671_v60 = vcombine.high %v1622_v23, %v1626_v52  ;;  %v1673_v43 = vld [vmem:[%s19788_s1 + $0x2e30] sm:$0xff]  ;;  %v1670_v45 = vld [vmem:[%s19788_s1 + $0x2e18] sm:$0xff] }
 0x5c1   :  { %v1674_v46 = vld [vmem:[%s19788_s1 + $0x2e38] sm:$0xff] }
 0x5c2   :  { %11148 = vmatpush1.bf16.msra.mxu0 %v13612_v26  ;;  %v1634_v26 = vld [vmem:[%s19788_s1 + $0x2cf8] sm:$0xff] }
 0x5c3   :  { %11681 = vmatpush1.bf16.msra.mxu1 %v13614_v2  ;;  %11149 = vmatprep.subr.bf16.mxu0 %v13621_v56  ;;  %v13668_v2 = vcombine.low %v1621_v30, %v1625_v51  ;;  %v13670_v56 = vcombine.low %v1622_v23, %v1626_v52  ;;  %v1677_v30 = vld [vmem:[%s19788_s1 + $0x2e50] sm:$0xff]  ;;  %v1678_v23 = vld [vmem:[%s19788_s1 + $0x2e58] sm:$0xff] }
 0x5c4   :  { %11682 = vmatprep.subr.bf16.mxu1 %v13623_v5  ;;  %v13677_v5 = vcombine.high %v1629_v41, %v1633_v33  ;;  %v1681_v51 = vld [vmem:[%s19788_s1 + $0x2e70] sm:$0xff]  ;;  %v1682_v52 = vld [vmem:[%s19788_s1 + $0x2e78] sm:$0xff] }
 0x5c6   :  { %11150 = vmatpush1.bf16.msra.mxu0 %v13620_v54  ;;  %v13676_v54 = vcombine.low %v1629_v41, %v1633_v33  ;;  %v1685_v41 = vld [vmem:[%s19788_s1 + $0x2e90] sm:$0xff] }
 0x5c7   :  { %11683 = vmatpush1.bf16.msra.mxu1 %v13622_v50  ;;  %11151 = vmatprep.subr.bf16.mxu0 %v13629_v18  ;;  %v13685_v18 = vcombine.high %v1637_v7, %v1641_v17  ;;  %v1689_v33 = vld [vmem:[%s19788_s1 + $0x2eb0] sm:$0xff] }
 0x5c8   :  { %11684 = vmatprep.subr.bf16.mxu1 %v13631_v11 }
 0x5ca   :  { %11152 = vmatpush1.bf16.msra.mxu0 %v13628_v29  ;;  %v13684_v29 = vcombine.low %v1637_v7, %v1641_v17  ;;  %v1693_v7 = vld [vmem:[%s19788_s1 + $0x2ed0] sm:$0xff] }
 0x5cb   :  { %11685 = vmatpush1.bf16.msra.mxu1 %v13630_v21  ;;  %11153 = vmatprep.subr.bf16.mxu0 %v13637_v32  ;;  %v13693_v32 = vcombine.high %v1645_v59, %v1649_v40  ;;  %v1697_v17 = vld [vmem:[%s19788_s1 + $0x2ef0] sm:$0xff] }
 0x5cc   :  { %11686 = vmatprep.subr.bf16.mxu1 %v13639_v0  ;;  %v13695_v0 = vcombine.high %v1646_v16, %v1650_v20 }
 0x5ce   :  { %11154 = vmatpush1.bf16.msra.mxu0 %v13636_v12  ;;  %v13692_v12 = vcombine.low %v1645_v59, %v1649_v40  ;;  %v1701_v59 = vld [vmem:[%s19788_s1 + $0x2f10] sm:$0xff] }
 0x5cf   :  { %11687 = vmatpush1.bf16.msra.mxu1 %v13638_v3  ;;  %11155 = vmatprep.subr.bf16.mxu0 %v13645_v34  ;;  %v13694_v3 = vcombine.low %v1646_v16, %v1650_v20  ;;  %v13701_v34 = vcombine.high %v1653_v22, %v1657_v4  ;;  %v1705_v40 = vld [vmem:[%s19788_s1 + $0x2f30] sm:$0xff]  ;;  %v1702_v16 = vld [vmem:[%s19788_s1 + $0x2f18] sm:$0xff] }
 0x5d0   :  { %11688 = vmatprep.subr.bf16.mxu1 %v13647_v38  ;;  %v13703_v38 = vcombine.high %v1654_v31, %v1658_v24  ;;  %v1706_v20 = vld [vmem:[%s19788_s1 + $0x2f38] sm:$0xff] }
 0x5d2   :  { %11156 = vmatpush1.bf16.msra.mxu0 %v13644_v36  ;;  %v13700_v36 = vcombine.low %v1653_v22, %v1657_v4  ;;  %v1709_v22 = vld [vmem:[%s19788_s1 + $0x2f50] sm:$0xff] }
 0x5d3   :  { %11689 = vmatpush1.bf16.msra.mxu1 %v13646_v37  ;;  %11166 = vmatprep.subr.bf16.mxu0 %v13653_v27  ;;  %v13702_v37 = vcombine.low %v1654_v31, %v1658_v24  ;;  %v13709_v27 = vcombine.high %v1661_v10, %v1665_v35  ;;  %v1713_v4 = vld [vmem:[%s19788_s1 + $0x2f70] sm:$0xff]  ;;  %v1710_v31 = vld [vmem:[%s19788_s1 + $0x2f58] sm:$0xff] }
 0x5d4   :  { %11699 = vmatprep.subr.bf16.mxu1 %v13655_v14  ;;  %v13711_v14 = vcombine.high %v1662_v28, %v1666_v62  ;;  %v1714_v24 = vld [vmem:[%s19788_s1 + $0x2f78] sm:$0xff] }
 0x5d5   :  { %11158 = vmatmul.mubr.bf16.vlgmr.msra.gmra.mrb[4].mxu0 %v16702_v15 }
 0x5d6   :  { %11167 = vmatpush1.bf16.msra.mxu0 %v13652_v9  ;;  %11691 = vmatmul.mubr.bf16.vlgmr.msra.gmra.mrb[4].mxu1 %v16702_v15  ;;  %v1630_v15 = vld [vmem:[%s19788_s1 + $0x2cd8] sm:$0xff]  ;;  %v13708_v9 = vcombine.low %v1661_v10, %v1665_v35  ;;  %v1717_v10 = vld [vmem:[%s19788_s1 + $0x2f90] sm:$0xff] }
 0x5d7   :  { %11700 = vmatpush1.bf16.msra.mxu1 %v13654_v53  ;;  %11168 = vmatprep.subr.bf16.mxu0 %v13661_v39  ;;  %v13679_v6 = vcombine.high %v1630_v15, %v1634_v26  ;;  %v13678_v50 = vcombine.low %v1630_v15, %v1634_v26  ;;  %v13710_v53 = vcombine.low %v1662_v28, %v1666_v62  ;;  %v1686_v15 = vld [vmem:[%s19788_s1 + $0x2e98] sm:$0xff]  ;;  %v1721_v35 = vld [vmem:[%s19788_s1 + $0x2fb0] sm:$0xff] }
 0x5d8   :  { %11701 = vmatprep.subr.bf16.mxu1 %v13663_v48  ;;  %11198 = vmatprep.mubr.bf16.mxu0 %v16716_v61  ;;  %v13717_v39 = vcombine.high %v1669_v42, %v1673_v43  ;;  %v13719_v48 = vcombine.high %v1670_v45, %v1674_v46  ;;  %v1690_v26 = vld [vmem:[%s19788_s1 + $0x2eb8] sm:$0xff] }
 0x5d9   :  { %11731 = vmatprep.mubr.bf16.mxu1 %v16716_v61  ;;  %v1638_v61 = vld [vmem:[%s19788_s1 + $0x2d18] sm:$0xff] }
 0x5da   :  { %11169 = vmatpush1.bf16.msra.mxu0 %v13660_v57  ;;  %v13687_v11 = vcombine.high %v1638_v61, %v1642_v13  ;;  %v13686_v21 = vcombine.low %v1638_v61, %v1642_v13  ;;  %v13716_v57 = vcombine.low %v1669_v42, %v1673_v43  ;;  %v1694_v61 = vld [vmem:[%s19788_s1 + $0x2ed8] sm:$0xff]  ;;  %v1725_v42 = vld [vmem:[%s19788_s1 + $0x2fd0] sm:$0xff] }
 0x5db   :  { %11702 = vmatpush1.bf16.msra.mxu1 %v13662_v58  ;;  %11170 = vmatprep.subr.bf16.mxu0 %v13669_v19  ;;  %v13718_v58 = vcombine.low %v1670_v45, %v1674_v46  ;;  %v13725_v19 = vcombine.high %v1677_v30, %v1681_v51  ;;  %v1698_v13 = vld [vmem:[%s19788_s1 + $0x2ef8] sm:$0xff]  ;;  %v1729_v43 = vld [vmem:[%s19788_s1 + $0x2ff0] sm:$0xff] }
 0x5dc   :  { %11703 = vmatprep.subr.bf16.mxu1 %v13671_v60  ;;  %v13727_v60 = vcombine.high %v1678_v23, %v1682_v52  ;;  %v1718_v28 = vld [vmem:[%s19788_s1 + $0x2f98] sm:$0xff] }
 0x5dd   :  { %v1722_v62 = vld [vmem:[%s19788_s1 + $0x2fb8] sm:$0xff] }
 0x5de   :  { %11171 = vmatpush1.bf16.msra.mxu0 %v13668_v2  ;;  %v13724_v2 = vcombine.low %v1677_v30, %v1681_v51  ;;  %v1726_v45 = vld [vmem:[%s19788_s1 + $0x2fd8] sm:$0xff]  ;;  %v1733_v30 = vld [vmem:[%s19788_s1 + $0x3010] sm:$0xff] }
 0x5df   :  { %11704 = vmatpush1.bf16.msra.mxu1 %v13670_v56  ;;  %11172 = vmatprep.subr.bf16.mxu0 %v13677_v5  ;;  %v13726_v56 = vcombine.low %v1678_v23, %v1682_v52  ;;  %v13733_v5 = vcombine.high %v1685_v41, %v1689_v33  ;;  %v1730_v46 = vld [vmem:[%s19788_s1 + $0x2ff8] sm:$0xff]  ;;  %v1737_v51 = vld [vmem:[%s19788_s1 + $0x3030] sm:$0xff] }
 0x5e0   :  { %11705 = vmatprep.subr.bf16.mxu1 %v13679_v6  ;;  %v13735_v6 = vcombine.high %v1686_v15, %v1690_v26  ;;  %v1734_v23 = vld [vmem:[%s19788_s1 + $0x3018] sm:$0xff] }
 0x5e1   :  { %v1738_v52 = vld [vmem:[%s19788_s1 + $0x3038] sm:$0xff] }
 0x5e2   :  { %11173 = vmatpush1.bf16.msra.mxu0 %v13676_v54  ;;  %v13732_v54 = vcombine.low %v1685_v41, %v1689_v33  ;;  %v1741_v41 = vld [vmem:[%s19788_s1 + $0x3050] sm:$0xff] }
 0x5e3   :  { %11706 = vmatpush1.bf16.msra.mxu1 %v13678_v50  ;;  %11174 = vmatprep.subr.bf16.mxu0 %v13685_v18  ;;  %v13734_v50 = vcombine.low %v1686_v15, %v1690_v26  ;;  %v13741_v18 = vcombine.high %v1693_v7, %v1697_v17  ;;  %v1745_v33 = vld [vmem:[%s19788_s1 + $0x3070] sm:$0xff]  ;;  %v1742_v15 = vld [vmem:[%s19788_s1 + $0x3058] sm:$0xff] }
 0x5e4   :  { %11707 = vmatprep.subr.bf16.mxu1 %v13687_v11  ;;  %v13743_v11 = vcombine.high %v1694_v61, %v1698_v13  ;;  %v1746_v26 = vld [vmem:[%s19788_s1 + $0x3078] sm:$0xff] }
 0x5e6   :  { %11175 = vmatpush1.bf16.msra.mxu0 %v13684_v29  ;;  %v13740_v29 = vcombine.low %v1693_v7, %v1697_v17  ;;  %v1749_v7 = vld [vmem:[%s19788_s1 + $0x3090] sm:$0xff] }
 0x5e7   :  { %11708 = vmatpush1.bf16.msra.mxu1 %v13686_v21  ;;  %11176 = vmatprep.subr.bf16.mxu0 %v13693_v32  ;;  %v13742_v21 = vcombine.low %v1694_v61, %v1698_v13  ;;  %v13749_v32 = vcombine.high %v1701_v59, %v1705_v40  ;;  %v1753_v17 = vld [vmem:[%s19788_s1 + $0x30b0] sm:$0xff]  ;;  %v1750_v61 = vld [vmem:[%s19788_s1 + $0x3098] sm:$0xff] }
 0x5e8   :  { %11709 = vmatprep.subr.bf16.mxu1 %v13695_v0  ;;  %v13751_v0 = vcombine.high %v1702_v16, %v1706_v20  ;;  %v1754_v13 = vld [vmem:[%s19788_s1 + $0x30b8] sm:$0xff] }
 0x5ea   :  { %11177 = vmatpush1.bf16.msra.mxu0 %v13692_v12  ;;  %v13748_v12 = vcombine.low %v1701_v59, %v1705_v40  ;;  %v1757_v59 = vld [vmem:[%s19788_s1 + $0x30d0] sm:$0xff] }
 0x5eb   :  { %11710 = vmatpush1.bf16.msra.mxu1 %v13694_v3  ;;  %11178 = vmatprep.subr.bf16.mxu0 %v13701_v34  ;;  %v13750_v3 = vcombine.low %v1702_v16, %v1706_v20  ;;  %v13757_v34 = vcombine.high %v1709_v22, %v1713_v4  ;;  %v1761_v40 = vld [vmem:[%s19788_s1 + $0x30f0] sm:$0xff]  ;;  %v1771_v16 = vsub.s32 1, %v14417_v44  ;;  %v1762_v20 = vld [vmem:[%s19788_s1 + $0x30f8] sm:$0xff] }
 0x5ec   :  { %11711 = vmatprep.subr.bf16.mxu1 %v13703_v38  ;;  %v13759_v38 = vcombine.high %v1710_v31, %v1714_v24 }
 0x5ee   :  { %11179 = vmatpush1.bf16.msra.mxu0 %v13700_v36  ;;  %v13756_v36 = vcombine.low %v1709_v22, %v1713_v4  ;;  %v13805_v22 = vcombine.high %v1757_v59, %v1761_v40 }
 0x5ef   :  { %11712 = vmatpush1.bf16.msra.mxu1 %v13702_v37  ;;  %11180 = vmatprep.subr.bf16.mxu0 %v13709_v27  ;;  %v13758_v37 = vcombine.low %v1710_v31, %v1714_v24  ;;  %v13765_v27 = vcombine.high %v1717_v10, %v1721_v35  ;;  %v11805_v31 = vld [vmem:[%s19790_s3 + $0x80] sm:$0xff] }
 0x5f0   :  { %11713 = vmatprep.subr.bf16.mxu1 %v13711_v14  ;;  %v13767_v14 = vcombine.high %v1718_v28, %v1722_v62 }
 0x5f2   :  { %11181 = vmatpush1.bf16.msra.mxu0 %v13708_v9  ;;  %v13764_v9 = vcombine.low %v1717_v10, %v1721_v35 }
 0x5f3   :  { %11714 = vmatpush1.bf16.msra.mxu1 %v13710_v53  ;;  %11182 = vmatprep.subr.bf16.mxu0 %v13717_v39  ;;  %v13766_v53 = vcombine.low %v1718_v28, %v1722_v62  ;;  %v13773_v39 = vcombine.high %v1725_v42, %v1729_v43  ;;  %v11789_v28 = vld [vmem:[%s19790_s3] sm:$0xff]  ;;  %v11790_v62 = vld [vmem:[%s19790_s3 + $0x8] sm:$0xff] }
 0x5f4   :  { %11715 = vmatprep.subr.bf16.mxu1 %v13719_v48  ;;  %v13775_v48 = vcombine.high %v1726_v45, %v1730_v46 }
 0x5f6   :  { %11183 = vmatpush1.bf16.msra.mxu0 %v13716_v57  ;;  %v13772_v57 = vcombine.low %v1725_v42, %v1729_v43  ;;  %v11807_v42 = vld [vmem:[%s19790_s3 + $0x90] sm:$0xff]  ;;  %v11808_v43 = vld [vmem:[%s19790_s3 + $0x98] sm:$0xff] }
 0x5f7   :  { %11716 = vmatpush1.bf16.msra.mxu1 %v13718_v58  ;;  %11184 = vmatprep.subr.bf16.mxu0 %v13725_v19  ;;  %v13774_v58 = vcombine.low %v1726_v45, %v1730_v46  ;;  %v13781_v19 = vcombine.high %v1733_v30, %v1737_v51  ;;  %v13955_v46 = vpack.c.bf16 %v11790_v62, %v11789_v28  ;;  %v11848_v28 = vld [vmem:[%s19790_s3 + $0x1d8] sm:$0xff] }
 0x5f8   :  { %11717 = vmatprep.subr.bf16.mxu1 %v13727_v60  ;;  %v13783_v60 = vcombine.high %v1734_v23, %v1738_v52 }
 0x5fa   :  { %11185 = vmatpush1.bf16.msra.mxu0 %v13724_v2  ;;  %v13780_v2 = vcombine.low %v1733_v30, %v1737_v51  ;;  %v13957_v30 = vpack.c.bf16 %v11808_v43, %v11807_v42  ;;  %v11824_v51 = vld [vmem:[%s19790_s3 + $0x118] sm:$0xff]  ;;  %v11831_v42 = vld [vmem:[%s19790_s3 + $0x150] sm:$0xff] }
 0x5fb   :  { %11718 = vmatpush1.bf16.msra.mxu1 %v13726_v56  ;;  %11186 = vmatprep.subr.bf16.mxu0 %v13733_v5  ;;  %v13782_v56 = vcombine.low %v1734_v23, %v1738_v52  ;;  %v13789_v5 = vcombine.high %v1741_v41, %v1745_v33  ;;  %v11809_v23 = vld [vmem:[%s19790_s3 + $0xa0] sm:$0xff]  ;;  %v11810_v52 = vld [vmem:[%s19790_s3 + $0xa8] sm:$0xff] }
 0x5fc   :  { %11719 = vmatprep.subr.bf16.mxu1 %v13735_v6  ;;  %v13791_v6 = vcombine.high %v1742_v15, %v1746_v26 }
 0x5fe   :  { %11187 = vmatpush1.bf16.msra.mxu0 %v13732_v54  ;;  %v13788_v54 = vcombine.low %v1741_v41, %v1745_v33 }
 0x5ff   :  { %11720 = vmatpush1.bf16.msra.mxu1 %v13734_v50  ;;  %11188 = vmatprep.subr.bf16.mxu0 %v13741_v18  ;;  %v13790_v50 = vcombine.low %v1742_v15, %v1746_v26  ;;  %v13797_v18 = vcombine.high %v1749_v7, %v1753_v17  ;;  %v13961_v26 = vpack.c.bf16 %v11810_v52, %v11809_v23  ;;  %v11802_v23 = vld [vmem:[%s19790_s3 + $0x68] sm:$0xff]  ;;  %v11833_v52 = vld [vmem:[%s19790_s3 + $0x160] sm:$0xff] }
 0x600   :  { %11721 = vmatprep.subr.bf16.mxu1 %v13743_v11  ;;  %v13799_v11 = vcombine.high %v1750_v61, %v1754_v13 }
 0x602   :  { %11189 = vmatpush1.bf16.msra.mxu0 %v13740_v29  ;;  %v19363_v29 = vld [vmem:[%s19789_s2] sm:$0xff] }
 0x603   :  { %11722 = vmatpush1.bf16.msra.mxu1 %v13742_v21  ;;  %11190 = vmatprep.subr.bf16.mxu0 %v13749_v32  ;;  %v1779_v21 = vsub.s32 3, %v14417_v44  ;;  %v13796_v32 = vcombine.low %v1749_v7, %v1753_v17  ;;  %v1772_v24 = vrot.slane %v19363_v29, %v1771_v16  ;;  %v11811_v7 = vld [vmem:[%s19790_s3 + $0xb0] sm:$0xff]  ;;  %v11812_v17 = vld [vmem:[%s19790_s3 + $0xb8] sm:$0xff] }
 0x604   :  { %11723 = vmatprep.subr.bf16.mxu1 %v13751_v0  ;;  %v13798_v0 = vcombine.low %v1750_v61, %v1754_v13  ;;  %v11843_v61 = vld [vmem:[%s19790_s3 + $0x1b0] sm:$0xff]  ;;  %v11844_v13 = vld [vmem:[%s19790_s3 + $0x1b8] sm:$0xff] }
 0x605   :  { %v13997_v16 = vpack.c.bf16 %v11844_v13, %v11843_v61  ;;  %v11836_v13 = vld [vmem:[%s19790_s3 + $0x178] sm:$0xff] }
 0x606   :  { %11191 = vmatpush1.bf16.msra.mxu0 %v13748_v12  ;;  %v11837_v12 = vld [vmem:[%s19790_s3 + $0x180] sm:$0xff] }
 0x607   :  { %11724 = vmatpush1.bf16.msra.mxu1 %v13750_v3  ;;  %11192 = vmatprep.subr.bf16.mxu0 %v13757_v34  ;;  %v11838_v3 = vld [vmem:[%s19790_s3 + $0x188] sm:$0xff]  ;;  %v1780_v34 = vrot.slane %v19363_v29, %v1779_v21 }
 0x608   :  { %11725 = vmatprep.subr.bf16.mxu1 %v13759_v38  ;;  %v13804_v38 = vcombine.low %v1757_v59, %v1761_v40  ;;  %v11796_v59 = vld [vmem:[%s19790_s3 + $0x38] sm:$0xff]  ;;  %v11827_v40 = vld [vmem:[%s19790_s3 + $0x130] sm:$0xff]  ;;  %v11814_v21 = vld [vmem:[%s19790_s3 + $0xc8] sm:$0xff] }
 0x609   :  { %v14084_v45 = vadd.f32 %v17641_v55, %v1780_v34  ;;  %v11792_v55 = vld [vmem:[%s19790_s3 + $0x18] sm:$0xff]  ;;  %v11830_v34 = vld [vmem:[%s19790_s3 + $0x148] sm:$0xff] }
 0x60a   :  { %11193 = vmatpush1.bf16.msra.mxu0 %v13756_v36  ;;  %v13985_v36 = vpack.c.bf16 %v11838_v3, %v11837_v12  ;;  %v11829_v12 = vld [vmem:[%s19790_s3 + $0x140] sm:$0xff] }
 0x60b   :  { %11726 = vmatpush1.bf16.msra.mxu1 %v13758_v37  ;;  %11194 = vmatprep.subr.bf16.mxu0 %v13765_v27  ;;  %v11821_v37 = vld [vmem:[%s19790_s3 + $0x100] sm:$0xff]  ;;  %v11822_v27 = vld [vmem:[%s19790_s3 + $0x108] sm:$0xff]  ;;  %v11784_v41 = vmax.f32 %v14084_v45, 0.0  ;;  %v11832_v45 = vld [vmem:[%s19790_s3 + $0x158] sm:$0xff] }
 0x60c   :  { %11727 = vmatprep.subr.bf16.mxu1 %v13767_v14  ;;  %v14082_v14 = vadd.f32 %v17633_v25, %v1772_v24  ;;  %v11840_v25 = vld [vmem:[%s19790_s3 + $0x198] sm:$0xff]  ;;  %v11798_v24 = vld [vmem:[%s19790_s3 + $0x48] sm:$0xff] }
 0x60e   :  { %11195 = vmatpush1.bf16.msra.mxu0 %v13764_v9  ;;  %v11839_v9 = vld [vmem:[%s19790_s3 + $0x190] sm:$0xff] }
 0x60f   :  { %11728 = vmatpush1.bf16.msra.mxu1 %v13766_v53  ;;  %11196 = vmatprep.subr.bf16.mxu0 %v13773_v39  ;;  %v13987_v53 = vpack.c.bf16 %v11822_v27, %v11821_v37  ;;  %v11791_v39 = vld [vmem:[%s19790_s3 + $0x10] sm:$0xff] }
 0x610   :  { %11729 = vmatprep.subr.bf16.mxu1 %v13775_v48  ;;  %v11823_v48 = vld [vmem:[%s19790_s3 + $0x110] sm:$0xff]  ;;  %v13959_v33 = vpack.c.bf16 %v11792_v55, %v11791_v39  ;;  %v1767_v55 = vsub.s32 0, %v14417_v44 }
 0x611   :  { %v13991_v15 = vpack.c.bf16 %v11824_v51, %v11823_v48  ;;  %v11799_v27 = vld [vmem:[%s19790_s3 + $0x50] sm:$0xff]  ;;  %v14007_v48 = vpack.c.bf16 %v11832_v45, %v11831_v42  ;;  %v11801_v51 = vld [vmem:[%s19790_s3 + $0x60] sm:$0xff]  ;;  %v11906_v42 = vld [vmem:[%s19790_s3 + $0x3a8] sm:$0xff] }
 0x612   :  { %11197 = vmatpush1.bf16.msra.mxu0 %v13772_v57  ;;  %v11782_v57 = vmax.f32 %v14082_v14, 0.0  ;;  %v11800_v14 = vld [vmem:[%s19790_s3 + $0x58] sm:$0xff] }
 0x613   :  { %11730 = vmatpush1.bf16.msra.mxu1 %v13774_v58  ;;  %11207 = vmatprep.subr.bf16.mxu0 %v13781_v19  ;;  %v13989_v58 = vpack.c.bf16 %v11840_v25, %v11839_v9  ;;  %v11841_v19 = vld [vmem:[%s19790_s3 + $0x1a0] sm:$0xff]  ;;  %v11818_v9 = vld [vmem:[%s19790_s3 + $0xe8] sm:$0xff]  ;;  %v13975_v39 = vpack.c.bf16 %v11800_v14, %v11799_v27 }
 0x614   :  { %11740 = vmatprep.subr.bf16.mxu1 %v13783_v60  ;;  %v11842_v60 = vld [vmem:[%s19790_s3 + $0x1a8] sm:$0xff]  ;;  %v11849_v25 = vld [vmem:[%s19790_s3 + $0x1e0] sm:$0xff] }
 0x615   :  { %11199 = vmatmul.mubr.bf16.vlgmr.msra.gmra.mrb[4].mxu0 %v16904_v8  ;;  %v11874_v27 = vld [vmem:[%s19790_s3 + $0x2a8] sm:$0xff]  ;;  %v11905_v14 = vld [vmem:[%s19790_s3 + $0x3a0] sm:$0xff] }
 0x616   :  { %11208 = vmatpush1.bf16.msra.mxu0 %v13780_v2  ;;  %11732 = vmatmul.mubr.bf16.vlgmr.msra.gmra.mrb[4].mxu1 %v16904_v8  ;;  %v1758_v8 = vld [vmem:[%s19788_s1 + $0x30d8] sm:$0xff]  ;;  %v11793_v2 = vld [vmem:[%s19790_s3 + $0x20] sm:$0xff] }
 0x617   :  { %11741 = vmatpush1.bf16.msra.mxu1 %v13782_v56  ;;  %11209 = vmatprep.subr.bf16.mxu0 %v13789_v5  ;;  %v13807_v4 = vcombine.high %v1758_v8, %v1762_v20  ;;  %v13806_v10 = vcombine.low %v1758_v8, %v1762_v20  ;;  %v11794_v56 = vld [vmem:[%s19790_s3 + $0x28] sm:$0xff]  ;;  %v11825_v5 = vld [vmem:[%s19790_s3 + $0x120] sm:$0xff]  ;;  %v11828_v8 = vld [vmem:[%s19790_s3 + $0x138] sm:$0xff] }
 0x618   :  { %11742 = vmatprep.subr.bf16.mxu1 %v13791_v6  ;;  %11239 = vmatprep.mubr.bf16.mxu0 %v14318_v63  ;;  %v11826_v6 = vld [vmem:[%s19790_s3 + $0x128] sm:$0xff]  ;;  %v11813_v20 = vld [vmem:[%s19790_s3 + $0xc0] sm:$0xff] }
 0x619   :  { %11772 = vmatprep.mubr.bf16.mxu1 %v14318_v63  ;;  %v11806_v63 = vld [vmem:[%s19790_s3 + $0x88] sm:$0xff] }
 0x61a   :  { %11210 = vmatpush1.bf16.msra.mxu0 %v13788_v54  ;;  %v13953_v35 = vpack.c.bf16 %v11806_v63, %v11805_v31  ;;  %v13963_v54 = vpack.c.bf16 %v11794_v56, %v11793_v2  ;;  %v13969_v31 = vpack.c.bf16 %v11814_v21, %v11813_v20  ;;  %v11797_v63 = vld [vmem:[%s19790_s3 + $0x40] sm:$0xff]  ;;  %v1768_v2 = vrot.slane %v19363_v29, %v1767_v55  ;;  %v11854_v21 = vld [vmem:[%s19790_s3 + $0x208] sm:$0xff] }
 0x61b   :  { %11743 = vmatpush1.bf16.msra.mxu1 %v13790_v50  ;;  %11211 = vmatprep.subr.bf16.mxu0 %v13797_v18  ;;  %v13995_v50 = vpack.c.bf16 %v11826_v6, %v11825_v5  ;;  %v13965_v18 = vpack.c.bf16 %v11812_v17, %v11811_v7  ;;  %v13971_v62 = vpack.c.bf16 %v11798_v24, %v11797_v63  ;;  %v11804_v6 = vld [vmem:[%s19790_s3 + $0x78] sm:$0xff]  ;;  %v11835_v7 = vld [vmem:[%s19790_s3 + $0x170] sm:$0xff]  ;;  %v11853_v20 = vld [vmem:[%s19790_s3 + $0x200] sm:$0xff] }
 0x61c   :  { %11744 = vmatprep.subr.bf16.mxu1 %v13799_v11  ;;  %v11795_v11 = vld [vmem:[%s19790_s3 + $0x30] sm:$0xff]  ;;  %v14019_v24 = vpack.c.bf16 %v11854_v21, %v11853_v20  ;;  %v11890_v55 = vld [vmem:[%s19790_s3 + $0x328] sm:$0xff] }
 0x61d   :  { %v11903_v63 = vld [vmem:[%s19790_s3 + $0x390] sm:$0xff] }
 0x61e   :  { %11212 = vmatpush1.bf16.msra.mxu0 %v13796_v32  ;;  %v11845_v32 = vld [vmem:[%s19790_s3 + $0x1c0] sm:$0xff]  ;;  %v11863_v21 = vld [vmem:[%s19790_s3 + $0x250] sm:$0xff] }
 0x61f   :  { %11745 = vmatpush1.bf16.msra.mxu1 %v13798_v0  ;;  %11213 = vmatprep.subr.bf16.mxu0 %v13805_v22  ;;  %v11846_v0 = vld [vmem:[%s19790_s3 + $0x1c8] sm:$0xff]  ;;  %v13967_v22 = vpack.c.bf16 %v11796_v59, %v11795_v11 }
 0x620   :  { %11746 = vmatprep.subr.bf16.mxu1 %v13807_v4  ;;  %v13999_v4 = vpack.c.bf16 %v11828_v8, %v11827_v40  ;;  %v14001_v3 = vpack.c.bf16 %v11846_v0, %v11845_v32  ;;  %v11902_v11 = vld [vmem:[%s19790_s3 + $0x388] sm:$0xff]  ;;  %v14081_v40 = vadd.f32 %v17623_v47, %v1768_v2  ;;  %v11885_v32 = vld [vmem:[%s19790_s3 + $0x300] sm:$0xff] }
 0x621   :  { %v11878_v2 = vld [vmem:[%s19790_s3 + $0x2c8] sm:$0xff] }
 0x622   :  { %11214 = vmatpush1.bf16.msra.mxu0 %v13804_v38  ;;  %v11815_v38 = vld [vmem:[%s19790_s3 + $0xd0] sm:$0xff] }
 0x623   :  { %11747 = vmatpush1.bf16.msra.mxu1 %v13806_v10  ;;  %13954 = vmatprep.subr.bf16.mxu0 %v13953_v35  ;;  %v11816_v10 = vld [vmem:[%s19790_s3 + $0xd8] sm:$0xff]  ;;  %v11847_v35 = vld [vmem:[%s19790_s3 + $0x1d0] sm:$0xff] }
 0x624   :  { %13986 = vmatprep.subr.bf16.mxu1 %v13985_v36  ;;  %v14003_v36 = vpack.c.bf16 %v11830_v34, %v11829_v12  ;;  %v13973_v37 = vpack.c.bf16 %v11816_v10, %v11815_v38  ;;  %v14005_v43 = vpack.c.bf16 %v11848_v28, %v11847_v35  ;;  %v11781_v12 = vmax.f32 %v14081_v40, 0.0  ;;  %v11855_v38 = vld [vmem:[%s19790_s3 + $0x210] sm:$0xff]  ;;  %v11856_v10 = vld [vmem:[%s19790_s3 + $0x218] sm:$0xff] }
 0x625   :  { %13810 = vmatmul.mubr.msk.bf16.vlgmr.msra.gmra.mrb[4].mxu0 %vm9645_vm0, %v16961_v1  ;;  %v11887_v35 = vld [vmem:[%s19790_s3 + $0x310] sm:$0xff]  ;;  %v11912_v40 = vld [vmem:[%s19790_s3 + $0x3d8] sm:$0xff] }
 0x626   :  { %13811 = vmatmul.mubr.msk.bf16.vlgmr.msra.gmra.mrb[4].mxu1 %vm9645_vm0, %v16961_v1  ;;  %13956 = vmatpush3.bf16.msra.mxu0 %v13955_v46  ;;  %v13993_v1 = vpack.c.bf16 %v11842_v60, %v11841_v19  ;;  %v11817_v46 = vld [vmem:[%s19790_s3 + $0xe0] sm:$0xff]  ;;  %v11834_v19 = vld [vmem:[%s19790_s3 + $0x168] sm:$0xff]  ;;  %v11819_v60 = vld [vmem:[%s19790_s3 + $0xf0] sm:$0xff] }
 0x627   :  { %11988 = vmatprep.mubr.f32.mxu0 %v11782_v57  ;;  %13988 = vmatpush3.bf16.msra.mxu1 %v13987_v53  ;;  %v11850_v53 = vld [vmem:[%s19790_s3 + $0x1e8] sm:$0xff]  ;;  %v1775_v57 = vsub.s32 2, %v14417_v44  ;;  %v14011_v56 = vpack.c.bf16 %v11834_v19, %v11833_v52  ;;  %v11859_v19 = vld [vmem:[%s19790_s3 + $0x230] sm:$0xff] }
 0x628   :  { %12058 = vmatprep.mubr.f32.mxu1 %v11784_v41  ;;  %13958 = vmatprep.subr.bf16.mxu0 %v13957_v30  ;;  %v13977_v30 = vpack.c.bf16 %v11818_v9, %v11817_v46  ;;  %v11820_v41 = vld [vmem:[%s19790_s3 + $0xf8] sm:$0xff]  ;;  %v11857_v9 = vld [vmem:[%s19790_s3 + $0x220] sm:$0xff] }
 0x629   :  { %13990 = vmatprep.subr.bf16.mxu1 %v13989_v58  ;;  %v14009_v58 = vpack.c.bf16 %v11850_v53, %v11849_v25  ;;  %v13981_v5 = vpack.c.bf16 %v11820_v41, %v11819_v60  ;;  %v1776_v17 = vrot.slane %v19363_v29, %v1775_v57  ;;  %v11858_v25 = vld [vmem:[%s19790_s3 + $0x228] sm:$0xff]  ;;  %v11889_v53 = vld [vmem:[%s19790_s3 + $0x320] sm:$0xff]  ;;  %v11860_v60 = vld [vmem:[%s19790_s3 + $0x238] sm:$0xff] }
 0x62a   :  { %13960 = vmatpush3.bf16.msra.mxu0 %v13959_v33  ;;  %v11851_v33 = vld [vmem:[%s19790_s3 + $0x1f0] sm:$0xff]  ;;  %v14027_v52 = vpack.c.bf16 %v11858_v25, %v11857_v9  ;;  %v14059_v57 = vpack.c.bf16 %v11890_v55, %v11889_v53 }
 0x62b   :  { %13992 = vmatpush3.bf16.msra.mxu1 %v13991_v15  ;;  %13962 = vmatprep.subr.bf16.mxu0 %v13961_v26  ;;  %v11852_v15 = vld [vmem:[%s19790_s3 + $0x1f8] sm:$0xff]  ;;  %v13979_v26 = vpack.c.bf16 %v11802_v23, %v11801_v51  ;;  %v14083_v0 = vadd.f32 %v17631_v49, %v1776_v17  ;;  %v11907_v51 = vld [vmem:[%s19790_s3 + $0x3b0] sm:$0xff]  ;;  %v11861_v17 = vld [vmem:[%s19790_s3 + $0x240] sm:$0xff] }
 0x62c   :  { %13994 = vmatprep.subr.bf16.mxu1 %v13993_v1  ;;  %v11803_v1 = vld [vmem:[%s19790_s3 + $0x70] sm:$0xff]  ;;  %v14013_v61 = vpack.c.bf16 %v11852_v15, %v11851_v33  ;;  %v11904_v49 = vld [vmem:[%s19790_s3 + $0x398] sm:$0xff] }
 0x62d   :  { %v13983_v59 = vpack.c.bf16 %v11804_v6, %v11803_v1  ;;  %v11783_v28 = vmax.f32 %v14083_v0, 0.0  ;;  %v11908_v23 = vld [vmem:[%s19790_s3 + $0x3b8] sm:$0xff]  ;;  %v11891_v41 = vld [vmem:[%s19790_s3 + $0x330] sm:$0xff]  ;;  %v14031_v1 = vpack.c.bf16 %v11860_v60, %v11859_v19 }
 0x62e   :  { %13964 = vmatpush3.bf16.msra.mxu0 %v13963_v54  ;;  %v11869_v54 = vld [vmem:[%s19790_s3 + $0x280] sm:$0xff]  ;;  %v14061_v33 = vpack.c.bf16 %v11908_v23, %v11907_v51  ;;  %v11892_v15 = vld [vmem:[%s19790_s3 + $0x338] sm:$0xff]  ;;  %v11895_v0 = vld [vmem:[%s19790_s3 + $0x350] sm:$0xff]  ;;  %v1787_v51 = vsub.s32 5, %v14417_v44  ;;  %v1795_v23 = vsub.s32 7, %v14417_v44 }
 0x62f   :  { %13996 = vmatpush3.bf16.msra.mxu1 %v13995_v50  ;;  %13966 = vmatprep.subr.bf16.mxu0 %v13965_v18  ;;  %v11870_v50 = vld [vmem:[%s19790_s3 + $0x288] sm:$0xff]  ;;  %v11901_v18 = vld [vmem:[%s19790_s3 + $0x380] sm:$0xff]  ;;  %v14063_v6 = vpack.c.bf16 %v11892_v15, %v11891_v41  ;;  %v11899_v53 = vld [vmem:[%s19790_s3 + $0x370] sm:$0xff] }
 0x630   :  { %13998 = vmatprep.subr.bf16.mxu1 %v13997_v16  ;;  %v14015_v16 = vpack.c.bf16 %v11836_v13, %v11835_v7  ;;  %v14017_v8 = vpack.c.bf16 %v11870_v50, %v11869_v54  ;;  %v14049_v47 = vpack.c.bf16 %v11902_v11, %v11901_v18  ;;  %v11893_v13 = vld [vmem:[%s19790_s3 + $0x340] sm:$0xff]  ;;  %v11894_v50 = vld [vmem:[%s19790_s3 + $0x348] sm:$0xff]  ;;  %v11879_v18 = vld [vmem:[%s19790_s3 + $0x2d0] sm:$0xff]  ;;  %v1796_v19 = vrot.slane %v19363_v29, %v1795_v23 }
 0x631   :  { %v11880_v11 = vld [vmem:[%s19790_s3 + $0x2d8] sm:$0xff] }
 0x632   :  { %13968 = vmatpush3.bf16.msra.mxu0 %v13967_v22  ;;  %v11886_v22 = vld [vmem:[%s19790_s3 + $0x308] sm:$0xff]  ;;  %v14037_v20 = vpack.c.bf16 %v11880_v11, %v11879_v18  ;;  %v13812_v18 = vld [vmem:[%s19791_s4] ss:$0 sm:$0xff]  ;;  %s14320_s4 = smov [#allocation2]  }
 0x633   :  { %14000 = vmatpush3.bf16.msra.mxu1 %v13999_v4  ;;  %13970 = vmatprep.subr.bf16.mxu0 %v13969_v31  ;;  %v11871_v4 = vld [vmem:[%s19790_s3 + $0x290] sm:$0xff]  ;;  %v11872_v31 = vld [vmem:[%s19790_s3 + $0x298] sm:$0xff]  ;;  %s12231_s0 = sshll.u32 %s14320_s4, 4  ;;  %s12232_s0 = int_to_ptr.vmem [resolvable:$true] %s12231_s0 }
 0x634   :  { %14002 = vmatprep.subr.bf16.mxu1 %v14001_v3  ;;  %v14051_v3 = vpack.c.bf16 %v11886_v22, %v11885_v32  ;;  %v14021_v34 = vpack.c.bf16 %v11872_v31, %v11871_v4  ;;  %v11864_v32 = vld [vmem:[%s19790_s3 + $0x258] sm:$0xff]  ;;  %v11881_v4 = vld [vmem:[%s19790_s3 + $0x2e0] sm:$0xff]  ;;  %v11882_v31 = vld [vmem:[%s19790_s3 + $0x2e8] sm:$0xff]  ;;  %s14293_s14 = scalar_lea.vmem %s12232_s0, 32  ;;  %p14298_p1 = scmp.lt.s32.totalorder %s12232_s0, %s12232_s0 }
 0x635   :  { %v11896_v22 = vld [vmem:[%s19790_s3 + $0x358] sm:$0xff]  ;;  %p14294_p0 = scmp.ne.s32.totalorder %s12232_s0, %s14293_s14  ;;  %p14299_p2 = scmp.lt.s32.totalorder %s14293_s14, %s14293_s14 }
 0x636   :  { %13972 = vmatpush3.bf16.msra.mxu0 %v13971_v62  ;;  %v14053_v62 = vpack.c.bf16 %v11904_v49, %v11903_v63  ;;  %v11913_v63 = vld [vmem:[%s19790_s3 + $0x3e0] sm:$0xff]  ;;  %v11914_v49 = vld [vmem:[%s19790_s3 + $0x3e8] sm:$0xff] }
 0x637   :  { %14004 = vmatpush3.bf16.msra.mxu1 %v14003_v36  ;;  %13974 = vmatprep.subr.bf16.mxu0 %v13973_v37  ;;  %v11888_v36 = vld [vmem:[%s19790_s3 + $0x318] sm:$0xff]  ;;  %v11873_v37 = vld [vmem:[%s19790_s3 + $0x2a0] sm:$0xff]  ;;  %p14300_p3 = por %p14299_p2, %p14298_p1 }
 0x638   :  { %14006 = vmatprep.subr.bf16.mxu1 %v14005_v43  ;;  %v14023_v43 = vpack.c.bf16 %v11856_v10, %v11855_v38  ;;  %v14055_v45 = vpack.c.bf16 %v11888_v36, %v11887_v35  ;;  %v14025_v46 = vpack.c.bf16 %v11874_v27, %v11873_v37  ;;  %v11865_v38 = vld [vmem:[%s19790_s3 + $0x260] sm:$0xff]  ;;  %v11866_v10 = vld [vmem:[%s19790_s3 + $0x268] sm:$0xff]  ;;  %v11883_v37 = vld [vmem:[%s19790_s3 + $0x2f0] sm:$0xff] }
 0x639   :  { %v11897_v35 = vld [vmem:[%s19790_s3 + $0x360] sm:$0xff]  ;;  %v11884_v27 = vld [vmem:[%s19790_s3 + $0x2f8] sm:$0xff]  ;;  %p14301_p4 = pnand %p14300_p3, %p14294_p0 }
 0x63a   :  { %13976 = vmatpush3.bf16.msra.mxu0 %v13975_v39  ;;  %v14057_v39 = vpack.c.bf16 %v11906_v42, %v11905_v14  ;;  %v11915_v14 = vld [vmem:[%s19790_s3 + $0x3f0] sm:$0xff]  ;;  %v14045_v42 = vpack.c.bf16 %v11884_v27, %v11883_v37 }
 0x63b   :  { %14008 = vmatpush3.bf16.msra.mxu1 %v14007_v48  ;;  %13978 = vmatprep.subr.bf16.mxu0 %v13977_v30  ;;  %v11875_v48 = vld [vmem:[%s19790_s3 + $0x2b0] sm:$0xff]  ;;  %v11876_v30 = vld [vmem:[%s19790_s3 + $0x2b8] sm:$0xff] }
 0x63c   :  { %14010 = vmatprep.subr.bf16.mxu1 %v14009_v58  ;;  %v14029_v58 = vpack.c.bf16 %v11876_v30, %v11875_v48  ;;  %v1783_v48 = vsub.s32 4, %v14417_v44  ;;  %v1791_v30 = vsub.s32 6, %v14417_v44 }
 0x63e   :  { %13980 = vmatpush3.bf16.msra.mxu0 %v13979_v26  ;;  %v11877_v26 = vld [vmem:[%s19790_s3 + $0x2c0] sm:$0xff] }
 0x63f   :  { %14012 = vmatpush3.bf16.msra.mxu1 %v14011_v56  ;;  %13982 = vmatprep.subr.bf16.mxu0 %v13981_v5  ;;  %v11909_v56 = vld [vmem:[%s19790_s3 + $0x3c0] sm:$0xff]  ;;  %v11910_v5 = vld [vmem:[%s19790_s3 + $0x3c8] sm:$0xff]  ;;  %v14033_v7 = vpack.c.bf16 %v11878_v2, %v11877_v26 }
 0x640   :  { %14014 = vmatprep.subr.bf16.mxu1 %v14013_v61  ;;  %v11862_v61 = vld [vmem:[%s19790_s3 + $0x248] sm:$0xff]  ;;  %v14065_v54 = vpack.c.bf16 %v11910_v5, %v11909_v56 }
 0x642   :  { %13984 = vmatpush3.bf16.msra.mxu0 %v13983_v59  ;;  %v11911_v59 = vld [vmem:[%s19790_s3 + $0x3d0] sm:$0xff] }
 0x643   :  { %14016 = vmatpush3.bf16.msra.mxu1 %v14015_v16  ;;  %14018 = vmatprep.subr.bf16.mxu0 %v14017_v8  ;;  %v14035_v16 = vpack.c.bf16 %v11862_v61, %v11861_v17  ;;  %v14067_v8 = vpack.c.bf16 %v11894_v50, %v11893_v13 }
 0x644   :  { %14050 = vmatprep.subr.bf16.mxu1 %v14049_v47  ;;  %v14069_v47 = vpack.c.bf16 %v11912_v40, %v11911_v59 }
 0x645   :  { %11989 = vmatmul.mubr.f32.vlgmr.msra.gmra.mrb[8].mxu0 %v11781_v12  ;;  %v14071_v12 = vpack.c.bf16 %v11896_v22, %v11895_v0 }
 0x646   :  { %12059 = vmatmul.mubr.f32.vlgmr.msra.gmra.mrb[8].mxu1 %v11783_v28  ;;  %14020 = vmatpush3.bf16.msra.mxu0 %v14019_v24  ;;  %v14039_v24 = vpack.c.bf16 %v11864_v32, %v11863_v21  ;;  %v14043_v28 = vpack.c.bf16 %v11866_v10, %v11865_v38 }
 0x647   :  { %14052 = vmatpush3.bf16.msra.mxu1 %v14051_v3  ;;  %14022 = vmatprep.subr.bf16.mxu0 %v14021_v34  ;;  %v14041_v3 = vpack.c.bf16 %v11882_v31, %v11881_v4  ;;  %v14073_v34 = vpack.c.bf16 %v11914_v49, %v11913_v63 }
 0x648   :  { %14054 = vmatprep.subr.bf16.mxu1 %v14053_v62  ;;  %v11898_v62 = vld [vmem:[%s19790_s3 + $0x368] sm:$0xff] }
 0x649   :  { %v14075_v36 = vpack.c.bf16 %v11898_v62, %v11897_v35 }
 0x64a   :  { %14024 = vmatpush3.bf16.msra.mxu0 %v14023_v43  ;;  %v11916_v43 = vld [vmem:[%s19790_s3 + $0x3f8] sm:$0xff] }
 0x64b   :  { %14056 = vmatpush3.bf16.msra.mxu1 %v14055_v45  ;;  %14026 = vmatprep.subr.bf16.mxu0 %v14025_v46  ;;  %v11867_v45 = vld [vmem:[%s19790_s3 + $0x270] sm:$0xff]  ;;  %v11868_v46 = vld [vmem:[%s19790_s3 + $0x278] sm:$0xff]  ;;  %v14077_v9 = vpack.c.bf16 %v11916_v43, %v11915_v14 }
 0x64c   :  { %14058 = vmatprep.subr.bf16.mxu1 %v14057_v39  ;;  %v14047_v25 = vpack.c.bf16 %v11868_v46, %v11867_v45  ;;  %v11900_v39 = vld [vmem:[%s19790_s3 + $0x378] sm:$0xff] }
 0x64d   :  { %v14079_v55 = vpack.c.bf16 %v11900_v39, %v11899_v53 }
 0x64e   :  { %14028 = vmatpush3.bf16.msra.mxu0 %v14027_v52  ;;  %v1784_v52 = vrot.slane %v19363_v29, %v1783_v48 }
 0x64f   :  { %14060 = vmatpush3.bf16.msra.mxu1 %v14059_v57  ;;  %14030 = vmatprep.subr.bf16.mxu0 %v14029_v58  ;;  %v1792_v57 = vrot.slane %v19363_v29, %v1791_v30  ;;  %v1788_v58 = vrot.slane %v19363_v29, %v1787_v51 }
 0x650   :  { %14062 = vmatprep.subr.bf16.mxu1 %v14061_v33 }
 0x652   :  { %14032 = vmatpush3.bf16.msra.mxu0 %v14031_v1 }
 0x653   :  { %14064 = vmatpush3.bf16.msra.mxu1 %v14063_v6  ;;  %14034 = vmatprep.subr.bf16.mxu0 %v14033_v7 }
 0x654   :  { %14066 = vmatprep.subr.bf16.mxu1 %v14065_v54 }
 0x656   :  { %14036 = vmatpush3.bf16.msra.mxu0 %v14035_v16 }
 0x657   :  { %14068 = vmatpush3.bf16.msra.mxu1 %v14067_v8  ;;  %14038 = vmatprep.subr.bf16.mxu0 %v14037_v20 }
 0x658   :  { %14070 = vmatprep.subr.bf16.mxu1 %v14069_v47 }
 0x65a   :  { %14040 = vmatpush3.bf16.msra.mxu0 %v14039_v24 }
 0x65b   :  { %14072 = vmatpush3.bf16.msra.mxu1 %v14071_v12  ;;  %14042 = vmatprep.subr.bf16.mxu0 %v14041_v3 }
 0x65c   :  { %14074 = vmatprep.subr.bf16.mxu1 %v14073_v34 }
 0x65e   :  { %14044 = vmatpush3.bf16.msra.mxu0 %v14043_v28 }
 0x65f   :  { %14076 = vmatpush3.bf16.msra.mxu1 %v14075_v36  ;;  %14046 = vmatprep.subr.bf16.mxu0 %v14045_v42 }
 0x660   :  { %14078 = vmatprep.subr.bf16.mxu1 %v14077_v9 }
 0x662   :  { %14048 = vmatpush3.bf16.msra.mxu0 %v14047_v25 }
 0x663   :  { %14080 = vmatpush3.bf16.msra.mxu1 %v14079_v55 }
 0x6f8   :  { %v11241_v60 = vpop.f32.mrb[4].mxu0 }
 0x6f9   :  { %v14085_v41 = vadd.f32 %v11241_v60, %v1784_v52  ;;  %v11774_v33 = vpop.f32.mrb[4].mxu1  ;;  %v11243_v15 = vpop.f32.mrb[5].mxu0 }
 0x6fa   :  { %v14087_v26 = vadd.f32 %v11774_v33, %v1792_v57  ;;  %v14086_v2 = vadd.f32 %v11243_v15, %v1788_v58  ;;  %v11776_v56 = vpop.f32.mrb[5].mxu1  ;;  %v11245_v5 = vpop.f32.mrb[6].mxu0 }
 0x6fb   :  { %v14088_v1 = vadd.f32 %v11776_v56, %v1796_v19  ;;  %v11778_v6 = vpop.f32.mrb[6].mxu1  ;;  %v11246_v7 = vpop.f32.mrb[7].mxu0  ;;  %v11785_v61 = vmax.f32 %v14085_v41, 0.0 }
 0x6fc   :  { %v11786_v44 = vmax.f32 %v14086_v2, 0.0  ;;  %v11779_v17 = vpop.f32.mrb[7].mxu1  ;;  %v11787_v54 = vmax.f32 %v14087_v26, 0.0 }
 0x6fd   :  { %v11788_v13 = vmax.f32 %v14088_v1, 0.0 }
 0x6fe   :  { %12128 = vmatprep.mubr.f32.mxu0 %v11786_v44 }
 0x6ff   :  { %12198 = vmatprep.mubr.f32.mxu1 %v11788_v13  ;;  %12129 = vmatmul.mubr.f32.vlgmr.msra.gmra.mrb[10].mxu0 %v11785_v61 }
 0x700   :  { %12199 = vmatmul.mubr.f32.vlgmr.msra.gmra.mrb[10].mxu1 %v11787_v54 }
 0x718   :  { %v13845_v29 = vpop.f32.mrb[8].mxu0 }
 0x719   :  { %v13880_v50 = vpop.f32.mrb[8].mxu1  ;;  %v13846_v11 = vpop.f32.mrb[9].mxu0 }
 0x71a   :  { %v13847_v59 = vadd.f32 %v13846_v11, %v13845_v29  ;;  %v13881_v40 = vpop.f32.mrb[9].mxu1 }
 0x71b   :  { %v13882_v16 = vadd.f32 %v13881_v40, %v13880_v50 }
 0x71c   :  { %v11991_v8 = vadd.f32 %v13847_v59, %v13812_v18 }
 0x71e   :  { %v12061_v20 = vadd.f32 %v13882_v16, %v11991_v8 }
 0x7d2   :  { %v13915_v21 = vpop.f32.mrb[10].mxu0 }
 0x7d3   :  { %v13950_v32 = vpop.f32.mrb[10].mxu1  ;;  %v13916_v0 = vpop.f32.mrb[11].mxu0 }
 0x7d4   :  { %v13917_v47 = vadd.f32 %v13916_v0, %v13915_v21  ;;  %v13951_v22 = vpop.f32.mrb[11].mxu1 }
 0x7d5   :  { %v13952_v4 = vadd.f32 %v13951_v22, %v13950_v32 }
 0x7d6   :  { %v12131_v31 = vadd.f32 %v13917_v47, %v12061_v20 }
 0x7d8   :  { %v12201_v63 = vadd.f32 %v13952_v4, %v12131_v31 }
 0x7da   :  { %12206 = vperm.xlu1 %14285, %v12201_v63   ;;  %12210 = vrot.lane.b32.xlu0 %v12201_v63, %s14319_s13 }
 0x84c   :  { %v12211_v49 = vpop.permute.xlu0 %12210 }
 0x84d   :  { %v12214_v24 = vsel %vm12213_vm1, %v12211_v49, 0.0 }
 0x84e   :  { %12215 = vadd.xlane.f32.xlu0 %v12214_v24 }
 0x859   :  { %v12207_v12 = vpop.permute.xlu1 %12206 }
 0x85a   :  { %v12209_v34 = vadd.f32 %v12207_v12, %v12201_v63 }
 0x8db   :  { %v12216_v3 = vpop.xlane.xlu0 %12215 }
 0x8dc   :  { %v12218_v38 = vmul.f32 0.16666667, %v12216_v3 }
 0x8de   :  { %v12219_v10 = vsub.f32 %v12209_v34, %v12218_v38 }
 0x8e0   :  { %12221 = vrot.lane.b32.xlu1 %v12219_v10, %s14319_s13 }
 0x952   :  { %v12222_v35 = vpop.permute.xlu1 %12221 }
 0x953   :  { %12224 = vst.msk [vmem:[#allocation2] sm:$0x3] %vm12213_vm1, %v12222_v35 }
 0x954   :  { %14304 = shalt.err (!%p14301_p4)
}
 0x955   :  { %s14305_s17 = scalar_lea.hbm %s19792_s5, 32 }
 0x956   :  { %p14306_p5 = scmp.ne.s32.totalorder %s19792_s5, %s14305_s17  ;;  %p14309_p6 = scmp.lt.u32.totalorder %s14305_s17, %s19792_s5 }
 0x958   :  { %p14311_p7 = pnand %p14309_p6, %p14306_p5 }
 0x95a   :  { %14314 = shalt.err (!%p14311_p7)
}
 0x95b   :  { %12234 = dma.vmem_to_hbm [thread:$0]  %s12232_s0, 32, %s19792_s5, [#allocation3]  }
 0x95c   :  { %14315 = dma.done.wait [#allocation3], 32  }
 0x95d   :  { %14316 = vsyncadd [#allocation3], 4294967264 }
 0x95e   :  { %12238 = vsyncpa [#allocation3], 1 }

</bundles_post_ra>
